<compile_context>
chip_gen: v6e
topology: v6e:2x2x1
jax: 0.10.0
libtpu: 0.0.40
codegen_flags: <defaults>
</compile_context>

<pallas_src>
import functools

import jax
import jax.numpy as jnp
from jax import lax
from jax.experimental import pallas as pl
from jax.experimental.pallas import tpu as pltpu

K = 9      # conv kernel size
PAD = 4    # conv padding ("same" for stride 1)
POOL = 4   # max-pool kernel / stride


def _pick_tile(length, target):
    """Largest multiple of POOL <= target that divides `length`."""
    t = min(target, length)
    t -= t % POOL
    while length % t != 0:
        t -= POOL
    assert t >= POOL
    return t


def _fused_kernel(x_ref, w1_ref, b1_ref, w2_ref, b2_ref, o_ref,
                  xpad_ref, p1pad_ref, *, t1, t2):
    """Fused (conv1+ReLU+pool1) -> (conv2+ReLU+pool2) for one batch row.

    x_ref    : (1, L, C_in)        bf16, channels-last
    w1_ref   : (K, C_in, C1)       bf16
    b1_ref   : (1, C1)             f32
    w2_ref   : (K, C1, C2)         bf16
    b2_ref   : (1, C2)             f32
    o_ref    : (1, L//16, C2)      f32
    xpad_ref : (L + 2*PAD, C_in)   bf16 scratch (zero-padded halo input)
    p1pad_ref: (L//4 + 2*PAD, C1)  bf16 scratch (pooled layer-1 output + halo)
    """
    L = x_ref.shape[1]
    c_in = x_ref.shape[2]
    c1 = w1_ref.shape[2]
    c2 = w2_ref.shape[2]
    L1 = L // POOL                         # conv2 input length

    # ---- stage 0: build zero-padded input in VMEM (no HBM pad round trip) ---
    # Halo zeros are rewritten every grid step (cheap: 4 rows per edge) so the
    # kernel stays correct when the batch grid is sharded across cores.
    xpad_ref[0:PAD, :] = jnp.zeros((PAD, c_in), xpad_ref.dtype)
    xpad_ref[PAD + L:PAD + L + PAD, :] = jnp.zeros((PAD, c_in), xpad_ref.dtype)
    xpad_ref[PAD:PAD + L, :] = x_ref[0]

    p1pad_ref[0:PAD, :] = jnp.zeros((PAD, c1), p1pad_ref.dtype)
    p1pad_ref[PAD + L1:PAD + L1 + PAD, :] = jnp.zeros((PAD, c1), p1pad_ref.dtype)

    bias1 = b1_ref[...]                    # (1, c1) -- hoisted out of tile loops
    bias2 = b2_ref[...]                    # (1, c2)

    # ---- stage 1: conv1(k=9) + maxpool(4) + bias + ReLU -> p1pad scratch ----
    for t in range(L // t1):               # internal L-tiles bound the f32 acc
        r0 = t * t1
        acc = jnp.dot(xpad_ref[r0:r0 + t1, :], w1_ref[0],
                      preferred_element_type=jnp.float32)
        for k in range(1, K):              # 9 taps -> 9 bf16 MXU matmuls
            acc = acc + jnp.dot(xpad_ref[r0 + k:r0 + k + t1, :], w1_ref[k],
                                preferred_element_type=jnp.float32)
        pooled = jnp.max(acc.reshape(t1 // POOL, POOL, c1), axis=1)
        # bias-add and ReLU commute exactly with max-pool -> do them post-pool
        pooled = jnp.maximum(pooled + bias1, 0.0)
        q0 = PAD + r0 // POOL
        p1pad_ref[q0:q0 + t1 // POOL, :] = pooled.astype(p1pad_ref.dtype)

    # ---- stage 2: conv2(k=9) + maxpool(4) + bias + ReLU -> output -----------
    for t in range(L1 // t2):
        r0 = t * t2
        acc = jnp.dot(p1pad_ref[r0:r0 + t2, :], w2_ref[0],
                      preferred_element_type=jnp.float32)
        for k in range(1, K):
            acc = acc + jnp.dot(p1pad_ref[r0 + k:r0 + k + t2, :], w2_ref[k],
                                preferred_element_type=jnp.float32)
        pooled = jnp.max(acc.reshape(t2 // POOL, POOL, c2), axis=1)
        pooled = jnp.maximum(pooled + bias2, 0.0)
        o_ref[0, r0 // POOL:r0 // POOL + t2 // POOL, :] = pooled


def base_feature_net_pallas(x_nlc_bf16, w1, b1, w2, b2):
    """x_nlc_bf16: (B, L, C_in) bf16; w: (K, C_in, C_out) bf16; b: (C_out,) f32."""
    B, L, C_in = x_nlc_bf16.shape
    C1 = w1.shape[2]
    C2 = w2.shape[2]
    assert L % (POOL * POOL) == 0, "sequence length must be a multiple of 16"
    L_out = L // (POOL * POOL)

    t1 = _pick_tile(L, 256)                # conv1 output rows per inner tile
    t2 = _pick_tile(L // POOL, 256)        # conv2 output rows per inner tile
    kernel = functools.partial(_fused_kernel, t1=t1, t2=t2)

    b1_2 = b1.reshape(1, C1).astype(jnp.float32)
    b2_2 = b2.reshape(1, C2).astype(jnp.float32)

    return pl.pallas_call(
        kernel,
        out_shape=jax.ShapeDtypeStruct((B, L_out, C2), jnp.float32),
        grid_spec=pltpu.PrefetchScalarGridSpec(
            num_scalar_prefetch=0,
            grid=(B,),
            in_specs=[
                pl.BlockSpec((1, L, C_in), lambda b: (b, 0, 0)),
                pl.BlockSpec((K, C_in, C1), lambda b: (0, 0, 0)),   # constant -> DMA'd once
                pl.BlockSpec((1, C1), lambda b: (0, 0)),
                pl.BlockSpec((K, C1, C2), lambda b: (0, 0, 0)),     # constant -> DMA'd once
                pl.BlockSpec((1, C2), lambda b: (0, 0)),
            ],
            out_specs=pl.BlockSpec((1, L_out, C2), lambda b: (b, 0, 0)),
            scratch_shapes=[
                pltpu.VMEM((L + 2 * PAD, C_in), jnp.bfloat16),
                pltpu.VMEM((L // POOL + 2 * PAD, C1), jnp.bfloat16),
            ],
        ),
        compiler_params=pltpu.CompilerParams(
            dimension_semantics=("parallel",)),
    )(x_nlc_bf16, w1, b1_2, w2, b2_2)


@jax.jit
def base_feature_net(x_ncl, w1, b1, w2, b2):
    """NCL interface matching PyTorch: (B, 303, L) f32 -> (B, 256, L//16) f32."""
    # Relayout to channels-last and cast to bf16 in one fused XLA pass.
    x = jnp.transpose(x_ncl, (0, 2, 1)).astype(jnp.bfloat16)
    h = base_feature_net_pallas(x, w1, b1, w2, b2)      # (B, L//16, 256)
    return jnp.transpose(h, (0, 2, 1))                  # back to NCL


def init_params(key):
    """PyTorch-style Conv1d init; kernel weights stored as bf16 (K, C_in, C_out)."""
    k1, k2, k3, k4 = jax.random.split(key, 4)

    def conv_init(kw, kb, c_in, c_out):
        bound = 1.0 / jnp.sqrt(jnp.float32(c_in * K))
        w_oik = jax.random.uniform(kw, (c_out, c_in, K), jnp.float32,
                                   minval=-bound, maxval=bound)
        b = jax.random.uniform(kb, (c_out,), jnp.float32,
                               minval=-bound, maxval=bound)
        w_kio = jnp.transpose(w_oik, (2, 1, 0)).astype(jnp.bfloat16)
        return w_kio, b

    w1, b1 = conv_init(k1, k2, 303, 256)
    w2, b2 = conv_init(k3, k4, 256, 256)
    return dict(w1=w1, b1=b1, w2=w2, b2=b2)


def reference_forward(x_ncl, w1_kio, b1, w2_kio, b2):
    """Pure-JAX reference with the same bf16 operand quantization as the kernel."""
    x = x_ncl.astype(jnp.bfloat16).astype(jnp.float32)
    w1 = jnp.transpose(w1_kio.astype(jnp.float32), (2, 1, 0))   # (O, I, K)
    w2 = jnp.transpose(w2_kio.astype(jnp.float32), (2, 1, 0))

    def layer(x, w, b):
        y = lax.conv_general_dilated(
            x, w, window_strides=(1,), padding=[(PAD, PAD)],
            dimension_numbers=("NCH", "OIH", "NCH"),
            precision=lax.Precision.HIGHEST)
        y = jnp.maximum(y + b[None, :, None], 0.0)
        return lax.reduce_window(y, -jnp.inf, lax.max,
                                 (1, 1, POOL), (1, 1, POOL), "VALID")

    h = layer(x, w1, b1)
    # kernel stores the pooled layer-1 activations in bf16; mirror that here.
    h = h.astype(jnp.bfloat16).astype(jnp.float32)
    return layer(h, w2, b2)


if __name__ == "__main__":
    key = jax.random.PRNGKey(0)
    kx, kp = jax.random.split(key)

    B, C_IN, L = 2, 303, 128                       # small; L must be a multiple of 16
    x = jax.random.normal(kx, (B, C_IN, L), jnp.float32)
    params = init_params(kp)

    out = base_feature_net(x, params["w1"], params["b1"],
                           params["w2"], params["b2"])
    out = jax.block_until_ready(out)
    assert out.shape == (B, 256, L // 16), out.shape

    ref = reference_forward(x, params["w1"], params["b1"],
                            params["w2"], params["b2"])
    max_err = float(jnp.max(jnp.abs(out - ref)))
    assert jnp.allclose(out, ref, rtol=2e-3, atol=2e-3), max_err

    print("KERNEL_OK")
</pallas_src>

<mosaic_0001>
module attributes {stable_mosaic.version = 11 : i64} {
  func.func @_fused_kernel(%arg0: i32, %arg1: memref<1x128x303xbf16, #tpu.memory_space<vmem>>, %arg2: memref<9x303x256xbf16, #tpu.memory_space<vmem>>, %arg3: memref<1x256xf32, #tpu.memory_space<vmem>>, %arg4: memref<9x256x256xbf16, #tpu.memory_space<vmem>>, %arg5: memref<1x256xf32, #tpu.memory_space<vmem>>, %arg6: memref<1x8x256xf32, #tpu.memory_space<vmem>>, %arg7: memref<136x303xbf16, #tpu.memory_space<vmem>>, %arg8: memref<40x256xbf16, #tpu.memory_space<vmem>>) attributes {dimension_semantics = [#tpu.dimension_semantics<parallel>], iteration_bounds = array<i64: 2>, scalar_prefetch = 0 : i64, scratch_operands = 2 : i64, tpu.core_type = #tpu.core_type<tc>, window_params = [{transform_indices = @transform_0, window_bounds = array<i64: 1, 128, 303>}, {pipeline_mode = #tpu.pipeline_mode<synchronous>, transform_indices = @transform_1, window_bounds = array<i64: 9, 303, 256>}, {pipeline_mode = #tpu.pipeline_mode<synchronous>, transform_indices = @transform_2, window_bounds = array<i64: 1, 256>}, {pipeline_mode = #tpu.pipeline_mode<synchronous>, transform_indices = @transform_3, window_bounds = array<i64: 9, 256, 256>}, {pipeline_mode = #tpu.pipeline_mode<synchronous>, transform_indices = @transform_4, window_bounds = array<i64: 1, 256>}, {transform_indices = @transform_5, window_bounds = array<i64: 1, 8, 256>}]} {
    %cst = arith.constant 0.000000e+00 : bf16
    %0 = vector.broadcast %cst : bf16 to vector<4x303xbf16>
    %c0 = arith.constant 0 : index
    %c0_0 = arith.constant 0 : index
    %1 = vector.load %arg7[%c0, %c0_0] : memref<136x303xbf16, #tpu.memory_space<vmem>>, vector<4x303xbf16>
    tpu.vector_store %arg7[%c0, %c0_0], %0 {strides = array<i32>} : memref<136x303xbf16, #tpu.memory_space<vmem>>, vector<4x303xbf16>,
    %cst_1 = arith.constant 0.000000e+00 : bf16
    %2 = vector.broadcast %cst_1 : bf16 to vector<4x303xbf16>
    %c132 = arith.constant 132 : index
    %c0_2 = arith.constant 0 : index
    %3 = vector.load %arg7[%c132, %c0_2] : memref<136x303xbf16, #tpu.memory_space<vmem>>, vector<4x303xbf16>
    tpu.vector_store %arg7[%c132, %c0_2], %2 {strides = array<i32>} : memref<136x303xbf16, #tpu.memory_space<vmem>>, vector<4x303xbf16>,
    %c0_3 = arith.constant 0 : index
    %c0_4 = arith.constant 0 : index
    %c0_5 = arith.constant 0 : index
    %4 = vector.load %arg1[%c0_3, %c0_4, %c0_5] : memref<1x128x303xbf16, #tpu.memory_space<vmem>>, vector<1x128x303xbf16>
    %5 = vector.shape_cast %4 : vector<1x128x303xbf16> to vector<128x303xbf16>
    %c4 = arith.constant 4 : index
    %c0_6 = arith.constant 0 : index
    %6 = vector.load %arg7[%c4, %c0_6] : memref<136x303xbf16, #tpu.memory_space<vmem>>, vector<128x303xbf16>
    tpu.vector_store %arg7[%c4, %c0_6], %5 {strides = array<i32>} : memref<136x303xbf16, #tpu.memory_space<vmem>>, vector<128x303xbf16>,
    %cst_7 = arith.constant 0.000000e+00 : bf16
    %7 = vector.broadcast %cst_7 : bf16 to vector<4x256xbf16>
    %c0_8 = arith.constant 0 : index
    %c0_9 = arith.constant 0 : index
    %8 = vector.load %arg8[%c0_8, %c0_9] : memref<40x256xbf16, #tpu.memory_space<vmem>>, vector<4x256xbf16>
    tpu.vector_store %arg8[%c0_8, %c0_9], %7 {strides = array<i32>} : memref<40x256xbf16, #tpu.memory_space<vmem>>, vector<4x256xbf16>,
    %cst_10 = arith.constant 0.000000e+00 : bf16
    %9 = vector.broadcast %cst_10 : bf16 to vector<4x256xbf16>
    %c36 = arith.constant 36 : index
    %c0_11 = arith.constant 0 : index
    %10 = vector.load %arg8[%c36, %c0_11] : memref<40x256xbf16, #tpu.memory_space<vmem>>, vector<4x256xbf16>
    tpu.vector_store %arg8[%c36, %c0_11], %9 {strides = array<i32>} : memref<40x256xbf16, #tpu.memory_space<vmem>>, vector<4x256xbf16>,
    %c0_12 = arith.constant 0 : index
    %c0_13 = arith.constant 0 : index
    %11 = vector.load %arg3[%c0_12, %c0_13] : memref<1x256xf32, #tpu.memory_space<vmem>>, vector<1x256xf32>
    %c0_14 = arith.constant 0 : index
    %c0_15 = arith.constant 0 : index
    %12 = vector.load %arg5[%c0_14, %c0_15] : memref<1x256xf32, #tpu.memory_space<vmem>>, vector<1x256xf32>
    %c0_16 = arith.constant 0 : index
    %c0_17 = arith.constant 0 : index
    %13 = vector.load %arg7[%c0_16, %c0_17] : memref<136x303xbf16, #tpu.memory_space<vmem>>, vector<128x303xbf16>
    %c0_18 = arith.constant 0 : index
    %c0_19 = arith.constant 0 : index
    %c0_20 = arith.constant 0 : index
    %14 = vector.load %arg2[%c0_18, %c0_19, %c0_20] : memref<9x303x256xbf16, #tpu.memory_space<vmem>>, vector<1x303x256xbf16>
    %15 = vector.shape_cast %14 : vector<1x303x256xbf16> to vector<303x256xbf16>
    %cst_21 = arith.constant dense<0.000000e+00> : vector<128x256xf32>
    %16 = tpu.matmul %13, %15, %cst_21 {dimension_numbers = #tpu.dot_dimension_numbers<[1], [0], [0], [1], [0, 0, 1, 1], [], []>} : vector<128x303xbf16>, vector<303x256xbf16>, vector<128x256xf32> -> vector<128x256xf32>
    %c1 = arith.constant 1 : index
    %c0_22 = arith.constant 0 : index
    %17 = vector.load %arg7[%c1, %c0_22] : memref<136x303xbf16, #tpu.memory_space<vmem>>, vector<128x303xbf16>
    %c1_23 = arith.constant 1 : index
    %c0_24 = arith.constant 0 : index
    %c0_25 = arith.constant 0 : index
    %18 = vector.load %arg2[%c1_23, %c0_24, %c0_25] : memref<9x303x256xbf16, #tpu.memory_space<vmem>>, vector<1x303x256xbf16>
    %19 = vector.shape_cast %18 : vector<1x303x256xbf16> to vector<303x256xbf16>
    %cst_26 = arith.constant dense<0.000000e+00> : vector<128x256xf32>
    %20 = tpu.matmul %17, %19, %cst_26 {dimension_numbers = #tpu.dot_dimension_numbers<[1], [0], [0], [1], [0, 0, 1, 1], [], []>} : vector<128x303xbf16>, vector<303x256xbf16>, vector<128x256xf32> -> vector<128x256xf32>
    %21 = arith.addf %16, %20 : vector<128x256xf32>
    %c2 = arith.constant 2 : index
    %c0_27 = arith.constant 0 : index
    %22 = vector.load %arg7[%c2, %c0_27] : memref<136x303xbf16, #tpu.memory_space<vmem>>, vector<128x303xbf16>
    %c2_28 = arith.constant 2 : index
    %c0_29 = arith.constant 0 : index
    %c0_30 = arith.constant 0 : index
    %23 = vector.load %arg2[%c2_28, %c0_29, %c0_30] : memref<9x303x256xbf16, #tpu.memory_space<vmem>>, vector<1x303x256xbf16>
    %24 = vector.shape_cast %23 : vector<1x303x256xbf16> to vector<303x256xbf16>
    %cst_31 = arith.constant dense<0.000000e+00> : vector<128x256xf32>
    %25 = tpu.matmul %22, %24, %cst_31 {dimension_numbers = #tpu.dot_dimension_numbers<[1], [0], [0], [1], [0, 0, 1, 1], [], []>} : vector<128x303xbf16>, vector<303x256xbf16>, vector<128x256xf32> -> vector<128x256xf32>
    %26 = arith.addf %21, %25 : vector<128x256xf32>
    %c3 = arith.constant 3 : index
    %c0_32 = arith.constant 0 : index
    %27 = vector.load %arg7[%c3, %c0_32] : memref<136x303xbf16, #tpu.memory_space<vmem>>, vector<128x303xbf16>
    %c3_33 = arith.constant 3 : index
    %c0_34 = arith.constant 0 : index
    %c0_35 = arith.constant 0 : index
    %28 = vector.load %arg2[%c3_33, %c0_34, %c0_35] : memref<9x303x256xbf16, #tpu.memory_space<vmem>>, vector<1x303x256xbf16>
    %29 = vector.shape_cast %28 : vector<1x303x256xbf16> to vector<303x256xbf16>
    %cst_36 = arith.constant dense<0.000000e+00> : vector<128x256xf32>
    %30 = tpu.matmul %27, %29, %cst_36 {dimension_numbers = #tpu.dot_dimension_numbers<[1], [0], [0], [1], [0, 0, 1, 1], [], []>} : vector<128x303xbf16>, vector<303x256xbf16>, vector<128x256xf32> -> vector<128x256xf32>
    %31 = arith.addf %26, %30 : vector<128x256xf32>
    %c4_37 = arith.constant 4 : index
    %c0_38 = arith.constant 0 : index
    %32 = vector.load %arg7[%c4_37, %c0_38] : memref<136x303xbf16, #tpu.memory_space<vmem>>, vector<128x303xbf16>
    %c4_39 = arith.constant 4 : index
    %c0_40 = arith.constant 0 : index
    %c0_41 = arith.constant 0 : index
    %33 = vector.load %arg2[%c4_39, %c0_40, %c0_41] : memref<9x303x256xbf16, #tpu.memory_space<vmem>>, vector<1x303x256xbf16>
    %34 = vector.shape_cast %33 : vector<1x303x256xbf16> to vector<303x256xbf16>
    %cst_42 = arith.constant dense<0.000000e+00> : vector<128x256xf32>
    %35 = tpu.matmul %32, %34, %cst_42 {dimension_numbers = #tpu.dot_dimension_numbers<[1], [0], [0], [1], [0, 0, 1, 1], [], []>} : vector<128x303xbf16>, vector<303x256xbf16>, vector<128x256xf32> -> vector<128x256xf32>
    %36 = arith.addf %31, %35 : vector<128x256xf32>
    %c5 = arith.constant 5 : index
    %c0_43 = arith.constant 0 : index
    %37 = vector.load %arg7[%c5, %c0_43] : memref<136x303xbf16, #tpu.memory_space<vmem>>, vector<128x303xbf16>
    %c5_44 = arith.constant 5 : index
    %c0_45 = arith.constant 0 : index
    %c0_46 = arith.constant 0 : index
    %38 = vector.load %arg2[%c5_44, %c0_45, %c0_46] : memref<9x303x256xbf16, #tpu.memory_space<vmem>>, vector<1x303x256xbf16>
    %39 = vector.shape_cast %38 : vector<1x303x256xbf16> to vector<303x256xbf16>
    %cst_47 = arith.constant dense<0.000000e+00> : vector<128x256xf32>
    %40 = tpu.matmul %37, %39, %cst_47 {dimension_numbers = #tpu.dot_dimension_numbers<[1], [0], [0], [1], [0, 0, 1, 1], [], []>} : vector<128x303xbf16>, vector<303x256xbf16>, vector<128x256xf32> -> vector<128x256xf32>
    %41 = arith.addf %36, %40 : vector<128x256xf32>
    %c6 = arith.constant 6 : index
    %c0_48 = arith.constant 0 : index
    %42 = vector.load %arg7[%c6, %c0_48] : memref<136x303xbf16, #tpu.memory_space<vmem>>, vector<128x303xbf16>
    %c6_49 = arith.constant 6 : index
    %c0_50 = arith.constant 0 : index
    %c0_51 = arith.constant 0 : index
    %43 = vector.load %arg2[%c6_49, %c0_50, %c0_51] : memref<9x303x256xbf16, #tpu.memory_space<vmem>>, vector<1x303x256xbf16>
    %44 = vector.shape_cast %43 : vector<1x303x256xbf16> to vector<303x256xbf16>
    %cst_52 = arith.constant dense<0.000000e+00> : vector<128x256xf32>
    %45 = tpu.matmul %42, %44, %cst_52 {dimension_numbers = #tpu.dot_dimension_numbers<[1], [0], [0], [1], [0, 0, 1, 1], [], []>} : vector<128x303xbf16>, vector<303x256xbf16>, vector<128x256xf32> -> vector<128x256xf32>
    %46 = arith.addf %41, %45 : vector<128x256xf32>
    %c7 = arith.constant 7 : index
    %c0_53 = arith.constant 0 : index
    %47 = vector.load %arg7[%c7, %c0_53] : memref<136x303xbf16, #tpu.memory_space<vmem>>, vector<128x303xbf16>
    %c7_54 = arith.constant 7 : index
    %c0_55 = arith.constant 0 : index
    %c0_56 = arith.constant 0 : index
    %48 = vector.load %arg2[%c7_54, %c0_55, %c0_56] : memref<9x303x256xbf16, #tpu.memory_space<vmem>>, vector<1x303x256xbf16>
    %49 = vector.shape_cast %48 : vector<1x303x256xbf16> to vector<303x256xbf16>
    %cst_57 = arith.constant dense<0.000000e+00> : vector<128x256xf32>
    %50 = tpu.matmul %47, %49, %cst_57 {dimension_numbers = #tpu.dot_dimension_numbers<[1], [0], [0], [1], [0, 0, 1, 1], [], []>} : vector<128x303xbf16>, vector<303x256xbf16>, vector<128x256xf32> -> vector<128x256xf32>
    %51 = arith.addf %46, %50 : vector<128x256xf32>
    %c8 = arith.constant 8 : index
    %c0_58 = arith.constant 0 : index
    %52 = vector.load %arg7[%c8, %c0_58] : memref<136x303xbf16, #tpu.memory_space<vmem>>, vector<128x303xbf16>
    %c8_59 = arith.constant 8 : index
    %c0_60 = arith.constant 0 : index
    %c0_61 = arith.constant 0 : index
    %53 = vector.load %arg2[%c8_59, %c0_60, %c0_61] : memref<9x303x256xbf16, #tpu.memory_space<vmem>>, vector<1x303x256xbf16>
    %54 = vector.shape_cast %53 : vector<1x303x256xbf16> to vector<303x256xbf16>
    %cst_62 = arith.constant dense<0.000000e+00> : vector<128x256xf32>
    %55 = tpu.matmul %52, %54, %cst_62 {dimension_numbers = #tpu.dot_dimension_numbers<[1], [0], [0], [1], [0, 0, 1, 1], [], []>} : vector<128x303xbf16>, vector<303x256xbf16>, vector<128x256xf32> -> vector<128x256xf32>
    %56 = arith.addf %51, %55 : vector<128x256xf32>
    %57 = vector.shape_cast %56 : vector<128x256xf32> to vector<32x4x256xf32>
    %cst_63 = arith.constant dense<0xFF800000> : vector<32x256xf32>
    %58 = vector.multi_reduction <maximumf>, %57, %cst_63 [1] : vector<32x4x256xf32> to vector<32x256xf32>
    %59 = vector.broadcast %11 : vector<1x256xf32> to vector<32x256xf32>
    %60 = arith.addf %58, %59 : vector<32x256xf32>
    %cst_64 = arith.constant 0.000000e+00 : f32
    %61 = vector.broadcast %cst_64 : f32 to vector<32x256xf32>
    %62 = arith.maximumf %60, %61 : vector<32x256xf32>
    %63 = arith.truncf %62 : vector<32x256xf32> to vector<32x256xbf16>
    %c4_65 = arith.constant 4 : index
    %c0_66 = arith.constant 0 : index
    %64 = vector.load %arg8[%c4_65, %c0_66] : memref<40x256xbf16, #tpu.memory_space<vmem>>, vector<32x256xbf16>
    tpu.vector_store %arg8[%c4_65, %c0_66], %63 {strides = array<i32>} : memref<40x256xbf16, #tpu.memory_space<vmem>>, vector<32x256xbf16>,
    %c0_67 = arith.constant 0 : index
    %c0_68 = arith.constant 0 : index
    %65 = vector.load %arg8[%c0_67, %c0_68] : memref<40x256xbf16, #tpu.memory_space<vmem>>, vector<32x256xbf16>
    %c0_69 = arith.constant 0 : index
    %c0_70 = arith.constant 0 : index
    %c0_71 = arith.constant 0 : index
    %66 = vector.load %arg4[%c0_69, %c0_70, %c0_71] : memref<9x256x256xbf16, #tpu.memory_space<vmem>>, vector<1x256x256xbf16>
    %67 = vector.shape_cast %66 : vector<1x256x256xbf16> to vector<256x256xbf16>
    %cst_72 = arith.constant dense<0.000000e+00> : vector<32x256xf32>
    %68 = tpu.matmul %65, %67, %cst_72 {dimension_numbers = #tpu.dot_dimension_numbers<[1], [0], [0], [1], [0, 0, 1, 1], [], []>} : vector<32x256xbf16>, vector<256x256xbf16>, vector<32x256xf32> -> vector<32x256xf32>
    %c1_73 = arith.constant 1 : index
    %c0_74 = arith.constant 0 : index
    %69 = vector.load %arg8[%c1_73, %c0_74] : memref<40x256xbf16, #tpu.memory_space<vmem>>, vector<32x256xbf16>
    %c1_75 = arith.constant 1 : index
    %c0_76 = arith.constant 0 : index
    %c0_77 = arith.constant 0 : index
    %70 = vector.load %arg4[%c1_75, %c0_76, %c0_77] : memref<9x256x256xbf16, #tpu.memory_space<vmem>>, vector<1x256x256xbf16>
    %71 = vector.shape_cast %70 : vector<1x256x256xbf16> to vector<256x256xbf16>
    %cst_78 = arith.constant dense<0.000000e+00> : vector<32x256xf32>
    %72 = tpu.matmul %69, %71, %cst_78 {dimension_numbers = #tpu.dot_dimension_numbers<[1], [0], [0], [1], [0, 0, 1, 1], [], []>} : vector<32x256xbf16>, vector<256x256xbf16>, vector<32x256xf32> -> vector<32x256xf32>
    %73 = arith.addf %68, %72 : vector<32x256xf32>
    %c2_79 = arith.constant 2 : index
    %c0_80 = arith.constant 0 : index
    %74 = vector.load %arg8[%c2_79, %c0_80] : memref<40x256xbf16, #tpu.memory_space<vmem>>, vector<32x256xbf16>
    %c2_81 = arith.constant 2 : index
    %c0_82 = arith.constant 0 : index
    %c0_83 = arith.constant 0 : index
    %75 = vector.load %arg4[%c2_81, %c0_82, %c0_83] : memref<9x256x256xbf16, #tpu.memory_space<vmem>>, vector<1x256x256xbf16>
    %76 = vector.shape_cast %75 : vector<1x256x256xbf16> to vector<256x256xbf16>
    %cst_84 = arith.constant dense<0.000000e+00> : vector<32x256xf32>
    %77 = tpu.matmul %74, %76, %cst_84 {dimension_numbers = #tpu.dot_dimension_numbers<[1], [0], [0], [1], [0, 0, 1, 1], [], []>} : vector<32x256xbf16>, vector<256x256xbf16>, vector<32x256xf32> -> vector<32x256xf32>
    %78 = arith.addf %73, %77 : vector<32x256xf32>
    %c3_85 = arith.constant 3 : index
    %c0_86 = arith.constant 0 : index
    %79 = vector.load %arg8[%c3_85, %c0_86] : memref<40x256xbf16, #tpu.memory_space<vmem>>, vector<32x256xbf16>
    %c3_87 = arith.constant 3 : index
    %c0_88 = arith.constant 0 : index
    %c0_89 = arith.constant 0 : index
    %80 = vector.load %arg4[%c3_87, %c0_88, %c0_89] : memref<9x256x256xbf16, #tpu.memory_space<vmem>>, vector<1x256x256xbf16>
    %81 = vector.shape_cast %80 : vector<1x256x256xbf16> to vector<256x256xbf16>
    %cst_90 = arith.constant dense<0.000000e+00> : vector<32x256xf32>
    %82 = tpu.matmul %79, %81, %cst_90 {dimension_numbers = #tpu.dot_dimension_numbers<[1], [0], [0], [1], [0, 0, 1, 1], [], []>} : vector<32x256xbf16>, vector<256x256xbf16>, vector<32x256xf32> -> vector<32x256xf32>
    %83 = arith.addf %78, %82 : vector<32x256xf32>
    %c4_91 = arith.constant 4 : index
    %c0_92 = arith.constant 0 : index
    %84 = vector.load %arg8[%c4_91, %c0_92] : memref<40x256xbf16, #tpu.memory_space<vmem>>, vector<32x256xbf16>
    %c4_93 = arith.constant 4 : index
    %c0_94 = arith.constant 0 : index
    %c0_95 = arith.constant 0 : index
    %85 = vector.load %arg4[%c4_93, %c0_94, %c0_95] : memref<9x256x256xbf16, #tpu.memory_space<vmem>>, vector<1x256x256xbf16>
    %86 = vector.shape_cast %85 : vector<1x256x256xbf16> to vector<256x256xbf16>
    %cst_96 = arith.constant dense<0.000000e+00> : vector<32x256xf32>
    %87 = tpu.matmul %84, %86, %cst_96 {dimension_numbers = #tpu.dot_dimension_numbers<[1], [0], [0], [1], [0, 0, 1, 1], [], []>} : vector<32x256xbf16>, vector<256x256xbf16>, vector<32x256xf32> -> vector<32x256xf32>
    %88 = arith.addf %83, %87 : vector<32x256xf32>
    %c5_97 = arith.constant 5 : index
    %c0_98 = arith.constant 0 : index
    %89 = vector.load %arg8[%c5_97, %c0_98] : memref<40x256xbf16, #tpu.memory_space<vmem>>, vector<32x256xbf16>
    %c5_99 = arith.constant 5 : index
    %c0_100 = arith.constant 0 : index
    %c0_101 = arith.constant 0 : index
    %90 = vector.load %arg4[%c5_99, %c0_100, %c0_101] : memref<9x256x256xbf16, #tpu.memory_space<vmem>>, vector<1x256x256xbf16>
    %91 = vector.shape_cast %90 : vector<1x256x256xbf16> to vector<256x256xbf16>
    %cst_102 = arith.constant dense<0.000000e+00> : vector<32x256xf32>
    %92 = tpu.matmul %89, %91, %cst_102 {dimension_numbers = #tpu.dot_dimension_numbers<[1], [0], [0], [1], [0, 0, 1, 1], [], []>} : vector<32x256xbf16>, vector<256x256xbf16>, vector<32x256xf32> -> vector<32x256xf32>
    %93 = arith.addf %88, %92 : vector<32x256xf32>
    %c6_103 = arith.constant 6 : index
    %c0_104 = arith.constant 0 : index
    %94 = vector.load %arg8[%c6_103, %c0_104] : memref<40x256xbf16, #tpu.memory_space<vmem>>, vector<32x256xbf16>
    %c6_105 = arith.constant 6 : index
    %c0_106 = arith.constant 0 : index
    %c0_107 = arith.constant 0 : index
    %95 = vector.load %arg4[%c6_105, %c0_106, %c0_107] : memref<9x256x256xbf16, #tpu.memory_space<vmem>>, vector<1x256x256xbf16>
    %96 = vector.shape_cast %95 : vector<1x256x256xbf16> to vector<256x256xbf16>
    %cst_108 = arith.constant dense<0.000000e+00> : vector<32x256xf32>
    %97 = tpu.matmul %94, %96, %cst_108 {dimension_numbers = #tpu.dot_dimension_numbers<[1], [0], [0], [1], [0, 0, 1, 1], [], []>} : vector<32x256xbf16>, vector<256x256xbf16>, vector<32x256xf32> -> vector<32x256xf32>
    %98 = arith.addf %93, %97 : vector<32x256xf32>
    %c7_109 = arith.constant 7 : index
    %c0_110 = arith.constant 0 : index
    %99 = vector.load %arg8[%c7_109, %c0_110] : memref<40x256xbf16, #tpu.memory_space<vmem>>, vector<32x256xbf16>
    %c7_111 = arith.constant 7 : index
    %c0_112 = arith.constant 0 : index
    %c0_113 = arith.constant 0 : index
    %100 = vector.load %arg4[%c7_111, %c0_112, %c0_113] : memref<9x256x256xbf16, #tpu.memory_space<vmem>>, vector<1x256x256xbf16>
    %101 = vector.shape_cast %100 : vector<1x256x256xbf16> to vector<256x256xbf16>
    %cst_114 = arith.constant dense<0.000000e+00> : vector<32x256xf32>
    %102 = tpu.matmul %99, %101, %cst_114 {dimension_numbers = #tpu.dot_dimension_numbers<[1], [0], [0], [1], [0, 0, 1, 1], [], []>} : vector<32x256xbf16>, vector<256x256xbf16>, vector<32x256xf32> -> vector<32x256xf32>
    %103 = arith.addf %98, %102 : vector<32x256xf32>
    %c8_115 = arith.constant 8 : index
    %c0_116 = arith.constant 0 : index
    %104 = vector.load %arg8[%c8_115, %c0_116] : memref<40x256xbf16, #tpu.memory_space<vmem>>, vector<32x256xbf16>
    %c8_117 = arith.constant 8 : index
    %c0_118 = arith.constant 0 : index
    %c0_119 = arith.constant 0 : index
    %105 = vector.load %arg4[%c8_117, %c0_118, %c0_119] : memref<9x256x256xbf16, #tpu.memory_space<vmem>>, vector<1x256x256xbf16>
    %106 = vector.shape_cast %105 : vector<1x256x256xbf16> to vector<256x256xbf16>
    %cst_120 = arith.constant dense<0.000000e+00> : vector<32x256xf32>
    %107 = tpu.matmul %104, %106, %cst_120 {dimension_numbers = #tpu.dot_dimension_numbers<[1], [0], [0], [1], [0, 0, 1, 1], [], []>} : vector<32x256xbf16>, vector<256x256xbf16>, vector<32x256xf32> -> vector<32x256xf32>
    %108 = arith.addf %103, %107 : vector<32x256xf32>
    %109 = vector.shape_cast %108 : vector<32x256xf32> to vector<8x4x256xf32>
    %cst_121 = arith.constant dense<0xFF800000> : vector<8x256xf32>
    %110 = vector.multi_reduction <maximumf>, %109, %cst_121 [1] : vector<8x4x256xf32> to vector<8x256xf32>
    %111 = vector.broadcast %12 : vector<1x256xf32> to vector<8x256xf32>
    %112 = arith.addf %110, %111 : vector<8x256xf32>
    %cst_122 = arith.constant 0.000000e+00 : f32
    %113 = vector.broadcast %cst_122 : f32 to vector<8x256xf32>
    %114 = arith.maximumf %112, %113 : vector<8x256xf32>
    %c0_123 = arith.constant 0 : index
    %c0_124 = arith.constant 0 : index
    %c0_125 = arith.constant 0 : index
    %115 = vector.load %arg6[%c0_123, %c0_124, %c0_125] : memref<1x8x256xf32, #tpu.memory_space<vmem>>, vector<1x8x256xf32>
    %116 = vector.shape_cast %115 : vector<1x8x256xf32> to vector<8x256xf32>
    %117 = vector.shape_cast %114 : vector<8x256xf32> to vector<1x8x256xf32>
    tpu.vector_store %arg6[%c0_123, %c0_124, %c0_125], %117 {strides = array<i32>} : memref<1x8x256xf32, #tpu.memory_space<vmem>>, vector<1x8x256xf32>,
    return
  }
  func.func @transform_0(%arg0: i32) -> (i32, i32, i32) {
    %c0_i32 = arith.constant 0 : i32
    %c0_i32_0 = arith.constant 0 : i32
    %c0_i32_1 = arith.constant 0 : i32
    return %arg0, %c0_i32, %c0_i32_0 : i32, i32, i32
  }
  func.func @transform_1(%arg0: i32) -> (i32, i32, i32) {
    %c0_i32 = arith.constant 0 : i32
    %c0_i32_0 = arith.constant 0 : i32
    %c0_i32_1 = arith.constant 0 : i32
    %c0_i32_2 = arith.constant 0 : i32
    return %c0_i32, %c0_i32_0, %c0_i32_1 : i32, i32, i32
  }
  func.func @transform_2(%arg0: i32) -> (i32, i32) {
    %c0_i32 = arith.constant 0 : i32
    %c0_i32_0 = arith.constant 0 : i32
    %c0_i32_1 = arith.constant 0 : i32
    return %c0_i32, %c0_i32_0 : i32, i32
  }
  func.func @transform_3(%arg0: i32) -> (i32, i32, i32) {
    %c0_i32 = arith.constant 0 : i32
    %c0_i32_0 = arith.constant 0 : i32
    %c0_i32_1 = arith.constant 0 : i32
    %c0_i32_2 = arith.constant 0 : i32
    return %c0_i32, %c0_i32_0, %c0_i32_1 : i32, i32, i32
  }
  func.func @transform_4(%arg0: i32) -> (i32, i32) {
    %c0_i32 = arith.constant 0 : i32
    %c0_i32_0 = arith.constant 0 : i32
    %c0_i32_1 = arith.constant 0 : i32
    return %c0_i32, %c0_i32_0 : i32, i32
  }
  func.func @transform_5(%arg0: i32) -> (i32, i32, i32) {
    %c0_i32 = arith.constant 0 : i32
    %c0_i32_0 = arith.constant 0 : i32
    %c0_i32_1 = arith.constant 0 : i32
    return %arg0, %c0_i32, %c0_i32_0 : i32, i32, i32
  }
}

</mosaic_0001>

<bundles_post_ra>
// kernel: base_feature_net.1
= control target key start
LH: loop header
LB: loop body
LE: loop exit
PB: predicated region body
PF: predicated region fallthrough
CT: control target
= control target key end

     0   :  { %10 = vsyncpa [#allocation5], 0  ;;  %s15954_s0 = inlined_call_operand.vmem [shape: bf16[2,128,303], index: 0, kind: input, shape index: {}]   ;;  %s15955_s1 = inlined_call_operand.hbm [shape: bf16[9,303,256], index: 1, kind: input, shape index: {}]   ;;  %s15956_s2 = inlined_call_operand.hbm [shape: f32[1,256], index: 2, kind: input, shape index: {}]   ;;  %s15957_s3 = inlined_call_operand.hbm [shape: bf16[9,256,256], index: 3, kind: input, shape index: {}]   ;;  %s15958_s4 = inlined_call_operand.hbm [shape: f32[1,256], index: 4, kind: input, shape index: {}]   ;;  %s15959_s5 = inlined_call_operand.hbm [shape: f32[2,8,256], index: 5, kind: output, shape index: {}]  }
   0x1   :  { %11 = vsyncpa [#allocation8], 0 }
   0x2   :  { %12 = vsyncpa [#allocation11], 0 }
   0x3   :  { %13 = vsyncpa [#allocation6], 0 }
   0x4   :  { %15 = vsyncpa [#allocation6 + $0x1], 0  ;;  %s12579_s18 = smov 0   ;;  %s12581_s19 = smov 0  }
   0x5   :  { %s12583_s20 = smov 0   ;;  %s12585_s21 = smov 0  }
   0x6 LB: > { %s12600_s22 = sadd.s32 4294967295, %s12538_s21   ;;  %s10342_s23 = sadd.s32 4294967294, %s12538_s21   ;;  %s12538_s21 = sphi %s12585_s21, %s16483_s21   ;;  %s12534_s20 = sphi %s12583_s20, %s16482_s20   ;;  %s12530_s19 = sphi %s12581_s19, %s16481_s19   ;;  %s12526_s18 = sphi %s12579_s18, %s16480_s18  }
   0x7   : > { %s12604_s24 = sadd.s32 1, %s12538_s21   ;;  %s138_s25 = sadd.s32 1, %s12534_s20 }
   0x8   : > { %s135_s26 = ssub.s32 %s12538_s21, %s12604_s24  ;;  %p148_p0 = scmp.ne.s32.totalorder %s12534_s20, %s12530_s19 }
   0x9   : > { %p136_p1 = scmp.eq.s32.totalorder %s135_s26, 0  ;;  %p149_p2 = scmp.eq.s32.totalorder %s12600_s22, 1 }
   0xa   : > { %p154_p3 = scmp.ne.s32.totalorder %s12530_s19, %s12526_s18  ;;  %p155_p4 = scmp.eq.s32.totalorder %s10342_s23, 1 }
   0xb   : > { %s12615_s27 = scalar_select %p136_p1, %s12534_s20, %s138_s25  }
   0xc   : > { %p12617_p5 = por %p149_p2, %p148_p0  ;;  %p12621_p6 = por %p155_p4, %p154_p3 }
   0xd   : > { %p10343_p7 = scmp.ge.s32.totalorder %s12538_s21, 1  ;;  %p162_p8 = scmp.lt.s32.totalorder %s12538_s21, 3 }
   0xe   : > { %s16100_s28 = scalar_select %p12617_p5, 1, 0 }
   0xf   : > { %s16101_s29 = scalar_select %p12621_p6, 1, 0 }
  0x10   : > { %p15960_p9 = scmp.eq.s32.totalorder %s12600_s22, 0  ;;  %p12628_p10 = pnand %p10343_p7, %p162_p8 }
  0x11   : > { %s12540_s6 = smov [#allocation7]   ;;  %s12541_s8 = smov [#allocation4]  }
  0x12   : > { %s16102_s30 = scalar_select %p12628_p10, 1, 0 }
  0x13   : > { %s188_s7 = sshll.u32 %s12540_s6, 4  ;;  %p11282_p11 = pneg %p12628_p10  ;;  %s189_s7 = int_to_ptr.vmem [resolvable:$true] %s188_s7 }
  0x14   : > { %s174_s9 = sshll.u32 %s12541_s8, 4  ;;  %s12542_s11 = smov [#allocation9]   ;;  %s175_s9 = int_to_ptr.vmem [resolvable:$true] %s174_s9 }
  0x15   : > { %p12636_p12 = pnand %p15960_p9, %p11282_p11  ;;  %s198_s12 = sshll.u32 %s12542_s11, 4  ;;  %s199_s12 = int_to_ptr.vmem [resolvable:$true] %s198_s12 }
  0x16   : > { %s12373_s13 = scalar_lea.vmem %s189_s7, 32  ;;  %p12381_p3 = scmp.lt.s32.totalorder %s189_s7, %s189_s7 }
  0x17   : > { %p12364_p13 = pneg %p12636_p12  ;;  %p12374_p0 = scmp.ne.s32.totalorder %s189_s7, %s12373_s13 }
  0x18   : > { %p12382_p4 = scmp.lt.s32.totalorder %s12373_s13, %s12373_s13 }
  0x19   : > { %p12376_p1 = pnand %p12374_p0, %p12364_p13 }
  0x1a   : > { %p12383_p7 = por %p12382_p4, %p12381_p3 }
  0x1b   : > { %p12377_p2 = pneg %p12376_p1 }
  0x1d   : > { %p12384_p8 = pnand %p12383_p7, %p12377_p2 }
  0x1f   : > { %12387 = shalt.err (!%p12384_p8)
}
  0x20   : > { %11288 = dma.hbm_to_vmem [thread:$0]  (!%p12636_p12), %s15956_s2, 32, %s189_s7, [#allocation8]  }
  0x21   : > { %s12399_s16 = scalar_lea.vmem %s175_s9, 43776  ;;  %p12407_p0 = scmp.lt.s32.totalorder %s175_s9, %s175_s9 }
  0x22   : > { %p12400_p11 = scmp.ne.s32.totalorder %s175_s9, %s12399_s16  ;;  %p12408_p1 = scmp.lt.s32.totalorder %s12399_s16, %s12399_s16 }
  0x24   : > { %p12402_p9 = pnand %p12400_p11, %p12364_p13  ;;  %p12409_p5 = por %p12408_p1, %p12407_p0 }
  0x26   : > { %p12403_p6 = pneg %p12402_p9 }
  0x28   : > { %p12410_p10 = pnand %p12409_p5, %p12403_p6 }
  0x2a   : > { %12413 = shalt.err (!%p12410_p10)
}
  0x2b   : > { %s12543_s17 = smov 128   ;;  %s12544_s23 = smov 8  }
  0x2c   : > { %11285 = dma.hbm_to_vmem [thread:$0]  (!%p12636_p12), %s15955_s1, 43776, %s175_s9, [#allocation5], %s12543_s17, %s12543_s17, %s12544_s23  }
  0x2d   : > { %s12425_s6 = scalar_lea.vmem %s199_s12, 36864  ;;  %p12433_p4 = scmp.lt.s32.totalorder %s199_s12, %s199_s12 }
  0x2e   : > { %p12426_p2 = scmp.ne.s32.totalorder %s199_s12, %s12425_s6  ;;  %p12434_p7 = scmp.lt.s32.totalorder %s12425_s6, %s12425_s6 }
  0x30   : > { %p12428_p9 = pnand %p12426_p2, %p12364_p13  ;;  %p12435_p5 = por %p12434_p7, %p12433_p4 }
  0x32   : > { %p12429_p3 = pneg %p12428_p9 }
  0x34   : > { %p12436_p6 = pnand %p12435_p5, %p12429_p3 }
  0x36   : > { %12439 = shalt.err (!%p12436_p6)
}
  0x37   : > { %11291 = dma.hbm_to_vmem [thread:$0]  (!%p12636_p12), %s15957_s3, 36864, %s199_s12, [#allocation8], %s12543_s17, %s12543_s17, %s12544_s23  }
  0x38   : > { %s12545_s9 = smov [#allocation10]  }
  0x39   : > { %s212_s11 = sshll.u32 %s12545_s9, 4  ;;  %s213_s11 = int_to_ptr.vmem [resolvable:$true] %s212_s11 }
  0x3a   : > { %s12451_s13 = scalar_lea.vmem %s213_s11, 32  ;;  %p12459_p0 = scmp.lt.s32.totalorder %s213_s11, %s213_s11 }
  0x3b   : > { %p12452_p10 = scmp.ne.s32.totalorder %s213_s11, %s12451_s13  ;;  %p12460_p1 = scmp.lt.s32.totalorder %s12451_s13, %s12451_s13 }
  0x3d   : > { %p12454_p8 = pnand %p12452_p10, %p12364_p13  ;;  %p12461_p2 = por %p12460_p1, %p12459_p0 }
  0x3f   : > { %p12455_p11 = pneg %p12454_p8 }
  0x41   : > { %p12462_p9 = pnand %p12461_p2, %p12455_p11 }
  0x43   : > { %12465 = shalt.err (!%p12462_p9)
}
  0x44   : > { %11294 = dma.hbm_to_vmem [thread:$0]  (!%p12636_p12), %s15958_s4, 32, %s213_s11, [#allocation11]  }
  0x45   : > { %p16104_p3 = scmp.ne.s32.totalorder %s16102_s30, 0 }
  0x47   : > { %233 = sbr.rel (%p16104_p3) target bundleno = 1613 (0x64d), region = 40 }
  0x4c   : > { %p16105_p4 = scmp.eq.s32.totalorder %s12600_s22, 0 }
  0x4e   : > { %12509 = dma.done.wait (%p16105_p4), [#allocation5], 43776   ;;  %p16106_p13 = pmov %p16105_p4 }
  0x4f   : > { %p16107_p7 = pmov %p16105_p4 }
  0x50   : > { %12511 = vsyncadd (%p16106_p13), [#allocation5], 4294923520 }
  0x51   : > { %12513 = dma.done.wait (%p16107_p7), [#allocation8], 36896   ;;  %p16108_p5 = pmov %p16105_p4 }
  0x52   : > { %p16109_p6 = pmov %p16105_p4 }
  0x53   : > { %12515 = vsyncadd (%p16108_p5), [#allocation8], 4294930400 }
  0x54   : > { %12517 = dma.done.wait (%p16109_p6), [#allocation11], 32   ;;  %p16110_p12 = pmov %p16105_p4 }
  0x55   : > { %v15963_v0 = vmov 0   ;;  %vm280_vm0 = vcmask 377856   ;;  %vm283_vm1 = vcmask 379906   ;;  %p273_p10 = scmp.lt.s32.totalorder %s12600_s22, 1  ;;  %vm1176_vm2 = vcmask 1046528   ;;  %v596_v32 = vld [vmem:[#allocation4 + $0x150] sm:$0xff] }
  0x56   : > { %12519 = vsyncadd (%p16110_p12), [#allocation11], 4294967264  ;;  %1331 = vmatprep.mubr.bf16.mxu1 %v15963_v0  ;;  %279 = vst [vmem:[#allocation2] sm:$0x33] %v15963_v0  ;;  %vm1177_vm3 = vcmask 1047552   ;;  %v12547_v2 = vmov 65535  }
  0x57   : > { %282 = vst [vmem:[#allocation2 + $0xc0] sm:$0xcc] %v15963_v0  ;;  %515 = vst [vmem:[#allocation3 + $0x20] sm:$0x33] %v15963_v0  ;;  %v11348_v1 = vld [vmem:[#allocation4 + $0x1a4] ss:$8 sps:$4 sm:$0xff]  }
  0x58   : > { %516 = vst [vmem:[#allocation3] sm:$0xcc] %v15963_v0  ;;  %281 = vst.msk [vmem:[#allocation2 + $0x8] sm:$0x3] %vm280_vm0, %v15963_v0  ;;  %v1178_v3 = vsel %vm1176_vm2, 4294967295, %v12547_v2  ;;  %s274_s30 = scalar_select %p273_p10, %s12600_s22, 1  ;;  %1186 = vmatprep.subr.bf16.mxu0 %v11348_v1 }
  0x59   : > { %284 = vst.msk [vmem:[#allocation2 + $0xc8] sm:$0xc] %vm283_vm1, %v15963_v0  ;;  %v11350_v4 = vld [vmem:[#allocation4 + $0x1a0] ss:$8 sps:$4 sm:$0xff]   ;;  %v11351_v5 = vld [vmem:[#allocation4 + $0x194] ss:$8 sps:$4 sm:$0xff]  }
  0x5a   : > { %1187 = vmatpush1.bf16.msra.mxu0 %v11350_v4  ;;  %v11353_v6 = vld [vmem:[#allocation4 + $0x190] ss:$8 sps:$4 sm:$0xff]   ;;  %v12700_v7 = vsel %vm1177_vm3, %v1178_v3, 0  ;;  %v11354_v8 = vld [vmem:[#allocation4 + $0x184] ss:$8 sps:$4 sm:$0xff]   ;;  %s11263_s10 = smul.u32 192, %s274_s30 }
  0x5b   : > { %1188 = vmatprep.subr.bf16.mxu0 %v11351_v5  ;;  %v11356_v9 = vld [vmem:[#allocation4 + $0x254] ss:$8 sps:$4 sm:$0xff]   ;;  %v11359_v10 = vld [vmem:[#allocation4 + $0x250] ss:$8 sps:$4 sm:$0xff]   ;;  %v11358_v12 = vld [vmem:[#allocation4 + $0x180] ss:$8 sps:$4 sm:$0xff]  }
  0x5c   : > { %v1184_v11 = vand.u32 %v11356_v9, %v12700_v7  ;;  %v1181_v13 = vand.u32 %v11359_v10, %v12700_v7  ;;  %v11362_v14 = vld [vmem:[#allocation4 + $0x244] ss:$8 sps:$4 sm:$0xff]   ;;  %v11360_v15 = vld [vmem:[#allocation4 + $0x174] ss:$8 sps:$4 sm:$0xff]   ;;  %s12707_s17 = scalar_lea.vmem %s15954_s0, %s11263_s10  ;;  %v11365_v16 = vld [vmem:[#allocation4 + $0x240] ss:$8 sps:$4 sm:$0xff]  }
  0x5d   : > { %v11364_v17 = vld [vmem:[#allocation4 + $0x170] ss:$8 sps:$4 sm:$0xff]   ;;  %v11368_v18 = vld [vmem:[#allocation4 + $0x234] ss:$8 sps:$4 sm:$0xff]   ;;  %vm349_vm4 = vcmask 1041408   ;;  %vm350_vm5 = vcmask 1045508  }
  0x5e   : > { %1189 = vmatpush1.bf16.msra.mxu0 %v11353_v6  ;;  %1309 = vmatprep.subr.bf16.mxu1 %v1184_v11  ;;  %v11366_v19 = vld [vmem:[#allocation4 + $0x164] ss:$8 sps:$4 sm:$0xff]   ;;  %v11371_v20 = vld [vmem:[#allocation4 + $0x230] ss:$8 sps:$4 sm:$0xff]   ;;  %v286_v21 = vld [vmem:[%s12707_s17 + $0x8] sm:$0xf] }
  0x5f   : > { %1190 = vmatprep.subr.bf16.mxu0 %v11354_v8  ;;  %1310 = vmatpush1.bf16.msra.mxu1 %v1181_v13  ;;  %v288_v22 = vld [vmem:[%s12707_s17 + $0x14] sm:$0xf]  ;;  %v290_v23 = vld [vmem:[%s12707_s17 + $0x20] sm:$0xf]  ;;  %v292_v24 = vld [vmem:[%s12707_s17 + $0x2c] sm:$0xf] }
  0x60   : > { %1311 = vmatprep.subr.bf16.mxu1 %v11362_v14  ;;  %vm12713_vm6 = vmor %vm349_vm4, %vm350_vm5  ;;  %v353_v26 = vrot.slane %v286_v21, 6  ;;  %v358_v27 = vrot.slane %v288_v22, 6  ;;  %v364_v28 = vrot.slane %v290_v23, 6  ;;  %v370_v29 = vrot.slane %v292_v24, 6  ;;  %v11370_v30 = vld [vmem:[#allocation4 + $0x160] ss:$8 sps:$4 sm:$0xff]  }
  0x61   : > { %vm483_vm7 = vcmask 379904   ;;  %v11378_v31 = vld [vmem:[#allocation4 + $0x74] ss:$8 sps:$4 sm:$0xff]   ;;  %v294_v42 = vld [vmem:[%s12707_s17 + $0x38] sm:$0xf]  ;;  %vm1151_vm9 = vcmask 384000  }
  0x62   : > { %1191 = vmatpush1.bf16.msra.mxu0 %v11358_v12  ;;  %v597_v33 = vld [vmem:[#allocation4 + $0x158] sm:$0xff]  ;;  %v357_v34 = vrot.slane %v353_v26, 4  ;;  %v363_v35 = vrot.slane %v358_v27, 4  ;;  %v369_v36 = vrot.slane %v364_v28, 4  ;;  %481 = vst.msk [vmem:[#allocation2 + $0x8] sm:$0xc] %vm283_vm1, %v353_v26 }
  0x63   : > { %1192 = vmatprep.subr.bf16.mxu0 %v11360_v15  ;;  %1312 = vmatpush1.bf16.msra.mxu1 %v11365_v16  ;;  %v11372_v37 = vld [vmem:[#allocation4 + $0x154] ss:$8 sps:$4 sm:$0xff]   ;;  %v375_v41 = vrot.slane %v370_v29, 4  ;;  %v10387_v43 = vcombine.low %v596_v32, %v597_v33  ;;  %v296_v44 = vld [vmem:[%s12707_s17 + $0x44] sm:$0xf]  ;;  %v376_v45 = vrot.slane %v294_v42, 6 }
  0x64   : > { %1313 = vmatprep.subr.bf16.mxu1 %v11368_v18  ;;  %v359_v38 = vsel %vm12713_vm6, %v357_v34, %v358_v27  ;;  %v365_v39 = vsel %vm12713_vm6, %v363_v35, %v364_v28  ;;  %v371_v40 = vsel %vm12713_vm6, %v369_v36, %v370_v29  ;;  %v11379_v46 = vld [vmem:[#allocation4 + $0x144] ss:$8 sps:$4 sm:$0xff]   ;;  %v382_v47 = vrot.slane %v296_v44, 6  ;;  %v11384_v51 = vld [vmem:[#allocation4 + $0x140] ss:$8 sps:$4 sm:$0xff]   ;;  %v592_v52 = vld [vmem:[#allocation4 + $0x130] sm:$0xff] }
  0x65   : > { %484 = vst.msk [vmem:[#allocation2 + $0x14] sm:$0xf] %vm483_vm7, %v359_v38  ;;  %486 = vst.msk [vmem:[#allocation2 + $0x20] sm:$0xf] %vm483_vm7, %v365_v39  ;;  %v377_v48 = vsel %vm12713_vm6, %v375_v41, %v376_v45  ;;  %v381_v49 = vrot.slane %v376_v45, 4  ;;  %v593_v54 = vld [vmem:[#allocation4 + $0x138] sm:$0xff] }
  0x66   : > { %1193 = vmatpush1.bf16.msra.mxu0 %v11364_v17  ;;  %488 = vst.msk [vmem:[#allocation2 + $0x2c] sm:$0xf] %vm483_vm7, %v371_v40  ;;  %490 = vst.msk [vmem:[#allocation2 + $0x38] sm:$0xf] %vm483_vm7, %v377_v48  ;;  %v11385_v55 = vld [vmem:[#allocation4 + $0x134] ss:$8 sps:$4 sm:$0xff]   ;;  %v10383_v2 = vcombine.low %v592_v52, %v593_v54 }
  0x67   : > { %1194 = vmatprep.subr.bf16.mxu0 %v11366_v19  ;;  %1314 = vmatpush1.bf16.msra.mxu1 %v11371_v20  ;;  %v383_v53 = vsel %vm12713_vm6, %v381_v49, %v382_v47  ;;  %v298_v56 = vld [vmem:[%s12707_s17 + $0x50] sm:$0xf]  ;;  %v387_v57 = vrot.slane %v382_v47, 4  ;;  %v300_v63 = vld [vmem:[%s12707_s17 + $0x5c] sm:$0xf]  ;;  %v620_v18 = vld [vmem:[#allocation4 + $0x210] sm:$0xff] }
  0x68   : > { %1638 = vmatprep.subr.bf16.mxu1 %v11378_v31  ;;  %492 = vst.msk [vmem:[#allocation2 + $0x44] sm:$0xf] %vm483_vm7, %v383_v53  ;;  %v388_v1 = vrot.slane %v298_v56, 6  ;;  %v11391_v3 = vld [vmem:[#allocation4 + $0x224] ss:$8 sps:$4 sm:$0xff]   ;;  %v394_v4 = vrot.slane %v300_v63, 6 }
  0x69   : > { %v520_v50 = vld [vmem:[#allocation2 + $0x8] sm:$0xf]  ;;  %vm742_vm8 = vsmask.f32 7424  ;;  %v11376_v14 = vld [vmem:[#allocation4 + $0x70] ss:$8 sps:$4 sm:$0xff]  }
  0x6a   : > { %1195 = vmatpush1.bf16.msra.mxu0 %v11370_v30  ;;  %v389_v10 = vsel %vm12713_vm6, %v387_v57, %v388_v1  ;;  %v393_v11 = vrot.slane %v388_v1, 4  ;;  %v11383_v15 = vld [vmem:[#allocation4 + $0x64] ss:$8 sps:$4 sm:$0xff]   ;;  %v11396_v17 = vld [vmem:[#allocation4 + $0x220] ss:$8 sps:$4 sm:$0xff]   ;;  %v399_v20 = vrot.slane %v394_v4, 4 }
  0x6b   : > { %1196 = vmatprep.subr.bf16.mxu0 %v11372_v37  ;;  %494 = vst.msk [vmem:[#allocation2 + $0x50] sm:$0xf] %vm483_vm7, %v389_v10  ;;  %v621_v24 = vld [vmem:[#allocation4 + $0x218] sm:$0xff]  ;;  %v302_v27 = vld [vmem:[%s12707_s17 + $0x68] sm:$0xf]  ;;  %vm3183_vm11 = vcmask 1045504  }
  0x6c   : > { %v522_v58 = vld [vmem:[#allocation2 + $0x14] sm:$0xf]  ;;  %v524_v59 = vld [vmem:[#allocation2 + $0x20] sm:$0xf]  ;;  %v395_v19 = vsel %vm12713_vm6, %v393_v11, %v394_v4  ;;  %v11397_v26 = vld [vmem:[#allocation4 + $0x214] ss:$8 sps:$4 sm:$0xff]   ;;  %v10411_v34 = vcombine.low %v620_v18, %v621_v24 }
  0x6d   : > { %v526_v60 = vld [vmem:[#allocation2 + $0x2c] sm:$0xf]  ;;  %v12736_v61 = vcombine.low %v520_v50, %v522_v58  ;;  %v528_v9 = vld [vmem:[#allocation2 + $0x38] sm:$0xf]  ;;  %496 = vst.msk [vmem:[#allocation2 + $0x5c] sm:$0xf] %vm483_vm7, %v395_v19 }
  0x6e   : > { %1197 = vmatpush1.bf16.msra.mxu0 %v10387_v43  ;;  %v12738_v62 = vcombine.low %v524_v59, %v526_v60  ;;  %v304_v28 = vld [vmem:[%s12707_s17 + $0x74] sm:$0xf]  ;;  %v400_v29 = vrot.slane %v302_v27, 6  ;;  %v11403_v39 = vld [vmem:[#allocation4 + $0x204] ss:$8 sps:$4 sm:$0xff]   ;;  %v617_v54 = vld [vmem:[#allocation4 + $0x1f8] sm:$0xff] }
  0x6f   : > { %1198 = vmatprep.subr.bf16.mxu0 %v11379_v46  ;;  %v768_v5 = vshrl.u32 %v12736_v61, 16  ;;  %v770_v6 = vshll.u32 %v12736_v61, 16  ;;  %v530_v16 = vld [vmem:[#allocation2 + $0x44] sm:$0xf]  ;;  %v406_v32 = vrot.slane %v304_v28, 6  ;;  %v613_v19 = vld [vmem:[#allocation4 + $0x1d8] sm:$0xff] }
  0x70   : > { %16113 = vst [vmem:[#allocation17_spill] sm:$0xff] %v12738_v62  ;;  %v12744_v8 = vshll.u32 %v12738_v62, 16  ;;  %v12752_v22 = vcombine.low %v528_v9, %v530_v16  ;;  %v12755_v23 = vshrl.u32 %v12738_v62, 16  ;;  %v11381_v33 = vld [vmem:[#allocation4 + $0x60] ss:$8 sps:$4 sm:$0xff]   ;;  %v401_v35 = vsel %vm12713_vm6, %v399_v20, %v400_v29  ;;  %v616_v46 = vld [vmem:[#allocation4 + $0x1f0] sm:$0xff] }
  0x71   : > { %v772_v12 = vrot.slane %v770_v6, 1  ;;  %v405_v36 = vrot.slane %v400_v29, 4  ;;  %498 = vst.msk [vmem:[#allocation2 + $0x68] sm:$0xf] %vm483_vm7, %v401_v35  ;;  %v11390_v40 = vld [vmem:[#allocation4 + $0x54] ss:$8 sps:$4 sm:$0xff]  }
  0x72   : > { %1199 = vmatpush1.bf16.msra.mxu0 %v11384_v51  ;;  %16114 = vst [vmem:[#allocation18_spill] sm:$0xff] %v12744_v8  ;;  %v777_v13 = vrot.slane %v12744_v8, 1  ;;  %16115 = vst [vmem:[#allocation19_spill] sm:$0xff] %v12752_v22  ;;  %v12762_v31 = vshll.u32 %v12752_v22, 16  ;;  %v532_v41 = vld [vmem:[#allocation2 + $0x50] sm:$0xf] }
  0x73   : > { %1200 = vmatprep.subr.bf16.mxu0 %v11385_v55  ;;  %v773_v21 = vor.u32 %v772_v12, %v768_v5  ;;  %16116 = vst [vmem:[#allocation20_spill] sm:$0xff] %v12755_v23  ;;  %v407_v42 = vsel %vm12713_vm6, %v405_v36, %v406_v32  ;;  %v11388_v43 = vld [vmem:[#allocation4 + $0x50] ss:$8 sps:$4 sm:$0xff]   ;;  %v12774_v44 = vshrl.u32 %v12752_v22, 16  ;;  %v11408_v45 = vld [vmem:[#allocation4 + $0x200] ss:$8 sps:$4 sm:$0xff]  }
  0x74   : > { %16117 = vst [vmem:[#allocation21_spill] sm:$0xff] %v12762_v31  ;;  %v797_v37 = vor.u32 %v12755_v23, %v777_v13  ;;  %v801_v38 = vrot.slane %v12762_v31, 1  ;;  %500 = vst.msk [vmem:[#allocation2 + $0x74] sm:$0xf] %vm483_vm7, %v407_v42  ;;  %v411_v47 = vrot.slane %v406_v32, 4  ;;  %v285_v24 = vld [vmem:[%s12707_s17] sm:$0xff] }
  0x75   : > { %v778_v30 = vsel %vm742_vm8, %v773_v21, %v777_v13  ;;  %16118 = vst [vmem:[#allocation22_spill] sm:$0xff] %v12774_v44  ;;  %v11395_v48 = vld [vmem:[#allocation4 + $0x44] ss:$8 sps:$4 sm:$0xff]   ;;  %v534_v49 = vld [vmem:[#allocation2 + $0x5c] sm:$0xf]  ;;  %v12814_v35 = vld [vmem:[%s12707_s17 + $0x24] sm:$0xff] }
  0x76   : > { %1201 = vmatpush1.bf16.msra.mxu0 %v10383_v2  ;;  %10421 = vmatmul.mubr.msk.bf16.vlgmr.msra.gmra.mxu1 %vm1151_vm9, %v778_v30  ;;  %v306_v50 = vld [vmem:[%s12707_s17 + $0x80] sm:$0xf]  ;;  %v308_v51 = vld [vmem:[%s12707_s17 + $0x8c] sm:$0xf]  ;;  %v802_v52 = vsel %vm742_vm8, %v797_v37, %v801_v38  ;;  %v12780_v53 = vcombine.low %v532_v41, %v534_v49  ;;  %v11409_v57 = vld [vmem:[#allocation4 + $0x1f4] ss:$8 sps:$4 sm:$0xff]   ;;  %v10407_v2 = vcombine.low %v616_v46, %v617_v54 }
  0x77   : > { %1202 = vmatprep.subr.bf16.mxu0 %v11391_v3  ;;  %1639 = vmatpush1.bf16.msra.mxu1 %v11376_v14  ;;  %v412_v55 = vrot.slane %v306_v50, 6  ;;  %v418_v56 = vrot.slane %v308_v51, 6  ;;  %v11393_v63 = vld [vmem:[#allocation4 + $0x40] ss:$8 sps:$4 sm:$0xff]   ;;  %v821_v3 = vor.u32 %v12774_v44, %v801_v38  ;;  %v11402_v5 = vld [vmem:[#allocation4 + $0x34] ss:$8 sps:$4 sm:$0xff]  }
  0x78   : > { %1341 = vmatprep.mubr.bf16.mxu1 %v15963_v0  ;;  %1640 = vmatprep.subr.bf16.mxu1 %v11383_v15  ;;  %16119 = vst [vmem:[#allocation23_spill] sm:$0xff] %v12780_v53  ;;  %v12783_v58 = vshll.u32 %v12780_v53, 16  ;;  %v536_v1 = vld [vmem:[#allocation2 + $0x68] sm:$0xf]  ;;  %v11415_v6 = vld [vmem:[#allocation4 + $0x1e4] ss:$8 sps:$4 sm:$0xff]  }
  0x79   : > { %v413_v59 = vsel %vm12713_vm6, %v411_v47, %v412_v55  ;;  %v417_v60 = vrot.slane %v412_v55, 4  ;;  %v11420_v11 = vld [vmem:[#allocation4 + $0x1e0] ss:$8 sps:$4 sm:$0xff]   ;;  %v423_v12 = vrot.slane %v418_v56, 4  ;;  %v11400_v13 = vld [vmem:[#allocation4 + $0x30] ss:$8 sps:$4 sm:$0xff]  }
  0x7a   : > { %1203 = vmatpush2.bf16.msra.mxu0 %v11396_v17  ;;  %16120 = vst [vmem:[#allocation24_spill] sm:$0xff] %v12783_v58  ;;  %502 = vst.msk [vmem:[#allocation2 + $0x80] sm:$0xf] %vm483_vm7, %v413_v59  ;;  %v825_v4 = vrot.slane %v12783_v58, 1  ;;  %v12797_v15 = vld [vmem:[#allocation4 + $0x1d0] sm:$0xff]  ;;  %v12804_v27 = vshrl.u32 %v12780_v53, 16 }
  0x7b   : > { %1204 = vmatprep.subr.bf16.mxu0 %v11397_v26  ;;  %1641 = vmatpush1.bf16.msra.mxu1 %v11381_v33  ;;  %v419_v9 = vsel %vm12713_vm6, %v417_v60, %v418_v56  ;;  %v538_v10 = vld [vmem:[#allocation2 + $0x74] sm:$0xf]  ;;  %v310_v16 = vld [vmem:[%s12707_s17 + $0x98] sm:$0xf]  ;;  %v312_v17 = vld [vmem:[%s12707_s17 + $0xa4] sm:$0xf] }
  0x7c   : > { %1642 = vmatprep.subr.bf16.mxu1 %v11390_v40  ;;  %504 = vst.msk [vmem:[#allocation2 + $0x8c] sm:$0xf] %vm483_vm7, %v419_v9  ;;  %v12795_v14 = vcombine.low %v536_v1, %v538_v10  ;;  %v11407_v18 = vld [vmem:[#allocation4 + $0x24] ss:$8 sps:$4 sm:$0xff]   ;;  %v424_v20 = vrot.slane %v310_v16, 6  ;;  %v430_v21 = vrot.slane %v312_v17, 6  ;;  %v826_v26 = vsel %vm742_vm8, %v821_v3, %v825_v4 }
  0x7d   : > { %16122 = vst [vmem:[#allocation26_spill] sm:$0xff] %v12804_v27  ;;  %v11421_v29 = vld [vmem:[#allocation4 + $0x1d4] ss:$8 sps:$4 sm:$0xff]   ;;  %v289_v32 = vld [vmem:[%s12707_s17 + $0x18] sm:$0xff]  ;;  %v352_v36 = vrot.slane %v285_v24, 6  ;;  %v367_v41 = vrot.slane %v12814_v35, 6  ;;  %v845_v51 = vor.u32 %v12804_v27, %v825_v4 }
  0x7e   : > { %1205 = vmatpush2.bf16.msra.mxu0 %v10411_v34  ;;  %10422 = vmatmul.mubr.msk.bf16.gmra.mxu1 %vm1151_vm9, %v802_v52  ;;  %16121 = vst [vmem:[#allocation25_spill] sm:$0xff] %v12795_v14  ;;  %v12807_v28 = vshll.u32 %v12795_v14, 16  ;;  %v287_v30 = vld [vmem:[%s12707_s17 + $0xc] sm:$0xff]  ;;  %v425_v33 = vsel %vm12713_vm6, %v423_v12, %v424_v20  ;;  %v429_v34 = vrot.slane %v424_v20, 4  ;;  %v11405_v38 = vld [vmem:[#allocation4 + $0x20] ss:$8 sps:$4 sm:$0xff]  }
  0x7f   : > { %1206 = vmatprep.subr.bf16.mxu0 %v11403_v39  ;;  %1643 = vmatpush1.bf16.msra.mxu1 %v11388_v43  ;;  %v355_v37 = vrot.slane %v287_v30, 6  ;;  %506 = vst.msk [vmem:[#allocation2 + $0x98] sm:$0xf] %vm483_vm7, %v425_v33  ;;  %v361_v40 = vrot.slane %v289_v32, 6  ;;  %v11414_v42 = vld [vmem:[#allocation4 + $0x14] ss:$8 sps:$4 sm:$0xff]   ;;  %v10403_v43 = vcombine.low %v12797_v15, %v613_v19 }
  0x80   : > { %1351 = vmatprep.mubr.bf16.mxu1 %v15963_v0  ;;  %1644 = vmatprep.subr.bf16.mxu1 %v11395_v48  ;;  %16123 = vst [vmem:[#allocation27_spill] sm:$0xff] %v12807_v28  ;;  %v12820_v46 = vld [vmem:[#allocation4 + $0x1b0] sm:$0xff]  ;;  %v12822_v47 = vld [vmem:[#allocation4 + $0x1b8] sm:$0xff]  ;;  %v431_v48 = vsel %vm12713_vm6, %v429_v34, %v430_v21  ;;  %v354_v49 = vrot.slane %v352_v36, 4  ;;  %480 = vst [vmem:[#allocation2] sm:$0xcc] %v352_v36 }
  0x81   : > { %v540_v39 = vld [vmem:[#allocation2 + $0x80] sm:$0xf]  ;;  %v360_v50 = vrot.slane %v355_v37, 4  ;;  %v849_v52 = vrot.slane %v12807_v28, 1  ;;  %v12830_v55 = vshrl.u32 %v12795_v14, 16  ;;  %v366_v56 = vrot.slane %v361_v40, 4 }
  0x82   : > { %1207 = vmatpush2.bf16.msra.mxu0 %v11408_v45  ;;  %v11427_v45 = vld [vmem:[#allocation4 + $0x1c4] ss:$8 sps:$4 sm:$0xff]   ;;  %508 = vst.msk [vmem:[#allocation2 + $0xa4] sm:$0xf] %vm483_vm7, %v431_v48  ;;  %v12837_v59 = vsel %vm12713_vm6, %v354_v49, %v355_v37  ;;  %v314_v1 = vld [vmem:[%s12707_s17 + $0xb0] sm:$0xf]  ;;  %v10399_v12 = vcombine.low %v12820_v46, %v12822_v47 }
  0x83   : > { %1208 = vmatprep.subr.bf16.mxu0 %v11409_v57  ;;  %1645 = vmatpush1.bf16.msra.mxu1 %v11393_v63  ;;  %v542_v54 = vld [vmem:[#allocation2 + $0x8c] sm:$0xf]  ;;  %16124 = vst [vmem:[#allocation28_spill] sm:$0xff] %v12830_v55  ;;  %v362_v60 = vsel %vm12713_vm6, %v360_v50, %v361_v40  ;;  %v12841_v63 = vld [vmem:[#allocation4 + $0x120] ss:$8 sps:$4 sm:$0xff]   ;;  %v368_v4 = vsel %vm12713_vm6, %v366_v56, %v367_v41  ;;  %482 = vst [vmem:[#allocation2 + $0xc] sm:$0xff] %v12837_v59 }
  0x84   : > { %1646 = vmatprep.subr.bf16.mxu1 %v11402_v5  ;;  %v12833_v57 = vcombine.low %v540_v39, %v542_v54  ;;  %v11412_v3 = vld [vmem:[#allocation4 + $0x10] ss:$8 sps:$4 sm:$0xff]   ;;  %485 = vst [vmem:[#allocation2 + $0x18] sm:$0xff] %v362_v60  ;;  %v435_v5 = vrot.slane %v430_v21, 4  ;;  %v11419_v9 = vld [vmem:[#allocation4 + $0x4] ss:$8 sps:$4 sm:$0xff]   ;;  %v12857_v15 = vcombine.low %v362_v60, %v368_v4  ;;  %v1633_v33 = vand.u32 %v12841_v63, %v12700_v7 }
  0x85   : > { %487 = vst [vmem:[#allocation2 + $0x24] sm:$0xff] %v368_v4  ;;  %v11444_v16 = vld [vmem:[#allocation4 + $0x124] ss:$8 sps:$4 sm:$0xff]   ;;  %v293_v17 = vld [vmem:[%s12707_s17 + $0x30] sm:$0xff]  ;;  %v372_v34 = vrot.slane %v367_v41, 4  ;;  %vm4453_vm13 = vcmask 1044480  }
  0x86   : > { %1209 = vmatpush2.bf16.msra.mxu0 %v10407_v2  ;;  %10423 = vmatmul.mubr.msk.bf16.gmra.mxu1 %vm1151_vm9, %v826_v26  ;;  %16125 = vst [vmem:[#allocation29_spill] sm:$0xff] %v12833_v57  ;;  %v12845_v2 = vld [vmem:[%s12707_s17 + $0xbc] sm:$0xf]  ;;  %v12851_v10 = vshll.u32 %v12833_v57, 16  ;;  %16128 = vst [vmem:[#allocation32_spill] sm:$0xff] %v12857_v15  ;;  %v869_v26 = vor.u32 %v12830_v55, %v849_v52  ;;  %v12871_v35 = vshrl.u32 %v12833_v57, 16 }
  0x87   : > { %1210 = vmatprep.subr.bf16.mxu0 %v11415_v6  ;;  %1647 = vmatpush1.bf16.msra.mxu1 %v11400_v13  ;;  %v436_v6 = vrot.slane %v314_v1, 6  ;;  %v12855_v13 = vcombine.high %v362_v60, %v368_v4  ;;  %v442_v21 = vrot.slane %v12845_v2, 6  ;;  %v295_v24 = vld [vmem:[%s12707_s17 + $0x3c] sm:$0xff]  ;;  %v11433_v30 = vld [vmem:[#allocation4 + $0x1b4] ss:$8 sps:$4 sm:$0xff]   ;;  %v373_v39 = vrot.slane %v293_v17, 6 }
  0x88   : > { %1361 = vmatprep.mubr.bf16.mxu1 %v15963_v0  ;;  %1648 = vmatprep.subr.bf16.mxu1 %v11407_v18  ;;  %16126 = vst [vmem:[#allocation30_spill] sm:$0xff] %v12851_v10  ;;  %v850_v18 = vsel %vm742_vm8, %v845_v51, %v849_v52  ;;  %v544_v32 = vld [vmem:[#allocation2 + $0x98] sm:$0xf]  ;;  %16129 = vst [vmem:[#allocation33_spill] sm:$0xff] %v12871_v35  ;;  %v519_v36 = vld [vmem:[#allocation2] sm:$0xff]  ;;  %v12883_v41 = vshll.u32 %v12857_v15, 16 }
  0x89   : > { %16127 = vst [vmem:[#allocation31_spill] sm:$0xff] %v12855_v13  ;;  %v437_v19 = vsel %vm12713_vm6, %v435_v5, %v436_v6  ;;  %v441_v20 = vrot.slane %v436_v6, 4  ;;  %v12874_v37 = vshll.u32 %v12855_v13, 16  ;;  %v546_v40 = vld [vmem:[#allocation2 + $0xa4] sm:$0xf]  ;;  %v12891_v49 = vcombine.low %v519_v36, %v12837_v59  ;;  %v297_v5 = vld [vmem:[%s12707_s17 + $0x48] sm:$0xff] }
  0x8a   : > { %1211 = vmatpush2.bf16.msra.mxu0 %v11420_v11  ;;  %v11432_v11 = vld [vmem:[#allocation4 + $0x1c0] ss:$8 sps:$4 sm:$0xff]   ;;  %510 = vst.msk [vmem:[#allocation2 + $0xb0] sm:$0xf] %vm483_vm7, %v437_v19  ;;  %16131 = vst [vmem:[#allocation35_spill] sm:$0xff] %v12883_v41  ;;  %v12888_v48 = vcombine.low %v544_v32, %v546_v40  ;;  %v374_v50 = vsel %vm12713_vm6, %v372_v34, %v373_v39  ;;  %v12896_v51 = vshrl.u32 %v12855_v13, 16 }
  0x8b   : > { %1212 = vmatprep.subr.bf16.mxu0 %v11421_v29  ;;  %1649 = vmatpush1.bf16.msra.mxu1 %v11405_v38  ;;  %v873_v29 = vrot.slane %v12851_v10, 1  ;;  %16130 = vst [vmem:[#allocation34_spill] sm:$0xff] %v12874_v37  ;;  %v443_v38 = vsel %vm12713_vm6, %v441_v20, %v442_v21  ;;  %v11417_v46 = vld [vmem:[#allocation4] ss:$8 sps:$4 sm:$0xff]   ;;  %v11426_v47 = vld [vmem:[#allocation4 + $0xf4] ss:$8 sps:$4 sm:$0xff]  }
  0x8c   : > { %1650 = vmatprep.subr.bf16.mxu1 %v11414_v42  ;;  %v12880_v42 = vcombine.high %v519_v36, %v12837_v59  ;;  %512 = vst.msk [vmem:[#allocation2 + $0xbc] sm:$0xf] %vm483_vm7, %v443_v38  ;;  %16132 = vst [vmem:[#allocation36_spill] sm:$0xff] %v12888_v48  ;;  %v378_v60 = vrot.slane %v373_v39, 4  ;;  %v12905_v2 = vshll.u32 %v12888_v48, 16  ;;  %v746_v4 = vshll.u32 %v12891_v49, 16 }
  0x8d   : > { %16133 = vst [vmem:[#allocation37_spill] sm:$0xff] %v12896_v51  ;;  %v874_v52 = vsel %vm742_vm8, %v869_v26, %v873_v29  ;;  %489 = vst [vmem:[#allocation2 + $0x30] sm:$0xff] %v374_v50  ;;  %v12902_v1 = vor.u32 %v12871_v35, %v873_v29  ;;  %v11424_v6 = vld [vmem:[#allocation4 + $0xf0] ss:$8 sps:$4 sm:$0xff]   ;;  %v445_v17 = vrot.slane %v442_v21, 4  ;;  %v753_v19 = vrot.slane %v12883_v41, 1 }
  0x8e   : > { %1213 = vmatpush2.bf16.msra.mxu0 %v10403_v43  ;;  %10424 = vmatmul.mubr.msk.bf16.gmra.mxu1 %vm1151_vm9, %v850_v18  ;;  %v1636_v43 = vand.u32 %v11444_v16, %v12700_v7  ;;  %v756_v54 = vshrl.u32 %v12880_v42, 16  ;;  %v758_v56 = vshll.u32 %v12880_v42, 16  ;;  %16134 = vst [vmem:[#allocation38_spill] sm:$0xff] %v12905_v2  ;;  %v748_v18 = vrot.slane %v746_v4, 1  ;;  %v299_v32 = vld [vmem:[%s12707_s17 + $0x54] sm:$0xff]  ;;  %s270_s23 = sand.u32 1, %s12530_s19  }
  0x8f   : > { %1214 = vmatprep.subr.bf16.mxu0 %v11427_v45  ;;  %v379_v45 = vrot.slane %v295_v24, 6  ;;  %1651 = vmatpush1.bf16.msra.mxu1 %v11412_v3  ;;  %v744_v3 = vshrl.u32 %v12891_v49, 16  ;;  %514 = vst.msk [vmem:[#allocation2 + $0xc8] sm:$0x3] %vm280_vm0, %v445_v17  ;;  %v385_v34 = vrot.slane %v297_v5, 6  ;;  %v897_v36 = vrot.slane %v12905_v2, 1 }
  0x90   : > { %1371 = vmatprep.mubr.bf16.mxu1 %v15963_v0  ;;  %1652 = vmatprep.subr.bf16.mxu1 %v11419_v9  ;;  %v760_v9 = vrot.slane %v758_v56, 1  ;;  %v11461_v56 = vld [vmem:[#allocation4 + $0x114] ss:$8 sps:$4 sm:$0xff]   ;;  %v391_v4 = vrot.slane %v299_v32, 6  ;;  %v16149_v2 = vmov 0   ;;  %vm6389_vm15 = vcmask 1043456  }
  0x91   : > { %v380_v16 = vsel %vm12713_vm6, %v378_v60, %v379_v45  ;;  %v548_v20 = vld [vmem:[#allocation2 + $0xb0] sm:$0xf]  ;;  %v384_v21 = vrot.slane %v379_v45, 4  ;;  %v749_v38 = vor.u32 %v748_v18, %v744_v3  ;;  %v390_v3 = vrot.slane %v385_v34, 4  ;;  %v11475_v8 = vld [vmem:[#allocation4 + $0x384] ss:$8 sps:$4 sm:$0xff]  }
  0x92   : > { %1215 = vmatpush2.bf16.msra.mxu0 %v11432_v11  ;;  %v765_v11 = vrot.slane %v12874_v37, 1  ;;  %491 = vst [vmem:[#allocation2 + $0x3c] sm:$0xff] %v380_v16  ;;  %v12914_v24 = vcombine.high %v374_v50, %v380_v16  ;;  %v12916_v26 = vcombine.low %v374_v50, %v380_v16  ;;  %v761_v29 = vor.u32 %v760_v9, %v756_v54  ;;  %v11438_v5 = vld [vmem:[#allocation4 + $0xd4] ss:$8 sps:$4 sm:$0xff]   ;;  %v11436_v16 = vld [vmem:[#allocation4 + $0xd0] ss:$8 sps:$4 sm:$0xff]  }
  0x93   : > { %1216 = vmatprep.subr.bf16.mxu0 %v11433_v30  ;;  %1653 = vmatpush1.bf16.msra.mxu1 %v11417_v46  ;;  %v550_v39 = vld [vmem:[#allocation2 + $0xbc] sm:$0xf]  ;;  %v386_v54 = vsel %vm12713_vm6, %v384_v21, %v385_v34  ;;  %v754_v60 = vsel %vm742_vm8, %v749_v38, %v753_v19  ;;  %v392_v17 = vsel %vm12713_vm6, %v390_v3, %v391_v4  ;;  %v303_v18 = vld [vmem:[%s12707_s17 + $0x6c] sm:$0xff]  ;;  %v11441_v38 = vld [vmem:[#allocation4 + $0xc4] ss:$8 sps:$4 sm:$0xff]   ;;  %vm7267_vm0 = vcmask 1045509  }
  0x94   : > { %16135 = vst [vmem:[#allocation39_spill] sm:$0xff] %v12914_v24  ;;  %16136 = vst [vmem:[#allocation40_spill] sm:$0xff] %v12916_v26  ;;  %1654 = vmatprep.subr.bf16.mxu1 %v11426_v47  ;;  %v789_v30 = vor.u32 %v12896_v51, %v765_v11  ;;  %v12923_v40 = vshll.u32 %v12914_v24, 16  ;;  %v11429_v46 = vld [vmem:[#allocation4 + $0xe0] ss:$8 sps:$4 sm:$0xff]   ;;  %v766_v47 = vsel %vm742_vm8, %v761_v29, %v765_v11  ;;  %v12933_v45 = vshll.u32 %v12916_v26, 16 }
  0x95   : > { %v12930_v50 = vcombine.low %v548_v20, %v550_v39  ;;  %493 = vst [vmem:[#allocation2 + $0x48] sm:$0xff] %v386_v54  ;;  %1218 = vmatprep.mubr.bf16.mxu0 %v766_v47  ;;  %v12941_v9 = vshrl.u32 %v12914_v24, 16  ;;  %v301_v11 = vld [vmem:[%s12707_s17 + $0x60] sm:$0xff]  ;;  %v396_v20 = vrot.slane %v391_v4, 4  ;;  %495 = vst [vmem:[#allocation2 + $0x54] sm:$0xff] %v392_v17  ;;  %v898_v34 = vsel %vm742_vm8, %v12902_v1, %v897_v36  ;;  %v305_v1 = vld [vmem:[%s12707_s17 + $0x78] sm:$0xff] }
  0x96   : > { %1217 = vmatpush2.bf16.msra.mxu0 %v10399_v12  ;;  %v11431_v12 = vld [vmem:[#allocation4 + $0xe4] ss:$8 sps:$4 sm:$0xff]   ;;  %16137 = vst [vmem:[#allocation41_spill] sm:$0xff] %v12923_v40  ;;  %10425 = vmatmul.mubr.msk.bf16.gmra.mxu1 %vm1151_vm9, %v874_v52  ;;  %16140 = vst [vmem:[#allocation44_spill] sm:$0xff] %v12933_v45  ;;  %v793_v52 = vrot.slane %v12923_v40, 1  ;;  %v785_v32 = vrot.slane %v12933_v45, 1 }
  0x97   : > { %1761 = vmatprep.subr.bf16.mxu0 %v1636_v43  ;;  %v12926_v43 = vshrl.u32 %v12857_v15, 16  ;;  %16139 = vst [vmem:[#allocation43_spill] sm:$0xff] %v12930_v50  ;;  %1655 = vmatpush2.bf16.msra.mxu1 %v11424_v6  ;;  %16141 = vst [vmem:[#allocation45_spill] sm:$0xff] %v12941_v9  ;;  %v11459_v21 = vld [vmem:[#allocation4 + $0x110] ss:$8 sps:$4 sm:$0xff]   ;;  %v12961_v63 = vshll.u32 %v12930_v50, 16 }
  0x98   : > { %1381 = vmatprep.mubr.bf16.mxu1 %v15963_v0  ;;  %1656 = vmatprep.subr.bf16.mxu1 %v11431_v12  ;;  %v794_v6 = vsel %vm742_vm8, %v789_v30, %v793_v52  ;;  %v12952_v12 = vshrl.u32 %v12888_v48, 16  ;;  %v12956_v30 = vcombine.high %v386_v54, %v392_v17  ;;  %v813_v39 = vor.u32 %v12941_v9, %v793_v52  ;;  %v11439_v3 = vld [vmem:[#allocation4 + $0xc0] ss:$8 sps:$4 sm:$0xff]   ;;  %v11452_v4 = vld [vmem:[#allocation2 + $0xc8] ss:$0 sps:$4 sm:$0x11]  }
  0x99   : > { %16138 = vst [vmem:[#allocation42_spill] sm:$0xff] %v12926_v43  ;;  %1219 = vmatmul.mubr.bf16.vlgmr.msra.gmra.mxu0 %v754_v60  ;;  %v781_v29 = vor.u32 %v12926_v43, %v753_v19  ;;  %16144 = vst [vmem:[#allocation48_spill] sm:$0xff] %v12961_v63  ;;  %v397_v19 = vrot.slane %v301_v11, 6  ;;  %v403_v60 = vrot.slane %v303_v18, 6  ;;  %v11464_v0 = vld [vmem:[#allocation4 + $0x104] ss:$8 sps:$4 sm:$0xff]  }
  0x9a   : > { %1762 = vmatpush1.bf16.msra.mxu0 %v1633_v33  ;;  %16142 = vst [vmem:[#allocation46_spill] sm:$0xff] %v12952_v12  ;;  %1228 = vmatprep.mubr.bf16.mxu0 %v794_v6  ;;  %16143 = vst [vmem:[#allocation47_spill] sm:$0xff] %v12956_v30  ;;  %v12963_v33 = vcombine.low %v386_v54, %v392_v17  ;;  %v12967_v47 = vshll.u32 %v12956_v30, 16  ;;  %v917_v52 = vor.u32 %v12952_v12, %v897_v36  ;;  %v11448_v12 = vld [vmem:[#allocation4 + $0xb4] ss:$8 sps:$4 sm:$0xff]   ;;  %vm7270_vm1 = vcmask 1046534  }
  0x9b   : > { %1657 = vmatpush2.bf16.msra.mxu1 %v11429_v46  ;;  %1763 = vmatprep.subr.bf16.mxu0 %v11461_v56  ;;  %v12970_v46 = vshrl.u32 %v12916_v26, 16  ;;  %v398_v54 = vsel %vm12713_vm6, %v396_v20, %v397_v19  ;;  %v402_v56 = vrot.slane %v397_v19, 4  ;;  %v786_v11 = vsel %vm742_vm8, %v781_v29, %v785_v32  ;;  %v11462_v19 = vld [vmem:[#allocation4 + $0x100] ss:$8 sps:$4 sm:$0xff]   ;;  %s10354_s25 = sshll.u32 %s270_s23, 4  ;;  %s11262_s26 = sshll.u32 %s12600_s22, 8 }
  0x9c   : > { %16145 = vst [vmem:[#allocation49_spill] sm:$0xff] %v12963_v33  ;;  %1658 = vmatprep.subr.bf16.mxu1 %v11438_v5  ;;  %16146 = vst [vmem:[#allocation50_spill] sm:$0xff] %v12967_v47  ;;  %v12974_v6 = vshll.u32 %v12963_v33, 16  ;;  %v307_v5 = vld [vmem:[%s12707_s17 + $0x84] sm:$0xff]  ;;  %v817_v17 = vrot.slane %v12967_v47, 1  ;;  %v408_v18 = vrot.slane %v403_v60, 4  ;;  %s15909_s22 = scalar_lea.hbm %s15959_s5, %s11262_s26 }
  0x9d   : > { %16147 = vst [vmem:[#allocation51_spill] sm:$0xff] %v12970_v46  ;;  %497 = vst [vmem:[#allocation2 + $0x60] sm:$0xff] %v398_v54  ;;  %v921_v20 = vrot.slane %v12961_v63, 1  ;;  %v12988_v36 = vshrl.u32 %v12956_v30, 16  ;;  %v409_v29 = vrot.slane %v305_v1, 6  ;;  %v309_v35 = vld [vmem:[%s12707_s17 + $0x90] sm:$0xff] }
  0x9e   : > { %16148 = vst [vmem:[#allocation52_spill] sm:$0xff] %v12974_v6  ;;  %10426 = vmatmul.mubr.msk.bf16.gmra.mxu1 %vm1151_vm9, %v898_v34  ;;  %1764 = vmatpush1.bf16.msra.mxu0 %v11459_v21  ;;  %v404_v34 = vsel %vm12713_vm6, %v402_v56, %v403_v60  ;;  %v12991_v21 = vshrl.u32 %v12930_v50, 16  ;;  %v818_v10 = vsel %vm742_vm8, %v813_v39, %v817_v17  ;;  %v311_v63 = vld [vmem:[%s12707_s17 + $0x9c] sm:$0xff]  ;;  %v943_v28 = vshll.u32 %v11452_v4, 16  ;;  %s272_s6 = scalar_lea.vmem [#allocation12], %s10354_s25  ;;  %s10228_s11 = scalar_lea.sflag [#allocation6], %s270_s23 }
  0x9f   : > { %1659 = vmatpush2.bf16.msra.mxu1 %v11436_v16  ;;  %1391 = vmatprep.mubr.bf16.mxu1 %v16149_v2  ;;  %16150 = vst [vmem:[#allocation53_spill] sm:$0xff] %v12988_v36  ;;  %499 = vst [vmem:[#allocation2 + $0x6c] sm:$0xff] %v404_v34  ;;  %v12994_v16 = vcombine.high %v398_v54, %v404_v34  ;;  %v805_v60 = vor.u32 %v12970_v46, %v785_v32  ;;  %v809_v56 = vrot.slane %v12974_v6, 1  ;;  %vm2506_vm10 = vsmask.f32 6400  ;;  %s10242_s7 = sshll.u32 %s272_s6, 4  ;;  %s15911_s7 = int_to_ptr.vmem [resolvable:$true] %s10242_s7 }
  0xa0   : > { %1660 = vmatprep.subr.bf16.mxu1 %v11441_v38  ;;  %16151 = vst [vmem:[#allocation54_spill] sm:$0xff] %v12991_v21  ;;  %v410_v38 = vsel %vm12713_vm6, %v408_v18, %v409_v29  ;;  %v13005_v55 = vcombine.low %v398_v54, %v404_v34  ;;  %v414_v39 = vrot.slane %v409_v29, 4  ;;  %v415_v58 = vrot.slane %v307_v5, 6  ;;  %1765 = vmatprep.subr.bf16.mxu0 %v11464_v0  ;;  %v11449_v29 = vld [vmem:[#allocation4 + $0xa0] ss:$8 sps:$4 sm:$0xff]   ;;  %s12466_s13 = scalar_lea.vmem %s15911_s7, 256 }
  0xa1   : > { %16152 = vst [vmem:[#allocation55_spill] sm:$0xff] %v12994_v16  ;;  %1229 = vmatmul.mubr.bf16.gmra.mxu0 %v786_v11  ;;  %v13003_v1 = vshll.u32 %v12994_v16, 16  ;;  %501 = vst [vmem:[#allocation2 + $0x78] sm:$0xff] %v410_v38  ;;  %v922_v4 = vsel %vm742_vm8, %v917_v52, %v921_v20  ;;  %v11446_v11 = vld [vmem:[#allocation4 + $0xb0] ss:$8 sps:$4 sm:$0xff]   ;;  %v837_v32 = vor.u32 %v12988_v36, %v817_v17  ;;  %v421_v27 = vrot.slane %v309_v35, 6  ;;  %p12467_p8 = scmp.ne.s32.totalorder %s15911_s7, %s12466_s13 }
  0xa2   : > { %1238 = vmatprep.mubr.bf16.mxu0 %v818_v10  ;;  %16154 = vst [vmem:[#allocation57_spill] sm:$0xff] %v13005_v55  ;;  %v427_v31 = vrot.slane %v311_v63, 6  ;;  %1766 = vmatpush1.bf16.msra.mxu0 %v11462_v19  ;;  %v11451_v10 = vld [vmem:[#allocation4 + $0xa4] ss:$8 sps:$4 sm:$0xff]   ;;  %v416_v5 = vsel %vm12713_vm6, %v414_v39, %v415_v58  ;;  %v420_v18 = vrot.slane %v415_v58, 4  ;;  %v941_v0 = vor.u32 %v12991_v21, %v921_v20  ;;  %v313_v58 = vld [vmem:[%s12707_s17 + $0xa8] sm:$0xff] }
  0xa3   : > { %16153 = vst [vmem:[#allocation56_spill] sm:$0xff] %v13003_v1  ;;  %1661 = vmatpush2.bf16.msra.mxu1 %v11439_v3  ;;  %v841_v54 = vrot.slane %v13003_v1, 1  ;;  %v13014_v3 = vshrl.u32 %v12963_v33, 16  ;;  %503 = vst [vmem:[#allocation2 + $0x84] sm:$0xff] %v416_v5  ;;  %v13016_v52 = vcombine.high %v410_v38, %v416_v5  ;;  %v426_v35 = vrot.slane %v421_v27, 4  ;;  %v315_v20 = vld [vmem:[%s12707_s17 + $0xb4] sm:$0xff] }
  0xa4   : > { %1662 = vmatprep.subr.bf16.mxu1 %v11448_v12  ;;  %v945_v12 = vrot.slane %v943_v28, 1  ;;  %v810_v63 = vsel %vm742_vm8, %v805_v60, %v809_v56  ;;  %v13021_v17 = vshll.u32 %v13005_v55, 16  ;;  %v13024_v34 = vshrl.u32 %v12994_v16, 16  ;;  %p16478_p11 = scmp.ne.s32.totalorder %s16100_s28, 0  ;;  %s12548_s14 = smov [#allocation12]  }
  0xa5   : > { %16155 = vst [vmem:[#allocation58_spill] sm:$0xff] %v13014_v3  ;;  %16156 = vst [vmem:[#allocation59_spill] sm:$0xff] %v13016_v52  ;;  %v842_v19 = vsel %vm742_vm8, %v837_v32, %v841_v54  ;;  %v13031_v39 = vshll.u32 %v13016_v52, 16  ;;  %v422_v28 = vsel %vm12713_vm6, %v420_v18, %v421_v27  ;;  %v428_v60 = vsel %vm12713_vm6, %v426_v35, %v427_v31  ;;  %v11453_v18 = vld [vmem:[#allocation4 + $0x90] ss:$8 sps:$4 sm:$0xff]   ;;  %s12470_s15 = sshll.u32 %s12548_s14, 4  ;;  %s12471_s15 = int_to_ptr.vmem [resolvable:$false] %s12470_s15 }
  0xa6   : > { %10427 = vmatmul.mubr.msk.bf16.gmra.mxu1 %vm1151_vm9, %v922_v4  ;;  %16157 = vst [vmem:[#allocation60_spill] sm:$0xff] %v13021_v17  ;;  %16158 = vst [vmem:[#allocation61_spill] sm:$0xff] %v13024_v34  ;;  %v11455_v4 = vld [vmem:[#allocation4 + $0x94] ss:$8 sps:$4 sm:$0xff]   ;;  %v432_v21 = vrot.slane %v427_v31, 4  ;;  %v439_v44 = vrot.slane %v315_v20, 6  ;;  %v829_v32 = vor.u32 %v13014_v3, %v809_v56  ;;  %v13039_v1 = vcombine.low %v410_v38, %v416_v5  ;;  %p12468_p0 = pnand %p12467_p8, %p16478_p11  ;;  %p12473_p2 = scmp.lt.s32.totalorder %s15911_s7, %s12471_s15 }
  0xa7   : > { %1663 = vmatpush2.bf16.msra.mxu1 %v11446_v11  ;;  %1401 = vmatprep.mubr.bf16.mxu1 %v16149_v2  ;;  %16159 = vst [vmem:[#allocation62_spill] sm:$0xff] %v13031_v39  ;;  %505 = vst [vmem:[#allocation2 + $0x90] sm:$0xff] %v422_v28  ;;  %v433_v11 = vrot.slane %v313_v58, 6  ;;  %v833_v23 = vrot.slane %v13021_v17, 1  ;;  %v946_v27 = vsel %vm742_vm8, %v941_v0, %v945_v12  ;;  %v865_v35 = vrot.slane %v13031_v39, 1  ;;  %s12472_s30 = scalar_lea.vmem %s12471_s15, 512 }
  0xa8   : > { %1664 = vmatprep.subr.bf16.mxu1 %v11451_v10  ;;  %507 = vst [vmem:[#allocation2 + $0x9c] sm:$0xff] %v428_v60  ;;  %16160 = vst [vmem:[#allocation63_spill] sm:$0xff] %v13039_v1  ;;  %v861_v10 = vor.u32 %v13024_v34, %v841_v54  ;;  %v13044_v31 = vcombine.high %v422_v28, %v428_v60  ;;  %v444_v20 = vrot.slane %v439_v44, 4  ;;  %v13052_v54 = vshrl.u32 %v13005_v55, 16  ;;  %p12469_p1 = pneg %p12468_p0  ;;  %p12474_p9 = scmp.lt.s32.totalorder %s12472_s30, %s12466_s13 }
  0xa9   : > { %1239 = vmatmul.mubr.bf16.gmra.mxu0 %v810_v63  ;;  %v11458_v63 = vld [vmem:[#allocation4 + $0x84] ss:$8 sps:$4 sm:$0xff]   ;;  %v434_v58 = vsel %vm12713_vm6, %v432_v21, %v433_v11  ;;  %v438_v56 = vrot.slane %v433_v11, 4  ;;  %v2197_v38 = vand.u32 %v11475_v8, %v12700_v7  ;;  %v834_v5 = vsel %vm742_vm8, %v829_v32, %v833_v23  ;;  %v11456_v21 = vld [vmem:[#allocation4 + $0x80] ss:$8 sps:$4 sm:$0xff]  }
  0xaa   : > { %1248 = vmatprep.mubr.bf16.mxu0 %v842_v19  ;;  %16161 = vst [vmem:[#allocation64_spill] sm:$0xff] %v13044_v31  ;;  %509 = vst [vmem:[#allocation2 + $0xa8] sm:$0xff] %v434_v58  ;;  %v13055_v0 = vshll.u32 %v13039_v1, 16  ;;  %v13062_v8 = vshrl.u32 %v13016_v52, 16  ;;  %v13065_v19 = vshll.u32 %v13044_v31, 16  ;;  %v853_v25 = vor.u32 %v13052_v54, %v833_v23  ;;  %p12475_p3 = por %p12474_p9, %p12473_p2 }
  0xab   : > { %1665 = vmatpush2.bf16.msra.mxu1 %v11449_v29  ;;  %16162 = vst [vmem:[#allocation65_spill] sm:$0xff] %v13052_v54  ;;  %v440_v12 = vsel %vm12713_vm6, %v438_v56, %v439_v44  ;;  %v866_v29 = vsel %vm742_vm8, %v861_v10, %v865_v35  ;;  %513 = vst [vmem:[#allocation2 + $0xc0] sm:$0x33] %v444_v20  ;;  %2322 = vmatprep.subr.bf16.mxu0 %v2197_v38  ;;  %v11472_v10 = vld [vmem:[#allocation4 + $0x2c4] ss:$8 sps:$4 sm:$0xff]   ;;  %v13078_v23 = vshrl.u32 %v13039_v1, 16 }
  0xac   : > { %1666 = vmatprep.subr.bf16.mxu1 %v11455_v4  ;;  %16163 = vst [vmem:[#allocation66_spill] sm:$0xff] %v13055_v0  ;;  %16164 = vst [vmem:[#allocation67_spill] sm:$0xff] %v13062_v8  ;;  %v11469_v4 = vld [vmem:[#allocation4 + $0x2d4] ss:$8 sps:$4 sm:$0xff]   ;;  %v857_v44 = vrot.slane %v13055_v0, 1  ;;  %v885_v11 = vor.u32 %v13062_v8, %v865_v35  ;;  %v889_v32 = vrot.slane %v13065_v19, 1  ;;  %p12476_p4 = pnand %p12475_p3, %p12469_p1 }
  0xad   : > { %16165 = vst [vmem:[#allocation68_spill] sm:$0xff] %v13065_v19  ;;  %511 = vst [vmem:[#allocation2 + $0xb4] sm:$0xff] %v440_v12  ;;  %v13086_v35 = vshrl.u32 %v13044_v31, 16  ;;  %v11478_v38 = vld [vmem:[#allocation4 + $0x2b4] ss:$8 sps:$4 sm:$0xff]   ;;  %vm7273_vm3 = vcmask 1047559  }
  0xae   : > { %10428 = vmatmul.mubr.msk.bf16.gmra.mxu1 %vm1151_vm9, %v946_v27  ;;  %v13073_v27 = vcombine.high %v434_v58, %v440_v12  ;;  %16168 = vst [vmem:[#allocation71_spill] sm:$0xff] %v13078_v23  ;;  %v11481_v19 = vld [vmem:[#allocation4 + $0x2a4] ss:$8 sps:$4 sm:$0xff]   ;;  %vm3776_vm12 = vsmask.f32 5376  ;;  %vm7283_vm4 = vcmask 1041409  }
  0xaf   : > { %1667 = vmatpush2.bf16.msra.mxu1 %v11453_v18  ;;  %1670 = vmatprep.mubr.bf16.mxu1 %v12880_v42  ;;  %v13069_v42 = vcombine.low %v422_v28, %v428_v60  ;;  %v11467_v18 = vld [vmem:[#allocation4 + $0x2d0] ss:$8 sps:$4 sm:$0xff]   ;;  %v890_v60 = vsel %vm742_vm8, %v885_v11, %v889_v32  ;;  %16170 = vst [vmem:[#allocation73_spill] sm:$0xff] %v13086_v35  ;;  %v11487_v0 = vld [vmem:[#allocation4 + $0x284] ss:$8 sps:$4 sm:$0xff]   ;;  %vm7286_vm5 = vcmask 1042434  }
  0xb0   : > { %1668 = vmatprep.subr.bf16.mxu1 %v11458_v63  ;;  %16167 = vst [vmem:[#allocation70_spill] sm:$0xff] %v13073_v27  ;;  %v858_v63 = vsel %vm742_vm8, %v853_v25, %v857_v44  ;;  %v13089_v56 = vshll.u32 %v13073_v27, 16  ;;  %vm5046_vm14 = vsmask.f32 4352  ;;  %vm7289_vm6 = vcmask 1043459  }
  0xb1   : > { %1249 = vmatmul.mubr.bf16.gmra.mxu0 %v834_v5  ;;  %16166 = vst [vmem:[#allocation69_spill] sm:$0xff] %v13069_v42  ;;  %v13081_v28 = vshll.u32 %v13069_v42, 16  ;;  %v877_v5 = vor.u32 %v13078_v23, %v857_v44  ;;  %v13102_v44 = vshrl.u32 %v13069_v42, 16  ;;  %vm7292_vm7 = vcmask 1044484  }
  0xb2   : > { %1258 = vmatprep.mubr.bf16.mxu0 %v866_v29  ;;  %16171 = vst [vmem:[#allocation74_spill] sm:$0xff] %v13089_v56  ;;  %v589_v20 = vld [vmem:[#allocation2 + $0xc0] sm:$0x11]  ;;  %v13093_v29 = vcombine.low %v434_v58, %v440_v12  ;;  %v913_v25 = vrot.slane %v13089_v56, 1 }
  0xb3   : > { %1669 = vmatpush2.bf16.msra.mxu1 %v11456_v21  ;;  %16169 = vst [vmem:[#allocation72_spill] sm:$0xff] %v13081_v28  ;;  %v881_v21 = vrot.slane %v13081_v28, 1  ;;  %v13097_v11 = vcombine.high %v589_v20, %v589_v20  ;;  %16173 = vst [vmem:[#allocation76_spill] sm:$0xff] %v13102_v44  ;;  %v13115_v56 = vcombine.low %v589_v20, %v589_v20 }
  0xb4   : > { %2199 = vmatprep.subr.bf16.mxu1 %v11469_v4  ;;  %16172 = vst [vmem:[#allocation75_spill] sm:$0xff] %v13093_v29  ;;  %v909_v4 = vor.u32 %v13086_v35, %v889_v32  ;;  %v13105_v58 = vshll.u32 %v13093_v29, 16  ;;  %v13110_v32 = vshrl.u32 %v13073_v27, 16  ;;  %v11482_v35 = vld [vmem:[#allocation4 + $0x290] ss:$8 sps:$4 sm:$0xff]  }
  0xb6   : > { %1671 = vmatmul.mubr.bf16.vlgmr.msra.gmra.mxu1 %v12891_v49  ;;  %v11470_v49 = vld [vmem:[#allocation4 + $0x2c0] ss:$8 sps:$4 sm:$0xff]   ;;  %16174 = vst [vmem:[#allocation77_spill] sm:$0xff] %v13105_v58  ;;  %v914_v12 = vsel %vm742_vm8, %v909_v4, %v913_v25  ;;  %16175 = vst [vmem:[#allocation78_spill] sm:$0xff] %v13110_v32  ;;  %v933_v28 = vor.u32 %v13110_v32, %v913_v25 }
  0xb7   : > { %1680 = vmatprep.mubr.bf16.mxu1 %v12855_v13  ;;  %2200 = vmatpush1.bf16.msra.mxu1 %v11467_v18  ;;  %v11476_v18 = vld [vmem:[#allocation4 + $0x2b0] ss:$8 sps:$4 sm:$0xff]   ;;  %v11485_v25 = vld [vmem:[#allocation4 + $0x280] ss:$8 sps:$4 sm:$0xff]  }
  0xb8   : > { %2201 = vmatprep.subr.bf16.mxu1 %v11472_v10  ;;  %v882_v10 = vsel %vm742_vm8, %v877_v5, %v881_v21  ;;  %v905_v5 = vrot.slane %v13105_v58, 1 }
  0xb9   : > { %1259 = vmatmul.mubr.bf16.gmra.mxu0 %v858_v63  ;;  %v935_v63 = vshll.u32 %v13097_v11, 16 }
  0xba   : > { %1268 = vmatprep.mubr.bf16.mxu0 %v890_v60  ;;  %v11479_v60 = vld [vmem:[#allocation4 + $0x2a0] ss:$8 sps:$4 sm:$0xff]  }
  0xbb   : > { %2202 = vmatpush1.bf16.msra.mxu1 %v11470_v49  ;;  %v11484_v49 = vld [vmem:[#allocation4 + $0x294] ss:$8 sps:$4 sm:$0xff]   ;;  %v937_v4 = vrot.slane %v935_v63, 1 }
  0xbc   : > { %2203 = vmatprep.subr.bf16.mxu1 %v11478_v38  ;;  %v901_v38 = vor.u32 %v13102_v44, %v881_v21  ;;  %v927_v21 = vshll.u32 %v13115_v56, 16 }
  0xbd   : > { %v938_v20 = vsel %vm742_vm8, %v933_v28, %v937_v4  ;;  %v11494_v28 = vld [vmem:[#allocation4 + $0x260] ss:$8 sps:$4 sm:$0xff]   ;;  %v11497_v4 = vld [vmem:[#allocation4 + $0x350] ss:$8 sps:$4 sm:$0xff]  }
  0xbe   : > { %1681 = vmatmul.mubr.bf16.gmra.mxu1 %v12857_v15  ;;  %v929_v63 = vrot.slane %v927_v21, 1  ;;  %v11493_v21 = vld [vmem:[#allocation4 + $0x374] ss:$8 sps:$4 sm:$0xff]  }
  0xbf   : > { %1690 = vmatprep.mubr.bf16.mxu1 %v12914_v24  ;;  %2204 = vmatpush1.bf16.msra.mxu1 %v11476_v18  ;;  %v13121_v18 = vshrl.u32 %v13093_v29, 16 }
  0xc0   : > { %2205 = vmatprep.subr.bf16.mxu1 %v11481_v19  ;;  %v906_v19 = vsel %vm742_vm8, %v901_v38, %v905_v5 }
  0xc1   : > { %1269 = vmatmul.mubr.bf16.gmra.mxu0 %v882_v10  ;;  %16176 = vst [vmem:[#allocation79_spill] sm:$0xff] %v13121_v18  ;;  %v11490_v10 = vld [vmem:[#allocation4 + $0x274] ss:$8 sps:$4 sm:$0xff]  }
  0xc2   : > { %1278 = vmatprep.mubr.bf16.mxu0 %v914_v12  ;;  %v925_v12 = vor.u32 %v13121_v18, %v905_v5  ;;  %v11502_v5 = vld [vmem:[#allocation4 + $0x344] ss:$8 sps:$4 sm:$0xff]  }
  0xc3   : > { %2206 = vmatpush1.bf16.msra.mxu1 %v11479_v60  ;;  %v11488_v60 = vld [vmem:[#allocation4 + $0x270] ss:$8 sps:$4 sm:$0xff]  }
  0xc4   : > { %2207 = vmatprep.subr.bf16.mxu1 %v11484_v49  ;;  %v11496_v49 = vld [vmem:[#allocation4 + $0x264] ss:$8 sps:$4 sm:$0xff]   ;;  %v930_v38 = vsel %vm742_vm8, %v925_v12, %v929_v63  ;;  %v11503_v12 = vld [vmem:[#allocation4 + $0x330] ss:$8 sps:$4 sm:$0xff]  }
  0xc5   : > { %v11508_v63 = vld [vmem:[#allocation4 + $0x324] ss:$8 sps:$4 sm:$0xff]  }
  0xc6   : > { %1691 = vmatmul.mubr.bf16.gmra.mxu1 %v12916_v26 }
  0xc7   : > { %1700 = vmatprep.mubr.bf16.mxu1 %v12956_v30  ;;  %2208 = vmatpush1.bf16.msra.mxu1 %v11482_v35  ;;  %v11473_v35 = vld [vmem:[#allocation4 + $0x380] ss:$8 sps:$4 sm:$0xff]  }
  0xc8   : > { %2209 = vmatprep.subr.bf16.mxu1 %v11487_v0  ;;  %v11499_v0 = vld [vmem:[#allocation4 + $0x354] ss:$8 sps:$4 sm:$0xff]  }
  0xc9   : > { %1279 = vmatmul.mubr.bf16.gmra.mxu0 %v906_v19  ;;  %v2194_v19 = vand.u32 %v11473_v35, %v12700_v7  ;;  %v11512_v35 = vld [vmem:[#allocation4 + $0x360] ss:$8 sps:$4 sm:$0xff]  }
  0xca   : > { %1288 = vmatprep.mubr.bf16.mxu0 %v938_v20  ;;  %v11500_v20 = vld [vmem:[#allocation4 + $0x340] ss:$8 sps:$4 sm:$0xff]  }
  0xcb   : > { %2210 = vmatpush1.bf16.msra.mxu1 %v11485_v25  ;;  %v11505_v25 = vld [vmem:[#allocation4 + $0x334] ss:$8 sps:$4 sm:$0xff]  }
  0xcc   : > { %2211 = vmatprep.subr.bf16.mxu1 %v11490_v10  ;;  %v11491_v10 = vld [vmem:[#allocation4 + $0x370] ss:$8 sps:$4 sm:$0xff]  }
  0xce   : > { %1701 = vmatmul.mubr.bf16.gmra.mxu1 %v12963_v33 }
  0xcf   : > { %1710 = vmatprep.mubr.bf16.mxu1 %v12994_v16  ;;  %2212 = vmatpush1.bf16.msra.mxu1 %v11488_v60  ;;  %v11532_v60 = vld [vmem:[#allocation4 + $0x4b4] ss:$8 sps:$4 sm:$0xff]  }
  0xd0   : > { %2213 = vmatprep.subr.bf16.mxu1 %v11496_v49  ;;  %v11514_v49 = vld [vmem:[#allocation4 + $0x364] ss:$8 sps:$4 sm:$0xff]  }
  0xd1   : > { %1289 = vmatmul.mubr.bf16.gmra.mxu0 %v930_v38  ;;  %v11506_v38 = vld [vmem:[#allocation4 + $0x320] ss:$8 sps:$4 sm:$0xff]  }
  0xd2   : > { %1783 = vmatprep.mubr.bf16.mxu0 %v16149_v2 }
  0xd3   : > { %2214 = vmatpush1.bf16.msra.mxu1 %v11494_v28  ;;  %v11511_v28 = vld [vmem:[#allocation4 + $0x314] ss:$8 sps:$4 sm:$0xff]  }
  0xd4   : > { %2215 = vmatprep.subr.bf16.mxu1 %v11499_v0  ;;  %v1864_v0 = vld [vmem:[#allocation2] sm:$0xee] }
  0xd6   : > { %1711 = vmatmul.mubr.bf16.gmra.mxu1 %v13005_v55 }
  0xd7   : > { %1720 = vmatprep.mubr.bf16.mxu1 %v13016_v52  ;;  %2216 = vmatpush2.bf16.msra.mxu1 %v11497_v4  ;;  %v11509_v4 = vld [vmem:[#allocation4 + $0x310] ss:$8 sps:$4 sm:$0xff]  }
  0xd8   : > { %2217 = vmatprep.subr.bf16.mxu1 %v11502_v5  ;;  %v11517_v5 = vld [vmem:[#allocation4 + $0x304] ss:$8 sps:$4 sm:$0xff]  }
  0xd9   : > { %10467 = vmatmul.mubr.msk.bf16.vlgmr.msra.gmra.mxu0 %vm1151_vm9, %v12736_v61  ;;  %v2874_v61 = vand.u32 %v11532_v60, %v12700_v7 }
  0xda   : > { %2323 = vmatpush1.bf16.msra.mxu0 %v2194_v19  ;;  %1793 = vmatprep.mubr.bf16.mxu0 %v16149_v2  ;;  %v13144_v19 = vcombine.high %v1864_v0, %v12837_v59  ;;  %v11523_v59 = vld [vmem:[#allocation4 + $0x2e4] ss:$8 sps:$4 sm:$0xff]  }
  0xdb   : > { %2324 = vmatprep.subr.bf16.mxu0 %v11493_v21  ;;  %2218 = vmatpush2.bf16.msra.mxu1 %v11500_v20  ;;  %v11515_v21 = vld [vmem:[#allocation4 + $0x300] ss:$8 sps:$4 sm:$0xff]   ;;  %v11520_v20 = vld [vmem:[#allocation4 + $0x2f4] ss:$8 sps:$4 sm:$0xff]  }
  0xdc   : > { %2219 = vmatprep.subr.bf16.mxu1 %v11505_v25  ;;  %v1917_v25 = vrot.slane %v13144_v19, 1 }
  0xde   : > { %1721 = vmatmul.mubr.bf16.gmra.mxu1 %v13039_v1  ;;  %2325 = vmatpush1.bf16.msra.mxu0 %v11491_v10  ;;  %v1918_v10 = vrot.slane %v12855_v13, 1 }
  0xdf   : > { %1730 = vmatprep.mubr.bf16.mxu1 %v13044_v31  ;;  %2220 = vmatpush2.bf16.msra.mxu1 %v11503_v12  ;;  %v11518_v12 = vld [vmem:[#allocation4 + $0x2f0] ss:$8 sps:$4 sm:$0xff]  }
  0xe0   : > { %2221 = vmatprep.subr.bf16.mxu1 %v11508_v63  ;;  %2326 = vmatprep.subr.bf16.mxu0 %v11514_v49  ;;  %v12325_v63 = vld [vmem:[#allocation2 + $0xc] sm:$0xff]  ;;  %v1919_v49 = vsel %vm1176_vm2, %v1917_v25, %v1918_v10 }
  0xe1   : > { %10468 = vmatmul.mubr.msk.bf16.gmra.mxu0 %vm1151_vm9, %v12738_v62  ;;  %v13153_v60 = vcombine.low %v1864_v0, %v12325_v63  ;;  %v11524_v0 = vld [vmem:[#allocation4 + $0x400] ss:$8 sps:$4 sm:$0xff]   ;;  %v11527_v25 = vld [vmem:[#allocation4 + $0x3f0] ss:$8 sps:$4 sm:$0xff]   ;;  %v1931_v63 = vrot.slane %v12956_v30, 1 }
  0xe2   : > { %1803 = vmatprep.mubr.bf16.mxu0 %v16149_v2  ;;  %2327 = vmatpush1.bf16.msra.mxu0 %v11512_v35 }
  0xe3   : > { %2222 = vmatpush2.bf16.msra.mxu1 %v11506_v38  ;;  %2999 = vmatprep.subr.bf16.mxu0 %v2874_v61  ;;  %v11521_v38 = vld [vmem:[#allocation4 + $0x2e0] ss:$8 sps:$4 sm:$0xff]   ;;  %v1914_v35 = vrot.slane %v13153_v60, 1  ;;  %v1915_v61 = vrot.slane %v12857_v15, 1 }
  0xe4   : > { %2223 = vmatprep.subr.bf16.mxu1 %v11511_v28  ;;  %v11526_v28 = vld [vmem:[#allocation4 + $0x404] ss:$8 sps:$4 sm:$0xff]  }
  0xe6   : > { %1731 = vmatmul.mubr.bf16.gmra.mxu1 %v13069_v42 }
  0xe7   : > { %1740 = vmatprep.mubr.bf16.mxu1 %v13073_v27  ;;  %2224 = vmatpush2.bf16.msra.mxu1 %v11509_v4  ;;  %v1925_v4 = vrot.slane %v12914_v24, 1 }
  0xe8   : > { %2225 = vmatprep.subr.bf16.mxu1 %v11517_v5  ;;  %v11529_v5 = vld [vmem:[#allocation4 + $0x3f4] ss:$8 sps:$4 sm:$0xff]  }
  0xe9   : > { %10469 = vmatmul.mubr.msk.bf16.gmra.mxu0 %vm1151_vm9, %v12752_v22 }
  0xea   : > { %1813 = vmatprep.mubr.bf16.mxu0 %v16149_v2 }
  0xeb   : > { %2226 = vmatpush2.bf16.msra.mxu1 %v11515_v21  ;;  %v1916_v21 = vsel %vm1176_vm2, %v1914_v35, %v1915_v61  ;;  %v11536_v35 = vld [vmem:[#allocation4 + $0x3d0] ss:$8 sps:$4 sm:$0xff]  }
  0xec   : > { %2227 = vmatprep.subr.bf16.mxu1 %v11520_v20  ;;  %v1926_v20 = vsel %vm1176_vm2, %v1918_v10, %v1925_v4 }
  0xee   : > { %1741 = vmatmul.mubr.bf16.gmra.mxu1 %v13093_v29 }
  0xef   : > { %2228 = vmatpush2.bf16.msra.mxu1 %v11518_v12  ;;  %2231 = vmatprep.mubr.bf16.mxu1 %v1919_v49  ;;  %v11535_v12 = vld [vmem:[#allocation4 + $0x3e4] ss:$8 sps:$4 sm:$0xff]   ;;  %v11533_v49 = vld [vmem:[#allocation4 + $0x3e0] ss:$8 sps:$4 sm:$0xff]  }
  0xf0   : > { %2229 = vmatprep.subr.bf16.mxu1 %v11523_v59  ;;  %v1923_v59 = vrot.slane %v12916_v26, 1 }
  0xf1   : > { %10470 = vmatmul.mubr.msk.bf16.gmra.mxu0 %vm1151_vm9, %v12780_v53 }
  0xf2   : > { %1823 = vmatprep.mubr.bf16.mxu0 %v16149_v2  ;;  %v1924_v10 = vsel %vm1176_vm2, %v1915_v61, %v1923_v59  ;;  %v11544_v61 = vld [vmem:[#allocation4 + $0x3b4] ss:$8 sps:$4 sm:$0xff]  }
  0xf3   : > { %2230 = vmatpush2.bf16.msra.mxu1 %v11521_v38  ;;  %v11538_v38 = vld [vmem:[#allocation4 + $0x3d4] ss:$8 sps:$4 sm:$0xff]  }
  0xf4   : > { %2876 = vmatprep.subr.bf16.mxu1 %v11526_v28  ;;  %v1932_v28 = vsel %vm1176_vm2, %v1925_v4, %v1931_v63 }
  0xf6   : > { %2232 = vmatmul.mubr.bf16.vlgmr.msra.gmra.mxu1 %v1916_v21  ;;  %v1937_v21 = vrot.slane %v12994_v16, 1  ;;  %v11548_v16 = vld [vmem:[#allocation4 + $0x4a0] ss:$8 sps:$4 sm:$0xff]  }
  0xf7   : > { %2877 = vmatpush1.bf16.msra.mxu1 %v11524_v0  ;;  %2241 = vmatprep.mubr.bf16.mxu1 %v1926_v20  ;;  %v11541_v0 = vld [vmem:[#allocation4 + $0x3c4] ss:$8 sps:$4 sm:$0xff]   ;;  %v11539_v20 = vld [vmem:[#allocation4 + $0x3c0] ss:$8 sps:$4 sm:$0xff]  }
  0xf8   : > { %2878 = vmatprep.subr.bf16.mxu1 %v11529_v5  ;;  %v1929_v5 = vrot.slane %v12963_v33, 1 }
  0xf9   : > { %10471 = vmatmul.mubr.msk.bf16.gmra.mxu0 %vm1151_vm9, %v12795_v14 }
  0xfa   : > { %1833 = vmatprep.mubr.bf16.mxu0 %v16149_v2  ;;  %v1930_v4 = vsel %vm1176_vm2, %v1923_v59, %v1929_v5  ;;  %v11545_v59 = vld [vmem:[#allocation4 + $0x3a0] ss:$8 sps:$4 sm:$0xff]  }
  0xfb   : > { %2879 = vmatpush1.bf16.msra.mxu1 %v11527_v25  ;;  %v1938_v25 = vsel %vm1176_vm2, %v1931_v63, %v1937_v21 }
  0xfc   : > { %2880 = vmatprep.subr.bf16.mxu1 %v11535_v12  ;;  %v11542_v12 = vld [vmem:[#allocation4 + $0x3b0] ss:$8 sps:$4 sm:$0xff]  }
  0xfe   : > { %2242 = vmatmul.mubr.bf16.gmra.mxu1 %v1924_v10  ;;  %v1943_v10 = vrot.slane %v13016_v52, 1  ;;  %v11556_v52 = vld [vmem:[#allocation4 + $0x484] ss:$8 sps:$4 sm:$0xff]  }
  0xff   : > { %2881 = vmatpush1.bf16.msra.mxu1 %v11533_v49  ;;  %2251 = vmatprep.mubr.bf16.mxu1 %v1932_v28  ;;  %v1935_v49 = vrot.slane %v13005_v55, 1  ;;  %v1865_v28 = vld [vmem:[#allocation2 + $0x8] sm:$0xe]  ;;  %v1949_v55 = vrot.slane %v13044_v31, 1 }
 0x100   : > { %2882 = vmatprep.subr.bf16.mxu1 %v11538_v38  ;;  %v11547_v38 = vld [vmem:[#allocation4 + $0x3a4] ss:$8 sps:$4 sm:$0xff]  }
 0x101   : > { %10472 = vmatmul.mubr.msk.bf16.gmra.mxu0 %vm1151_vm9, %v12833_v57  ;;  %v1936_v63 = vsel %vm1176_vm2, %v1929_v5, %v1935_v49  ;;  %v11530_v5 = vld [vmem:[#allocation4 + $0x4b0] ss:$8 sps:$4 sm:$0xff]  }
 0x102   : > { %1843 = vmatprep.mubr.bf16.mxu0 %v16149_v2  ;;  %v2871_v31 = vand.u32 %v11530_v5, %v12700_v7  ;;  %v11571_v5 = vld [vmem:[#allocation4 + $0x494] ss:$8 sps:$4 sm:$0xff]  }
 0x103   : > { %2883 = vmatpush1.bf16.msra.mxu1 %v11536_v35  ;;  %v11553_v35 = vld [vmem:[#allocation4 + $0x394] ss:$8 sps:$4 sm:$0xff]  }
 0x104   : > { %2884 = vmatprep.subr.bf16.mxu1 %v11541_v0  ;;  %v1944_v0 = vsel %vm1176_vm2, %v1937_v21, %v1943_v10 }
 0x106   : > { %2252 = vmatmul.mubr.bf16.gmra.mxu1 %v1930_v4 }
 0x107   : > { %2885 = vmatpush1.bf16.msra.mxu1 %v11539_v20  ;;  %2261 = vmatprep.mubr.bf16.mxu1 %v1938_v25  ;;  %v12326_v20 = vld [vmem:[#allocation2 + $0x14] sm:$0xf]  ;;  %v1941_v25 = vrot.slane %v13039_v1, 1  ;;  %v11562_v1 = vld [vmem:[#allocation4 + $0x464] ss:$8 sps:$4 sm:$0xff]  }
 0x108   : > { %2886 = vmatprep.subr.bf16.mxu1 %v11544_v61  ;;  %v13186_v4 = vcombine.low %v1865_v28, %v12326_v20  ;;  %v11551_v61 = vld [vmem:[#allocation4 + $0x390] ss:$8 sps:$4 sm:$0xff]  }
 0x109   : > { %10473 = vmatmul.mubr.msk.bf16.gmra.mxu0 %vm1151_vm9, %v12888_v48  ;;  %v1942_v28 = vsel %vm1176_vm2, %v1935_v49, %v1941_v25  ;;  %v1955_v49 = vrot.slane %v13073_v27, 1 }
 0x10a   : > { %1853 = vmatprep.mubr.bf16.mxu0 %v16149_v2  ;;  %v1920_v21 = vrot.slane %v13186_v4, 1 }
 0x10b   : > { %2887 = vmatpush1.bf16.msra.mxu1 %v11542_v12  ;;  %v1921_v12 = vrot.slane %v12738_v62, 1  ;;  %v1947_v62 = vrot.slane %v13069_v42, 1 }
 0x10c   : > { %2888 = vmatprep.subr.bf16.mxu1 %v11547_v38  ;;  %v11554_v38 = vld [vmem:[#allocation4 + $0x480] ss:$8 sps:$4 sm:$0xff]  }
 0x10d   : > { %v1922_v20 = vsel %vm1176_vm2, %v1920_v21, %v1921_v12  ;;  %v1948_v21 = vsel %vm1176_vm2, %v1941_v25, %v1947_v62 }
 0x10e   : > { %2262 = vmatmul.mubr.bf16.gmra.mxu1 %v1936_v63  ;;  %v1950_v63 = vsel %vm1176_vm2, %v1943_v10, %v1949_v55  ;;  %v1927_v10 = vrot.slane %v12752_v22, 1  ;;  %v1953_v22 = vrot.slane %v13093_v29, 1 }
 0x10f   : > { %2889 = vmatpush1.bf16.msra.mxu1 %v11545_v59  ;;  %2271 = vmatprep.mubr.bf16.mxu1 %v1944_v0  ;;  %v11559_v59 = vld [vmem:[#allocation4 + $0x474] ss:$8 sps:$4 sm:$0xff]   ;;  %v11557_v0 = vld [vmem:[#allocation4 + $0x470] ss:$8 sps:$4 sm:$0xff]  }
 0x110   : > { %2890 = vmatprep.subr.bf16.mxu1 %v11553_v35  ;;  %v11550_v35 = vld [vmem:[#allocation4 + $0x4a4] ss:$8 sps:$4 sm:$0xff]   ;;  %v1954_v25 = vsel %vm1176_vm2, %v1947_v62, %v1953_v22  ;;  %v1959_v62 = vrot.slane %v13115_v56, 1  ;;  %v2515_v56 = vrot.slane %v12926_v43, 1 }
 0x111   : > { %10474 = vmatmul.mubr.msk.bf16.gmra.mxu0 %vm1151_vm9, %v12930_v50 }
 0x112   : > { %2344 = vmatprep.mubr.bf16.mxu0 %v16149_v2 }
 0x113   : > { %2891 = vmatpush1.bf16.msra.mxu1 %v11551_v61  ;;  %v11565_v61 = vld [vmem:[#allocation4 + $0x454] ss:$8 sps:$4 sm:$0xff]  }
 0x114   : > { %2892 = vmatprep.subr.bf16.mxu1 %v11556_v52  ;;  %v11560_v52 = vld [vmem:[#allocation4 + $0x460] ss:$8 sps:$4 sm:$0xff]  }
 0x116   : > { %2272 = vmatmul.mubr.bf16.gmra.mxu1 %v1942_v28  ;;  %v1956_v28 = vsel %vm1176_vm2, %v1949_v55, %v1955_v49  ;;  %v2523_v55 = vshll.u32 %v13144_v19, 16 }
 0x117   : > { %2893 = vmatpush2.bf16.msra.mxu1 %v11554_v38  ;;  %2281 = vmatprep.mubr.bf16.mxu1 %v1950_v63  ;;  %v11589_v38 = vld [vmem:[#allocation4 + $0x5e4] ss:$8 sps:$4 sm:$0xff]   ;;  %v1928_v63 = vsel %vm1176_vm2, %v1921_v12, %v1927_v10  ;;  %v11566_v12 = vld [vmem:[#allocation4 + $0x440] ss:$8 sps:$4 sm:$0xff]  }
 0x118   : > { %2894 = vmatprep.subr.bf16.mxu1 %v11559_v59  ;;  %v11563_v59 = vld [vmem:[#allocation4 + $0x450] ss:$8 sps:$4 sm:$0xff]  }
 0x119   : > { %10516 = vmatmul.mubr.msk.bf16.vlgmr.msra.gmra.mxu0 %vm1151_vm9, %v1922_v20  ;;  %v11569_v20 = vld [vmem:[#allocation4 + $0x490] ss:$8 sps:$4 sm:$0xff]  }
 0x11a   : > { %3000 = vmatpush1.bf16.msra.mxu0 %v2871_v31  ;;  %2354 = vmatprep.mubr.bf16.mxu0 %v16149_v2  ;;  %v11568_v31 = vld [vmem:[#allocation4 + $0x444] ss:$8 sps:$4 sm:$0xff]  }
 0x11b   : > { %3001 = vmatprep.subr.bf16.mxu0 %v11550_v35  ;;  %2895 = vmatpush2.bf16.msra.mxu1 %v11557_v0  ;;  %v2520_v35 = vshrl.u32 %v13144_v19, 16  ;;  %v3467_v0 = vand.u32 %v11589_v38, %v12700_v7  ;;  %v2527_v19 = vrot.slane %v12896_v51, 1  ;;  %v11572_v38 = vld [vmem:[#allocation4 + $0x430] ss:$8 sps:$4 sm:$0xff]  }
 0x11c   : > { %2896 = vmatprep.subr.bf16.mxu1 %v11562_v1  ;;  %v1961_v1 = vrot.slane %v13097_v11, 1  ;;  %v2525_v11 = vrot.slane %v2523_v55, 2  ;;  %v1960_v55 = vsel %vm1176_vm2, %v1953_v22, %v1959_v62  ;;  %v3134_v51 = vld [vmem:[#allocation2] sm:$0xcc] }
 0x11e   : > { %3002 = vmatpush1.bf16.msra.mxu0 %v11548_v16  ;;  %2282 = vmatmul.mubr.bf16.gmra.mxu1 %v1948_v21  ;;  %v1933_v16 = vrot.slane %v12780_v53, 1  ;;  %v2522_v21 = vrot.slane %v2520_v35, 1  ;;  %v11575_v35 = vld [vmem:[#allocation4 + $0x420] ss:$8 sps:$4 sm:$0xff]   ;;  %v11652_v53 = vld [vmem:[#allocation4 + $0x644] ss:$8 sps:$4 sm:$0xff]  }
 0x11f   : > { %2897 = vmatpush2.bf16.msra.mxu1 %v11560_v52  ;;  %2291 = vmatprep.mubr.bf16.mxu1 %v1956_v28  ;;  %v11574_v52 = vld [vmem:[#allocation4 + $0x434] ss:$8 sps:$4 sm:$0xff]  }
 0x120   : > { %2898 = vmatprep.subr.bf16.mxu1 %v11565_v61  ;;  %3003 = vmatprep.subr.bf16.mxu0 %v11571_v5  ;;  %v1962_v61 = vsel %vm1176_vm2, %v1955_v49, %v1961_v1  ;;  %v2528_v5 = vrot.slane %v12874_v37, 2  ;;  %v1934_v28 = vsel %vm1176_vm2, %v1927_v10, %v1933_v16  ;;  %v2526_v49 = vor.u32 %v2525_v11, %v2522_v21 }
 0x121   : > { %10517 = vmatmul.mubr.msk.bf16.gmra.mxu0 %vm1151_vm9, %v1928_v63  ;;  %v11577_v63 = vld [vmem:[#allocation4 + $0x424] ss:$8 sps:$4 sm:$0xff]   ;;  %v1939_v10 = vrot.slane %v12795_v14, 1  ;;  %v2548_v21 = vrot.slane %v12923_v40, 2  ;;  %v11619_v40 = vld [vmem:[#allocation4 + $0x594] ss:$8 sps:$4 sm:$0xff]  }
 0x122   : > { %2364 = vmatprep.mubr.bf16.mxu0 %v16149_v2  ;;  %3004 = vmatpush1.bf16.msra.mxu0 %v11569_v20  ;;  %v2529_v20 = vor.u32 %v2528_v5, %v2527_v19  ;;  %v11583_v19 = vld [vmem:[#allocation4 + $0x534] ss:$8 sps:$4 sm:$0xff]  }
 0x123   : > { %2899 = vmatpush2.bf16.msra.mxu1 %v11563_v59  ;;  %3592 = vmatprep.subr.bf16.mxu0 %v3467_v0  ;;  %v2508_v59 = vshrl.u32 %v13153_v60, 16  ;;  %v11580_v0 = vld [vmem:[#allocation4 + $0x414] ss:$8 sps:$4 sm:$0xff]   ;;  %v1940_v11 = vsel %vm1176_vm2, %v1933_v16, %v1939_v10  ;;  %v2543_v16 = vrot.slane %v12970_v46, 1  ;;  %v2457_v46 = vld [vmem:[#allocation2 + $0xc0] sm:$0x33] }
 0x124   : > { %2900 = vmatprep.subr.bf16.mxu1 %v11568_v31  ;;  %v2511_v31 = vshll.u32 %v13153_v60, 16  ;;  %v2516_v60 = vrot.slane %v12883_v41, 2 }
 0x125   : > { %v2510_v1 = vrot.slane %v2508_v59, 1  ;;  %v11586_v59 = vld [vmem:[#allocation4 + $0x524] ss:$8 sps:$4 sm:$0xff]  }
 0x126   : > { %2292 = vmatmul.mubr.bf16.gmra.mxu1 %v1954_v25  ;;  %v2513_v25 = vrot.slane %v2511_v31, 2  ;;  %v2517_v5 = vor.u32 %v2516_v60, %v2515_v56  ;;  %v2544_v31 = vrot.slane %v12933_v45, 2 }
 0x127   : > { %2901 = vmatpush2.bf16.msra.mxu1 %v11566_v12  ;;  %2301 = vmatprep.mubr.bf16.mxu1 %v1962_v61  ;;  %v2530_v12 = vsel %vm2506_vm10, %v2526_v49, %v2529_v20  ;;  %v11578_v61 = vld [vmem:[#allocation4 + $0x410] ss:$8 sps:$4 sm:$0xff]  }
 0x128   : > { %2902 = vmatprep.subr.bf16.mxu1 %v11574_v52  ;;  %v2547_v52 = vrot.slane %v12941_v9, 1  ;;  %v2514_v22 = vor.u32 %v2513_v25, %v2510_v1  ;;  %v11584_v25 = vld [vmem:[#allocation4 + $0x520] ss:$8 sps:$4 sm:$0xff]   ;;  %v2545_v56 = vor.u32 %v2544_v31, %v2543_v16  ;;  %v16177_v16 = vld [vmem:[#allocation56_spill] sm:$0xff] }
 0x129   : > { %10518 = vmatmul.mubr.msk.bf16.gmra.mxu0 %vm1151_vm9, %v1934_v28  ;;  %v11581_v28 = vld [vmem:[#allocation4 + $0x530] ss:$8 sps:$4 sm:$0xff]   ;;  %v2572_v31 = vrot.slane %v16177_v16, 2  ;;  %v1957_v16 = vrot.slane %v12930_v50, 1 }
 0x12a   : > { %2374 = vmatprep.mubr.bf16.mxu0 %v16149_v2  ;;  %v2518_v62 = vsel %vm2506_vm10, %v2514_v22, %v2517_v5  ;;  %v12327_v50 = vld [vmem:[#allocation2 + $0xc8] ss:$0 sps:$4 sm:$0x11]  }
 0x12b   : > { %2903 = vmatpush2.bf16.msra.mxu1 %v11572_v38  ;;  %v2549_v38 = vor.u32 %v2548_v21, %v2547_v52 }
 0x12c   : > { %2904 = vmatprep.subr.bf16.mxu1 %v11577_v63  ;;  %v1945_v63 = vrot.slane %v12833_v57, 1  ;;  %v11611_v57 = vld [vmem:[#allocation4 + $0x5b0] ss:$8 sps:$4 sm:$0xff]  }
 0x12d   : > { %v2550_v49 = vsel %vm2506_vm10, %v2529_v20, %v2549_v38  ;;  %v11590_v20 = vld [vmem:[#allocation4 + $0x510] ss:$8 sps:$4 sm:$0xff]  }
 0x12e   : > { %2302 = vmatmul.mubr.bf16.gmra.mxu1 %v1960_v55  ;;  %v1946_v55 = vsel %vm1176_vm2, %v1939_v10, %v1945_v63  ;;  %v2546_v10 = vsel %vm2506_vm10, %v2517_v5, %v2545_v56 }
 0x12f   : > { %2905 = vmatpush2.bf16.msra.mxu1 %v11575_v35  ;;  %2908 = vmatprep.mubr.bf16.mxu1 %v2530_v12  ;;  %v2559_v35 = vrot.slane %v12988_v36, 1  ;;  %v11592_v12 = vld [vmem:[#allocation4 + $0x514] ss:$8 sps:$4 sm:$0xff]  }
 0x130   : > { %2906 = vmatprep.subr.bf16.mxu1 %v11580_v0  ;;  %v2560_v0 = vrot.slane %v12967_v47, 2  ;;  %v11608_v47 = vld [vmem:[#allocation4 + $0x4c0] ss:$8 sps:$4 sm:$0xff]  }
 0x131   : > { %10519 = vmatmul.mubr.msk.bf16.gmra.mxu0 %vm1151_vm9, %v1940_v11  ;;  %v2555_v11 = vrot.slane %v13014_v3, 1  ;;  %v16180_v3 = vld [vmem:[#allocation68_spill] sm:$0xff] }
 0x132   : > { %2384 = vmatprep.mubr.bf16.mxu0 %v16149_v2  ;;  %v2561_v52 = vor.u32 %v2560_v0, %v2559_v35 }
 0x133   : > { %2907 = vmatpush2.bf16.msra.mxu1 %v11578_v61  ;;  %v1951_v61 = vrot.slane %v12888_v48, 1  ;;  %v2596_v48 = vrot.slane %v16180_v3, 2  ;;  %v11613_v3 = vld [vmem:[#allocation4 + $0x5b4] ss:$8 sps:$4 sm:$0xff]  }
 0x134   : > { %3469 = vmatprep.subr.bf16.mxu1 %v11583_v19  ;;  %v2556_v19 = vrot.slane %v12974_v6, 2 }
 0x135   : > { %v1952_v0 = vsel %vm1176_vm2, %v1945_v63, %v1951_v61 }
 0x136   : > { %v13242_v1 = vpop.f32.mrf.mxu1  ;;  %2909 = vmatmul.mubr.bf16.vlgmr.msra.gmra.mxu1 %v2518_v62  ;;  %v2571_v62 = vrot.slane %v13024_v34, 1  ;;  %v2557_v5 = vor.u32 %v2556_v19, %v2555_v11  ;;  %v11601_v19 = vld [vmem:[#allocation4 + $0x4e4] ss:$8 sps:$4 sm:$0xff]  }
 0x137   : > { %3470 = vmatpush1.bf16.msra.mxu1 %v11581_v28  ;;  %2918 = vmatprep.mubr.bf16.mxu1 %v2550_v49  ;;  %v11595_v28 = vld [vmem:[#allocation4 + $0x504] ss:$8 sps:$4 sm:$0xff]   ;;  %v11593_v49 = vld [vmem:[#allocation4 + $0x500] ss:$8 sps:$4 sm:$0xff]  }
 0x138   : > { %v13245_v60 = vpop.f32.mrf.mxu1  ;;  %3471 = vmatprep.subr.bf16.mxu1 %v11586_v59  ;;  %v2562_v59 = vsel %vm2506_vm10, %v2549_v38, %v2561_v52  ;;  %v11596_v38 = vld [vmem:[#allocation4 + $0x4f0] ss:$8 sps:$4 sm:$0xff]   ;;  %v2558_v63 = vsel %vm2506_vm10, %v2545_v56, %v2557_v5 }
 0x139   : > { %10520 = vmatmul.mubr.msk.bf16.gmra.mxu0 %vm1151_vm9, %v1946_v55 }
 0x13a   : > { %v13248_v21 = vpop.f32.mrf.mxu1  ;;  %2394 = vmatprep.mubr.bf16.mxu0 %v16149_v2 }
 0x13b   : > { %3472 = vmatpush1.bf16.msra.mxu1 %v11584_v25  ;;  %v11598_v25 = vld [vmem:[#allocation4 + $0x4f4] ss:$8 sps:$4 sm:$0xff]  }
 0x13c   : > { %v13255_v22 = vpop.f32.mrf.mxu1  ;;  %3473 = vmatprep.subr.bf16.mxu1 %v11592_v12  ;;  %v2573_v12 = vor.u32 %v2572_v31, %v2571_v62  ;;  %v2584_v62 = vrot.slane %v13031_v39, 2  ;;  %v11599_v31 = vld [vmem:[#allocation4 + $0x4e0] ss:$8 sps:$4 sm:$0xff]  }
 0x13e   : > { %v13260_v35 = vpop.f32.mrf.mxu1  ;;  %2919 = vmatmul.mubr.bf16.gmra.mxu1 %v2546_v10  ;;  %v2568_v10 = vrot.slane %v13021_v17, 2 }
 0x13f   : > { %3474 = vmatpush1.bf16.msra.mxu1 %v11590_v20  ;;  %2928 = vmatprep.mubr.bf16.mxu1 %v2562_v59  ;;  %v2567_v20 = vrot.slane %v13052_v54, 1  ;;  %v2583_v59 = vrot.slane %v13062_v8, 1  ;;  %v11602_v8 = vld [vmem:[#allocation4 + $0x4d0] ss:$8 sps:$4 sm:$0xff]  }
 0x140   : > { %v13263_v55 = vpop.f32.mrf.mxu1  ;;  %3475 = vmatprep.subr.bf16.mxu1 %v11595_v28  ;;  %v2574_v28 = vsel %vm2506_vm10, %v2561_v52, %v2573_v12  ;;  %v2532_v52 = vshrl.u32 %v13186_v4, 16 }
 0x141   : > { %10521 = vmatmul.mubr.msk.bf16.gmra.mxu0 %vm1151_vm9, %v1952_v0  ;;  %v2569_v56 = vor.u32 %v2568_v10, %v2567_v20  ;;  %v2585_v54 = vor.u32 %v2584_v62, %v2583_v59  ;;  %v2579_v20 = vrot.slane %v13078_v23, 1  ;;  %v16178_v10 = vld [vmem:[#allocation66_spill] sm:$0xff]  ;;  %v11610_v59 = vld [vmem:[#allocation4 + $0x4c4] ss:$8 sps:$4 sm:$0xff]  }
 0x142   : > { %v13266_v34 = vpop.f32.mrf.mxu1  ;;  %2404 = vmatprep.mubr.bf16.mxu0 %v16149_v2  ;;  %v16181_v23 = vld [vmem:[#allocation20_spill] sm:$0xff] }
 0x143   : > { %3476 = vmatpush1.bf16.msra.mxu1 %v11593_v49  ;;  %v1958_v49 = vsel %vm1176_vm2, %v1951_v61, %v1957_v16  ;;  %v1963_v61 = vrot.slane %v12327_v50, 1  ;;  %v2586_v62 = vsel %vm2506_vm10, %v2573_v12, %v2585_v54  ;;  %v2534_v50 = vrot.slane %v2532_v52, 1 }
 0x144   : > { %v13273_v11 = vpop.f32.mrf.mxu1  ;;  %3477 = vmatprep.subr.bf16.mxu1 %v11598_v25  ;;  %v11604_v25 = vld [vmem:[#allocation4 + $0x4d4] ss:$8 sps:$4 sm:$0xff]   ;;  %v2539_v36 = vrot.slane %v16181_v23, 1  ;;  %v13316_v23 = vcombine.high %v2457_v46, %v2457_v46 }
 0x146   : > { %v13278_v0 = vpop.f32.mrf.mxu1  ;;  %2929 = vmatmul.mubr.bf16.gmra.mxu1 %v2558_v63  ;;  %v2570_v63 = vsel %vm2506_vm10, %v2557_v5, %v2569_v56  ;;  %v1964_v5 = vsel %vm1176_vm2, %v1957_v16, %v1963_v61 }
 0x147   : > { %3478 = vmatpush1.bf16.msra.mxu1 %v11596_v38  ;;  %2938 = vmatprep.mubr.bf16.mxu1 %v2574_v28  ;;  %v2535_v38 = vshll.u32 %v13186_v4, 16 }
 0x148   : > { %v13281_v17 = vpop.f32.mrf.mxu1  ;;  %3479 = vmatprep.subr.bf16.mxu1 %v11601_v19  ;;  %v2580_v19 = vrot.slane %v16178_v10, 2  ;;  %v16182_v10 = vld [vmem:[#allocation18_spill] sm:$0xff] }
 0x149   : > { %10522 = vmatmul.mubr.msk.bf16.gmra.mxu0 %vm1151_vm9, %v1958_v49  ;;  %v16179_v49 = vld [vmem:[#allocation73_spill] sm:$0xff]  ;;  %v2540_v45 = vrot.slane %v16182_v10, 2 }
 0x14a   : > { %v13285_v39 = vpop.f32.mrf.mxu1  ;;  %2414 = vmatprep.mubr.bf16.mxu0 %v16149_v2  ;;  %v2595_v6 = vrot.slane %v16179_v49, 1  ;;  %v11587_v49 = vld [vmem:[#allocation4 + $0x5e0] ss:$8 sps:$4 sm:$0xff]  }
 0x14b   : > { %3480 = vmatpush1.bf16.msra.mxu1 %v11599_v31  ;;  %v2537_v31 = vrot.slane %v2535_v38, 2  ;;  %v2541_v38 = vor.u32 %v2540_v45, %v2539_v36  ;;  %v11607_v45 = vld [vmem:[#allocation4 + $0x5d4] ss:$8 sps:$4 sm:$0xff]  }
 0x14c   : > { %v13292_v28 = vpop.f32.mrf.mxu1  ;;  %3481 = vmatprep.subr.bf16.mxu1 %v11604_v25  ;;  %v2581_v25 = vor.u32 %v2580_v19, %v2579_v20  ;;  %v2597_v52 = vor.u32 %v2596_v48, %v2595_v6  ;;  %v16183_v20 = vld [vmem:[#allocation72_spill] sm:$0xff] }
 0x14d   : > { %v2538_v61 = vor.u32 %v2537_v31, %v2534_v50  ;;  %v2592_v19 = vrot.slane %v16183_v20, 2  ;;  %v11616_v48 = vld [vmem:[#allocation4 + $0x5a4] ss:$8 sps:$4 sm:$0xff]   ;;  %v3464_v50 = vand.u32 %v11587_v49, %v12700_v7  ;;  %v16185_v31 = vld [vmem:[#allocation22_spill] sm:$0xff]  ;;  %v2628_v49 = vshll.u32 %v13316_v23, 16 }
 0x14e   : > { %v13297_v4 = vpop.f32.mrf.mxu1  ;;  %2939 = vmatmul.mubr.bf16.gmra.mxu1 %v2570_v63  ;;  %v2591_v63 = vrot.slane %v13102_v44, 1  ;;  %v2598_v6 = vsel %vm2506_vm10, %v2585_v54, %v2597_v52  ;;  %v2551_v20 = vrot.slane %v16185_v31, 1  ;;  %v13345_v31 = vcombine.low %v2457_v46, %v2457_v46 }
 0x14f   : > { %3482 = vmatpush1.bf16.msra.mxu1 %v11602_v8  ;;  %2948 = vmatprep.mubr.bf16.mxu1 %v2586_v62  ;;  %v2582_v8 = vsel %vm2506_vm10, %v2569_v56, %v2581_v25  ;;  %v2607_v62 = vrot.slane %v13110_v32, 1  ;;  %v2542_v56 = vsel %vm2506_vm10, %v2538_v61, %v2541_v38  ;;  %v11605_v32 = vld [vmem:[#allocation4 + $0x5d0] ss:$8 sps:$4 sm:$0xff]   ;;  %v2625_v61 = vshrl.u32 %v13316_v23, 16 }
 0x150   : > { %v13302_v12 = vpop.f32.mrf.mxu1  ;;  %3483 = vmatprep.subr.bf16.mxu1 %v11610_v59  ;;  %v13324_v54 = vor.u32 %v2592_v19, %v2591_v63  ;;  %16187 = vst [vmem:[#allocation80_spill] sm:$0xff] %v13345_v31  ;;  %v2619_v37 = vshll.u32 %v13345_v31, 16 }
 0x151   : > { %10523 = vmatmul.mubr.msk.bf16.gmra.mxu0 %vm1151_vm9, %v1964_v5  ;;  %v16184_v5 = vld [vmem:[#allocation74_spill] sm:$0xff] }
 0x152   : > { %v13305_v16 = vpop.f32.mrf.mxu1  ;;  %3021 = vmatprep.mubr.bf16.mxu0 %v16149_v2  ;;  %v2608_v10 = vrot.slane %v16184_v5, 2 }
 0x153   : > { %3484 = vmatpush1.bf16.msra.mxu1 %v11608_v47  ;;  %v11614_v47 = vld [vmem:[#allocation4 + $0x5a0] ss:$8 sps:$4 sm:$0xff]  }
 0x154   : > { %v13311_v59 = vpop.f32.mrf.mxu1  ;;  %3485 = vmatprep.subr.bf16.mxu1 %v11613_v3  ;;  %v16186_v3 = vld [vmem:[#allocation21_spill] sm:$0xff]  ;;  %v13328_v9 = vor.u32 %v2608_v10, %v2607_v62  ;;  %v11622_v10 = vld [vmem:[#allocation4 + $0x584] ss:$8 sps:$4 sm:$0xff]   ;;  %v2603_v62 = vrot.slane %v13121_v18, 1  ;;  %v11620_v18 = vld [vmem:[#allocation4 + $0x580] ss:$8 sps:$4 sm:$0xff]  }
 0x155   : > { %v2552_v44 = vrot.slane %v16186_v3, 2  ;;  %v11617_v3 = vld [vmem:[#allocation4 + $0x590] ss:$8 sps:$4 sm:$0xff]  }
 0x156   : > { %v13318_v36 = vpop.f32.mrf.mxu1  ;;  %2949 = vmatmul.mubr.bf16.gmra.mxu1 %v2582_v8  ;;  %v11649_v8 = vld [vmem:[#allocation4 + $0x714] ss:$8 sps:$4 sm:$0xff]  }
 0x157   : > { %3486 = vmatpush2.bf16.msra.mxu1 %v11611_v57  ;;  %2958 = vmatprep.mubr.bf16.mxu1 %v2598_v6  ;;  %v13339_v19 = vor.u32 %v2552_v44, %v2551_v20  ;;  %v2594_v6 = vsel %vm2506_vm10, %v2581_v25, %v13324_v54  ;;  %v2610_v44 = vsel %vm2506_vm10, %v2597_v52, %v13328_v9  ;;  %v11628_v20 = vld [vmem:[#allocation4 + $0x5c4] ss:$8 sps:$4 sm:$0xff]   ;;  %v16188_v25 = vld [vmem:[#allocation26_spill] sm:$0xff] }
 0x158   : > { %v13326_v5 = vpop.f32.mrf.mxu1  ;;  %3487 = vmatprep.subr.bf16.mxu1 %v11616_v48  ;;  %v2563_v43 = vrot.slane %v16188_v25, 1  ;;  %v11625_v52 = vld [vmem:[#allocation4 + $0x574] ss:$8 sps:$4 sm:$0xff]   ;;  %v2616_v25 = vshrl.u32 %v13345_v31, 16  ;;  %v11644_v31 = vld [vmem:[#allocation4 + $0x650] ss:$8 sps:$4 sm:$0xff]  }
 0x159   : > { %v1220_v41 = vpop.f32.mrf.mxu0  ;;  %10565 = vmatmul.mubr.msk.bf16.vlgmr.msra.gmra.mxu0 %vm1151_vm9, %v2542_v56  ;;  %v2604_v56 = vrot.slane %v13105_v58, 2  ;;  %v11626_v58 = vld [vmem:[#allocation4 + $0x5c0] ss:$8 sps:$4 sm:$0xff]  }
 0x15a   : > { %v13333_v57 = vpop.f32.mrf.mxu1  ;;  %v13336_v63 = vadd.f32 %v13242_v1, %v1220_v41  ;;  %3593 = vmatpush1.bf16.msra.mxu0 %v3464_v50  ;;  %3031 = vmatprep.mubr.bf16.mxu0 %v16149_v2 }
 0x15b   : > { %v1222_v48 = vpop.f32.mrf.mxu0  ;;  %3594 = vmatprep.subr.bf16.mxu0 %v11607_v45  ;;  %3488 = vmatpush2.bf16.msra.mxu1 %v11614_v47  ;;  %v2627_v45 = vrot.slane %v2625_v61, 1  ;;  %v2630_v47 = vrot.slane %v2628_v49, 2  ;;  %v2605_v49 = vor.u32 %v2604_v56, %v2603_v62 }
 0x15c   : > { %v13347_v41 = vpop.f32.mrf.mxu1  ;;  %v13350_v1 = vadd.f32 %v13245_v60, %v1222_v48  ;;  %3489 = vmatprep.subr.bf16.mxu1 %v11619_v40  ;;  %v2554_v60 = vsel %vm2506_vm10, %v2541_v38, %v13339_v19  ;;  %v16189_v48 = vld [vmem:[#allocation24_spill] sm:$0xff] }
 0x15d   : > { %v1224_v50 = vpop.f32.mrf.mxu0  ;;  %v2564_v40 = vrot.slane %v16189_v48, 2 }
 0x15e   : > { %v13355_v14 = vpop.f32.mrf.mxu1  ;;  %v13358_v46 = vadd.f32 %v13248_v21, %v1224_v50  ;;  %3595 = vmatpush1.bf16.msra.mxu0 %v11605_v32  ;;  %2959 = vmatmul.mubr.bf16.gmra.mxu1 %v2594_v6  ;;  %v4144_v21 = vand.u32 %v11649_v8, %v12700_v7  ;;  %v2631_v32 = vor.u32 %v2630_v47, %v2627_v45  ;;  %v11623_v8 = vld [vmem:[#allocation4 + $0x570] ss:$8 sps:$4 sm:$0xff]  }
 0x15f   : > { %v1226_v61 = vpop.f32.mrf.mxu0  ;;  %3490 = vmatpush2.bf16.msra.mxu1 %v11617_v3  ;;  %2968 = vmatprep.mubr.bf16.mxu1 %v2610_v44  ;;  %v2565_v56 = vor.u32 %v2564_v40, %v2563_v43  ;;  %v11631_v44 = vld [vmem:[#allocation4 + $0x564] ss:$8 sps:$4 sm:$0xff]  }
 0x160   : > { %v13366_v50 = vpop.f32.mrf.mxu1  ;;  %v13369_v38 = vadd.f32 %v13255_v22, %v1226_v61  ;;  %3491 = vmatprep.subr.bf16.mxu1 %v11622_v10  ;;  %3596 = vmatprep.subr.bf16.mxu0 %v11628_v20  ;;  %v2606_v22 = vsel %vm2506_vm10, %v13324_v54, %v2605_v49  ;;  %v2618_v10 = vrot.slane %v2616_v25, 1  ;;  %v2621_v20 = vrot.slane %v2619_v37, 2  ;;  %v16190_v25 = vld [vmem:[#allocation28_spill] sm:$0xff]  ;;  %v11636_v61 = vld [vmem:[#allocation4 + $0x554] ss:$8 sps:$4 sm:$0xff]  }
 0x161   : > { %v1230_v6 = vpop.f32.mrf.mxu0  ;;  %10566 = vmatmul.mubr.msk.bf16.gmra.mxu0 %vm1151_vm9, %v2554_v60  ;;  %v2632_v43 = vsel %vm2506_vm10, %v13328_v9, %v2631_v32  ;;  %v2566_v37 = vsel %vm2506_vm10, %v13339_v19, %v2565_v56  ;;  %v2575_v40 = vrot.slane %v16190_v25, 1  ;;  %v3188_v19 = vrot.slane %v12855_v13, 2  ;;  %v11643_v25 = vld [vmem:[#allocation4 + $0x664] ss:$8 sps:$4 sm:$0xff]  }
 0x162   : > { %v13372_v3 = vpop.f32.mrf.mxu1  ;;  %v13375_v62 = vadd.f32 %v13260_v35, %v1230_v6  ;;  %3041 = vmatprep.mubr.bf16.mxu0 %v16149_v2  ;;  %3597 = vmatpush1.bf16.msra.mxu0 %v11626_v58  ;;  %v12328_v35 = vld [vmem:[#allocation2 + $0xc] sm:$0xff] }
 0x163   : > { %v1232_v48 = vpop.f32.mrf.mxu0  ;;  %3492 = vmatpush2.bf16.msra.mxu1 %v11620_v18  ;;  %4269 = vmatprep.subr.bf16.mxu0 %v4144_v21  ;;  %v13387_v58 = vcombine.high %v3134_v51, %v12328_v35  ;;  %v2622_v21 = vor.u32 %v2621_v20, %v2618_v10  ;;  %v11634_v20 = vld [vmem:[#allocation4 + $0x550] ss:$8 sps:$4 sm:$0xff]  }
 0x164   : > { %v13380_v45 = vpop.f32.mrf.mxu1  ;;  %v13383_v47 = vadd.f32 %v13263_v55, %v1232_v48  ;;  %3493 = vmatprep.subr.bf16.mxu1 %v11625_v52  ;;  %v16191_v55 = vld [vmem:[#allocation27_spill] sm:$0xff] }
 0x165   : > { %v1234_v60 = vpop.f32.mrf.mxu0  ;;  %v2576_v48 = vrot.slane %v16191_v55, 2  ;;  %v11629_v52 = vld [vmem:[#allocation4 + $0x560] ss:$8 sps:$4 sm:$0xff]  }
 0x166   : > { %v13389_v18 = vpop.f32.mrf.mxu1  ;;  %v13392_v54 = vadd.f32 %v13266_v34, %v1234_v60  ;;  %2969 = vmatmul.mubr.bf16.gmra.mxu1 %v2606_v22  ;;  %v3187_v34 = vrot.slane %v13387_v58, 2 }
 0x167   : > { %v1236_v9 = vpop.f32.mrf.mxu0  ;;  %3494 = vmatpush2.bf16.msra.mxu1 %v11623_v8  ;;  %2978 = vmatprep.mubr.bf16.mxu1 %v2632_v43  ;;  %v2577_v10 = vor.u32 %v2576_v48, %v2575_v40 }
 0x168   : > { %v13398_v32 = vpop.f32.mrf.mxu1  ;;  %v13401_v6 = vadd.f32 %v13273_v11, %v1236_v9  ;;  %3495 = vmatprep.subr.bf16.mxu1 %v11631_v44  ;;  %v11639_v11 = vld [vmem:[#allocation4 + $0x544] ss:$8 sps:$4 sm:$0xff]   ;;  %v2623_v44 = vsel %vm2506_vm10, %v2605_v49, %v2622_v21  ;;  %v13413_v9 = vcombine.low %v3134_v51, %v12328_v35  ;;  %v16194_v51 = vld [vmem:[#allocation30_spill] sm:$0xff] }
 0x169   : > { %v1240_v60 = vpop.f32.mrf.mxu0  ;;  %10567 = vmatmul.mubr.msk.bf16.gmra.mxu0 %vm1151_vm9, %v2566_v37  ;;  %v2578_v48 = vsel %vm2506_vm10, %v2565_v56, %v2577_v10  ;;  %v2588_v35 = vrot.slane %v16194_v51, 2  ;;  %v11637_v21 = vld [vmem:[#allocation4 + $0x540] ss:$8 sps:$4 sm:$0xff]   ;;  %v3195_v56 = vrot.slane %v12914_v24, 2 }
 0x16a   : > { %v13406_v22 = vpop.f32.mrf.mxu1  ;;  %v13409_v8 = vadd.f32 %v13278_v0, %v1240_v60  ;;  %3051 = vmatprep.mubr.bf16.mxu0 %v16149_v2  ;;  %16192 = vst [vmem:[#allocation81_spill] sm:$0xff] %v13413_v9  ;;  %v3189_v0 = vsel %vm3183_vm11, %v3187_v34, %v3188_v19  ;;  %v3185_v34 = vrot.slane %v12857_v15, 2  ;;  %v11641_v15 = vld [vmem:[#allocation4 + $0x660] ss:$8 sps:$4 sm:$0xff]  }
 0x16b   : > { %v1242_v43 = vpop.f32.mrf.mxu0  ;;  %3496 = vmatpush2.bf16.msra.mxu1 %v11629_v52  ;;  %v16193_v52 = vld [vmem:[#allocation33_spill] sm:$0xff] }
 0x16c   : > { %v13415_v13 = vpop.f32.mrf.mxu1  ;;  %v13418_v37 = vadd.f32 %v13281_v17, %v1242_v43  ;;  %3497 = vmatprep.subr.bf16.mxu1 %v11636_v61  ;;  %v2587_v49 = vrot.slane %v16193_v52, 1  ;;  %v3184_v61 = vrot.slane %v13413_v9, 2  ;;  %v16196_v9 = vld [vmem:[#allocation38_spill] sm:$0xff] }
 0x16d   : > { %v1244_v60 = vpop.f32.mrf.mxu0 }
 0x16e   : > { %v13421_v55 = vpop.f32.mrf.mxu1  ;;  %v13424_v40 = vadd.f32 %v13285_v39, %v1244_v60  ;;  %2979 = vmatmul.mubr.bf16.gmra.mxu1 %v2623_v44 }
 0x16f   : > { %v1246_v17 = vpop.f32.mrf.mxu0  ;;  %3498 = vmatpush2.bf16.msra.mxu1 %v11634_v20  ;;  %3501 = vmatprep.mubr.bf16.mxu1 %v3189_v0  ;;  %v2589_v0 = vor.u32 %v2588_v35, %v2587_v49  ;;  %v16195_v35 = vld [vmem:[#allocation46_spill] sm:$0xff] }
 0x170   : > { %v13431_v43 = vpop.f32.mrf.mxu1  ;;  %v13434_v39 = vadd.f32 %v13292_v28, %v1246_v17  ;;  %3499 = vmatprep.subr.bf16.mxu1 %v11639_v11  ;;  %v3186_v28 = vsel %vm3183_vm11, %v3184_v61, %v3185_v34  ;;  %v11646_v17 = vld [vmem:[#allocation4 + $0x654] ss:$8 sps:$4 sm:$0xff]   ;;  %v2600_v61 = vrot.slane %v16196_v9, 2 }
 0x171   : > { %v1250_v60 = vpop.f32.mrf.mxu0  ;;  %10568 = vmatmul.mubr.msk.bf16.gmra.mxu0 %vm1151_vm9, %v2578_v48  ;;  %v3196_v48 = vsel %vm3183_vm11, %v3188_v19, %v3195_v56  ;;  %v2590_v49 = vsel %vm2506_vm10, %v2577_v10, %v2589_v0  ;;  %v3193_v19 = vrot.slane %v12916_v26, 2  ;;  %v3201_v10 = vrot.slane %v12956_v30, 2  ;;  %v11655_v26 = vld [vmem:[#allocation4 + $0x634] ss:$8 sps:$4 sm:$0xff]  }
 0x172   : > { %v13438_v44 = vpop.f32.mrf.mxu1  ;;  %v13441_v20 = vadd.f32 %v13297_v4, %v1250_v60  ;;  %3061 = vmatprep.mubr.bf16.mxu0 %v16149_v2 }
 0x173   : > { %v1252_v51 = vpop.f32.mrf.mxu0  ;;  %3500 = vmatpush2.bf16.msra.mxu1 %v11637_v21  ;;  %v2599_v21 = vrot.slane %v16195_v35, 1 }
 0x174   : > { %v13445_v11 = vpop.f32.mrf.mxu1  ;;  %v13448_v24 = vadd.f32 %v13302_v12, %v1252_v51  ;;  %4146 = vmatprep.subr.bf16.mxu1 %v11643_v25 }
 0x175   : > { %v1254_v52 = vpop.f32.mrf.mxu0 }
 0x176   : > { %v1672_v4 = vpop.f32.mrf.mxu1  ;;  %v13452_v60 = vadd.f32 %v13305_v16, %v1254_v52  ;;  %3502 = vmatmul.mubr.bf16.vlgmr.msra.gmra.mxu1 %v3186_v28 }
 0x177   : > { %v13458_v12 = vadd.f32 %v1672_v4, %v13336_v63  ;;  %v1256_v25 = vpop.f32.mrf.mxu0  ;;  %4147 = vmatpush1.bf16.msra.mxu1 %v11641_v15  ;;  %3511 = vmatprep.mubr.bf16.mxu1 %v3196_v48  ;;  %v2601_v15 = vor.u32 %v2600_v61, %v2599_v21  ;;  %v11650_v48 = vld [vmem:[#allocation4 + $0x640] ss:$8 sps:$4 sm:$0xff]  }
 0x178   : > { %v1674_v51 = vpop.f32.mrf.mxu1  ;;  %v13462_v16 = vadd.f32 %v13311_v59, %v1256_v25  ;;  %4148 = vmatprep.subr.bf16.mxu1 %v11646_v17  ;;  %v13476_v25 = vld [vmem:[#allocation2 + $0xc8] ss:$0 sps:$4 sm:$0x33]  }
 0x179   : > { %v13466_v52 = vadd.f32 %v1674_v51, %v13350_v1  ;;  %v1260_v28 = vpop.f32.mrf.mxu0  ;;  %10569 = vmatmul.mubr.msk.bf16.gmra.mxu0 %vm1151_vm9, %v2590_v49  ;;  %v3194_v1 = vsel %vm3183_vm11, %v3185_v34, %v3193_v19  ;;  %v16198_v34 = vld [vmem:[#allocation48_spill] sm:$0xff] }
 0x17a   : > { %v1676_v63 = vpop.f32.mrf.mxu1  ;;  %v13470_v4 = vadd.f32 %v13318_v36, %v1260_v28  ;;  %3071 = vmatprep.mubr.bf16.mxu0 %v16149_v2  ;;  %v3202_v36 = vsel %vm3183_vm11, %v3195_v56, %v3201_v10  ;;  %v2612_v9 = vrot.slane %v16198_v34, 2 }
 0x17b   : > { %v13474_v59 = vadd.f32 %v1676_v63, %v13358_v46  ;;  %v1262_v17 = vpop.f32.mrf.mxu0  ;;  %4149 = vmatpush1.bf16.msra.mxu1 %v11644_v31  ;;  %v2602_v63 = vsel %vm2506_vm10, %v2589_v0, %v2601_v15  ;;  %v16197_v31 = vld [vmem:[#allocation54_spill] sm:$0xff]  ;;  %v16199_v0 = vld [vmem:[#allocation55_spill] sm:$0xff] }
 0x17c   : > { %v1678_v51 = vpop.f32.mrf.mxu1  ;;  %v13480_v49 = vadd.f32 %v13326_v5, %v1262_v17  ;;  %4150 = vmatprep.subr.bf16.mxu1 %v11652_v53  ;;  %v2611_v30 = vrot.slane %v16197_v31, 1  ;;  %v11653_v5 = vld [vmem:[#allocation4 + $0x630] ss:$8 sps:$4 sm:$0xff]   ;;  %v11658_v17 = vld [vmem:[#allocation4 + $0x624] ss:$8 sps:$4 sm:$0xff]  }
 0x17d   : > { %v13484_v21 = vadd.f32 %v1678_v51, %v13369_v38  ;;  %v1264_v61 = vpop.f32.mrf.mxu0  ;;  %v3199_v38 = vrot.slane %v12963_v33, 2 }
 0x17e   : > { %v1682_v28 = vpop.f32.mrf.mxu1  ;;  %v13487_v46 = vadd.f32 %v13333_v57, %v1264_v61  ;;  %3512 = vmatmul.mubr.bf16.gmra.mxu1 %v3194_v1  ;;  %v3207_v61 = vrot.slane %v16199_v0, 2 }
 0x17f   : > { %v13493_v53 = vadd.f32 %v1682_v28, %v13375_v62  ;;  %v1266_v56 = vpop.f32.mrf.mxu0  ;;  %4151 = vmatpush1.bf16.msra.mxu1 %v11650_v48  ;;  %3521 = vmatprep.mubr.bf16.mxu1 %v3202_v36  ;;  %v2634_v62 = vshrl.u32 %v13476_v25, 16  ;;  %v2613_v36 = vor.u32 %v2612_v9, %v2611_v30 }
 0x180   : > { %v1684_v51 = vpop.f32.mrf.mxu1  ;;  %v13497_v57 = vadd.f32 %v13347_v41, %v1266_v56  ;;  %4152 = vmatprep.subr.bf16.mxu1 %v11655_v26  ;;  %v2637_v41 = vshll.u32 %v13476_v25, 16  ;;  %v11656_v26 = vld [vmem:[#allocation4 + $0x620] ss:$8 sps:$4 sm:$0xff]   ;;  %v11661_v56 = vld [vmem:[#allocation4 + $0x614] ss:$8 sps:$4 sm:$0xff]  }
 0x181   : > { %v13501_v34 = vadd.f32 %v1684_v51, %v13383_v47  ;;  %v1270_v1 = vpop.f32.mrf.mxu0  ;;  %10570 = vmatmul.mubr.msk.bf16.gmra.mxu0 %vm1151_vm9, %v2602_v63  ;;  %v3200_v63 = vsel %vm3183_vm11, %v3193_v19, %v3199_v38 }
 0x182   : > { %v1686_v28 = vpop.f32.mrf.mxu1  ;;  %v13506_v48 = vadd.f32 %v13355_v14, %v1270_v1  ;;  %3081 = vmatprep.mubr.bf16.mxu0 %v16149_v2  ;;  %v3208_v14 = vsel %vm3183_vm11, %v3201_v10, %v3207_v61  ;;  %v16200_v10 = vld [vmem:[#allocation57_spill] sm:$0xff] }
 0x183   : > { %v13511_v0 = vadd.f32 %v1686_v28, %v13392_v54  ;;  %v1272_v47 = vpop.f32.mrf.mxu0  ;;  %4153 = vmatpush1.bf16.msra.mxu1 %v11653_v5  ;;  %v2614_v54 = vsel %vm2506_vm10, %v2601_v15, %v2613_v36  ;;  %v2636_v5 = vrot.slane %v2634_v62, 1  ;;  %v2639_v28 = vrot.slane %v2637_v41, 2 }
 0x184   : > { %v1688_v51 = vpop.f32.mrf.mxu1  ;;  %v13515_v33 = vadd.f32 %v13366_v50, %v1272_v47  ;;  %4154 = vmatprep.subr.bf16.mxu1 %v11658_v17  ;;  %v11659_v17 = vld [vmem:[#allocation4 + $0x610] ss:$8 sps:$4 sm:$0xff]  }
 0x185   : > { %v13519_v30 = vadd.f32 %v1688_v51, %v13401_v6  ;;  %v1274_v9 = vpop.f32.mrf.mxu0  ;;  %v3205_v6 = vrot.slane %v16200_v10, 2 }
 0x186   : > { %v1692_v1 = vpop.f32.mrf.mxu1  ;;  %v13522_v31 = vadd.f32 %v13372_v3, %v1274_v9  ;;  %3522 = vmatmul.mubr.bf16.gmra.mxu1 %v3200_v63  ;;  %v11664_v3 = vld [vmem:[#allocation4 + $0x604] ss:$8 sps:$4 sm:$0xff]  }
 0x187   : > { %v13526_v19 = vadd.f32 %v1692_v1, %v13409_v8  ;;  %v1276_v50 = vpop.f32.mrf.mxu0  ;;  %4155 = vmatpush1.bf16.msra.mxu1 %v11656_v26  ;;  %3531 = vmatprep.mubr.bf16.mxu1 %v3208_v14  ;;  %v16201_v9 = vld [vmem:[#allocation59_spill] sm:$0xff]  ;;  %v3135_v8 = vld [vmem:[#allocation2 + $0x8] sm:$0xc]  ;;  %v2640_v14 = vor.u32 %v2639_v28, %v2636_v5 }
 0x188   : > { %v1694_v47 = vpop.f32.mrf.mxu1  ;;  %v13530_v51 = vadd.f32 %v13380_v45, %v1276_v50  ;;  %4156 = vmatprep.subr.bf16.mxu1 %v11661_v56  ;;  %v3213_v15 = vrot.slane %v16201_v9, 2  ;;  %v11662_v45 = vld [vmem:[#allocation4 + $0x600] ss:$8 sps:$4 sm:$0xff]   ;;  %v11670_v1 = vld [vmem:[#allocation4 + $0x5f4] ss:$8 sps:$4 sm:$0xff]  }
 0x189   : > { %v13534_v62 = vadd.f32 %v1694_v47, %v13418_v37  ;;  %v1280_v41 = vpop.f32.mrf.mxu0  ;;  %10571 = vmatmul.mubr.msk.bf16.gmra.mxu0 %vm1151_vm9, %v2614_v54  ;;  %v3206_v37 = vsel %vm3183_vm11, %v3199_v38, %v3205_v6  ;;  %v11668_v38 = vld [vmem:[#allocation4 + $0x5f0] ss:$8 sps:$4 sm:$0xff]  }
 0x18a   : > { %v1696_v26 = vpop.f32.mrf.mxu1  ;;  %v13538_v63 = vadd.f32 %v13389_v18, %v1280_v41  ;;  %3091 = vmatprep.mubr.bf16.mxu0 %v16149_v2  ;;  %v3214_v18 = vsel %vm3183_vm11, %v3207_v61, %v3213_v15 }
 0x18b   : > { %v13542_v56 = vadd.f32 %v1696_v26, %v13424_v40  ;;  %v1282_v50 = vpop.f32.mrf.mxu0  ;;  %4157 = vmatpush1.bf16.msra.mxu1 %v11659_v17  ;;  %v2641_v40 = vsel %vm2506_vm10, %v2613_v36, %v2640_v14  ;;  %v12329_v17 = vld [vmem:[#allocation2 + $0x14] sm:$0xf]  ;;  %v16203_v36 = vld [vmem:[#allocation64_spill] sm:$0xff] }
 0x18c   : > { %v1698_v47 = vpop.f32.mrf.mxu1  ;;  %v13546_v54 = vadd.f32 %v13398_v32, %v1282_v50  ;;  %4158 = vmatprep.subr.bf16.mxu1 %v11664_v3  ;;  %v13556_v26 = vcombine.low %v3135_v8, %v12329_v17  ;;  %v3219_v14 = vrot.slane %v16203_v36, 2 }
 0x18d   : > { %v13550_v41 = vadd.f32 %v1698_v47, %v13434_v39  ;;  %v1284_v5 = vpop.f32.mrf.mxu0  ;;  %v16202_v39 = vld [vmem:[#allocation63_spill] sm:$0xff] }
 0x18e   : > { %v1702_v28 = vpop.f32.mrf.mxu1  ;;  %v13553_v9 = vadd.f32 %v13406_v22, %v1284_v5  ;;  %3532 = vmatmul.mubr.bf16.gmra.mxu1 %v3206_v37  ;;  %v3211_v61 = vrot.slane %v16202_v39, 2  ;;  %v11673_v22 = vld [vmem:[#allocation4 + $0x6e4] ss:$8 sps:$4 sm:$0xff]  }
 0x18f   : > { %v13559_v32 = vadd.f32 %v1702_v28, %v13441_v20  ;;  %v1286_v3 = vpop.f32.mrf.mxu0  ;;  %4159 = vmatpush1.bf16.msra.mxu1 %v11662_v45  ;;  %3541 = vmatprep.mubr.bf16.mxu1 %v3214_v18  ;;  %v3190_v18 = vrot.slane %v13556_v26, 2  ;;  %v11671_v28 = vld [vmem:[#allocation4 + $0x6e0] ss:$8 sps:$4 sm:$0xff]   ;;  %v11667_v39 = vld [vmem:[#allocation4 + $0x704] ss:$8 sps:$4 sm:$0xff]  }
 0x190   : > { %v1704_v50 = vpop.f32.mrf.mxu1  ;;  %v13563_v47 = vadd.f32 %v13415_v13, %v1286_v3  ;;  %4160 = vmatprep.subr.bf16.mxu1 %v11670_v1  ;;  %v16204_v13 = vld [vmem:[#allocation17_spill] sm:$0xff]  ;;  %v3212_v3 = vsel %vm3183_vm11, %v3205_v6, %v3211_v61 }
 0x191   : > { %v13567_v8 = vadd.f32 %v1704_v50, %v13448_v24  ;;  %v1290_v37 = vpop.f32.mrf.mxu0  ;;  %10572 = vmatmul.mubr.msk.bf16.gmra.mxu0 %vm1151_vm9, %v2641_v40  ;;  %v3191_v5 = vrot.slane %v16204_v13, 2  ;;  %v11647_v1 = vld [vmem:[#allocation4 + $0x710] ss:$8 sps:$4 sm:$0xff]  }
 0x192   : > { %v1706_v20 = vpop.f32.mrf.mxu1  ;;  %v13571_v45 = vadd.f32 %v13421_v55, %v1290_v37  ;;  %3614 = vmatprep.mubr.bf16.mxu0 %v16149_v2  ;;  %v11676_v55 = vld [vmem:[#allocation4 + $0x6d4] ss:$8 sps:$4 sm:$0xff]   ;;  %v3220_v37 = vsel %vm3183_vm11, %v3213_v15, %v3219_v14  ;;  %v4141_v6 = vand.u32 %v11647_v1, %v12700_v7  ;;  %v16205_v1 = vld [vmem:[#allocation19_spill] sm:$0xff] }
 0x193   : > { %v13577_v17 = vadd.f32 %v1706_v20, %v13452_v60  ;;  %v1292_v24 = vpop.f32.mrf.mxu0  ;;  %4161 = vmatpush1.bf16.msra.mxu1 %v11668_v38  ;;  %v3192_v38 = vsel %vm3183_vm11, %v3190_v18, %v3191_v5  ;;  %v11679_v20 = vld [vmem:[#allocation4 + $0x6c4] ss:$8 sps:$4 sm:$0xff]  }
 0x194   : > { %v1708_v40 = vpop.f32.mrf.mxu1  ;;  %v13581_v50 = vadd.f32 %v13431_v43, %v1292_v24  ;;  %4162 = vmatprep.subr.bf16.mxu1 %v11673_v22  ;;  %v11674_v43 = vld [vmem:[#allocation4 + $0x6d0] ss:$8 sps:$4 sm:$0xff]  }
 0x195   : > { %v13585_v36 = vadd.f32 %v1708_v40, %v13462_v16  ;;  %v1294_v13 = vpop.f32.mrf.mxu0  ;;  %v16082_v16 = vrot.slane %v13069_v42, 2 }
 0x196   : > { %v1712_v10 = vpop.f32.mrf.mxu1  ;;  %v13588_v60 = vadd.f32 %v13438_v44, %v1294_v13  ;;  %3542 = vmatmul.mubr.bf16.gmra.mxu1 %v3212_v3  ;;  %v3225_v44 = vrot.slane %v13073_v27, 2  ;;  %v11677_v3 = vld [vmem:[#allocation4 + $0x6c0] ss:$8 sps:$4 sm:$0xff]  }
 0x197   : > { %v13593_v22 = vadd.f32 %v1712_v10, %v13470_v4  ;;  %v1296_v15 = vpop.f32.mrf.mxu0  ;;  %4163 = vmatpush2.bf16.msra.mxu1 %v11671_v28  ;;  %3551 = vmatprep.mubr.bf16.mxu1 %v3220_v37 }
 0x198   : > { %v1714_v24 = vpop.f32.mrf.mxu1  ;;  %v13597_v40 = vadd.f32 %v13445_v11, %v1296_v15  ;;  %4164 = vmatprep.subr.bf16.mxu1 %v11676_v55  ;;  %v11665_v11 = vld [vmem:[#allocation4 + $0x700] ss:$8 sps:$4 sm:$0xff]   ;;  %v11682_v15 = vld [vmem:[#allocation4 + $0x6b4] ss:$8 sps:$4 sm:$0xff]  }
 0x199   : > { %v13601_v18 = vadd.f32 %v1714_v24, %v13480_v49  ;;  %v1785_v13 = vpop.f32.mrf.mxu0  ;;  %10614 = vmatmul.mubr.msk.bf16.vlgmr.msra.gmra.mxu0 %vm1151_vm9, %v3192_v38  ;;  %v3218_v49 = vsel %vm3183_vm11, %v3211_v61, %v16082_v16  ;;  %v11706_v38 = vld [vmem:[#allocation4 + $0x844] ss:$8 sps:$4 sm:$0xff]   ;;  %v3226_v24 = vsel %vm3183_vm11, %v3219_v14, %v3225_v44  ;;  %v16206_v61 = vrot.slane %v16205_v1, 2 }
 0x19a   : > { %v1716_v4 = vpop.f32.mrf.mxu1  ;;  %v13605_v10 = vadd.f32 %v1785_v13, %v13458_v12  ;;  %4270 = vmatpush1.bf16.msra.mxu0 %v4141_v6  ;;  %3624 = vmatprep.mubr.bf16.mxu0 %v16149_v2  ;;  %v11688_v13 = vld [vmem:[#allocation4 + $0x6f4] ss:$8 sps:$4 sm:$0xff]  }
 0x19b   : > { %v13610_v55 = vadd.f32 %v1716_v4, %v13487_v46  ;;  %v1787_v37 = vpop.f32.mrf.mxu0  ;;  %4271 = vmatprep.subr.bf16.mxu0 %v11667_v39  ;;  %4165 = vmatpush2.bf16.msra.mxu1 %v11674_v43  ;;  %v11680_v39 = vld [vmem:[#allocation4 + $0x6b0] ss:$8 sps:$4 sm:$0xff]   ;;  %v3198_v16 = vsel %vm3183_vm11, %v3191_v5, %v16206_v61  ;;  %v3790_v5 = vshrl.u32 %v13387_v58, 16 }
 0x19c   : > { %v1718_v12 = vpop.f32.mrf.mxu1  ;;  %v13616_v6 = vadd.f32 %v1787_v37, %v13466_v52  ;;  %4166 = vmatprep.subr.bf16.mxu1 %v11679_v20  ;;  %v11685_v52 = vld [vmem:[#allocation4 + $0x6a4] ss:$8 sps:$4 sm:$0xff]   ;;  %v11686_v20 = vld [vmem:[#allocation4 + $0x6f0] ss:$8 sps:$4 sm:$0xff]  }
 0x19d   : > { %v13620_v46 = vadd.f32 %v1718_v12, %v13497_v57  ;;  %v1789_v4 = vpop.f32.mrf.mxu0  ;;  %v3223_v57 = vrot.slane %v13093_v29, 2  ;;  %v3231_v12 = vrot.slane %v13316_v23, 2 }
 0x19e   : > { %v1722_v43 = vpop.f32.mrf.mxu1  ;;  %v13623_v28 = vadd.f32 %v1789_v4, %v13474_v59  ;;  %4272 = vmatpush1.bf16.msra.mxu0 %v11665_v11  ;;  %3552 = vmatmul.mubr.bf16.gmra.mxu1 %v3218_v49  ;;  %v4737_v59 = vand.u32 %v11706_v38, %v12700_v7 }
 0x19f   : > { %v13629_v14 = vadd.f32 %v1722_v43, %v13506_v48  ;;  %v1791_v37 = vpop.f32.mrf.mxu0  ;;  %4167 = vmatpush2.bf16.msra.mxu1 %v11677_v3  ;;  %3561 = vmatprep.mubr.bf16.mxu1 %v3226_v24  ;;  %v3793_v48 = vshll.u32 %v13387_v58, 16  ;;  %v11691_v24 = vld [vmem:[#allocation4 + $0x694] ss:$8 sps:$4 sm:$0xff]   ;;  %v3232_v43 = vsel %vm3183_vm11, %v3225_v44, %v3231_v12  ;;  %v16212_v12 = vrot.slane %v16205_v1, 2 }
 0x1a0   : > { %v1724_v4 = vpop.f32.mrf.mxu1  ;;  %v13635_v27 = vadd.f32 %v1791_v37, %v13484_v21  ;;  %4168 = vmatprep.subr.bf16.mxu1 %v11682_v15  ;;  %4273 = vmatprep.subr.bf16.mxu0 %v11688_v13  ;;  %v16207_v21 = vld [vmem:[#allocation23_spill] sm:$0xff] }
 0x1a1   : > { %v13640_v11 = vadd.f32 %v1724_v4, %v13515_v33  ;;  %v1795_v3 = vpop.f32.mrf.mxu0  ;;  %10615 = vmatmul.mubr.msk.bf16.gmra.mxu0 %vm1151_vm9, %v3198_v16  ;;  %v11683_v15 = vld [vmem:[#allocation4 + $0x6a0] ss:$8 sps:$4 sm:$0xff]   ;;  %v16208_v33 = vrot.slane %v13069_v42, 2  ;;  %v16211_v44 = vrot.slane %v16207_v21, 2 }
 0x1a2   : > { %v1726_v49 = vpop.f32.mrf.mxu1  ;;  %v13644_v23 = vadd.f32 %v1795_v3, %v13493_v53  ;;  %3634 = vmatprep.mubr.bf16.mxu0 %v16149_v2  ;;  %4274 = vmatpush1.bf16.msra.mxu0 %v11686_v20  ;;  %v16209_v53 = vld [vmem:[#allocation37_spill] sm:$0xff]  ;;  %v3792_v20 = vrot.slane %v3790_v5, 2  ;;  %v3795_v3 = vrot.slane %v3793_v48, 3 }
 0x1a3   : > { %v13649_v13 = vadd.f32 %v1726_v49, %v13522_v31  ;;  %v1797_v58 = vpop.f32.mrf.mxu0  ;;  %4169 = vmatpush2.bf16.msra.mxu1 %v11680_v39  ;;  %v3224_v16 = vsel %vm3183_vm11, %v16208_v33, %v3223_v57  ;;  %v3797_v61 = vrot.slane %v16209_v53, 2  ;;  %4862 = vmatprep.subr.bf16.mxu0 %v4737_v59  ;;  %v16210_v31 = vld [vmem:[#allocation34_spill] sm:$0xff]  ;;  %v16213_v59 = vld [vmem:[#allocation80_spill] sm:$0xff]  ;;  %v16219_v53 = vld [vmem:[#allocation41_spill] sm:$0xff] }
 0x1a4   : > { %v1728_v37 = vpop.f32.mrf.mxu1  ;;  %v13657_v4 = vadd.f32 %v1797_v58, %v13501_v34  ;;  %4170 = vmatprep.subr.bf16.mxu1 %v11685_v52  ;;  %v3798_v49 = vrot.slane %v16210_v31, 3  ;;  %v3204_v34 = vsel %vm3183_vm11, %v16212_v12, %v16211_v44  ;;  %v11689_v52 = vld [vmem:[#allocation4 + $0x690] ss:$8 sps:$4 sm:$0xff]   ;;  %v3229_v5 = vrot.slane %v16213_v59, 2  ;;  %v11694_v44 = vld [vmem:[#allocation4 + $0x684] ss:$8 sps:$4 sm:$0xff]  }
 0x1a5   : > { %v13661_v39 = vadd.f32 %v1728_v37, %v13530_v51  ;;  %v1799_v38 = vpop.f32.mrf.mxu0  ;;  %v16214_v58 = vld [vmem:[#allocation81_spill] sm:$0xff] }
 0x1a6   : > { %v1732_v29 = vpop.f32.mrf.mxu1  ;;  %v13664_v33 = vadd.f32 %v1799_v38, %v13511_v0  ;;  %3562 = vmatmul.mubr.bf16.gmra.mxu1 %v3224_v16  ;;  %v3778_v37 = vshrl.u32 %v16214_v58, 16  ;;  %v3781_v0 = vshll.u32 %v16214_v58, 16  ;;  %v3796_v16 = vor.u32 %v3795_v3, %v3792_v20  ;;  %v11692_v3 = vld [vmem:[#allocation4 + $0x680] ss:$8 sps:$4 sm:$0xff]  }
 0x1a7   : > { %v13673_v48 = vadd.f32 %v1732_v29, %v13538_v63  ;;  %v1801_v51 = vpop.f32.mrf.mxu0  ;;  %4171 = vmatpush2.bf16.msra.mxu1 %v11683_v15  ;;  %3571 = vmatprep.mubr.bf16.mxu1 %v3232_v43  ;;  %v3799_v12 = vor.u32 %v3798_v49, %v3797_v61  ;;  %v16215_v43 = vld [vmem:[#allocation25_spill] sm:$0xff]  ;;  %v16217_v58 = vld [vmem:[#allocation35_spill] sm:$0xff] }
 0x1a8   : > { %v1734_v38 = vpop.f32.mrf.mxu1  ;;  %v13678_v31 = vadd.f32 %v1801_v51, %v13519_v30  ;;  %4172 = vmatprep.subr.bf16.mxu1 %v11691_v24  ;;  %v3209_v30 = vrot.slane %v16215_v43, 2  ;;  %v3230_v24 = vsel %vm3183_vm11, %v3223_v57, %v3229_v5  ;;  %v16216_v51 = vld [vmem:[#allocation42_spill] sm:$0xff]  ;;  %v3780_v49 = vrot.slane %v3778_v37, 2  ;;  %v16218_v5 = vld [vmem:[#allocation45_spill] sm:$0xff] }
 0x1a9   : > { %v13681_v59 = vadd.f32 %v1734_v38, %v13546_v54  ;;  %v1805_v29 = vpop.f32.mrf.mxu0  ;;  %10616 = vmatmul.mubr.msk.bf16.gmra.mxu0 %vm1151_vm9, %v3204_v34  ;;  %v3785_v20 = vrot.slane %v16216_v51, 2  ;;  %v3783_v34 = vrot.slane %v3781_v0, 3  ;;  %v3786_v38 = vrot.slane %v16217_v58, 3  ;;  %v11697_v43 = vld [vmem:[#allocation4 + $0x674] ss:$8 sps:$4 sm:$0xff]  }
 0x1aa   : > { %v1736_v63 = vpop.f32.mrf.mxu1  ;;  %v13685_v15 = vadd.f32 %v1805_v29, %v13526_v19  ;;  %3644 = vmatprep.mubr.bf16.mxu0 %v16149_v2  ;;  %v3800_v57 = vsel %vm3776_vm12, %v3796_v16, %v3799_v12  ;;  %v3817_v51 = vrot.slane %v16218_v5, 2  ;;  %v16220_v58 = vrot.slane %v16207_v21, 2 }
 0x1ab   : > { %v13692_v61 = vadd.f32 %v1736_v63, %v13553_v9  ;;  %v1807_v54 = vpop.f32.mrf.mxu0  ;;  %4173 = vmatpush2.bf16.msra.mxu1 %v11689_v52  ;;  %v3818_v9 = vrot.slane %v16219_v53, 3  ;;  %v3784_v53 = vor.u32 %v3783_v34, %v3780_v49  ;;  %v16222_v34 = vld [vmem:[#allocation51_spill] sm:$0xff] }
 0x1ac   : > { %v1738_v19 = vpop.f32.mrf.mxu1  ;;  %v13696_v29 = vadd.f32 %v1807_v54, %v13534_v62  ;;  %4174 = vmatprep.subr.bf16.mxu1 %v11694_v44  ;;  %v3210_v62 = vsel %vm3183_vm11, %v16220_v58, %v3209_v30  ;;  %v11695_v54 = vld [vmem:[#allocation4 + $0x670] ss:$8 sps:$4 sm:$0xff]   ;;  %v3813_v58 = vrot.slane %v16222_v34, 2 }
 0x1ad   : > { %v13702_v63 = vadd.f32 %v1738_v19, %v13563_v47  ;;  %v1809_v52 = vpop.f32.mrf.mxu0  ;;  %v3787_v47 = vor.u32 %v3786_v38, %v3785_v20  ;;  %v16221_v20 = vld [vmem:[#allocation29_spill] sm:$0xff]  ;;  %v16223_v38 = vld [vmem:[#allocation44_spill] sm:$0xff] }
 0x1ae   : > { %v1742_v37 = vpop.f32.mrf.mxu1  ;;  %v13705_v0 = vadd.f32 %v1809_v52, %v13542_v56  ;;  %3572 = vmatmul.mubr.bf16.gmra.mxu1 %v3230_v24  ;;  %v11700_v56 = vld [vmem:[#allocation4 + $0x794] ss:$8 sps:$4 sm:$0xff]   ;;  %v3819_v52 = vor.u32 %v3818_v9, %v3817_v51  ;;  %v3215_v49 = vrot.slane %v16221_v20, 2  ;;  %v16233_v20 = vld [vmem:[#allocation56_spill] sm:$0xff] }
 0x1af   : > { %v13711_v44 = vadd.f32 %v1742_v37, %v13571_v45  ;;  %v1811_v16 = vpop.f32.mrf.mxu0  ;;  %4175 = vmatpush2.bf16.msra.mxu1 %v11692_v3  ;;  %4178 = vmatprep.mubr.bf16.mxu1 %v3800_v57  ;;  %v3788_v51 = vsel %vm3776_vm12, %v3784_v53, %v3787_v47  ;;  %v3814_v57 = vrot.slane %v16223_v38, 3  ;;  %v11703_v37 = vld [vmem:[#allocation4 + $0x784] ss:$8 sps:$4 sm:$0xff]  }
 0x1b0   : > { %v1744_v19 = vpop.f32.mrf.mxu1  ;;  %v13714_v5 = vadd.f32 %v1811_v16, %v13550_v41  ;;  %4176 = vmatprep.subr.bf16.mxu1 %v11697_v43  ;;  %v16224_v16 = vld [vmem:[#allocation53_spill] sm:$0xff]  ;;  %v3216_v38 = vsel %vm3183_vm11, %v3209_v30, %v3215_v49 }
 0x1b1   : > { %v13717_v21 = vadd.f32 %v1744_v19, %v13581_v50  ;;  %v1815_v24 = vpop.f32.mrf.mxu0  ;;  %10617 = vmatmul.mubr.msk.bf16.gmra.mxu0 %vm1151_vm9, %v3210_v62  ;;  %v11698_v50 = vld [vmem:[#allocation4 + $0x790] ss:$8 sps:$4 sm:$0xff]   ;;  %v3820_v62 = vsel %vm3776_vm12, %v3799_v12, %v3819_v52  ;;  %v16225_v19 = vld [vmem:[#allocation50_spill] sm:$0xff]  ;;  %v3815_v12 = vor.u32 %v3814_v57, %v3813_v58 }
 0x1b2   : > { %v1746_v45 = vpop.f32.mrf.mxu1  ;;  %v13721_v3 = vadd.f32 %v1815_v24, %v13559_v32  ;;  %3654 = vmatprep.mubr.bf16.mxu0 %v16149_v2  ;;  %v3830_v24 = vrot.slane %v16225_v19, 3  ;;  %v11707_v57 = vld [vmem:[#allocation4 + $0x770] ss:$8 sps:$4 sm:$0xff]  }
 0x1b3   : > { %v13726_v41 = vadd.f32 %v1746_v45, %v13588_v60  ;;  %v1817_v43 = vpop.f32.mrf.mxu0  ;;  %4177 = vmatpush2.bf16.msra.mxu1 %v11695_v54  ;;  %v3829_v60 = vrot.slane %v16224_v16, 2 }
 0x1b4   : > { %v1748_v9 = vpop.f32.mrf.mxu1  ;;  %v13732_v32 = vadd.f32 %v1817_v43, %v13567_v8  ;;  %4739 = vmatprep.subr.bf16.mxu1 %v11700_v56  ;;  %v11701_v56 = vld [vmem:[#allocation4 + $0x780] ss:$8 sps:$4 sm:$0xff]  }
 0x1b5   : > { %v13738_v54 = vadd.f32 %v1748_v9, %v13597_v40  ;;  %v1819_v53 = vpop.f32.mrf.mxu0  ;;  %v11709_v40 = vld [vmem:[#allocation4 + $0x774] ss:$8 sps:$4 sm:$0xff]   ;;  %v3831_v9 = vor.u32 %v3830_v24, %v3829_v60  ;;  %v16230_v60 = vld [vmem:[#allocation52_spill] sm:$0xff] }
 0x1b6   : > { %v13741_v45 = vadd.f32 %v1819_v53, %v13577_v17  ;;  %v13744_v34 = vpop.f32.mrf.mxu1  ;;  %4179 = vmatmul.mubr.bf16.vlgmr.msra.gmra.mxu1 %v3788_v51  ;;  %v16228_v51 = vld [vmem:[#allocation36_spill] sm:$0xff]  ;;  %v3826_v24 = vrot.slane %v16230_v60, 3 }
 0x1b7   : > { %v1821_v8 = vpop.f32.mrf.mxu0  ;;  %4740 = vmatpush1.bf16.msra.mxu1 %v11698_v50  ;;  %4188 = vmatprep.mubr.bf16.mxu1 %v3820_v62  ;;  %v3221_v50 = vrot.slane %v16228_v51, 2  ;;  %v16232_v51 = vld [vmem:[#allocation61_spill] sm:$0xff] }
 0x1b8   : > { %v13747_v43 = vadd.f32 %v1821_v8, %v13585_v36  ;;  %v13749_v19 = vpop.f32.mrf.mxu1  ;;  %4741 = vmatprep.subr.bf16.mxu1 %v11703_v37  ;;  %v3816_v36 = vsel %vm3776_vm12, %v3787_v47, %v3815_v12  ;;  %v16229_v37 = vld [vmem:[#allocation58_spill] sm:$0xff]  ;;  %v11712_v8 = vld [vmem:[#allocation4 + $0x764] ss:$8 sps:$4 sm:$0xff]   ;;  %v3841_v16 = vrot.slane %v16232_v51, 2 }
 0x1b9   : > { %v1825_v17 = vpop.f32.mrf.mxu0  ;;  %10618 = vmatmul.mubr.msk.bf16.gmra.mxu0 %vm1151_vm9, %v3216_v38  ;;  %v3825_v53 = vrot.slane %v16229_v37, 2  ;;  %v3222_v37 = vsel %vm3183_vm11, %v3215_v49, %v3221_v50  ;;  %v16237_v49 = vld [vmem:[#allocation43_spill] sm:$0xff] }
 0x1ba   : > { %16226 = vst [vmem:[#allocation80_spill] sm:$0xff] %v13747_v43  ;;  %v13753_v30 = vadd.f32 %v1825_v17, %v13593_v22  ;;  %3664 = vmatprep.mubr.bf16.mxu0 %v16149_v2  ;;  %v13757_v62 = vpop.f32.mrf.mxu1  ;;  %v3832_v17 = vsel %vm3776_vm12, %v3819_v52, %v3831_v9 }
 0x1bb   : > { %v1827_v58 = vpop.f32.mrf.mxu0  ;;  %4742 = vmatpush1.bf16.msra.mxu1 %v11701_v56  ;;  %v3842_v56 = vrot.slane %v16233_v20, 3  ;;  %v11715_v20 = vld [vmem:[#allocation4 + $0x754] ss:$8 sps:$4 sm:$0xff]  }
 0x1bc   : > { %16227 = vst [vmem:[#allocation81_spill] sm:$0xff] %v13753_v30  ;;  %v13763_v38 = vadd.f32 %v1827_v58, %v13601_v18  ;;  %v13765_v22 = vpop.f32.mrf.mxu1  ;;  %4743 = vmatprep.subr.bf16.mxu1 %v11709_v40  ;;  %v11710_v58 = vld [vmem:[#allocation4 + $0x760] ss:$8 sps:$4 sm:$0xff]   ;;  %v3827_v40 = vor.u32 %v3826_v24, %v3825_v53  ;;  %v11713_v24 = vld [vmem:[#allocation4 + $0x750] ss:$8 sps:$4 sm:$0xff]  }
 0x1bd   : > { %v1829_v1 = vpop.f32.mrf.mxu0  ;;  %v3843_v42 = vor.u32 %v3842_v56, %v3841_v16  ;;  %v16239_v16 = vld [vmem:[#allocation60_spill] sm:$0xff] }
 0x1be   : > { %16231 = vst [vmem:[#allocation82_spill] sm:$0xff] %v13763_v38  ;;  %v13771_v47 = vadd.f32 %v1829_v1, %v13610_v55  ;;  %v13774_v60 = vpop.f32.mrf.mxu1  ;;  %4189 = vmatmul.mubr.bf16.gmra.mxu1 %v3816_v36  ;;  %v3227_v36 = vrot.slane %v16237_v49, 2  ;;  %v3838_v56 = vrot.slane %v16239_v16, 3  ;;  %v16241_v49 = vld [vmem:[#allocation67_spill] sm:$0xff] }
 0x1bf   : > { %v1831_v18 = vpop.f32.mrf.mxu0  ;;  %4744 = vmatpush1.bf16.msra.mxu1 %v11707_v57  ;;  %4198 = vmatprep.mubr.bf16.mxu1 %v3832_v17 }
 0x1c0   : > { %16234 = vst [vmem:[#allocation83_spill] sm:$0xff] %v13771_v47  ;;  %v13777_v52 = vadd.f32 %v1831_v18, %v13620_v46  ;;  %v13779_v51 = vpop.f32.mrf.mxu1  ;;  %4745 = vmatprep.subr.bf16.mxu1 %v11712_v8  ;;  %v3828_v46 = vsel %vm3776_vm12, %v3815_v12, %v3827_v40  ;;  %v16238_v8 = vld [vmem:[#allocation65_spill] sm:$0xff]  ;;  %v11718_v18 = vld [vmem:[#allocation4 + $0x744] ss:$8 sps:$4 sm:$0xff]  }
 0x1c1   : > { %v1835_v1 = vpop.f32.mrf.mxu0  ;;  %10619 = vmatmul.mubr.msk.bf16.gmra.mxu0 %vm1151_vm9, %v3222_v37  ;;  %v3837_v17 = vrot.slane %v16238_v8, 2  ;;  %v3228_v8 = vsel %vm3183_vm11, %v3221_v50, %v3227_v36  ;;  %v3802_v50 = vshrl.u32 %v13556_v26, 16 }
 0x1c2   : > { %16235 = vst [vmem:[#allocation84_spill] sm:$0xff] %v13777_v52  ;;  %v13783_v55 = vadd.f32 %v1835_v1, %v13629_v14  ;;  %3674 = vmatprep.mubr.bf16.mxu0 %v16149_v2  ;;  %v13787_v57 = vpop.f32.mrf.mxu1  ;;  %v3844_v1 = vsel %vm3776_vm12, %v3831_v9, %v3843_v42  ;;  %v16242_v52 = vld [vmem:[#allocation62_spill] sm:$0xff] }
 0x1c3   : > { %v1837_v53 = vpop.f32.mrf.mxu0  ;;  %4746 = vmatpush1.bf16.msra.mxu1 %v11710_v58  ;;  %v3854_v58 = vrot.slane %v16242_v52, 3  ;;  %v11721_v52 = vld [vmem:[#allocation4 + $0x734] ss:$8 sps:$4 sm:$0xff]  }
 0x1c4   : > { %16236 = vst [vmem:[#allocation85_spill] sm:$0xff] %v13783_v55  ;;  %v13793_v37 = vadd.f32 %v1837_v53, %v13640_v11  ;;  %v13795_v14 = vpop.f32.mrf.mxu1  ;;  %4747 = vmatprep.subr.bf16.mxu1 %v11715_v20  ;;  %v3853_v55 = vrot.slane %v16241_v49, 2  ;;  %v11716_v53 = vld [vmem:[#allocation4 + $0x740] ss:$8 sps:$4 sm:$0xff]   ;;  %v3839_v20 = vor.u32 %v3838_v56, %v3837_v17  ;;  %v11719_v56 = vld [vmem:[#allocation4 + $0x730] ss:$8 sps:$4 sm:$0xff]  }
 0x1c5   : > { %v1839_v47 = vpop.f32.mrf.mxu0 }
 0x1c6   : > { %16240 = vst [vmem:[#allocation86_spill] sm:$0xff] %v13793_v37  ;;  %v13801_v12 = vadd.f32 %v1839_v47, %v13649_v13  ;;  %v13804_v16 = vpop.f32.mrf.mxu1  ;;  %4199 = vmatmul.mubr.bf16.gmra.mxu1 %v3828_v46  ;;  %v13811_v37 = vor.u32 %v3854_v58, %v3853_v55  ;;  %v3805_v47 = vshll.u32 %v13556_v26, 16  ;;  %v3840_v55 = vsel %vm3776_vm12, %v3827_v40, %v3839_v20 }
 0x1c7   : > { %v1841_v11 = vpop.f32.mrf.mxu0  ;;  %4748 = vmatpush1.bf16.msra.mxu1 %v11713_v24  ;;  %4208 = vmatprep.mubr.bf16.mxu1 %v3844_v1  ;;  %v16247_v1 = vld [vmem:[#allocation66_spill] sm:$0xff] }
 0x1c8   : > { %16243 = vst [vmem:[#allocation87_spill] sm:$0xff] %v13801_v12  ;;  %v13807_v9 = vadd.f32 %v1841_v11, %v13661_v39  ;;  %v13809_v49 = vpop.f32.mrf.mxu1  ;;  %4749 = vmatprep.subr.bf16.mxu1 %v11718_v18  ;;  %v3233_v39 = vrot.slane %v13476_v25, 2  ;;  %v16246_v18 = vld [vmem:[#allocation71_spill] sm:$0xff]  ;;  %v3850_v58 = vrot.slane %v16247_v1, 3  ;;  %v3856_v25 = vsel %vm3776_vm12, %v3843_v42, %v13811_v37  ;;  %v16252_v1 = vld [vmem:[#allocation18_spill] sm:$0xff] }
 0x1c9   : > { %v1845_v13 = vpop.f32.mrf.mxu0  ;;  %10620 = vmatmul.mubr.msk.bf16.gmra.mxu0 %vm1151_vm9, %v3228_v8  ;;  %v3849_v8 = vrot.slane %v16246_v18, 2  ;;  %v11727_v11 = vld [vmem:[#allocation4 + $0x724] ss:$8 sps:$4 sm:$0xff]   ;;  %v3804_v12 = vrot.slane %v3802_v50, 2  ;;  %v3807_v38 = vrot.slane %v3805_v47, 3  ;;  %v3810_v43 = vrot.slane %v16252_v1, 3 }
 0x1ca   : > { %16244 = vst [vmem:[#allocation88_spill] sm:$0xff] %v13807_v9  ;;  %v13817_v46 = vadd.f32 %v1845_v13, %v13673_v48  ;;  %3684 = vmatprep.mubr.bf16.mxu0 %v16149_v2  ;;  %v13821_v24 = vpop.f32.mrf.mxu1  ;;  %v16249_v13 = vld [vmem:[#allocation73_spill] sm:$0xff]  ;;  %v16251_v18 = vld [vmem:[#allocation20_spill] sm:$0xff] }
 0x1cb   : > { %v1847_v17 = vpop.f32.mrf.mxu0  ;;  %4750 = vmatpush1.bf16.msra.mxu1 %v11716_v53  ;;  %v16250_v53 = vld [vmem:[#allocation68_spill] sm:$0xff]  ;;  %v3809_v30 = vrot.slane %v16251_v18, 2  ;;  %v11730_v1 = vld [vmem:[#allocation4 + $0x814] ss:$8 sps:$4 sm:$0xff]  }
 0x1cc   : > { %16245 = vst [vmem:[#allocation89_spill] sm:$0xff] %v13817_v46  ;;  %v13827_v26 = vadd.f32 %v1847_v17, %v13681_v59  ;;  %v13829_v48 = vpop.f32.mrf.mxu1  ;;  %4751 = vmatprep.subr.bf16.mxu1 %v11721_v52  ;;  %v3865_v46 = vrot.slane %v16249_v13, 2  ;;  %v3866_v9 = vrot.slane %v16250_v53, 3  ;;  %v3234_v52 = vsel %vm3183_vm11, %v3227_v36, %v3233_v39  ;;  %v11725_v13 = vld [vmem:[#allocation4 + $0x720] ss:$8 sps:$4 sm:$0xff]  }
 0x1cd   : > { %v1849_v40 = vpop.f32.mrf.mxu0  ;;  %v3851_v53 = vor.u32 %v3850_v58, %v3849_v8  ;;  %v3808_v36 = vor.u32 %v3807_v38, %v3804_v12  ;;  %v13849_v39 = vor.u32 %v3810_v43, %v3809_v30  ;;  %v16256_v8 = vld [vmem:[#allocation76_spill] sm:$0xff]  ;;  %v16258_v43 = vld [vmem:[#allocation78_spill] sm:$0xff] }
 0x1ce   : > { %16248 = vst [vmem:[#allocation90_spill] sm:$0xff] %v13827_v26  ;;  %v13838_v59 = vadd.f32 %v1849_v40, %v13692_v61  ;;  %v13841_v17 = vpop.f32.mrf.mxu1  ;;  %4209 = vmatmul.mubr.bf16.gmra.mxu1 %v3840_v55  ;;  %v3867_v18 = vor.u32 %v3866_v9, %v3865_v46  ;;  %v11704_v55 = vld [vmem:[#allocation4 + $0x840] ss:$8 sps:$4 sm:$0xff]   ;;  %v3727_v40 = vld [vmem:[#allocation2 + $0xc0] sm:$0x77]  ;;  %v3861_v58 = vrot.slane %v16256_v8, 2 }
 0x1cf   : > { %v1851_v42 = vpop.f32.mrf.mxu0  ;;  %4752 = vmatpush1.bf16.msra.mxu1 %v11719_v56  ;;  %4218 = vmatprep.mubr.bf16.mxu1 %v3856_v25  ;;  %v3852_v46 = vsel %vm3776_vm12, %v3839_v20, %v3851_v53  ;;  %v11728_v38 = vld [vmem:[#allocation4 + $0x810] ss:$8 sps:$4 sm:$0xff]   ;;  %v3877_v30 = vrot.slane %v16258_v43, 2  ;;  %v16259_v12 = vld [vmem:[#allocation74_spill] sm:$0xff]  ;;  %v3812_v20 = vsel %vm3776_vm12, %v3808_v36, %v13849_v39  ;;  %v4734_v43 = vand.u32 %v11704_v55, %v12700_v7 }
 0x1d0   : > { %16253 = vst [vmem:[#allocation91_spill] sm:$0xff] %v13838_v59  ;;  %v13844_v50 = vadd.f32 %v1851_v42, %v13702_v63  ;;  %v13846_v47 = vpop.f32.mrf.mxu1  ;;  %4753 = vmatprep.subr.bf16.mxu1 %v11727_v11  ;;  %v16257_v11 = vld [vmem:[#allocation72_spill] sm:$0xff]  ;;  %v3868_v8 = vsel %vm3776_vm12, %v13811_v37, %v3867_v18  ;;  %v11724_v59 = vld [vmem:[#allocation4 + $0x834] ss:$8 sps:$4 sm:$0xff]   ;;  %v11731_v26 = vld [vmem:[#allocation4 + $0x800] ss:$8 sps:$4 sm:$0xff]  }
 0x1d1   : > { %v1855_v61 = vpop.f32.mrf.mxu0  ;;  %10621 = vmatmul.mubr.msk.bf16.gmra.mxu0 %vm1151_vm9, %v3234_v52  ;;  %v3862_v25 = vrot.slane %v16257_v11, 3  ;;  %v3878_v52 = vrot.slane %v16259_v12, 3  ;;  %v13869_v11 = vcombine.high %v3727_v40, %v3727_v40 }
 0x1d2   : > { %16254 = vst [vmem:[#allocation92_spill] sm:$0xff] %v13844_v50  ;;  %v13852_v56 = vadd.f32 %v1855_v61, %v13711_v44  ;;  %4291 = vmatprep.mubr.bf16.mxu0 %v16149_v2  ;;  %v13855_v63 = vpop.f32.mrf.mxu1  ;;  %v11733_v61 = vld [vmem:[#allocation4 + $0x804] ss:$8 sps:$4 sm:$0xff]  }
 0x1d3   : > { %v1857_v9 = vpop.f32.mrf.mxu0  ;;  %4754 = vmatpush1.bf16.msra.mxu1 %v11725_v13  ;;  %16261 = vst [vmem:[#allocation95_spill] sm:$0xff] %v13869_v11  ;;  %v13881_v50 = vor.u32 %v3862_v25, %v3861_v58  ;;  %v13883_v36 = vor.u32 %v3878_v52, %v3877_v30 }
 0x1d4   : > { %16255 = vst [vmem:[#allocation93_spill] sm:$0xff] %v13852_v56  ;;  %v13863_v44 = vadd.f32 %v1857_v9, %v13717_v21  ;;  %v13865_v42 = vpop.f32.mrf.mxu1  ;;  %4755 = vmatprep.subr.bf16.mxu1 %v11730_v1  ;;  %v16263_v21 = vld [vmem:[#allocation22_spill] sm:$0xff] }
 0x1d5   : > { %v1859_v13 = vpop.f32.mrf.mxu0  ;;  %v3821_v9 = vrot.slane %v16263_v21, 2  ;;  %v3864_v30 = vsel %vm3776_vm12, %v3851_v53, %v13881_v50  ;;  %v13905_v21 = vcombine.low %v3727_v40, %v3727_v40 }
 0x1d6   : > { %16260 = vst [vmem:[#allocation94_spill] sm:$0xff] %v13863_v44  ;;  %v13875_v12 = vadd.f32 %v1859_v13, %v13726_v41  ;;  %v16264_v44 = vld [vmem:[#allocation21_spill] sm:$0xff]  ;;  %v13879_v1 = vpop.f32.mrf.mxu1  ;;  %4219 = vmatmul.mubr.bf16.gmra.mxu1 %v3852_v46  ;;  %v3898_v46 = vshll.u32 %v13869_v11, 16 }
 0x1d7   : > { %v3822_v56 = vrot.slane %v16264_v44, 3  ;;  %v1861_v37 = vpop.f32.mrf.mxu0  ;;  %4756 = vmatpush2.bf16.msra.mxu1 %v11728_v38  ;;  %4228 = vmatprep.mubr.bf16.mxu1 %v3868_v8  ;;  %v11736_v13 = vld [vmem:[#allocation4 + $0x7f4] ss:$8 sps:$4 sm:$0xff]   ;;  %v3895_v44 = vshrl.u32 %v13869_v11, 16 }
 0x1d8   : > { %16262 = vst [vmem:[#allocation96_spill] sm:$0xff] %v13875_v12  ;;  %v13886_v55 = vadd.f32 %v1861_v37, %v13738_v54  ;;  %v13888_v41 = vpop.f32.mrf.mxu1  ;;  %4757 = vmatprep.subr.bf16.mxu1 %v11733_v61  ;;  %v11722_v54 = vld [vmem:[#allocation4 + $0x830] ss:$8 sps:$4 sm:$0xff]   ;;  %v16268_v37 = vld [vmem:[#allocation79_spill] sm:$0xff]  ;;  %v3900_v12 = vrot.slane %v3898_v46, 3 }
 0x1d9   : > { %16266 = vst [vmem:[#allocation98_spill] sm:$0xff] %v13888_v41  ;;  %v2346_v58 = vpop.f32.mrf.mxu0  ;;  %10663 = vmatmul.mubr.msk.bf16.vlgmr.msra.gmra.mxu0 %vm1151_vm9, %v3812_v20  ;;  %v13895_v8 = vor.u32 %v3822_v56, %v3821_v9  ;;  %v11734_v61 = vld [vmem:[#allocation4 + $0x7f0] ss:$8 sps:$4 sm:$0xff]   ;;  %v3880_v20 = vsel %vm3776_vm12, %v3867_v18, %v13883_v36  ;;  %v11766_v56 = vld [vmem:[#allocation4 + $0x974] ss:$8 sps:$4 sm:$0xff]  }
 0x1da   : > { %16265 = vst [vmem:[#allocation97_spill] sm:$0xff] %v13886_v55  ;;  %v2347_v25 = vadd.f32 %v2346_v58, %v13744_v34  ;;  %4863 = vmatpush1.bf16.msra.mxu0 %v4734_v43  ;;  %4301 = vmatprep.mubr.bf16.mxu0 %v16149_v2  ;;  %v13897_v38 = vpop.f32.mrf.mxu1  ;;  %v3873_v34 = vrot.slane %v16268_v37, 2  ;;  %v16269_v43 = vld [vmem:[#allocation77_spill] sm:$0xff]  ;;  %v3897_v55 = vrot.slane %v3895_v44, 2  ;;  %v16271_v41 = vld [vmem:[#allocation24_spill] sm:$0xff] }
 0x1db   : > { %16267 = vst [vmem:[#allocation99_spill] sm:$0xff] %v13897_v38  ;;  %v2348_v52 = vpop.f32.mrf.mxu0  ;;  %4864 = vmatprep.subr.bf16.mxu0 %v11724_v59  ;;  %4758 = vmatpush2.bf16.msra.mxu1 %v11731_v26  ;;  %v3874_v58 = vrot.slane %v16269_v43, 3  ;;  %v11739_v26 = vld [vmem:[#allocation4 + $0x7e4] ss:$8 sps:$4 sm:$0xff]   ;;  %v16270_v38 = vld [vmem:[#allocation26_spill] sm:$0xff]  ;;  %v3834_v43 = vrot.slane %v16271_v41, 3 }
 0x1dc   : > { %v13908_v9 = vadd.f32 %v2347_v25, %v13605_v10  ;;  %v2349_v11 = vadd.f32 %v2348_v52, %v13749_v19  ;;  %v13911_v53 = vpop.f32.mrf.mxu1  ;;  %4759 = vmatprep.subr.bf16.mxu1 %v11736_v13  ;;  %v11745_v59 = vld [vmem:[#allocation4 + $0x824] ss:$8 sps:$4 sm:$0xff]   ;;  %v3833_v37 = vrot.slane %v16270_v38, 2  ;;  %v3824_v19 = vsel %vm3776_vm12, %v13849_v39, %v13895_v8  ;;  %v11743_v44 = vld [vmem:[#allocation4 + $0x820] ss:$8 sps:$4 sm:$0xff]  }
 0x1dd   : > { %v2350_v18 = vpop.f32.mrf.mxu0  ;;  %v11737_v25 = vld [vmem:[#allocation4 + $0x7e0] ss:$8 sps:$4 sm:$0xff]   ;;  %v13924_v52 = vor.u32 %v3874_v58, %v3873_v34  ;;  %v4404_v58 = vld [vmem:[#allocation2] sm:$0x88] }
 0x1de   : > { %v13916_v40 = vadd.f32 %v2349_v11, %v13616_v6  ;;  %v2351_v10 = vadd.f32 %v2350_v18, %v13757_v62  ;;  %4865 = vmatpush1.bf16.msra.mxu0 %v11722_v54  ;;  %v13922_v13 = vpop.f32.mrf.mxu1  ;;  %4229 = vmatmul.mubr.bf16.gmra.mxu1 %v3864_v30  ;;  %v3886_v6 = vshrl.u32 %v13905_v21, 16  ;;  %v3889_v11 = vshll.u32 %v13905_v21, 16  ;;  %v11742_v30 = vld [vmem:[#allocation4 + $0x7d4] ss:$8 sps:$4 sm:$0xff]   ;;  %v16293_v38 = vld [vmem:[#allocation83_spill] sm:$0xff] }
 0x1df   : > { %v2352_v46 = vpop.f32.mrf.mxu0  ;;  %4760 = vmatpush2.bf16.msra.mxu1 %v11734_v61  ;;  %4238 = vmatprep.mubr.bf16.mxu1 %v3880_v20  ;;  %v5414_v62 = vand.u32 %v11766_v56, %v12700_v7  ;;  %v3901_v61 = vor.u32 %v3900_v12, %v3897_v55  ;;  %v13936_v34 = vor.u32 %v3834_v43, %v3833_v37  ;;  %v11740_v55 = vld [vmem:[#allocation4 + $0x7d0] ss:$8 sps:$4 sm:$0xff]  }
 0x1e0   : > { %v13930_v18 = vadd.f32 %v2351_v10, %v13623_v28  ;;  %v2353_v39 = vadd.f32 %v2352_v46, %v13765_v22  ;;  %v13933_v54 = vpop.f32.mrf.mxu1  ;;  %4761 = vmatprep.subr.bf16.mxu1 %v11739_v26  ;;  %4866 = vmatprep.subr.bf16.mxu0 %v11745_v59  ;;  %v3876_v12 = vsel %vm3776_vm12, %v13881_v50, %v13924_v52  ;;  %v3888_v37 = vrot.slane %v3886_v6, 2  ;;  %v11748_v59 = vld [vmem:[#allocation4 + $0x7c4] ss:$8 sps:$4 sm:$0xff]  }
 0x1e1   : > { %v2356_v20 = vpop.f32.mrf.mxu0  ;;  %10664 = vmatmul.mubr.msk.bf16.gmra.mxu0 %vm1151_vm9, %v3824_v19  ;;  %v3891_v43 = vrot.slane %v3889_v11, 3  ;;  %v3902_v10 = vsel %vm3776_vm12, %v13883_v36, %v3901_v61  ;;  %v12330_v19 = vld [vmem:[#allocation2 + $0xc] sm:$0xff]  ;;  %v3836_v46 = vsel %vm3776_vm12, %v13895_v8, %v13936_v34  ;;  %v16273_v11 = vld [vmem:[#allocation27_spill] sm:$0xff] }
 0x1e2   : > { %v13939_v41 = vadd.f32 %v2353_v39, %v13635_v27  ;;  %v2357_v28 = vadd.f32 %v2356_v20, %v13774_v60  ;;  %4311 = vmatprep.mubr.bf16.mxu0 %v16149_v2  ;;  %v13943_v22 = vpop.f32.mrf.mxu1  ;;  %4867 = vmatpush1.bf16.msra.mxu0 %v11743_v44  ;;  %v13956_v44 = vcombine.high %v4404_v58, %v12330_v19 }
 0x1e3   : > { %v2358_v56 = vpop.f32.mrf.mxu0  ;;  %4762 = vmatpush2.bf16.msra.mxu1 %v11737_v25  ;;  %5539 = vmatprep.subr.bf16.mxu0 %v5414_v62  ;;  %v16272_v25 = vld [vmem:[#allocation28_spill] sm:$0xff]  ;;  %v3846_v62 = vrot.slane %v16273_v11, 3  ;;  %v3892_v61 = vor.u32 %v3891_v43, %v3888_v37 }
 0x1e4   : > { %v13949_v27 = vadd.f32 %v2357_v28, %v13644_v23  ;;  %v2359_v60 = vadd.f32 %v2358_v56, %v13779_v51  ;;  %v13952_v26 = vpop.f32.mrf.mxu1  ;;  %4763 = vmatprep.subr.bf16.mxu1 %v11742_v30  ;;  %v3845_v6 = vrot.slane %v16272_v25, 2  ;;  %v11746_v30 = vld [vmem:[#allocation4 + $0x7c0] ss:$8 sps:$4 sm:$0xff]   ;;  %v4457_v28 = vrot.slane %v13956_v44, 3 }
 0x1e5   : > { %v2360_v50 = vpop.f32.mrf.mxu0  ;;  %v16274_v56 = vld [vmem:[#allocation31_spill] sm:$0xff]  ;;  %v3893_v43 = vsel %vm3776_vm12, %v13924_v52, %v3892_v61 }
 0x1e6   : > { %v13962_v23 = vadd.f32 %v2359_v60, %v13657_v4  ;;  %v2361_v51 = vadd.f32 %v2360_v50, %v13787_v57  ;;  %v13967_v39 = vpop.f32.mrf.mxu1  ;;  %4239 = vmatmul.mubr.bf16.gmra.mxu1 %v3876_v12  ;;  %v11753_v57 = vld [vmem:[#allocation4 + $0x7b4] ss:$8 sps:$4 sm:$0xff]   ;;  %v4458_v60 = vrot.slane %v16274_v56, 3  ;;  %v11754_v61 = vld [vmem:[#allocation4 + $0x7a0] ss:$8 sps:$4 sm:$0xff]  }
 0x1e7   : > { %v2362_v36 = vpop.f32.mrf.mxu0  ;;  %4764 = vmatpush2.bf16.msra.mxu1 %v11740_v55  ;;  %4248 = vmatprep.mubr.bf16.mxu1 %v3902_v10  ;;  %v13987_v10 = vcombine.low %v4404_v58, %v12330_v19 }
 0x1e8   : > { %v13970_v20 = vadd.f32 %v2361_v51, %v13664_v33  ;;  %v2363_v4 = vadd.f32 %v2362_v36, %v13795_v14  ;;  %v13973_v8 = vpop.f32.mrf.mxu1  ;;  %4765 = vmatprep.subr.bf16.mxu1 %v11748_v59  ;;  %v3847_v14 = vor.u32 %v3846_v62, %v3845_v6  ;;  %v11751_v59 = vld [vmem:[#allocation4 + $0x7b0] ss:$8 sps:$4 sm:$0xff]   ;;  %v4459_v6 = vsel %vm4453_vm13, %v4457_v28, %v4458_v60 }
 0x1e9   : > { %v2366_v50 = vpop.f32.mrf.mxu0  ;;  %10665 = vmatmul.mubr.msk.bf16.gmra.mxu0 %vm1151_vm9, %v3836_v46  ;;  %v16275_v36 = vld [vmem:[#allocation33_spill] sm:$0xff]  ;;  %v16277_v28 = vld [vmem:[#allocation32_spill] sm:$0xff] }
 0x1ea   : > { %v13979_v12 = vadd.f32 %v2363_v4, %v13678_v31  ;;  %v2367_v33 = vadd.f32 %v2366_v50, %v13804_v16  ;;  %4321 = vmatprep.mubr.bf16.mxu0 %v16149_v2  ;;  %v13983_v55 = vpop.f32.mrf.mxu1  ;;  %v11756_v16 = vld [vmem:[#allocation4 + $0x7a4] ss:$8 sps:$4 sm:$0xff]   ;;  %v16276_v4 = vld [vmem:[#allocation30_spill] sm:$0xff]  ;;  %v4455_v50 = vrot.slane %v16277_v28, 3 }
 0x1eb   : > { %v2368_v37 = vpop.f32.mrf.mxu0  ;;  %4766 = vmatpush2.bf16.msra.mxu1 %v11746_v30  ;;  %v3857_v30 = vrot.slane %v16275_v36, 2  ;;  %v3858_v56 = vrot.slane %v16276_v4, 3 }
 0x1ec   : > { %v13990_v46 = vadd.f32 %v2367_v33, %v13685_v15  ;;  %v2369_v31 = vadd.f32 %v2368_v37, %v13809_v49  ;;  %v13993_v51 = vpop.f32.mrf.mxu1  ;;  %4767 = vmatprep.subr.bf16.mxu1 %v11753_v57  ;;  %v3848_v15 = vsel %vm3776_vm12, %v13936_v34, %v3847_v14  ;;  %v4454_v57 = vrot.slane %v13987_v10, 3  ;;  %v11760_v34 = vld [vmem:[#allocation4 + $0x8c4] ss:$8 sps:$4 sm:$0xff]  }
 0x1ed   : > { %v2370_v62 = vpop.f32.mrf.mxu0  ;;  %v16278_v37 = vld [vmem:[#allocation39_spill] sm:$0xff] }
 0x1ee   : > { %v13999_v52 = vadd.f32 %v2369_v31, %v13696_v29  ;;  %v2371_v58 = vadd.f32 %v2370_v62, %v13821_v24  ;;  %v14004_v49 = vpop.f32.mrf.mxu1  ;;  %4249 = vmatmul.mubr.bf16.gmra.mxu1 %v3893_v43  ;;  %v4465_v31 = vrot.slane %v16278_v37, 3 }
 0x1ef   : > { %v2372_v19 = vpop.f32.mrf.mxu0  ;;  %4768 = vmatpush2.bf16.msra.mxu1 %v11751_v59  ;;  %4771 = vmatprep.mubr.bf16.mxu1 %v4459_v6  ;;  %v3859_v59 = vor.u32 %v3858_v56, %v3857_v30 }
 0x1f0   : > { %v14009_v33 = vadd.f32 %v2371_v58, %v13705_v0  ;;  %v2373_v29 = vadd.f32 %v2372_v19, %v13829_v48  ;;  %v14012_v24 = vpop.f32.mrf.mxu1  ;;  %4769 = vmatprep.subr.bf16.mxu1 %v11756_v16  ;;  %v4456_v16 = vsel %vm4453_vm13, %v4454_v57, %v4455_v50  ;;  %v11758_v58 = vld [vmem:[#allocation4 + $0x8c0] ss:$8 sps:$4 sm:$0xff]   ;;  %v3869_v57 = vrot.slane %v16195_v35, 2 }
 0x1f1   : > { %v2376_v43 = vpop.f32.mrf.mxu0  ;;  %10666 = vmatmul.mubr.msk.bf16.gmra.mxu0 %vm1151_vm9, %v3848_v15  ;;  %v3860_v28 = vsel %vm3776_vm12, %v3847_v14, %v3859_v59  ;;  %v16285_v35 = vld [vmem:[#allocation98_spill] sm:$0xff] }
 0x1f2   : > { %v14017_v6 = vadd.f32 %v2373_v29, %v13714_v5  ;;  %v2377_v62 = vadd.f32 %v2376_v43, %v13841_v17  ;;  %4331 = vmatprep.mubr.bf16.mxu0 %v16149_v2  ;;  %v14021_v0 = vpop.f32.mrf.mxu1  ;;  %v11763_v5 = vld [vmem:[#allocation4 + $0x8b4] ss:$8 sps:$4 sm:$0xff]   ;;  %v4466_v17 = vsel %vm4453_vm13, %v4458_v60, %v4465_v31  ;;  %v16280_v60 = vld [vmem:[#allocation40_spill] sm:$0xff] }
 0x1f3   : > { %v2378_v48 = vpop.f32.mrf.mxu0  ;;  %4770 = vmatpush2.bf16.msra.mxu1 %v11754_v61 }
 0x1f4   : > { %v14025_v19 = vadd.f32 %v2377_v62, %v13721_v3  ;;  %v2379_v15 = vadd.f32 %v2378_v48, %v13846_v47  ;;  %v14028_v30 = vpop.f32.mrf.mxu1  ;;  %5416 = vmatprep.subr.bf16.mxu1 %v11760_v34  ;;  %v16279_v3 = vld [vmem:[#allocation38_spill] sm:$0xff]  ;;  %v11761_v34 = vld [vmem:[#allocation4 + $0x8b0] ss:$8 sps:$4 sm:$0xff]   ;;  %v4463_v62 = vrot.slane %v16280_v60, 3 }
 0x1f5   : > { %v2380_v56 = vpop.f32.mrf.mxu0  ;;  %v3870_v37 = vrot.slane %v16279_v3, 3  ;;  %v16283_v60 = vld [vmem:[#allocation81_spill] sm:$0xff] }
 0x1f6   : > { %v14033_v29 = vadd.f32 %v2379_v15, %v13732_v32  ;;  %v2381_v61 = vadd.f32 %v2380_v56, %v13855_v63  ;;  %v14038_v43 = vpop.f32.mrf.mxu1  ;;  %4772 = vmatmul.mubr.bf16.vlgmr.msra.gmra.mxu1 %v4456_v16  ;;  %v11769_v63 = vld [vmem:[#allocation4 + $0x8a4] ss:$8 sps:$4 sm:$0xff]  }
 0x1f7   : > { %v2382_v47 = vpop.f32.mrf.mxu0  ;;  %5417 = vmatpush1.bf16.msra.mxu1 %v11758_v58  ;;  %4781 = vmatprep.mubr.bf16.mxu1 %v4466_v17  ;;  %v16281_v15 = vld [vmem:[#allocation47_spill] sm:$0xff]  ;;  %v16282_v16 = vld [vmem:[#allocation80_spill] sm:$0xff] }
 0x1f8   : > { %v14042_v14 = vadd.f32 %v2381_v61, %v13741_v45  ;;  %v2383_v32 = vadd.f32 %v2382_v47, %v13865_v42  ;;  %v14045_v48 = vpop.f32.mrf.mxu1  ;;  %5418 = vmatprep.subr.bf16.mxu1 %v11763_v5  ;;  %v4471_v56 = vrot.slane %v16281_v15, 3  ;;  %v3871_v45 = vor.u32 %v3870_v37, %v3869_v57  ;;  %v11767_v47 = vld [vmem:[#allocation4 + $0x8a0] ss:$8 sps:$4 sm:$0xff]  }
 0x1f9   : > { %v2386_v3 = vpop.f32.mrf.mxu0  ;;  %10667 = vmatmul.mubr.msk.bf16.gmra.mxu0 %vm1151_vm9, %v3860_v28  ;;  %v4464_v5 = vsel %vm4453_vm13, %v4455_v50, %v4463_v62  ;;  %v16286_v57 = vld [vmem:[#allocation54_spill] sm:$0xff]  ;;  %v16290_v50 = vld [vmem:[#allocation99_spill] sm:$0xff] }
 0x1fa   : > { %v14050_v58 = vadd.f32 %v2383_v32, %v16282_v16  ;;  %v2387_v17 = vadd.f32 %v2386_v3, %v13879_v1  ;;  %4341 = vmatprep.mubr.bf16.mxu0 %v16149_v2  ;;  %v14054_v61 = vpop.f32.mrf.mxu1  ;;  %v11772_v32 = vld [vmem:[#allocation4 + $0x894] ss:$8 sps:$4 sm:$0xff]   ;;  %v4472_v1 = vsel %vm4453_vm13, %v4465_v31, %v4471_v56  ;;  %v3881_v37 = vrot.slane %v16286_v57, 2  ;;  %v16287_v16 = vld [vmem:[#allocation48_spill] sm:$0xff] }
 0x1fb   : > { %v2388_v42 = vpop.f32.mrf.mxu0  ;;  %5419 = vmatpush1.bf16.msra.mxu1 %v11761_v34  ;;  %v3882_v36 = vrot.slane %v16287_v16, 3  ;;  %v16288_v34 = vld [vmem:[#allocation82_spill] sm:$0xff]  ;;  %v11770_v31 = vld [vmem:[#allocation4 + $0x890] ss:$8 sps:$4 sm:$0xff]  }
 0x1fc   : > { %v14058_v15 = vadd.f32 %v2387_v17, %v16283_v60  ;;  %v2389_v28 = vadd.f32 %v2388_v42, %v16285_v35  ;;  %v14061_v4 = vpop.f32.mrf.mxu1  ;;  %5420 = vmatprep.subr.bf16.mxu1 %v11769_v63  ;;  %v3872_v17 = vsel %vm3776_vm12, %v3859_v59, %v3871_v45  ;;  %v14071_v60 = vld [vmem:[#allocation2 + $0xc8] ss:$0 sps:$4 sm:$0x77]   ;;  %v11775_v59 = vld [vmem:[#allocation4 + $0x884] ss:$8 sps:$4 sm:$0xff]  }
 0x1fd   : > { %v2390_v3 = vpop.f32.mrf.mxu0  ;;  %16291 = vst [vmem:[#allocation39_spill] sm:$0xff] %v14071_v60  ;;  %v16292_v42 = vld [vmem:[#allocation49_spill] sm:$0xff] }
 0x1fe   : > { %16284 = vst [vmem:[#allocation31_spill] sm:$0xff] %v14058_v15  ;;  %v14067_v11 = vadd.f32 %v2389_v28, %v16288_v34  ;;  %v2391_v25 = vadd.f32 %v2390_v3, %v16290_v50  ;;  %v14073_v35 = vpop.f32.mrf.mxu1  ;;  %4782 = vmatmul.mubr.bf16.gmra.mxu1 %v4464_v5  ;;  %v4469_v57 = vrot.slane %v16292_v42, 3  ;;  %v16295_v3 = vld [vmem:[#allocation55_spill] sm:$0xff]  ;;  %v3883_v5 = vor.u32 %v3882_v36, %v3881_v37 }
 0x1ff   : > { %v2392_v63 = vpop.f32.mrf.mxu0  ;;  %5421 = vmatpush1.bf16.msra.mxu1 %v11767_v47  ;;  %4791 = vmatprep.mubr.bf16.mxu1 %v4472_v1  ;;  %v4477_v50 = vrot.slane %v16295_v3, 3  ;;  %v16296_v47 = vld [vmem:[#allocation84_spill] sm:$0xff]  ;;  %v11773_v42 = vld [vmem:[#allocation4 + $0x880] ss:$8 sps:$4 sm:$0xff]  }
 0x200   : > { %16289 = vst [vmem:[#allocation32_spill] sm:$0xff] %v14067_v11  ;;  %v14077_v16 = vadd.f32 %v2391_v25, %v16293_v38  ;;  %v2393_v28 = vadd.f32 %v2392_v63, %v13911_v53  ;;  %v14080_v34 = vpop.f32.mrf.mxu1  ;;  %5422 = vmatprep.subr.bf16.mxu1 %v11772_v32  ;;  %v3904_v38 = vshrl.u32 %v14071_v60, 16  ;;  %v3907_v53 = vshll.u32 %v14071_v60, 16  ;;  %v16300_v60 = vld [vmem:[#allocation86_spill] sm:$0xff] }
 0x201   : > { %v2396_v11 = vpop.f32.mrf.mxu0  ;;  %10668 = vmatmul.mubr.msk.bf16.gmra.mxu0 %vm1151_vm9, %v3872_v17  ;;  %v4470_v63 = vsel %vm4453_vm13, %v4463_v62, %v4469_v57  ;;  %v16298_v17 = vld [vmem:[#allocation85_spill] sm:$0xff] }
 0x202   : > { %16294 = vst [vmem:[#allocation40_spill] sm:$0xff] %v14077_v16  ;;  %v14085_v15 = vadd.f32 %v2393_v28, %v16296_v47  ;;  %v2397_v1 = vadd.f32 %v2396_v11, %v13922_v13  ;;  %4351 = vmatprep.mubr.bf16.mxu0 %v16149_v2  ;;  %v14091_v25 = vpop.f32.mrf.mxu1  ;;  %v11778_v13 = vld [vmem:[#allocation4 + $0x874] ss:$8 sps:$4 sm:$0xff]   ;;  %v4478_v11 = vsel %vm4453_vm13, %v4471_v56, %v4477_v50  ;;  %v3909_v16 = vrot.slane %v3907_v53, 3  ;;  %v16302_v56 = vld [vmem:[#allocation87_spill] sm:$0xff] }
 0x203   : > { %v2398_v32 = vpop.f32.mrf.mxu0  ;;  %5423 = vmatpush1.bf16.msra.mxu1 %v11770_v31  ;;  %v3884_v47 = vsel %vm3776_vm12, %v3871_v45, %v3883_v5  ;;  %v3906_v31 = vrot.slane %v3904_v38, 2  ;;  %v16304_v38 = vld [vmem:[#allocation59_spill] sm:$0xff] }
 0x204   : > { %16297 = vst [vmem:[#allocation47_spill] sm:$0xff] %v14085_v15  ;;  %v14095_v36 = vadd.f32 %v2397_v1, %v16298_v17  ;;  %v2399_v37 = vadd.f32 %v2398_v32, %v13933_v54  ;;  %v14098_v28 = vpop.f32.mrf.mxu1  ;;  %5424 = vmatprep.subr.bf16.mxu1 %v11775_v59  ;;  %v11776_v32 = vld [vmem:[#allocation4 + $0x870] ss:$8 sps:$4 sm:$0xff]   ;;  %v4483_v53 = vrot.slane %v16304_v38, 3 }
 0x205   : > { %v2400_v3 = vpop.f32.mrf.mxu0  ;;  %v16301_v59 = vld [vmem:[#allocation57_spill] sm:$0xff] }
 0x206   : > { %16299 = vst [vmem:[#allocation80_spill] sm:$0xff] %v14095_v36  ;;  %v14103_v15 = vadd.f32 %v2399_v37, %v16300_v60  ;;  %v2401_v62 = vadd.f32 %v2400_v3, %v13943_v22  ;;  %v14106_v1 = vpop.f32.mrf.mxu1  ;;  %4792 = vmatmul.mubr.bf16.gmra.mxu1 %v4470_v63  ;;  %v4475_v17 = vrot.slane %v16301_v59, 3  ;;  %v11781_v22 = vld [vmem:[#allocation4 + $0x864] ss:$8 sps:$4 sm:$0xff]   ;;  %v3910_v3 = vor.u32 %v3909_v16, %v3906_v31  ;;  %v11779_v59 = vld [vmem:[#allocation4 + $0x860] ss:$8 sps:$4 sm:$0xff]  }
 0x207   : > { %v2402_v54 = vpop.f32.mrf.mxu0  ;;  %5425 = vmatpush1.bf16.msra.mxu1 %v11773_v42  ;;  %4801 = vmatprep.mubr.bf16.mxu1 %v4478_v11  ;;  %v16305_v63 = vld [vmem:[#allocation88_spill] sm:$0xff]  ;;  %v16309_v31 = vld [vmem:[#allocation90_spill] sm:$0xff] }
 0x208   : > { %v14110_v36 = vadd.f32 %v2401_v62, %v16302_v56  ;;  %v2403_v45 = vadd.f32 %v2402_v54, %v13952_v26  ;;  %v14113_v60 = vpop.f32.mrf.mxu1  ;;  %5426 = vmatprep.subr.bf16.mxu1 %v11778_v13  ;;  %v4405_v54 = vld [vmem:[#allocation2 + $0x8] sm:$0x8]  ;;  %v4476_v13 = vsel %vm4453_vm13, %v4469_v57, %v4475_v17  ;;  %v3911_v57 = vsel %vm3776_vm12, %v3883_v5, %v3910_v3  ;;  %v11790_v5 = vld [vmem:[#allocation4 + $0x944] ss:$8 sps:$4 sm:$0xff]  }
 0x209   : > { %v2406_v37 = vpop.f32.mrf.mxu0  ;;  %10669 = vmatmul.mubr.msk.bf16.gmra.mxu0 %vm1151_vm9, %v3884_v47  ;;  %v16307_v56 = vld [vmem:[#allocation89_spill] sm:$0xff] }
 0x20a   : > { %16303 = vst [vmem:[#allocation81_spill] sm:$0xff] %v14110_v36  ;;  %v14118_v42 = vadd.f32 %v2403_v45, %v16305_v63  ;;  %v2407_v11 = vadd.f32 %v2406_v37, %v13967_v39  ;;  %4361 = vmatprep.mubr.bf16.mxu0 %v16149_v2  ;;  %v14122_v62 = vpop.f32.mrf.mxu1  ;;  %v11787_v39 = vld [vmem:[#allocation4 + $0x854] ss:$8 sps:$4 sm:$0xff]   ;;  %v4484_v37 = vsel %vm4453_vm13, %v4477_v50, %v4483_v53 }
 0x20b   : > { %v2408_v26 = vpop.f32.mrf.mxu0  ;;  %5427 = vmatpush1.bf16.msra.mxu1 %v11776_v32 }
 0x20c   : > { %16306 = vst [vmem:[#allocation98_spill] sm:$0xff] %v14118_v42  ;;  %v14126_v38 = vadd.f32 %v2407_v11, %v16307_v56  ;;  %v2409_v47 = vadd.f32 %v2408_v26, %v13973_v8  ;;  %v14129_v45 = vpop.f32.mrf.mxu1  ;;  %5428 = vmatprep.subr.bf16.mxu1 %v11781_v22  ;;  %v12331_v42 = vld [vmem:[#allocation2 + $0x14] sm:$0xf]  ;;  %v11785_v22 = vld [vmem:[#allocation4 + $0x850] ss:$8 sps:$4 sm:$0xff]   ;;  %v16312_v26 = vld [vmem:[#allocation63_spill] sm:$0xff] }
 0x20d   : > { %v2410_v16 = vpop.f32.mrf.mxu0  ;;  %v14137_v36 = vcombine.low %v4405_v54, %v12331_v42  ;;  %v4481_v50 = vrot.slane %v16312_v26, 3  ;;  %v16313_v56 = vld [vmem:[#allocation91_spill] sm:$0xff]  ;;  %v16315_v42 = vld [vmem:[#allocation64_spill] sm:$0xff] }
 0x20e   : > { %16308 = vst [vmem:[#allocation82_spill] sm:$0xff] %v14126_v38  ;;  %v14133_v63 = vadd.f32 %v2409_v47, %v16309_v31  ;;  %v2411_v32 = vadd.f32 %v2410_v16, %v13983_v55  ;;  %v14139_v11 = vpop.f32.mrf.mxu1  ;;  %4802 = vmatmul.mubr.bf16.gmra.mxu1 %v4476_v13  ;;  %v4489_v3 = vrot.slane %v16315_v42, 3  ;;  %v16316_v13 = vld [vmem:[#allocation92_spill] sm:$0xff]  ;;  %v16318_v31 = vld [vmem:[#allocation17_spill] sm:$0xff] }
 0x20f   : > { %16311 = vst [vmem:[#allocation49_spill] sm:$0xff] %v14137_v36  ;;  %v2412_v8 = vpop.f32.mrf.mxu0  ;;  %5429 = vmatpush1.bf16.msra.mxu1 %v11779_v59  ;;  %4811 = vmatprep.mubr.bf16.mxu1 %v4484_v37  ;;  %v4460_v16 = vrot.slane %v14137_v36, 3  ;;  %v4482_v26 = vsel %vm4453_vm13, %v4475_v17, %v4481_v50 }
 0x210   : > { %16310 = vst [vmem:[#allocation99_spill] sm:$0xff] %v14133_v63  ;;  %v14143_v38 = vadd.f32 %v2411_v32, %v16313_v56  ;;  %v2413_v47 = vadd.f32 %v2412_v8, %v13993_v51  ;;  %v14146_v55 = vpop.f32.mrf.mxu1  ;;  %5430 = vmatprep.subr.bf16.mxu1 %v11787_v39  ;;  %v4461_v51 = vrot.slane %v16318_v31, 3  ;;  %v11764_v32 = vld [vmem:[#allocation4 + $0x970] ss:$8 sps:$4 sm:$0xff]   ;;  %v11788_v56 = vld [vmem:[#allocation4 + $0x940] ss:$8 sps:$4 sm:$0xff]  }
 0x211   : > { %v2416_v54 = vpop.f32.mrf.mxu0  ;;  %10670 = vmatmul.mubr.msk.bf16.gmra.mxu0 %vm1151_vm9, %v3911_v57  ;;  %v16319_v57 = vld [vmem:[#allocation93_spill] sm:$0xff]  ;;  %v5411_v63 = vand.u32 %v11764_v32, %v12700_v7  ;;  %v16325_v32 = vld [vmem:[#allocation70_spill] sm:$0xff] }
 0x212   : > { %16314 = vst [vmem:[#allocation83_spill] sm:$0xff] %v14143_v38  ;;  %v14151_v59 = vadd.f32 %v2413_v47, %v16316_v13  ;;  %v2417_v37 = vadd.f32 %v2416_v54, %v14004_v49  ;;  %4884 = vmatprep.mubr.bf16.mxu0 %v16149_v2  ;;  %v14157_v8 = vpop.f32.mrf.mxu1  ;;  %v11793_v54 = vld [vmem:[#allocation4 + $0x934] ss:$8 sps:$4 sm:$0xff]   ;;  %v4490_v13 = vsel %vm4453_vm13, %v4483_v53, %v4489_v3 }
 0x213   : > { %v2418_v39 = vpop.f32.mrf.mxu0  ;;  %5431 = vmatpush1.bf16.msra.mxu1 %v11785_v22  ;;  %v4462_v17 = vsel %vm4453_vm13, %v4460_v16, %v4461_v51  ;;  %v11796_v16 = vld [vmem:[#allocation4 + $0x924] ss:$8 sps:$4 sm:$0xff]  }
 0x214   : > { %16317 = vst [vmem:[#allocation55_spill] sm:$0xff] %v14151_v59  ;;  %v14161_v42 = vadd.f32 %v2417_v37, %v16319_v57  ;;  %v2419_v47 = vadd.f32 %v2418_v39, %v14012_v24  ;;  %v14164_v49 = vpop.f32.mrf.mxu1  ;;  %5432 = vmatprep.subr.bf16.mxu1 %v11790_v5  ;;  %v16321_v59 = vld [vmem:[#allocation94_spill] sm:$0xff]  ;;  %v11784_v39 = vld [vmem:[#allocation4 + $0x964] ss:$8 sps:$4 sm:$0xff]   ;;  %v11791_v5 = vld [vmem:[#allocation4 + $0x930] ss:$8 sps:$4 sm:$0xff]  }
 0x215   : > { %v2420_v31 = vpop.f32.mrf.mxu0  ;;  %v16322_v57 = vld [vmem:[#allocation69_spill] sm:$0xff] }
 0x216   : > { %16320 = vst [vmem:[#allocation84_spill] sm:$0xff] %v14161_v42  ;;  %v14168_v38 = vadd.f32 %v2419_v47, %v16321_v59  ;;  %v2421_v22 = vadd.f32 %v2420_v31, %v14021_v0  ;;  %v14173_v37 = vpop.f32.mrf.mxu1  ;;  %4812 = vmatmul.mubr.bf16.gmra.mxu1 %v4482_v26  ;;  %v4487_v53 = vrot.slane %v16322_v57, 3  ;;  %v16323_v42 = vld [vmem:[#allocation96_spill] sm:$0xff]  ;;  %v16326_v26 = vld [vmem:[#allocation97_spill] sm:$0xff]  ;;  %v11794_v47 = vld [vmem:[#allocation4 + $0x920] ss:$8 sps:$4 sm:$0xff]  }
 0x217   : > { %v2422_v24 = vpop.f32.mrf.mxu0  ;;  %5433 = vmatpush2.bf16.msra.mxu1 %v11788_v56  ;;  %4821 = vmatprep.mubr.bf16.mxu1 %v4490_v13 }
 0x218   : > { %v14177_v36 = vadd.f32 %v2421_v22, %v16323_v42  ;;  %v2423_v59 = vadd.f32 %v2422_v24, %v14028_v30  ;;  %v14180_v0 = vpop.f32.mrf.mxu1  ;;  %5434 = vmatprep.subr.bf16.mxu1 %v11793_v54  ;;  %v16328_v42 = vld [vmem:[#allocation19_spill] sm:$0xff]  ;;  %v4488_v57 = vsel %vm4453_vm13, %v4481_v50, %v4487_v53 }
 0x219   : > { %v3023_v31 = vpop.f32.mrf.mxu0  ;;  %10712 = vmatmul.mubr.msk.bf16.vlgmr.msra.gmra.mxu0 %vm1151_vm9, %v4462_v17  ;;  %v11782_v30 = vld [vmem:[#allocation4 + $0x960] ss:$8 sps:$4 sm:$0xff]   ;;  %v11823_v17 = vld [vmem:[#allocation4 + $0xaa4] ss:$8 sps:$4 sm:$0xff]  }
 0x21a   : > { %16324 = vst [vmem:[#allocation85_spill] sm:$0xff] %v14177_v36  ;;  %v14185_v56 = vadd.f32 %v2423_v59, %v16326_v26  ;;  %v3024_v13 = vadd.f32 %v3023_v31, %v14038_v43  ;;  %5540 = vmatpush1.bf16.msra.mxu0 %v5411_v63  ;;  %4894 = vmatprep.mubr.bf16.mxu0 %v16149_v2  ;;  %v14190_v24 = vpop.f32.mrf.mxu1  ;;  %v11799_v31 = vld [vmem:[#allocation4 + $0x914] ss:$8 sps:$4 sm:$0xff]   ;;  %v16330_v26 = vrot.slane %v16325_v32, 3 }
 0x21b   : > { %v3025_v54 = vpop.f32.mrf.mxu0  ;;  %5541 = vmatprep.subr.bf16.mxu0 %v11784_v39  ;;  %5435 = vmatpush2.bf16.msra.mxu1 %v11791_v5 }
 0x21c   : > { %16327 = vst [vmem:[#allocation86_spill] sm:$0xff] %v14185_v56  ;;  %v14194_v59 = vadd.f32 %v3024_v13, %v13908_v9  ;;  %v3026_v43 = vadd.f32 %v3025_v54, %v14045_v48  ;;  %v14197_v63 = vpop.f32.mrf.mxu1  ;;  %5436 = vmatprep.subr.bf16.mxu1 %v11796_v16  ;;  %v4496_v22 = vsel %vm4453_vm13, %v4489_v3, %v16330_v26  ;;  %v11805_v56 = vld [vmem:[#allocation4 + $0x954] ss:$8 sps:$4 sm:$0xff]   ;;  %v16331_v9 = vrot.slane %v16328_v42, 3  ;;  %v16332_v16 = vld [vmem:[#allocation75_spill] sm:$0xff] }
 0x21d   : > { %v3027_v39 = vpop.f32.mrf.mxu0  ;;  %v4493_v54 = vrot.slane %v16332_v16, 3  ;;  %v11797_v3 = vld [vmem:[#allocation4 + $0x910] ss:$8 sps:$4 sm:$0xff]  }
 0x21e   : > { %16329 = vst [vmem:[#allocation57_spill] sm:$0xff] %v14194_v59  ;;  %v14203_v5 = vadd.f32 %v3026_v43, %v13916_v40  ;;  %v3028_v50 = vadd.f32 %v3027_v39, %v14054_v61  ;;  %v4468_v13 = vsel %vm4453_vm13, %v4461_v51, %v16331_v9  ;;  %5542 = vmatpush1.bf16.msra.mxu0 %v11782_v30  ;;  %v14209_v48 = vpop.f32.mrf.mxu1  ;;  %v11803_v59 = vld [vmem:[#allocation4 + $0x950] ss:$8 sps:$4 sm:$0xff]   ;;  %v5060_v40 = vshrl.u32 %v13956_v44, 16  ;;  %v16333_v39 = vld [vmem:[#allocation95_spill] sm:$0xff] }
 0x21f   : > { %4822 = vmatmul.mubr.bf16.gmra.mxu1 %v4488_v57  ;;  %v3029_v36 = vpop.f32.mrf.mxu0  ;;  %v5063_v43 = vshll.u32 %v13956_v44, 16  ;;  %v5969_v61 = vand.u32 %v11823_v17, %v12700_v7  ;;  %v11802_v57 = vld [vmem:[#allocation4 + $0x904] ss:$8 sps:$4 sm:$0xff]   ;;  %5543 = vmatprep.subr.bf16.mxu0 %v11805_v56 }
 0x220   : > { %5437 = vmatpush2.bf16.msra.mxu1 %v11794_v47  ;;  %4831 = vmatprep.mubr.bf16.mxu1 %v4496_v22  ;;  %v14216_v26 = vadd.f32 %v3028_v50, %v13930_v18  ;;  %v3030_v51 = vadd.f32 %v3029_v36, %v14061_v4  ;;  %v14219_v30 = vpop.f32.mrf.mxu1  ;;  %v4501_v47 = vrot.slane %v16333_v39, 3  ;;  %v16335_v18 = vld [vmem:[#allocation23_spill] sm:$0xff]  ;;  %v4494_v36 = vsel %vm4453_vm13, %v4487_v53, %v4493_v54  ;;  %v16337_v39 = vld [vmem:[#allocation34_spill] sm:$0xff] }
 0x221   : > { %5438 = vmatprep.subr.bf16.mxu1 %v11799_v31  ;;  %v3033_v9 = vpop.f32.mrf.mxu0  ;;  %10713 = vmatmul.mubr.msk.bf16.gmra.mxu0 %vm1151_vm9, %v4468_v13  ;;  %v11800_v31 = vld [vmem:[#allocation4 + $0x900] ss:$8 sps:$4 sm:$0xff]   ;;  %v5062_v50 = vrot.slane %v5060_v40, 3  ;;  %v5065_v13 = vrot.slane %v5063_v43, 4  ;;  %v11808_v53 = vld [vmem:[#allocation4 + $0x8f4] ss:$8 sps:$4 sm:$0xff]  }
 0x222   : > { %v14224_v22 = vadd.f32 %v3030_v51, %v13939_v41  ;;  %v3034_v44 = vadd.f32 %v3033_v9, %v14073_v35  ;;  %4904 = vmatprep.mubr.bf16.mxu0 %v16149_v2  ;;  %v14229_v4 = vpop.f32.mrf.mxu1  ;;  %5544 = vmatpush1.bf16.msra.mxu0 %v11803_v59  ;;  %v16336_v41 = vld [vmem:[#allocation37_spill] sm:$0xff]  ;;  %v5068_v35 = vrot.slane %v16337_v39, 4  ;;  %v16338_v59 = vrot.slane %v16325_v32, 3 }
 0x223   : > { %v3035_v56 = vpop.f32.mrf.mxu0  ;;  %v5067_v51 = vrot.slane %v16336_v41, 3  ;;  %6094 = vmatprep.subr.bf16.mxu0 %v5969_v61  ;;  %v5048_v43 = vshrl.u32 %v13987_v10, 16  ;;  %v5051_v41 = vshll.u32 %v13987_v10, 16  ;;  %v4499_v10 = vrot.slane %v13905_v21, 3 }
 0x224   : > { %16334 = vst [vmem:[#allocation87_spill] sm:$0xff] %v14224_v22  ;;  %5439 = vmatpush2.bf16.msra.mxu1 %v11797_v3  ;;  %v14237_v9 = vadd.f32 %v3034_v44, %v13949_v27  ;;  %v3036_v17 = vadd.f32 %v3035_v56, %v14080_v34  ;;  %v14240_v22 = vpop.f32.mrf.mxu1  ;;  %v4502_v3 = vsel %vm4453_vm13, %v16338_v59, %v4501_v47  ;;  %v16339_v34 = vrot.slane %v16335_v18, 3  ;;  %v11806_v47 = vld [vmem:[#allocation4 + $0x8f0] ss:$8 sps:$4 sm:$0xff]   ;;  %v11811_v59 = vld [vmem:[#allocation4 + $0x8e4] ss:$8 sps:$4 sm:$0xff]  }
 0x225   : > { %5440 = vmatprep.subr.bf16.mxu1 %v11802_v57  ;;  %v3037_v40 = vpop.f32.mrf.mxu0  ;;  %v16340_v44 = vrot.slane %v16328_v42, 3  ;;  %v5066_v39 = vor.u32 %v5065_v13, %v5062_v50  ;;  %v5053_v21 = vrot.slane %v5051_v41, 4  ;;  %v16342_v13 = vld [vmem:[#allocation42_spill] sm:$0xff] }
 0x226   : > { %v14248_v61 = vadd.f32 %v3036_v17, %v13962_v23  ;;  %v3038_v27 = vadd.f32 %v3037_v40, %v14091_v25  ;;  %v14256_v56 = vpop.f32.mrf.mxu1  ;;  %v14259_v23 = vor.u32 %v5068_v35, %v5067_v51  ;;  %v5050_v40 = vrot.slane %v5048_v43, 3  ;;  %v16343_v35 = vld [vmem:[#allocation35_spill] sm:$0xff] }
 0x227   : > { %v4474_v57 = vsel %vm4453_vm13, %v16340_v44, %v16339_v34  ;;  %4832 = vmatmul.mubr.bf16.gmra.mxu1 %v4494_v36  ;;  %v3039_v32 = vpop.f32.mrf.mxu0  ;;  %v5055_v51 = vrot.slane %v16342_v13, 3  ;;  %v4500_v43 = vsel %vm4453_vm13, %v4493_v54, %v4499_v10  ;;  %v11809_v41 = vld [vmem:[#allocation4 + $0x8e0] ss:$8 sps:$4 sm:$0xff]   ;;  %v16346_v54 = vrot.slane %v16335_v18, 3 }
 0x228   : > { %5441 = vmatpush2.bf16.msra.mxu1 %v11800_v31  ;;  %4841 = vmatprep.mubr.bf16.mxu1 %v4502_v3  ;;  %v14262_v25 = vadd.f32 %v3038_v27, %v13970_v20  ;;  %v3040_v17 = vadd.f32 %v3039_v32, %v14098_v28  ;;  %v14265_v42 = vpop.f32.mrf.mxu1  ;;  %v16341_v31 = vld [vmem:[#allocation25_spill] sm:$0xff] }
 0x229   : > { %5442 = vmatprep.subr.bf16.mxu1 %v11808_v53  ;;  %v3043_v36 = vpop.f32.mrf.mxu0  ;;  %10714 = vmatmul.mubr.msk.bf16.gmra.mxu0 %vm1151_vm9, %v4474_v57  ;;  %v4479_v3 = vrot.slane %v16341_v31, 3  ;;  %v5056_v53 = vrot.slane %v16343_v35, 4  ;;  %v11814_v57 = vld [vmem:[#allocation4 + $0x8d4] ss:$8 sps:$4 sm:$0xff]   ;;  %v11812_v35 = vld [vmem:[#allocation4 + $0x8d0] ss:$8 sps:$4 sm:$0xff]  }
 0x22a   : > { %v14270_v50 = vadd.f32 %v3040_v17, %v13979_v12  ;;  %v3044_v20 = vadd.f32 %v3043_v36, %v14106_v1  ;;  %4914 = vmatprep.mubr.bf16.mxu0 %v16149_v2  ;;  %v14274_v28 = vpop.f32.mrf.mxu1  ;;  %v5070_v12 = vsel %vm5046_vm14, %v5066_v39, %v14259_v23  ;;  %v16344_v32 = vld [vmem:[#allocation45_spill] sm:$0xff] }
 0x22b   : > { %v3045_v27 = vpop.f32.mrf.mxu0  ;;  %v5087_v17 = vrot.slane %v16344_v32, 3  ;;  %v4480_v10 = vsel %vm4453_vm13, %v16346_v54, %v4479_v3  ;;  %v11826_v31 = vld [vmem:[#allocation4 + $0x9d4] ss:$8 sps:$4 sm:$0xff]  }
 0x22c   : > { %5443 = vmatpush2.bf16.msra.mxu1 %v11806_v47  ;;  %v14284_v1 = vadd.f32 %v3044_v20, %v13990_v46  ;;  %v3046_v34 = vadd.f32 %v3045_v27, %v14113_v60  ;;  %v14287_v44 = vpop.f32.mrf.mxu1  ;;  %v16345_v47 = vld [vmem:[#allocation41_spill] sm:$0xff]  ;;  %v5057_v20 = vor.u32 %v5056_v53, %v5055_v51 }
 0x22d   : > { %5444 = vmatprep.subr.bf16.mxu1 %v11811_v59  ;;  %v5088_v36 = vrot.slane %v16345_v47, 4  ;;  %v3047_v16 = vpop.f32.mrf.mxu0  ;;  %v5054_v59 = vor.u32 %v5053_v21, %v5050_v40  ;;  %v16347_v51 = vld [vmem:[#allocation29_spill] sm:$0xff] }
 0x22e   : > { %v14297_v46 = vadd.f32 %v3046_v34, %v13999_v52  ;;  %v3048_v60 = vadd.f32 %v3047_v16, %v14122_v62  ;;  %v14300_v39 = vpop.f32.mrf.mxu1  ;;  %v11817_v52 = vld [vmem:[#allocation4 + $0x9f4] ss:$8 sps:$4 sm:$0xff]  }
 0x22f   : > { %4842 = vmatmul.mubr.bf16.gmra.mxu1 %v4500_v43  ;;  %v3049_v13 = vpop.f32.mrf.mxu0  ;;  %v5089_v34 = vor.u32 %v5088_v36, %v5087_v17  ;;  %v16349_v17 = vld [vmem:[#allocation44_spill] sm:$0xff]  ;;  %v16350_v36 = vld [vmem:[#allocation53_spill] sm:$0xff]  ;;  %v16351_v16 = vld [vmem:[#allocation50_spill] sm:$0xff] }
 0x230   : > { %5445 = vmatpush2.bf16.msra.mxu1 %v11809_v41  ;;  %5448 = vmatprep.mubr.bf16.mxu1 %v5070_v12  ;;  %v14303_v27 = vadd.f32 %v3048_v60, %v14009_v33  ;;  %v3050_v18 = vadd.f32 %v3049_v13, %v14129_v45  ;;  %v14306_v32 = vpop.f32.mrf.mxu1  ;;  %v4485_v33 = vrot.slane %v16347_v51, 3  ;;  %v5058_v45 = vsel %vm5046_vm14, %v5054_v59, %v5057_v20  ;;  %v11815_v41 = vld [vmem:[#allocation4 + $0x9f0] ss:$8 sps:$4 sm:$0xff]   ;;  %v16348_v12 = vld [vmem:[#allocation51_spill] sm:$0xff] }
 0x231   : > { %5446 = vmatprep.subr.bf16.mxu1 %v11814_v57  ;;  %v3053_v62 = vpop.f32.mrf.mxu0  ;;  %10715 = vmatmul.mubr.msk.bf16.gmra.mxu0 %vm1151_vm9, %v4480_v10  ;;  %v5083_v57 = vrot.slane %v16348_v12, 3  ;;  %v5084_v47 = vrot.slane %v16349_v17, 4  ;;  %v5100_v54 = vrot.slane %v16351_v16, 4  ;;  %v11820_v59 = vld [vmem:[#allocation4 + $0x9e4] ss:$8 sps:$4 sm:$0xff]   ;;  %v5090_v13 = vsel %vm5046_vm14, %v14259_v23, %v5089_v34  ;;  %v16355_v17 = vld [vmem:[#allocation58_spill] sm:$0xff] }
 0x232   : > { %v14310_v40 = vadd.f32 %v3050_v18, %v14017_v6  ;;  %v3054_v21 = vadd.f32 %v3053_v62, %v14139_v11  ;;  %4924 = vmatprep.mubr.bf16.mxu0 %v16149_v2  ;;  %v14315_v53 = vpop.f32.mrf.mxu1  ;;  %v5099_v6 = vrot.slane %v16350_v36, 3 }
 0x233   : > { %v3055_v43 = vpop.f32.mrf.mxu0  ;;  %v5085_v51 = vor.u32 %v5084_v47, %v5083_v57  ;;  %v16356_v47 = vld [vmem:[#allocation52_spill] sm:$0xff] }
 0x234   : > { %5447 = vmatpush2.bf16.msra.mxu1 %v11812_v35  ;;  %v14323_v11 = vadd.f32 %v3054_v21, %v14025_v19  ;;  %v3056_v10 = vadd.f32 %v3055_v43, %v14146_v55  ;;  %v14326_v60 = vpop.f32.mrf.mxu1  ;;  %v4486_v19 = vsel %vm4453_vm13, %v4479_v3, %v4485_v33  ;;  %v14339_v43 = vor.u32 %v5100_v54, %v5099_v6  ;;  %v11824_v54 = vld [vmem:[#allocation4 + $0x9d0] ss:$8 sps:$4 sm:$0xff]  }
 0x235   : > { %5971 = vmatprep.subr.bf16.mxu1 %v11817_v52  ;;  %v3057_v35 = vpop.f32.mrf.mxu0  ;;  %v11818_v52 = vld [vmem:[#allocation4 + $0x9e0] ss:$8 sps:$4 sm:$0xff]   ;;  %v5096_v36 = vrot.slane %v16356_v47, 4  ;;  %v5086_v16 = vsel %vm5046_vm14, %v5057_v20, %v5085_v51  ;;  %v16363_v47 = vld [vmem:[#allocation40_spill] sm:$0xff] }
 0x236   : > { %v14331_v18 = vadd.f32 %v3056_v10, %v14033_v29  ;;  %v3058_v62 = vadd.f32 %v3057_v35, %v14157_v8  ;;  %v14337_v21 = vpop.f32.mrf.mxu1  ;;  %v5102_v10 = vsel %vm5046_vm14, %v5089_v34, %v14339_v43  ;;  %v11829_v35 = vld [vmem:[#allocation4 + $0x9c4] ss:$8 sps:$4 sm:$0xff]  }
 0x237   : > { %5449 = vmatmul.mubr.bf16.vlgmr.msra.gmra.mxu1 %v5058_v45  ;;  %v3059_v55 = vpop.f32.mrf.mxu0  ;;  %v16353_v45 = vld [vmem:[#allocation36_spill] sm:$0xff] }
 0x238   : > { %5972 = vmatpush1.bf16.msra.mxu1 %v11815_v41  ;;  %5458 = vmatprep.mubr.bf16.mxu1 %v5090_v13  ;;  %v14342_v23 = vadd.f32 %v3058_v62, %v14042_v14  ;;  %v3060_v29 = vadd.f32 %v3059_v55, %v14164_v49  ;;  %v14345_v8 = vpop.f32.mrf.mxu1  ;;  %v4491_v12 = vrot.slane %v16353_v45, 3  ;;  %v5095_v49 = vrot.slane %v16355_v17, 3  ;;  %v16359_v62 = vld [vmem:[#allocation61_spill] sm:$0xff]  ;;  %v16360_v55 = vld [vmem:[#allocation56_spill] sm:$0xff] }
 0x239   : > { %5973 = vmatprep.subr.bf16.mxu1 %v11820_v59  ;;  %v3063_v3 = vpop.f32.mrf.mxu0  ;;  %10716 = vmatmul.mubr.msk.bf16.gmra.mxu0 %vm1151_vm9, %v4486_v19  ;;  %v5111_v19 = vrot.slane %v16359_v62, 3 }
 0x23a   : > { %16352 = vst [vmem:[#allocation59_spill] sm:$0xff] %v14342_v23  ;;  %v14350_v41 = vadd.f32 %v3060_v29, %v14050_v58  ;;  %v3064_v57 = vadd.f32 %v3063_v3, %v14173_v37  ;;  %4934 = vmatprep.mubr.bf16.mxu0 %v16149_v2  ;;  %v14354_v14 = vpop.f32.mrf.mxu1  ;;  %v16357_v58 = vld [vmem:[#allocation31_spill] sm:$0xff]  ;;  %v5112_v29 = vrot.slane %v16360_v55, 4  ;;  %v16361_v3 = vld [vmem:[#allocation32_spill] sm:$0xff]  ;;  %v4492_v34 = vsel %vm4453_vm13, %v4485_v33, %v4491_v12 }
 0x23b   : > { %v3065_v6 = vpop.f32.mrf.mxu0  ;;  %v16365_v33 = vld [vmem:[#allocation47_spill] sm:$0xff] }
 0x23c   : > { %16354 = vst [vmem:[#allocation88_spill] sm:$0xff] %v14350_v41  ;;  %5974 = vmatpush1.bf16.msra.mxu1 %v11818_v52  ;;  %v14362_v59 = vadd.f32 %v3064_v57, %v16357_v58  ;;  %v3066_v37 = vadd.f32 %v3065_v6, %v14180_v0  ;;  %v14365_v13 = vpop.f32.mrf.mxu1  ;;  %v5097_v0 = vor.u32 %v5096_v36, %v5095_v49  ;;  %v16367_v36 = vld [vmem:[#allocation43_spill] sm:$0xff]  ;;  %v16388_v41 = vld [vmem:[#allocation18_spill] sm:$0xff] }
 0x23d   : > { %5975 = vmatprep.subr.bf16.mxu1 %v11826_v31  ;;  %v3067_v52 = vpop.f32.mrf.mxu0  ;;  %v11827_v31 = vld [vmem:[#allocation4 + $0x9c0] ss:$8 sps:$4 sm:$0xff]  }
 0x23e   : > { %16358 = vst [vmem:[#allocation89_spill] sm:$0xff] %v14362_v59  ;;  %v14370_v20 = vadd.f32 %v3066_v37, %v16361_v3  ;;  %v3068_v45 = vadd.f32 %v3067_v52, %v14190_v24  ;;  %v14374_v57 = vpop.f32.mrf.mxu1  ;;  %v11832_v37 = vld [vmem:[#allocation4 + $0x9b4] ss:$8 sps:$4 sm:$0xff]   ;;  %v5113_v24 = vor.u32 %v5112_v29, %v5111_v19  ;;  %v16369_v3 = vld [vmem:[#allocation60_spill] sm:$0xff]  ;;  %v16389_v23 = vld [vmem:[#allocation99_spill] sm:$0xff] }
 0x23f   : > { %5459 = vmatmul.mubr.bf16.gmra.mxu1 %v5086_v16  ;;  %v3069_v17 = vpop.f32.mrf.mxu0  ;;  %v16368_v19 = vld [vmem:[#allocation65_spill] sm:$0xff]  ;;  %v16387_v59 = vld [vmem:[#allocation20_spill] sm:$0xff] }
 0x240   : > { %16362 = vst [vmem:[#allocation90_spill] sm:$0xff] %v14370_v20  ;;  %5976 = vmatpush1.bf16.msra.mxu1 %v11824_v54  ;;  %5468 = vmatprep.mubr.bf16.mxu1 %v5102_v10  ;;  %v14377_v6 = vadd.f32 %v3068_v45, %v16363_v47  ;;  %v3070_v58 = vadd.f32 %v3069_v17, %v14197_v63  ;;  %v14380_v62 = vpop.f32.mrf.mxu1  ;;  %v5107_v29 = vrot.slane %v16368_v19, 3  ;;  %v5108_v45 = vrot.slane %v16369_v3, 4  ;;  %v16371_v47 = vld [vmem:[#allocation62_spill] sm:$0xff] }
 0x241   : > { %5977 = vmatprep.subr.bf16.mxu1 %v11829_v35  ;;  %v3073_v55 = vpop.f32.mrf.mxu0  ;;  %10717 = vmatmul.mubr.msk.bf16.gmra.mxu0 %vm1151_vm9, %v4492_v34  ;;  %v5098_v63 = vsel %vm5046_vm14, %v5085_v51, %v5097_v0  ;;  %v11830_v35 = vld [vmem:[#allocation4 + $0x9b0] ss:$8 sps:$4 sm:$0xff]   ;;  %v16370_v34 = vld [vmem:[#allocation67_spill] sm:$0xff] }
 0x242   : > { %16364 = vst [vmem:[#allocation63_spill] sm:$0xff] %v14377_v6  ;;  %v14384_v16 = vadd.f32 %v3070_v58, %v16365_v33  ;;  %v3074_v49 = vadd.f32 %v3073_v55, %v14209_v48  ;;  %4944 = vmatprep.mubr.bf16.mxu0 %v16149_v2  ;;  %v14389_v10 = vpop.f32.mrf.mxu1  ;;  %v5123_v17 = vrot.slane %v16370_v34, 3  ;;  %v5124_v58 = vrot.slane %v16371_v47, 4  ;;  %v16372_v48 = vld [vmem:[#allocation80_spill] sm:$0xff] }
 0x243   : > { %v3075_v52 = vpop.f32.mrf.mxu0  ;;  %v11835_v51 = vld [vmem:[#allocation4 + $0x9a4] ss:$8 sps:$4 sm:$0xff]   ;;  %v16375_v34 = vrot.slane %v16367_v36, 3 }
 0x244   : > { %16366 = vst [vmem:[#allocation91_spill] sm:$0xff] %v14384_v16  ;;  %5978 = vmatpush1.bf16.msra.mxu1 %v11827_v31  ;;  %v14397_v55 = vadd.f32 %v3074_v49, %v16372_v48  ;;  %v3076_v33 = vadd.f32 %v3075_v52, %v14219_v30  ;;  %v14400_v54 = vpop.f32.mrf.mxu1  ;;  %v5114_v31 = vsel %vm5046_vm14, %v14339_v43, %v5113_v24  ;;  %v16376_v48 = vld [vmem:[#allocation81_spill] sm:$0xff] }
 0x245   : > { %5979 = vmatprep.subr.bf16.mxu1 %v11832_v37  ;;  %v3077_v16 = vpop.f32.mrf.mxu0  ;;  %v4498_v49 = vsel %vm4453_vm13, %v4491_v12, %v16375_v34  ;;  %v11833_v37 = vld [vmem:[#allocation4 + $0x9a0] ss:$8 sps:$4 sm:$0xff]   ;;  %v14413_v52 = vor.u32 %v5108_v45, %v5107_v29  ;;  %v14415_v43 = vor.u32 %v5124_v58, %v5123_v17  ;;  %v11838_v12 = vld [vmem:[#allocation4 + $0x994] ss:$8 sps:$4 sm:$0xff]  }
 0x246   : > { %16373 = vst [vmem:[#allocation64_spill] sm:$0xff] %v14397_v55  ;;  %v14405_v19 = vadd.f32 %v3076_v33, %v14103_v15  ;;  %v3078_v3 = vadd.f32 %v3077_v16, %v14229_v4  ;;  %v14411_v47 = vpop.f32.mrf.mxu1  ;;  %v16379_v29 = vld [vmem:[#allocation98_spill] sm:$0xff]  ;;  %v16381_v58 = vld [vmem:[#allocation39_spill] sm:$0xff] }
 0x247   : > { %5469 = vmatmul.mubr.bf16.gmra.mxu1 %v5098_v63  ;;  %v3079_v30 = vpop.f32.mrf.mxu0  ;;  %v16378_v63 = vld [vmem:[#allocation49_spill] sm:$0xff]  ;;  %v5110_v34 = vsel %vm5046_vm14, %v5097_v0, %v14413_v52  ;;  %v16386_v0 = vld [vmem:[#allocation68_spill] sm:$0xff] }
 0x248   : > { %16374 = vst [vmem:[#allocation92_spill] sm:$0xff] %v14405_v19  ;;  %5980 = vmatpush1.bf16.msra.mxu1 %v11830_v35  ;;  %5478 = vmatprep.mubr.bf16.mxu1 %v5114_v31  ;;  %v14418_v15 = vadd.f32 %v3078_v3, %v16376_v48  ;;  %v3080_v4 = vadd.f32 %v3079_v30, %v14240_v22  ;;  %v14421_v16 = vpop.f32.mrf.mxu1  ;;  %v5072_v35 = vshrl.u32 %v16378_v63, 16  ;;  %v5075_v31 = vshll.u32 %v16378_v63, 16  ;;  %v16382_v48 = vld [vmem:[#allocation71_spill] sm:$0xff]  ;;  %v16383_v63 = vld [vmem:[#allocation66_spill] sm:$0xff] }
 0x249   : > { %5981 = vmatprep.subr.bf16.mxu1 %v11835_v51  ;;  %v3083_v33 = vpop.f32.mrf.mxu0  ;;  %10718 = vmatmul.mubr.msk.bf16.gmra.mxu0 %vm1151_vm9, %v4498_v49  ;;  %v4503_v22 = vrot.slane %v16381_v58, 3  ;;  %v11836_v49 = vld [vmem:[#allocation4 + $0x990] ss:$8 sps:$4 sm:$0xff]   ;;  %v5126_v30 = vsel %vm5046_vm14, %v5113_v24, %v14415_v43  ;;  %v5136_v55 = vrot.slane %v16386_v0, 4 }
 0x24a   : > { %16377 = vst [vmem:[#allocation17_spill] sm:$0xff] %v14418_v15  ;;  %v14427_v45 = vadd.f32 %v3080_v4, %v16379_v29  ;;  %v3084_v17 = vadd.f32 %v3083_v33, %v14256_v56  ;;  %4954 = vmatprep.mubr.bf16.mxu0 %v16149_v2  ;;  %v14432_v3 = vpop.f32.mrf.mxu1  ;;  %v5119_v4 = vrot.slane %v16382_v48, 3  ;;  %v5120_v29 = vrot.slane %v16383_v63, 4  ;;  %v16384_v56 = vld [vmem:[#allocation82_spill] sm:$0xff]  ;;  %v16385_v15 = vld [vmem:[#allocation73_spill] sm:$0xff]  ;;  %v16396_v0 = vld [vmem:[#allocation72_spill] sm:$0xff] }
 0x24b   : > { %v3085_v51 = vpop.f32.mrf.mxu0  ;;  %v5135_v19 = vrot.slane %v16385_v15, 3  ;;  %v5074_v20 = vrot.slane %v5072_v35, 3  ;;  %v5077_v24 = vrot.slane %v5075_v31, 4  ;;  %v5079_v48 = vrot.slane %v16387_v59, 3  ;;  %v11842_v35 = vld [vmem:[#allocation4 + $0x980] ss:$8 sps:$4 sm:$0xff]  }
 0x24c   : > { %16380 = vst [vmem:[#allocation93_spill] sm:$0xff] %v14427_v45  ;;  %5982 = vmatpush1.bf16.msra.mxu1 %v11833_v37  ;;  %v14441_v33 = vadd.f32 %v3084_v17, %v16384_v56  ;;  %v3086_v58 = vadd.f32 %v3085_v51, %v14265_v42  ;;  %v14444_v45 = vpop.f32.mrf.mxu1  ;;  %v11844_v37 = vld [vmem:[#allocation4 + $0x984] ss:$8 sps:$4 sm:$0xff]   ;;  %v5080_v63 = vrot.slane %v16388_v41, 4  ;;  %v16390_v51 = vrot.slane %v16367_v36, 3 }
 0x24d   : > { %5983 = vmatprep.subr.bf16.mxu1 %v11838_v12  ;;  %v3087_v6 = vpop.f32.mrf.mxu0  ;;  %v14459_v31 = vor.u32 %v5120_v29, %v5119_v4  ;;  %v16391_v59 = vld [vmem:[#allocation83_spill] sm:$0xff] }
 0x24e   : > { %v14451_v17 = vadd.f32 %v3086_v58, %v16389_v23  ;;  %v3088_v42 = vadd.f32 %v3087_v6, %v14274_v28  ;;  %v4504_v12 = vsel %vm4453_vm13, %v16390_v51, %v4503_v22  ;;  %v14457_v56 = vpop.f32.mrf.mxu1  ;;  %v11847_v28 = vld [vmem:[#allocation4 + $0xa74] ss:$8 sps:$4 sm:$0xff]   ;;  %v14467_v6 = vor.u32 %v5136_v55, %v5135_v19  ;;  %v16393_v4 = vld [vmem:[#allocation55_spill] sm:$0xff]  ;;  %v16395_v55 = vld [vmem:[#allocation76_spill] sm:$0xff] }
 0x24f   : > { %5479 = vmatmul.mubr.bf16.gmra.mxu1 %v5110_v34  ;;  %v3089_v15 = vpop.f32.mrf.mxu0  ;;  %v5078_v22 = vor.u32 %v5077_v24, %v5074_v20  ;;  %v14470_v34 = vor.u32 %v5080_v63, %v5079_v48  ;;  %v5131_v19 = vrot.slane %v16395_v55, 3  ;;  %v5122_v20 = vsel %vm5046_vm14, %v14413_v52, %v14459_v31  ;;  %v11845_v24 = vld [vmem:[#allocation4 + $0xa70] ss:$8 sps:$4 sm:$0xff]   ;;  %v16397_v48 = vld [vmem:[#allocation78_spill] sm:$0xff] }
 0x250   : > { %5984 = vmatpush1.bf16.msra.mxu1 %v11836_v49  ;;  %5488 = vmatprep.mubr.bf16.mxu1 %v5126_v30  ;;  %v14462_v41 = vadd.f32 %v3088_v42, %v16391_v59  ;;  %v3090_v23 = vadd.f32 %v3089_v15, %v14287_v44  ;;  %v14465_v58 = vpop.f32.mrf.mxu1  ;;  %v11821_v49 = vld [vmem:[#allocation4 + $0xaa0] ss:$8 sps:$4 sm:$0xff]   ;;  %v14472_v30 = vld [vmem:[#allocation2 + $0xc0] sm:$0xff]  ;;  %v5132_v42 = vrot.slane %v16396_v0, 4  ;;  %v5147_v63 = vrot.slane %v16397_v48, 3 }
 0x251   : > { %5985 = vmatprep.subr.bf16.mxu1 %v11844_v37  ;;  %v3093_v36 = vpop.f32.mrf.mxu0  ;;  %10719 = vmatmul.mubr.msk.bf16.gmra.mxu0 %vm1151_vm9, %v4504_v12  ;;  %v16398_v12 = vld [vmem:[#allocation74_spill] sm:$0xff]  ;;  %v10721_v52 = vcombine.high %v14472_v30, %v14472_v30  ;;  %v5966_v0 = vand.u32 %v11821_v49, %v12700_v7 }
 0x252   : > { %16392 = vst [vmem:[#allocation94_spill] sm:$0xff] %v14462_v41  ;;  %v14475_v29 = vadd.f32 %v3090_v23, %v16393_v4  ;;  %v3094_v44 = vadd.f32 %v3093_v36, %v14300_v39  ;;  %5561 = vmatprep.mubr.bf16.mxu0 %v16149_v2  ;;  %v14479_v37 = vpop.f32.mrf.mxu1  ;;  %v5148_v15 = vrot.slane %v16398_v12, 4  ;;  %v16399_v39 = vld [vmem:[#allocation84_spill] sm:$0xff]  ;;  %v16401_v48 = vld [vmem:[#allocation22_spill] sm:$0xff] }
 0x253   : > { %v3095_v51 = vpop.f32.mrf.mxu0  ;;  %v11850_v4 = vld [vmem:[#allocation4 + $0xa64] ss:$8 sps:$4 sm:$0xff]   ;;  %v5091_v12 = vrot.slane %v16401_v48, 3  ;;  %v11841_v41 = vld [vmem:[#allocation4 + $0xa94] ss:$8 sps:$4 sm:$0xff]  }
 0x254   : > { %16394 = vst [vmem:[#allocation69_spill] sm:$0xff] %v14475_v29  ;;  %5986 = vmatpush1.bf16.msra.mxu1 %v11842_v35  ;;  %v14489_v59 = vadd.f32 %v3094_v44, %v16399_v39  ;;  %v3096_v23 = vadd.f32 %v3095_v51, %v14306_v32  ;;  %v14492_v36 = vpop.f32.mrf.mxu1  ;;  %v5138_v35 = vsel %vm5046_vm14, %v14415_v43, %v14467_v6  ;;  %v16402_v44 = vld [vmem:[#allocation21_spill] sm:$0xff]  ;;  %v11848_v7 = vld [vmem:[#allocation4 + $0xa60] ss:$8 sps:$4 sm:$0xff]  }
 0x255   : > { %5987 = vmatprep.subr.bf16.mxu1 %v11847_v28  ;;  %v3097_v55 = vpop.f32.mrf.mxu0  ;;  %v5092_v39 = vrot.slane %v16402_v44, 4  ;;  %v5082_v51 = vsel %vm5046_vm14, %v5078_v22, %v14470_v34  ;;  %v14510_v43 = vor.u32 %v5132_v42, %v5131_v19  ;;  %v14512_v49 = vor.u32 %v5148_v15, %v5147_v63  ;;  %v16404_v48 = vld [vmem:[#allocation85_spill] sm:$0xff]  ;;  %v16408_v44 = vld [vmem:[#allocation79_spill] sm:$0xff] }
 0x256   : > { %16400 = vst [vmem:[#allocation96_spill] sm:$0xff] %v14489_v59  ;;  %v14503_v32 = vadd.f32 %v3096_v23, %v14168_v38  ;;  %v3098_v28 = vadd.f32 %v3097_v55, %v14315_v53  ;;  %v14508_v59 = vpop.f32.mrf.mxu1  ;;  %v11853_v22 = vld [vmem:[#allocation4 + $0xa54] ss:$8 sps:$4 sm:$0xff]   ;;  %v5165_v55 = vshrl.u32 %v10721_v52, 16 }
 0x257   : > { %5489 = vmatmul.mubr.bf16.gmra.mxu1 %v5122_v20  ;;  %v3099_v29 = vpop.f32.mrf.mxu0  ;;  %v5168_v20 = vshll.u32 %v10721_v52, 16  ;;  %v14521_v42 = vor.u32 %v5092_v39, %v5091_v12  ;;  %v5134_v15 = vsel %vm5046_vm14, %v14459_v31, %v14510_v43  ;;  %v11851_v52 = vld [vmem:[#allocation4 + $0xa50] ss:$8 sps:$4 sm:$0xff]   ;;  %v5150_v12 = vsel %vm5046_vm14, %v14467_v6, %v14512_v49 }
 0x258   : > { %16403 = vst [vmem:[#allocation70_spill] sm:$0xff] %v14503_v32  ;;  %5988 = vmatpush2.bf16.msra.mxu1 %v11845_v24  ;;  %5498 = vmatprep.mubr.bf16.mxu1 %v5138_v35  ;;  %v14515_v38 = vadd.f32 %v3098_v28, %v16404_v48  ;;  %v3100_v53 = vadd.f32 %v3099_v29, %v14326_v60  ;;  %v14518_v23 = vpop.f32.mrf.mxu1  ;;  %v16406_v24 = vld [vmem:[#allocation86_spill] sm:$0xff]  ;;  %v11839_v60 = vld [vmem:[#allocation4 + $0xa90] ss:$8 sps:$4 sm:$0xff]  }
 0x259   : > { %5989 = vmatprep.subr.bf16.mxu1 %v11850_v4  ;;  %v3616_v19 = vpop.f32.mrf.mxu0  ;;  %10761 = vmatmul.mubr.msk.bf16.vlgmr.msra.gmra.mxu0 %vm1151_vm9, %v5082_v51  ;;  %v10720_v28 = vcombine.low %v14472_v30, %v14472_v30  ;;  %v16410_v51 = vld [vmem:[#allocation57_spill] sm:$0xff] }
 0x25a   : > { %16405 = vst [vmem:[#allocation97_spill] sm:$0xff] %v14515_v38  ;;  %v14524_v35 = vadd.f32 %v3100_v53, %v16406_v24  ;;  %v3617_v63 = vadd.f32 %v3616_v19, %v14337_v21  ;;  %6095 = vmatpush1.bf16.msra.mxu0 %v5966_v0  ;;  %5571 = vmatprep.mubr.bf16.mxu0 %v16149_v2  ;;  %v14528_v29 = vpop.f32.mrf.mxu1  ;;  %v5143_v21 = vrot.slane %v16408_v44, 3  ;;  %v16409_v0 = vld [vmem:[#allocation77_spill] sm:$0xff]  ;;  %v5167_v19 = vrot.slane %v5165_v55, 3  ;;  %v16412_v38 = vld [vmem:[#allocation24_spill] sm:$0xff] }
 0x25b   : > { %v3618_v4 = vpop.f32.mrf.mxu0  ;;  %6096 = vmatprep.subr.bf16.mxu0 %v11841_v41  ;;  %v5144_v39 = vrot.slane %v16409_v0, 4  ;;  %v11856_v41 = vld [vmem:[#allocation4 + $0xa44] ss:$8 sps:$4 sm:$0xff]   ;;  %v5170_v24 = vrot.slane %v5168_v20, 4  ;;  %v5104_v0 = vrot.slane %v16412_v38, 4  ;;  %v5156_v38 = vshrl.u32 %v10720_v28, 16 }
 0x25c   : > { %16407 = vst [vmem:[#allocation19_spill] sm:$0xff] %v14524_v35  ;;  %5990 = vmatpush2.bf16.msra.mxu1 %v11848_v7  ;;  %v14541_v48 = vadd.f32 %v3617_v63, %v16410_v51  ;;  %v3619_v31 = vadd.f32 %v3618_v4, %v14345_v8  ;;  %v14544_v53 = vpop.f32.mrf.mxu1  ;;  %v11862_v7 = vld [vmem:[#allocation4 + $0xa84] ss:$8 sps:$4 sm:$0xff]   ;;  %v16411_v35 = vld [vmem:[#allocation26_spill] sm:$0xff]  ;;  %v5094_v8 = vsel %vm5046_vm14, %v14470_v34, %v14521_v42  ;;  %v5159_v51 = vshll.u32 %v10720_v28, 16 }
 0x25d   : > { %5991 = vmatprep.subr.bf16.mxu1 %v11853_v22  ;;  %v3620_v6 = vpop.f32.mrf.mxu0  ;;  %v5103_v44 = vrot.slane %v16411_v35, 3  ;;  %v11860_v55 = vld [vmem:[#allocation4 + $0xa80] ss:$8 sps:$4 sm:$0xff]   ;;  %v5145_v35 = vor.u32 %v5144_v39, %v5143_v21  ;;  %v11859_v34 = vld [vmem:[#allocation4 + $0xa34] ss:$8 sps:$4 sm:$0xff]  }
 0x25e   : > { %v14549_v32 = vadd.f32 %v3619_v31, %v14203_v5  ;;  %v3621_v63 = vadd.f32 %v3620_v6, %v14354_v14  ;;  %6097 = vmatpush1.bf16.msra.mxu0 %v11839_v60  ;;  %v14555_v22 = vpop.f32.mrf.mxu1  ;;  %v11854_v4 = vld [vmem:[#allocation4 + $0xa40] ss:$8 sps:$4 sm:$0xff]   ;;  %v5171_v60 = vor.u32 %v5170_v24, %v5167_v19  ;;  %v11857_v28 = vld [vmem:[#allocation4 + $0xa30] ss:$8 sps:$4 sm:$0xff]  }
 0x25f   : > { %5499 = vmatmul.mubr.bf16.gmra.mxu1 %v5134_v15  ;;  %v3622_v20 = vpop.f32.mrf.mxu0  ;;  %6098 = vmatprep.subr.bf16.mxu0 %v11862_v7  ;;  %v16413_v6 = vld [vmem:[#allocation87_spill] sm:$0xff]  ;;  %v5146_v39 = vsel %vm5046_vm14, %v14510_v43, %v5145_v35  ;;  %v5161_v7 = vrot.slane %v5159_v51, 4 }
 0x260   : > { %5992 = vmatpush2.bf16.msra.mxu1 %v11851_v52  ;;  %5508 = vmatprep.mubr.bf16.mxu1 %v5150_v12  ;;  %v14558_v5 = vadd.f32 %v3621_v63, %v14216_v26  ;;  %v3623_v14 = vadd.f32 %v3622_v20, %v14365_v13  ;;  %v14561_v31 = vpop.f32.mrf.mxu1  ;;  %v5105_v52 = vor.u32 %v5104_v0, %v5103_v44 }
 0x261   : > { %5993 = vmatprep.subr.bf16.mxu1 %v11856_v41  ;;  %v3626_v15 = vpop.f32.mrf.mxu0  ;;  %10762 = vmatmul.mubr.msk.bf16.gmra.mxu0 %vm1151_vm9, %v5094_v8  ;;  %v5158_v41 = vrot.slane %v5156_v38, 3  ;;  %v5172_v0 = vsel %vm5046_vm14, %v14512_v49, %v5171_v60 }
 0x262   : > { %v14565_v12 = vadd.f32 %v3623_v14, %v16413_v6  ;;  %v3627_v21 = vadd.f32 %v3626_v15, %v14374_v57  ;;  %5581 = vmatprep.mubr.bf16.mxu0 %v16149_v2  ;;  %v14569_v26 = vpop.f32.mrf.mxu1  ;;  %6099 = vmatpush1.bf16.msra.mxu0 %v11860_v55  ;;  %v11865_v57 = vld [vmem:[#allocation4 + $0xa24] ss:$8 sps:$4 sm:$0xff]   ;;  %v5106_v8 = vsel %vm5046_vm14, %v14521_v42, %v5105_v52  ;;  %v11863_v14 = vld [vmem:[#allocation4 + $0xa20] ss:$8 sps:$4 sm:$0xff]  }
 0x263   : > { %v3628_v13 = vpop.f32.mrf.mxu0  ;;  %v5162_v49 = vor.u32 %v5161_v7, %v5158_v41  ;;  %v12333_v41 = vld [vmem:[#allocation2 + $0x18] sm:$0xff] }
 0x264   : > { %5994 = vmatpush2.bf16.msra.mxu1 %v11854_v4  ;;  %v14574_v19 = vadd.f32 %v3627_v21, %v14237_v9  ;;  %v3629_v24 = vadd.f32 %v3628_v13, %v14380_v62  ;;  %v14577_v44 = vpop.f32.mrf.mxu1  ;;  %v16414_v9 = vld [vmem:[#allocation28_spill] sm:$0xff]  ;;  %v16415_v4 = vld [vmem:[#allocation27_spill] sm:$0xff] }
 0x265   : > { %5995 = vmatprep.subr.bf16.mxu1 %v11859_v34  ;;  %v3630_v63 = vpop.f32.mrf.mxu0  ;;  %v5115_v20 = vrot.slane %v16414_v9, 3  ;;  %v5116_v62 = vrot.slane %v16415_v4, 4 }
 0x266   : > { %v14584_v43 = vadd.f32 %v3629_v24, %v14248_v61  ;;  %v3631_v55 = vadd.f32 %v3630_v63, %v14389_v10  ;;  %v14589_v38 = vpop.f32.mrf.mxu1  ;;  %v11870_v10 = vld [vmem:[#allocation4 + $0xa14] ss:$8 sps:$4 sm:$0xff]  }
 0x267   : > { %5509 = vmatmul.mubr.bf16.gmra.mxu1 %v5146_v39  ;;  %v3632_v51 = vpop.f32.mrf.mxu0  ;;  %v5117_v21 = vor.u32 %v5116_v62, %v5115_v20  ;;  %v11868_v39 = vld [vmem:[#allocation4 + $0xa10] ss:$8 sps:$4 sm:$0xff]   ;;  %v11871_v62 = vld [vmem:[#allocation4 + $0xa00] ss:$8 sps:$4 sm:$0xff]  }
 0x268   : > { %5996 = vmatpush2.bf16.msra.mxu1 %v11857_v28  ;;  %5518 = vmatprep.mubr.bf16.mxu1 %v5172_v0  ;;  %v14592_v34 = vadd.f32 %v3631_v55, %v14262_v25  ;;  %v3633_v61 = vadd.f32 %v3632_v51, %v14400_v54  ;;  %v14595_v42 = vpop.f32.mrf.mxu1  ;;  %v5163_v54 = vsel %vm5046_vm14, %v5145_v35, %v5162_v49  ;;  %v12332_v28 = vld [vmem:[#allocation2 + $0xc] sm:$0xff] }
 0x269   : > { %5997 = vmatprep.subr.bf16.mxu1 %v11865_v57  ;;  %v3636_v60 = vpop.f32.mrf.mxu0  ;;  %10763 = vmatmul.mubr.msk.bf16.gmra.mxu0 %vm1151_vm9, %v5106_v8  ;;  %v10770_v7 = vcombine.high %v12332_v28, %v12333_v41  ;;  %v16416_v63 = vld [vmem:[#allocation33_spill] sm:$0xff]  ;;  %v16417_v55 = vld [vmem:[#allocation30_spill] sm:$0xff]  ;;  %v5118_v4 = vsel %vm5046_vm14, %v5105_v52, %v5117_v21 }
 0x26a   : > { %v14599_v15 = vadd.f32 %v3633_v61, %v14270_v50  ;;  %v3637_v6 = vadd.f32 %v3636_v60, %v14411_v47  ;;  %5591 = vmatprep.mubr.bf16.mxu0 %v16149_v2  ;;  %v14603_v13 = vpop.f32.mrf.mxu1  ;;  %v11873_v47 = vld [vmem:[#allocation4 + $0xa04] ss:$8 sps:$4 sm:$0xff]   ;;  %v5127_v8 = vrot.slane %v16416_v63, 3  ;;  %v5128_v9 = vrot.slane %v16417_v55, 4 }
 0x26b   : > { %v3638_v25 = vpop.f32.mrf.mxu0 }
 0x26c   : > { %5998 = vmatpush2.bf16.msra.mxu1 %v11863_v14  ;;  %v14607_v24 = vadd.f32 %v3637_v6, %v14284_v1  ;;  %v3639_v50 = vadd.f32 %v3638_v25, %v14421_v16  ;;  %v14610_v57 = vpop.f32.mrf.mxu1  ;;  %v12335_v6 = vld [vmem:[#allocation2 + $0x30] sm:$0xff] }
 0x26d   : > { %5999 = vmatprep.subr.bf16.mxu1 %v11870_v10  ;;  %v3640_v0 = vpop.f32.mrf.mxu0 }
 0x26e   : > { %v14615_v35 = vadd.f32 %v3639_v50, %v14297_v46  ;;  %v3641_v20 = vadd.f32 %v3640_v0, %v14432_v3  ;;  %v14619_v1 = vpop.f32.mrf.mxu1  ;;  %v5129_v3 = vor.u32 %v5128_v9, %v5127_v8  ;;  %v16419_v0 = vld [vmem:[#allocation38_spill] sm:$0xff] }
 0x26f   : > { %5519 = vmatmul.mubr.bf16.gmra.mxu1 %v5163_v54  ;;  %v3642_v16 = vpop.f32.mrf.mxu0  ;;  %v5140_v63 = vrot.slane %v16419_v0, 4 }
 0x270   : > { %6000 = vmatpush2.bf16.msra.mxu1 %v11868_v39  ;;  %6003 = vmatprep.mubr.bf16.mxu1 %v10770_v7  ;;  %v14622_v51 = vadd.f32 %v3641_v20, %v14303_v27  ;;  %v3643_v14 = vadd.f32 %v3642_v16, %v14444_v45  ;;  %v14625_v49 = vpop.f32.mrf.mxu1  ;;  %v10769_v27 = vcombine.low %v12332_v28, %v12333_v41  ;;  %v12334_v45 = vld [vmem:[#allocation2 + $0x24] sm:$0xff]  ;;  %v16418_v41 = vld [vmem:[#allocation46_spill] sm:$0xff] }
 0x271   : > { %6001 = vmatprep.subr.bf16.mxu1 %v11873_v47  ;;  %v3646_v46 = vpop.f32.mrf.mxu0  ;;  %10764 = vmatmul.mubr.msk.bf16.gmra.mxu0 %vm1151_vm9, %v5118_v4  ;;  %v10773_v25 = vcombine.high %v12334_v45, %v12335_v6  ;;  %v5139_v47 = vrot.slane %v16418_v41, 3 }
 0x272   : > { %v14629_v52 = vadd.f32 %v3643_v14, %v14310_v40  ;;  %v3647_v61 = vadd.f32 %v3646_v46, %v14457_v56  ;;  %5601 = vmatprep.mubr.bf16.mxu0 %v16149_v2  ;;  %v14633_v10 = vpop.f32.mrf.mxu1  ;;  %v5130_v56 = vsel %vm5046_vm14, %v5117_v21, %v5129_v3  ;;  %v10772_v46 = vcombine.low %v12334_v45, %v12335_v6  ;;  %v16426_v45 = vld [vmem:[#allocation90_spill] sm:$0xff] }
 0x273   : > { %v3648_v60 = vpop.f32.mrf.mxu0  ;;  %v5141_v16 = vor.u32 %v5140_v63, %v5139_v47  ;;  %v16425_v47 = vld [vmem:[#allocation48_spill] sm:$0xff] }
 0x274   : > { %6002 = vmatpush2.bf16.msra.mxu1 %v11871_v62  ;;  %v14636_v54 = vadd.f32 %v3647_v61, %v14323_v11  ;;  %v3649_v39 = vadd.f32 %v3648_v60, %v14465_v58  ;;  %v14639_v7 = vpop.f32.mrf.mxu1  ;;  %v16420_v58 = vld [vmem:[#allocation59_spill] sm:$0xff]  ;;  %v14662_v62 = vld [vmem:[#allocation2 + $0xc8] sm:$0xf]  ;;  %v5152_v0 = vrot.slane %v16425_v47, 4 }
 0x275   : > { %v3650_v40 = vpop.f32.mrf.mxu0  ;;  %16422 = vst [vmem:[#allocation75_spill] sm:$0xff] %v14662_v62  ;;  %v10722_v63 = vcombine.low %v14662_v62, %v14662_v62 }
 0x276   : > { %v14643_v50 = vadd.f32 %v3649_v39, %v14331_v18  ;;  %v3651_v28 = vadd.f32 %v3650_v40, %v14479_v37  ;;  %v14648_v8 = vpop.f32.mrf.mxu1  ;;  %v16421_v37 = vld [vmem:[#allocation88_spill] sm:$0xff] }
 0x277   : > { %6004 = vmatmul.mubr.bf16.vlgmr.msra.gmra.mxu1 %v10769_v27  ;;  %v3652_v11 = vpop.f32.mrf.mxu0  ;;  %v12337_v27 = vld [vmem:[#allocation2 + $0x48] sm:$0xff] }
 0x278   : > { %6013 = vmatprep.mubr.bf16.mxu1 %v10773_v25  ;;  %v14651_v55 = vadd.f32 %v3651_v28, %v16420_v58  ;;  %v3653_v9 = vadd.f32 %v3652_v11, %v14492_v36  ;;  %v14654_v21 = vpop.f32.mrf.mxu1  ;;  %v12336_v36 = vld [vmem:[#allocation2 + $0x3c] sm:$0xff]  ;;  %v16423_v25 = vld [vmem:[#allocation89_spill] sm:$0xff]  ;;  %v16424_v28 = vld [vmem:[#allocation54_spill] sm:$0xff]  ;;  %v5142_v58 = vsel %vm5046_vm14, %v5129_v3, %v5141_v16 }
 0x279   : > { %v3656_v18 = vpop.f32.mrf.mxu0  ;;  %10765 = vmatmul.mubr.msk.bf16.gmra.mxu0 %vm1151_vm9, %v5130_v56  ;;  %v10776_v60 = vcombine.high %v12336_v36, %v12337_v27  ;;  %v5151_v41 = vrot.slane %v16424_v28, 3  ;;  %v5174_v28 = vshrl.u32 %v10722_v63, 16  ;;  %v10775_v47 = vcombine.low %v12336_v36, %v12337_v27 }
 0x27a   : > { %v14658_v20 = vadd.f32 %v3653_v9, %v16421_v37  ;;  %v3657_v4 = vadd.f32 %v3656_v18, %v14508_v59  ;;  %5611 = vmatprep.mubr.bf16.mxu0 %v16149_v2  ;;  %v14664_v14 = vpop.f32.mrf.mxu1  ;;  %v16427_v18 = vld [vmem:[#allocation63_spill] sm:$0xff] }
 0x27b   : > { %v3658_v61 = vpop.f32.mrf.mxu0  ;;  %v5176_v36 = vrot.slane %v5174_v28, 3 }
 0x27c   : > { %v14667_v39 = vadd.f32 %v3657_v4, %v16423_v25  ;;  %v3659_v40 = vadd.f32 %v3658_v61, %v14518_v23  ;;  %v14670_v56 = vpop.f32.mrf.mxu1 }
 0x27d   : > { %v3660_v59 = vpop.f32.mrf.mxu0 }
 0x27e   : > { %v14677_v6 = vadd.f32 %v3659_v40, %v16426_v45  ;;  %v3661_v11 = vadd.f32 %v3660_v59, %v14528_v29  ;;  %v14681_v9 = vpop.f32.mrf.mxu1  ;;  %v5153_v40 = vor.u32 %v5152_v0, %v5151_v41  ;;  %v16428_v29 = vld [vmem:[#allocation91_spill] sm:$0xff] }
 0x27f   : > { %6014 = vmatmul.mubr.bf16.gmra.mxu1 %v10772_v46  ;;  %v3662_v23 = vpop.f32.mrf.mxu0  ;;  %v5177_v46 = vshll.u32 %v10722_v63, 16 }
 0x280   : > { %6023 = vmatprep.mubr.bf16.mxu1 %v10776_v60  ;;  %v14684_v37 = vadd.f32 %v3661_v11, %v16427_v18  ;;  %v3663_v4 = vadd.f32 %v3662_v23, %v14544_v53  ;;  %v14687_v61 = vpop.f32.mrf.mxu1  ;;  %v12338_v53 = vld [vmem:[#allocation2 + $0x54] sm:$0xff]  ;;  %v12339_v11 = vld [vmem:[#allocation2 + $0x60] sm:$0xff] }
 0x281   : > { %v3666_v25 = vpop.f32.mrf.mxu0  ;;  %10766 = vmatmul.mubr.msk.bf16.gmra.mxu0 %vm1151_vm9, %v5142_v58  ;;  %v10779_v23 = vcombine.high %v12338_v53, %v12339_v11  ;;  %v16430_v18 = vld [vmem:[#allocation64_spill] sm:$0xff]  ;;  %v5179_v27 = vrot.slane %v5177_v46, 4 }
 0x282   : > { %v14691_v59 = vadd.f32 %v3663_v4, %v16428_v29  ;;  %v3667_v3 = vadd.f32 %v3666_v25, %v14555_v22  ;;  %5621 = vmatprep.mubr.bf16.mxu0 %v16149_v2  ;;  %v14695_v60 = vpop.f32.mrf.mxu1  ;;  %v5154_v22 = vsel %vm5046_vm14, %v5141_v16, %v5153_v40  ;;  %v16431_v4 = vld [vmem:[#allocation92_spill] sm:$0xff] }
 0x283   : > { %v3668_v45 = vpop.f32.mrf.mxu0  ;;  %v5180_v28 = vor.u32 %v5179_v27, %v5176_v36 }
 0x284   : > { %16429 = vst [vmem:[#allocation95_spill] sm:$0xff] %v14691_v59  ;;  %v14698_v62 = vadd.f32 %v3667_v3, %v16430_v18  ;;  %v3669_v41 = vadd.f32 %v3668_v45, %v14561_v31  ;;  %v14701_v0 = vpop.f32.mrf.mxu1  ;;  %v16432_v3 = vld [vmem:[#allocation17_spill] sm:$0xff] }
 0x285   : > { %v3670_v58 = vpop.f32.mrf.mxu0  ;;  %v5181_v27 = vsel %vm5046_vm14, %v5153_v40, %v5180_v28 }
 0x286   : > { %v14705_v25 = vadd.f32 %v3669_v41, %v16431_v4  ;;  %v3671_v63 = vadd.f32 %v3670_v58, %v14569_v26  ;;  %v14708_v29 = vpop.f32.mrf.mxu1  ;;  %v16433_v41 = vld [vmem:[#allocation93_spill] sm:$0xff] }
 0x287   : > { %6024 = vmatmul.mubr.bf16.gmra.mxu1 %v10775_v47  ;;  %v3672_v59 = vpop.f32.mrf.mxu0  ;;  %v10778_v47 = vcombine.low %v12338_v53, %v12339_v11  ;;  %v12340_v58 = vld [vmem:[#allocation2 + $0x6c] sm:$0xff] }
 0x288   : > { %6033 = vmatprep.mubr.bf16.mxu1 %v10779_v23  ;;  %v14711_v18 = vadd.f32 %v3671_v63, %v16432_v3  ;;  %v3673_v31 = vadd.f32 %v3672_v59, %v14577_v44  ;;  %v14714_v45 = vpop.f32.mrf.mxu1  ;;  %v12341_v63 = vld [vmem:[#allocation2 + $0x78] sm:$0xff] }
 0x289   : > { %v3676_v16 = vpop.f32.mrf.mxu0  ;;  %10767 = vmatmul.mubr.msk.bf16.gmra.mxu0 %vm1151_vm9, %v5154_v22  ;;  %v10782_v44 = vcombine.high %v12340_v58, %v12341_v63  ;;  %v10781_v28 = vcombine.low %v12340_v58, %v12341_v63 }
 0x28a   : > { %v14718_v4 = vadd.f32 %v3673_v31, %v16433_v41  ;;  %v3677_v26 = vadd.f32 %v3676_v16, %v14589_v38  ;;  %5631 = vmatprep.mubr.bf16.mxu0 %v16149_v2  ;;  %v14722_v46 = vpop.f32.mrf.mxu1  ;;  %v16435_v16 = vld [vmem:[#allocation94_spill] sm:$0xff] }
 0x28b   : > { %v3678_v23 = vpop.f32.mrf.mxu0 }
 0x28c   : > { %16434 = vst [vmem:[#allocation23_spill] sm:$0xff] %v14718_v4  ;;  %v14725_v59 = vadd.f32 %v3677_v26, %v14441_v33  ;;  %v3679_v22 = vadd.f32 %v3678_v23, %v14595_v42  ;;  %v14728_v3 = vpop.f32.mrf.mxu1 }
 0x28d   : > { %v3680_v31 = vpop.f32.mrf.mxu0 }
 0x28e   : > { %v14731_v38 = vadd.f32 %v3679_v22, %v14451_v17  ;;  %v3681_v36 = vadd.f32 %v3680_v31, %v14603_v13  ;;  %v14735_v53 = vpop.f32.mrf.mxu1  ;;  %v16436_v17 = vld [vmem:[#allocation69_spill] sm:$0xff]  ;;  %v12343_v22 = vld [vmem:[#allocation2 + $0x90] sm:$0xff] }
 0x28f   : > { %6034 = vmatmul.mubr.bf16.gmra.mxu1 %v10778_v47  ;;  %v3682_v11 = vpop.f32.mrf.mxu0 }
 0x290   : > { %6043 = vmatprep.mubr.bf16.mxu1 %v10782_v44  ;;  %v14738_v33 = vadd.f32 %v3681_v36, %v16435_v16  ;;  %v3683_v42 = vadd.f32 %v3682_v11, %v14610_v57  ;;  %v14741_v41 = vpop.f32.mrf.mxu1  ;;  %v12342_v44 = vld [vmem:[#allocation2 + $0x84] sm:$0xff] }
 0x291   : > { %v3686_v26 = vpop.f32.mrf.mxu0  ;;  %10768 = vmatmul.mubr.msk.bf16.gmra.mxu0 %vm1151_vm9, %v5181_v27  ;;  %v10785_v31 = vcombine.high %v12342_v44, %v12343_v22  ;;  %v16438_v57 = vld [vmem:[#allocation96_spill] sm:$0xff] }
 0x292   : > { %v14745_v23 = vadd.f32 %v3683_v42, %v16436_v17  ;;  %v3687_v13 = vadd.f32 %v3686_v26, %v14619_v1  ;;  %6116 = vmatprep.mubr.bf16.mxu0 %v16149_v2  ;;  %v14749_v40 = vpop.f32.mrf.mxu1  ;;  %v12344_v42 = vld [vmem:[#allocation2 + $0x14] sm:$0xf]  ;;  %v12345_v17 = vld [vmem:[#allocation2 + $0x20] sm:$0xf] }
 0x293   : > { %v3688_v47 = vpop.f32.mrf.mxu0  ;;  %v10771_v1 = vcombine.low %v12344_v42, %v12345_v17  ;;  %v16440_v26 = vld [vmem:[#allocation70_spill] sm:$0xff]  ;;  %v16442_v42 = vld [vmem:[#allocation19_spill] sm:$0xff] }
 0x294   : > { %16437 = vst [vmem:[#allocation37_spill] sm:$0xff] %v14745_v23  ;;  %v14752_v36 = vadd.f32 %v3687_v13, %v16438_v57  ;;  %v3689_v11 = vadd.f32 %v3688_v47, %v14625_v49  ;;  %v14755_v27 = vpop.f32.mrf.mxu1  ;;  %v16441_v13 = vld [vmem:[#allocation97_spill] sm:$0xff]  ;;  %v12346_v17 = vld [vmem:[#allocation2 + $0x9c] sm:$0xff] }
 0x295   : > { %v3690_v16 = vpop.f32.mrf.mxu0 }
 0x296   : > { %16439 = vst [vmem:[#allocation34_spill] sm:$0xff] %v14752_v36  ;;  %v14758_v23 = vadd.f32 %v3689_v11, %v16440_v26  ;;  %v3691_v58 = vadd.f32 %v3690_v16, %v14633_v10  ;;  %v14761_v63 = vpop.f32.mrf.mxu1  ;;  %v12347_v26 = vld [vmem:[#allocation2 + $0xa8] sm:$0xff] }
 0x297   : > { %6044 = vmatmul.mubr.bf16.gmra.mxu1 %v10781_v28  ;;  %v3692_v4 = vpop.f32.mrf.mxu0 }
 0x298   : > { %6053 = vmatprep.mubr.bf16.mxu1 %v10785_v31  ;;  %v14764_v57 = vadd.f32 %v3691_v58, %v16441_v13  ;;  %v3693_v49 = vadd.f32 %v3692_v4, %v14639_v7  ;;  %v14767_v47 = vpop.f32.mrf.mxu1  ;;  %v10784_v31 = vcombine.low %v12342_v44, %v12343_v22  ;;  %v10788_v58 = vcombine.high %v12346_v17, %v12347_v26 }
 0x299   : > { %v4293_v36 = vpop.f32.mrf.mxu0  ;;  %10831 = vmatmul.mubr.msk.bf16.vlgmr.msra.gmra.mxu0 %vm1151_vm9, %v10771_v1 }
 0x29a   : > { %v14771_v11 = vadd.f32 %v3693_v49, %v16442_v42  ;;  %v4294_v10 = vadd.f32 %v4293_v36, %v14648_v8  ;;  %6126 = vmatprep.mubr.bf16.mxu0 %v16149_v2  ;;  %v14775_v28 = vpop.f32.mrf.mxu1  ;;  %v12348_v49 = vld [vmem:[#allocation2 + $0x2c] sm:$0xf]  ;;  %v12349_v42 = vld [vmem:[#allocation2 + $0x38] sm:$0xf] }
 0x29b   : > { %v4295_v16 = vpop.f32.mrf.mxu0  ;;  %v10774_v8 = vcombine.low %v12348_v49, %v12349_v42  ;;  %v12351_v42 = vld [vmem:[#allocation2 + $0x44] sm:$0xf] }
 0x29c   : > { %16443 = vst [vmem:[#allocation25_spill] sm:$0xff] %v14771_v11  ;;  %v14778_v7 = vadd.f32 %v4294_v10, %v14541_v48  ;;  %v4296_v4 = vadd.f32 %v4295_v16, %v14654_v21  ;;  %v14781_v1 = vpop.f32.mrf.mxu1 }
 0x29d   : > { %v4297_v13 = vpop.f32.mrf.mxu0 }
 0x29e   : > { %v14784_v36 = vadd.f32 %v4296_v4, %v14549_v32  ;;  %v4298_v44 = vadd.f32 %v4297_v13, %v14664_v14  ;;  %v14787_v22 = vpop.f32.mrf.mxu1 }
 0x29f   : > { %6054 = vmatmul.mubr.bf16.gmra.mxu1 %v10784_v31  ;;  %v4299_v11 = vpop.f32.mrf.mxu0 }
 0x2a0   : > { %6063 = vmatprep.mubr.bf16.mxu1 %v10788_v58  ;;  %v14790_v48 = vadd.f32 %v4298_v44, %v14558_v5  ;;  %v4300_v21 = vadd.f32 %v4299_v11, %v14670_v56  ;;  %v14793_v10 = vpop.f32.mrf.mxu1  ;;  %v10787_v58 = vcombine.low %v12346_v17, %v12347_v26  ;;  %v12350_v5 = vld [vmem:[#allocation2 + $0xb4] sm:$0xff] }
 0x2a1   : > { %v4303_v16 = vpop.f32.mrf.mxu0  ;;  %10832 = vmatmul.mubr.msk.bf16.gmra.mxu0 %vm1151_vm9, %v10774_v8  ;;  %v10791_v13 = vcombine.high %v12350_v5, %v14472_v30  ;;  %v12352_v8 = vld [vmem:[#allocation2 + $0x50] sm:$0xf] }
 0x2a2   : > { %v14797_v32 = vadd.f32 %v4300_v21, %v14565_v12  ;;  %v4304_v14 = vadd.f32 %v4303_v16, %v14681_v9  ;;  %6136 = vmatprep.mubr.bf16.mxu0 %v16149_v2  ;;  %v14801_v31 = vpop.f32.mrf.mxu1  ;;  %v10777_v9 = vcombine.low %v12351_v42, %v12352_v8  ;;  %v12353_v42 = vld [vmem:[#allocation2 + $0x5c] sm:$0xf] }
 0x2a3   : > { %v4305_v4 = vpop.f32.mrf.mxu0 }
 0x2a4   : > { %16444 = vst [vmem:[#allocation42_spill] sm:$0xff] %v14797_v32  ;;  %v14805_v56 = vadd.f32 %v4304_v14, %v14574_v19  ;;  %v4306_v11 = vadd.f32 %v4305_v4, %v14687_v61  ;;  %v14808_v49 = vpop.f32.mrf.mxu1  ;;  %v10790_v4 = vcombine.low %v12350_v5, %v14472_v30 }
 0x2a5   : > { %v4307_v12 = vpop.f32.mrf.mxu0 }
 0x2a6   : > { %v14811_v44 = vadd.f32 %v4306_v11, %v14584_v43  ;;  %v4308_v17 = vadd.f32 %v4307_v12, %v14695_v60  ;;  %v14814_v26 = vpop.f32.mrf.mxu1 }
 0x2a7   : > { %6064 = vmatmul.mubr.bf16.gmra.mxu1 %v10787_v58  ;;  %v4309_v21 = vpop.f32.mrf.mxu0 }
 0x2a8   : > { %6073 = vmatprep.mubr.bf16.mxu1 %v10791_v13  ;;  %v14817_v19 = vadd.f32 %v4308_v17, %v14592_v34  ;;  %v4310_v61 = vadd.f32 %v4309_v21, %v14701_v0  ;;  %v14820_v16 = vpop.f32.mrf.mxu1 }
 0x2a9   : > { %v4313_v14 = vpop.f32.mrf.mxu0  ;;  %10833 = vmatmul.mubr.msk.bf16.gmra.mxu0 %vm1151_vm9, %v10777_v9 }
 0x2aa   : > { %v14824_v43 = vadd.f32 %v4310_v61, %v14599_v15  ;;  %v4314_v60 = vadd.f32 %v4313_v14, %v14708_v29  ;;  %6146 = vmatprep.mubr.bf16.mxu0 %v16149_v2  ;;  %v14828_v58 = vpop.f32.mrf.mxu1  ;;  %v12354_v15 = vld [vmem:[#allocation2 + $0x68] sm:$0xf] }
 0x2ab   : > { %v4315_v34 = vpop.f32.mrf.mxu0  ;;  %v10780_v8 = vcombine.low %v12353_v42, %v12354_v15 }
 0x2ac   : > { %v14832_v13 = vadd.f32 %v4314_v60, %v14607_v24  ;;  %v4316_v0 = vadd.f32 %v4315_v34, %v14714_v45  ;;  %v14835_v11 = vpop.f32.mrf.mxu1  ;;  %v12355_v34 = vld [vmem:[#allocation2 + $0x74] sm:$0xf] }
 0x2ad   : > { %v4317_v12 = vpop.f32.mrf.mxu0 }
 0x2ae   : > { %v14838_v29 = vadd.f32 %v4316_v0, %v14615_v35  ;;  %v4318_v9 = vadd.f32 %v4317_v12, %v14722_v46  ;;  %v14841_v17 = vpop.f32.mrf.mxu1  ;;  %v12356_v0 = vld [vmem:[#allocation2 + $0x80] sm:$0xf] }
 0x2af   : > { %6074 = vmatmul.mubr.bf16.gmra.mxu1 %v10790_v4  ;;  %v4319_v30 = vpop.f32.mrf.mxu0  ;;  %v10783_v12 = vcombine.low %v12355_v34, %v12356_v0 }
 0x2b0   : > { %v14844_v24 = vadd.f32 %v4318_v9, %v14622_v51  ;;  %v4320_v45 = vadd.f32 %v4319_v30, %v14728_v3  ;;  %v14847_v5 = vpop.f32.mrf.mxu1 }
 0x2b1   : > { %v4323_v21 = vpop.f32.mrf.mxu0  ;;  %10834 = vmatmul.mubr.msk.bf16.gmra.mxu0 %vm1151_vm9, %v10780_v8 }
 0x2b2   : > { %v14851_v61 = vadd.f32 %v4320_v45, %v14629_v52  ;;  %v4324_v35 = vadd.f32 %v4323_v21, %v14735_v53  ;;  %6156 = vmatprep.mubr.bf16.mxu0 %v16149_v2  ;;  %v14855_v46 = vpop.f32.mrf.mxu1 }
 0x2b3   : > { %v4325_v14 = vpop.f32.mrf.mxu0 }
 0x2b4   : > { %16445 = vst [vmem:[#allocation35_spill] sm:$0xff] %v14851_v61  ;;  %v14858_v51 = vadd.f32 %v4324_v35, %v14636_v54  ;;  %v4326_v3 = vadd.f32 %v4325_v14, %v14741_v41  ;;  %v14861_v60 = vpop.f32.mrf.mxu1  ;;  %v12357_v14 = vld [vmem:[#allocation2 + $0x8c] sm:$0xf] }
 0x2b5   : > { %v4327_v4 = vpop.f32.mrf.mxu0 }
 0x2b6   : > { %v14864_v52 = vadd.f32 %v4326_v3, %v14643_v50  ;;  %v4328_v53 = vadd.f32 %v4327_v4, %v14749_v40  ;;  %v14867_v42 = vpop.f32.mrf.mxu1  ;;  %v12358_v3 = vld [vmem:[#allocation2 + $0x98] sm:$0xf] }
 0x2b7   : > { %v4329_v15 = vpop.f32.mrf.mxu0  ;;  %v10786_v4 = vcombine.low %v12357_v14, %v12358_v3 }
 0x2b8   : > { %v14870_v8 = vadd.f32 %v4328_v53, %v14651_v55  ;;  %v4330_v54 = vadd.f32 %v4329_v15, %v14755_v27  ;;  %v14873_v41 = vpop.f32.mrf.mxu1 }
 0x2b9   : > { %v4333_v9 = vpop.f32.mrf.mxu0  ;;  %10835 = vmatmul.mubr.msk.bf16.gmra.mxu0 %vm1151_vm9, %v10783_v12 }
 0x2ba   : > { %v14877_v30 = vadd.f32 %v4330_v54, %v14658_v20  ;;  %v4334_v50 = vadd.f32 %v4333_v9, %v14761_v63  ;;  %6166 = vmatprep.mubr.bf16.mxu0 %v16149_v2  ;;  %v14881_v40 = vpop.f32.mrf.mxu1 }
 0x2bb   : > { %v4335_v45 = vpop.f32.mrf.mxu0 }
 0x2bc   : > { %16446 = vst [vmem:[#allocation45_spill] sm:$0xff] %v14877_v30  ;;  %v14884_v55 = vadd.f32 %v4334_v50, %v14667_v39  ;;  %v4336_v27 = vadd.f32 %v4335_v45, %v14767_v47  ;;  %v14887_v21 = vpop.f32.mrf.mxu1  ;;  %v12359_v50 = vld [vmem:[#allocation2 + $0xa4] sm:$0xf]  ;;  %v12360_v45 = vld [vmem:[#allocation2 + $0xb0] sm:$0xf] }
 0x2bd   : > { %16447 = vst [vmem:[#allocation41_spill] sm:$0xff] %v14887_v21  ;;  %v4337_v35 = vpop.f32.mrf.mxu0  ;;  %v11875_v30 = vld [vmem:[#allocation9 + $0x70] ss:$8 sps:$4 sm:$0xff]  }
 0x2be   : > { %v14890_v20 = vadd.f32 %v4336_v27, %v14677_v6  ;;  %v4338_v63 = vadd.f32 %v4337_v35, %v14775_v28  ;;  %v14893_v34 = vpop.f32.mrf.mxu1  ;;  %v10789_v27 = vcombine.low %v12359_v50, %v12360_v45 }
 0x2bf   : > { %v14895_v0 = vpop.f32.mrf.mxu0 }
 0x2c0   : > { %v14898_v39 = vadd.f32 %v4338_v63, %v14684_v37  ;;  %v14900_v12 = vpop.f32.mrf.mxu1 }
 0x2c1   : > { %v4343_v47 = vpop.f32.mrf.mxu0  ;;  %10836 = vmatmul.mubr.msk.bf16.gmra.mxu0 %vm1151_vm9, %v10786_v4 }
 0x2c2   : > { %v4344_v53 = vadd.f32 %v4343_v47, %v14787_v22  ;;  %6176 = vmatprep.mubr.bf16.mxu0 %v16149_v2  ;;  %v14905_v6 = vpop.f32.mrf.mxu1 }
 0x2c3   : > { %v4345_v15 = vpop.f32.mrf.mxu0 }
 0x2c4   : > { %v14908_v28 = vadd.f32 %v4344_v53, %v14698_v62  ;;  %v4346_v54 = vadd.f32 %v4345_v15, %v14793_v10  ;;  %v14911_v9 = vpop.f32.mrf.mxu1 }
 0x2c5   : > { %v4347_v37 = vpop.f32.mrf.mxu0 }
 0x2c6   : > { %v14914_v35 = vadd.f32 %v4346_v54, %v14705_v25  ;;  %v4348_v22 = vadd.f32 %v4347_v37, %v14801_v31  ;;  %v14917_v14 = vpop.f32.mrf.mxu1  ;;  %v12361_v54 = vld [vmem:[#allocation2 + $0xbc] sm:$0xf] }
 0x2c7   : > { %v14919_v3 = vpop.f32.mrf.mxu0  ;;  %v16448_v37 = vld [vmem:[#allocation75_spill] sm:$0xff] }
 0x2c8   : > { %v14922_v62 = vadd.f32 %v4348_v22, %v14711_v18  ;;  %v14924_v4 = vpop.f32.mrf.mxu1  ;;  %v10792_v50 = vcombine.low %v12361_v54, %v16448_v37 }
 0x2c9   : > { %v4353_v10 = vpop.f32.mrf.mxu0  ;;  %10837 = vmatmul.mubr.msk.bf16.gmra.mxu0 %vm1151_vm9, %v10789_v27 }
 0x2ca   : > { %v4354_v63 = vadd.f32 %v4353_v10, %v14814_v26  ;;  %6186 = vmatprep.mubr.bf16.mxu0 %v16149_v2  ;;  %v14929_v25 = vpop.f32.mrf.mxu1 }
 0x2cb   : > { %v4355_v47 = vpop.f32.mrf.mxu0 }
 0x2cc   : > { %v14932_v31 = vadd.f32 %v4354_v63, %v14725_v59  ;;  %v4356_v53 = vadd.f32 %v4355_v47, %v14820_v16  ;;  %v14935_v15 = vpop.f32.mrf.mxu1  ;;  %v16449_v47 = vld [vmem:[#allocation34_spill] sm:$0xff] }
 0x2cd   : > { %v4357_v18 = vpop.f32.mrf.mxu0 }
 0x2ce   : > { %v14939_v45 = vadd.f32 %v4356_v53, %v14731_v38  ;;  %v4358_v26 = vadd.f32 %v4357_v18, %v14828_v58  ;;  %v14942_v2 = vpop.f32.mrf.mxu1 }
 0x2cf   : > { %v14944_v27 = vpop.f32.mrf.mxu0 }
 0x2d0   : > { %v14947_v59 = vadd.f32 %v4358_v26, %v14738_v33  ;;  %v14949_v22 = vpop.f32.mrf.mxu1 }
 0x2d1   : > { %v4363_v16 = vpop.f32.mrf.mxu0  ;;  %10838 = vmatmul.mubr.msk.bf16.gmra.mxu0 %vm1151_vm9, %v10792_v50 }
 0x2d2   : > { %v4364_v10 = vadd.f32 %v4363_v16, %v14841_v17  ;;  %v14953_v63 = vpop.f32.mrf.mxu1 }
 0x2d3   : > { %v4365_v38 = vpop.f32.mrf.mxu0 }
 0x2d4   : > { %v14956_v53 = vadd.f32 %v4364_v10, %v16449_v47  ;;  %v4366_v58 = vadd.f32 %v4365_v38, %v14847_v5  ;;  %v14959_v18 = vpop.f32.mrf.mxu1 }
 0x2d5   : > { %16450 = vst [vmem:[#allocation29_spill] sm:$0xff] %v14959_v18  ;;  %v4367_v54 = vpop.f32.mrf.mxu0  ;;  %v11878_v18 = vld [vmem:[#allocation9 + $0x60] ss:$8 sps:$4 sm:$0xff]  }
 0x2d6   : > { %v14962_v33 = vadd.f32 %v4366_v58, %v14758_v23  ;;  %v4368_v37 = vadd.f32 %v4367_v54, %v14855_v46  ;;  %v14965_v26 = vpop.f32.mrf.mxu1 }
 0x2d7   : > { %v14967_v50 = vpop.f32.mrf.mxu0 }
 0x2d8   : > { %v14970_v17 = vadd.f32 %v4368_v37, %v14764_v57  ;;  %v14972_v16 = vpop.f32.mrf.mxu1 }
 0x2d9   : > { %v4886_v10 = vpop.f32.mrf.mxu0 }
 0x2da   : > { %v4887_v5 = vadd.f32 %v4886_v10, %v14867_v42  ;;  %v14975_v38 = vpop.f32.mrf.mxu1 }
 0x2db   : > { %v4888_v47 = vpop.f32.mrf.mxu0 }
 0x2dc   : > { %v14978_v23 = vadd.f32 %v4887_v5, %v14778_v7  ;;  %v4889_v46 = vadd.f32 %v4888_v47, %v14873_v41  ;;  %v14981_v58 = vpop.f32.mrf.mxu1  ;;  %v11877_v5 = vld [vmem:[#allocation9 + $0x74] ss:$8 sps:$4 sm:$0xff]  }
 0x2dd   : > { %v4890_v54 = vpop.f32.mrf.mxu0  ;;  %7929 = vmatprep.subr.bf16.mxu0 %v11877_v5 }
 0x2de   : > { %v14984_v32 = vadd.f32 %v4889_v46, %v14784_v36  ;;  %v4891_v57 = vadd.f32 %v4890_v54, %v14881_v40  ;;  %7930 = vmatpush1.bf16.msra.mxu0 %v11875_v30 }
 0x2df   : > { %v14987_v37 = vpop.f32.mrf.mxu1  ;;  %v14989_v21 = vpop.f32.mrf.mxu0 }
 0x2e0   : > { %16451 = vst [vmem:[#allocation51_spill] sm:$0xff] %v14989_v21  ;;  %v14992_v42 = vadd.f32 %v4891_v57, %v14790_v48  ;;  %v11880_v57 = vld [vmem:[#allocation9 + $0x64] ss:$8 sps:$4 sm:$0xff]  }
 0x2e1   : > { %v14994_v10 = vpop.f32.mrf.mxu1  ;;  %v4896_v7 = vpop.f32.mrf.mxu0  ;;  %7931 = vmatprep.subr.bf16.mxu0 %v11880_v57 }
 0x2e2   : > { %v4897_v41 = vadd.f32 %v4896_v7, %v14893_v34  ;;  %7932 = vmatpush1.bf16.msra.mxu0 %v11878_v18 }
 0x2e3   : > { %v14997_v47 = vpop.f32.mrf.mxu1  ;;  %v4898_v36 = vpop.f32.mrf.mxu0 }
 0x2e4   : > { %v15000_v40 = vadd.f32 %v4897_v41, %v14805_v56  ;;  %v4899_v46 = vadd.f32 %v4898_v36, %v14900_v12 }
 0x2e5   : > { %v15003_v54 = vpop.f32.mrf.mxu1  ;;  %v4900_v48 = vpop.f32.mrf.mxu0 }
 0x2e6   : > { %v15006_v21 = vadd.f32 %v4899_v46, %v14811_v44  ;;  %v4901_v34 = vadd.f32 %v4900_v48, %v14905_v6 }
 0x2e7   : > { %v15009_v7 = vpop.f32.mrf.mxu1  ;;  %v15011_v61 = vpop.f32.mrf.mxu0 }
 0x2e8   : > { %v15014_v56 = vadd.f32 %v4901_v34, %v14817_v19 }
 0x2e9   : > { %v15016_v12 = vpop.f32.mrf.mxu1  ;;  %v4906_v30 = vpop.f32.mrf.mxu0 }
 0x2ea   : > { %v4907_v5 = vadd.f32 %v4906_v30, %v14917_v14 }
 0x2eb   : > { %v15019_v41 = vpop.f32.mrf.mxu1  ;;  %v4908_v44 = vpop.f32.mrf.mxu0 }
 0x2ec   : > { %v15022_v6 = vadd.f32 %v4907_v5, %v14832_v13  ;;  %v4909_v36 = vadd.f32 %v4908_v44, %v14924_v4 }
 0x2ed   : > { %v15025_v46 = vpop.f32.mrf.mxu1  ;;  %v4910_v48 = vpop.f32.mrf.mxu0 }
 0x2ee   : > { %16452 = vst [vmem:[#allocation44_spill] sm:$0xff] %v15022_v6  ;;  %v15028_v19 = vadd.f32 %v4909_v36, %v14838_v29  ;;  %v4911_v57 = vadd.f32 %v4910_v48, %v14929_v25 }
 0x2ef   : > { %v15031_v18 = vpop.f32.mrf.mxu1  ;;  %v15033_v34 = vpop.f32.mrf.mxu0 }
 0x2f0   : > { %16453 = vst [vmem:[#allocation53_spill] sm:$0xff] %v15028_v19  ;;  %v15036_v14 = vadd.f32 %v4911_v57, %v14844_v24 }
 0x2f1   : > { %v15038_v30 = vpop.f32.mrf.mxu1  ;;  %v4916_v13 = vpop.f32.mrf.mxu0 }
 0x2f2   : > { %16454 = vst [vmem:[#allocation50_spill] sm:$0xff] %v15036_v14  ;;  %v4917_v4 = vadd.f32 %v4916_v13, %v14942_v2  ;;  %v11883_v14 = vld [vmem:[#allocation9 + $0x54] ss:$8 sps:$4 sm:$0xff]   ;;  %v11881_v13 = vld [vmem:[#allocation9 + $0x50] ss:$8 sps:$4 sm:$0xff]  }
 0x2f3   : > { %v15041_v5 = vpop.f32.mrf.mxu1  ;;  %v4918_v44 = vpop.f32.mrf.mxu0  ;;  %7933 = vmatprep.subr.bf16.mxu0 %v11883_v14 }
 0x2f4   : > { %v15044_v29 = vadd.f32 %v4917_v4, %v14858_v51  ;;  %v4919_v25 = vadd.f32 %v4918_v44, %v14949_v22  ;;  %7934 = vmatpush1.bf16.msra.mxu0 %v11881_v13 }
 0x2f5   : > { %v15047_v36 = vpop.f32.mrf.mxu1  ;;  %v4920_v48 = vpop.f32.mrf.mxu0 }
 0x2f6   : > { %v15050_v19 = vadd.f32 %v4919_v25, %v14864_v52  ;;  %v4921_v24 = vadd.f32 %v4920_v48, %v14953_v63  ;;  %v4340_v63 = vadd.f32 %v14895_v0, %v14781_v1 }
 0x2f7   : > { %v15053_v57 = vpop.f32.mrf.mxu1  ;;  %v15055_v2 = vpop.f32.mrf.mxu0 }
 0x2f8   : > { %16455 = vst [vmem:[#allocation36_spill] sm:$0xff] %v15050_v19  ;;  %v15058_v6 = vadd.f32 %v4921_v24, %v14870_v8 }
 0x2f9   : > { %v15060_v51 = vpop.f32.mrf.mxu1  ;;  %v4926_v22 = vpop.f32.mrf.mxu0 }
 0x2fa   : > { %16456 = vst [vmem:[#allocation58_spill] sm:$0xff] %v15058_v6  ;;  %v4927_v4 = vadd.f32 %v4926_v22, %v14965_v26  ;;  %v16458_v6 = vld [vmem:[#allocation95_spill] sm:$0xff] }
 0x2fb   : > { %v15063_v52 = vpop.f32.mrf.mxu1  ;;  %v4928_v44 = vpop.f32.mrf.mxu0  ;;  %v4391_v19 = vadd.f32 %v4340_v63, %v16458_v6 }
 0x2fc   : > { %v15068_v25 = vadd.f32 %v4927_v4, %v14884_v55  ;;  %v4929_v48 = vadd.f32 %v4928_v44, %v14972_v16  ;;  %v11886_v16 = vld [vmem:[#allocation9 + $0x44] ss:$8 sps:$4 sm:$0xff]   ;;  %v11884_v44 = vld [vmem:[#allocation9 + $0x40] ss:$8 sps:$4 sm:$0xff]  }
 0x2fd   : > { %v15071_v8 = vpop.f32.mrf.mxu1  ;;  %v4930_v24 = vpop.f32.mrf.mxu0  ;;  %7935 = vmatprep.subr.bf16.mxu0 %v11886_v16 }
 0x2fe   : > { %16457 = vst [vmem:[#allocation52_spill] sm:$0xff] %v15071_v8  ;;  %v15074_v14 = vadd.f32 %v4929_v48, %v14890_v20  ;;  %v4931_v13 = vadd.f32 %v4930_v24, %v14975_v38  ;;  %7936 = vmatpush1.bf16.msra.mxu0 %v11884_v44 }
 0x2ff   : > { %v15077_v26 = vpop.f32.mrf.mxu1  ;;  %v4932_v22 = vpop.f32.mrf.mxu0 }
 0x300   : > { %v15081_v1 = vadd.f32 %v4931_v13, %v14898_v39  ;;  %v4933_v55 = vadd.f32 %v4932_v22, %v14981_v58  ;;  %v4350_v39 = vadd.f32 %v14919_v3, %v14808_v49 }
 0x301   : > { %v15084_v0 = vpop.f32.mrf.mxu1  ;;  %v4936_v4 = vpop.f32.mrf.mxu0 }
 0x302   : > { %v15086_v8 = vadd.f32 %v4933_v55, %v4391_v19  ;;  %v4937_v20 = vadd.f32 %v4936_v4, %v14987_v37  ;;  %v16459_v55 = vld [vmem:[#allocation23_spill] sm:$0xff] }
 0x303   : > { %v15089_v38 = vpop.f32.mrf.mxu1  ;;  %v4938_v48 = vpop.f32.mrf.mxu0  ;;  %v4395_v16 = vadd.f32 %v4350_v39, %v16459_v55  ;;  %v16460_v55 = vld [vmem:[#allocation37_spill] sm:$0xff] }
 0x304   : > { %v15094_v6 = vadd.f32 %v4937_v20, %v14908_v28  ;;  %v4939_v58 = vadd.f32 %v4938_v48, %v14994_v10  ;;  %v4360_v20 = vadd.f32 %v14944_v27, %v14835_v11 }
 0x305   : > { %v15097_v63 = vpop.f32.mrf.mxu1  ;;  %v4940_v24 = vpop.f32.mrf.mxu0 }
 0x306   : > { %v15100_v19 = vadd.f32 %v4939_v58, %v14914_v35  ;;  %v4941_v37 = vadd.f32 %v4940_v24, %v14997_v47 }
 0x307   : > { %v15103_v13 = vpop.f32.mrf.mxu1  ;;  %v4942_v22 = vpop.f32.mrf.mxu0 }
 0x308   : > { %v15107_v49 = vadd.f32 %v4941_v37, %v14922_v62  ;;  %v4943_v28 = vadd.f32 %v4942_v22, %v15003_v54  ;;  %v11889_v22 = vld [vmem:[#allocation9 + $0x34] ss:$8 sps:$4 sm:$0xff]  }
 0x309   : > { %v15110_v3 = vpop.f32.mrf.mxu1  ;;  %v4946_v10 = vpop.f32.mrf.mxu0  ;;  %7937 = vmatprep.subr.bf16.mxu0 %v11889_v22  ;;  %v16461_v22 = vld [vmem:[#allocation25_spill] sm:$0xff] }
 0x30a   : > { %v15112_v4 = vadd.f32 %v4943_v28, %v4395_v16  ;;  %v4947_v35 = vadd.f32 %v4946_v10, %v15009_v7  ;;  %v4399_v16 = vadd.f32 %v4360_v20, %v16460_v55 }
 0x30b   : > { %v15115_v44 = vpop.f32.mrf.mxu1  ;;  %v4948_v47 = vpop.f32.mrf.mxu0 }
 0x30c   : > { %v15120_v48 = vadd.f32 %v4947_v35, %v14932_v31  ;;  %v4949_v62 = vadd.f32 %v4948_v47, %v15016_v12  ;;  %v11887_v12 = vld [vmem:[#allocation9 + $0x30] ss:$8 sps:$4 sm:$0xff]   ;;  %v4370_v47 = vadd.f32 %v14967_v50, %v14861_v60 }
 0x30d   : > { %v15123_v39 = vpop.f32.mrf.mxu1  ;;  %v4950_v54 = vpop.f32.mrf.mxu0  ;;  %7938 = vmatpush1.bf16.msra.mxu0 %v11887_v12 }
 0x30e   : > { %v15126_v58 = vadd.f32 %v4949_v62, %v14939_v45  ;;  %v4951_v24 = vadd.f32 %v4950_v54, %v15019_v41  ;;  %v4403_v55 = vadd.f32 %v4370_v47, %v16461_v22 }
 0x30f   : > { %v15129_v7 = vpop.f32.mrf.mxu1  ;;  %v4952_v37 = vpop.f32.mrf.mxu0 }
 0x310   : > { %v15133_v11 = vadd.f32 %v4951_v24, %v14947_v59  ;;  %v4953_v31 = vadd.f32 %v4952_v37, %v15025_v46 }
 0x311   : > { %v15136_v27 = vpop.f32.mrf.mxu1  ;;  %v4956_v28 = vpop.f32.mrf.mxu0 }
 0x312   : > { %v15138_v45 = vadd.f32 %v4953_v31, %v4399_v16  ;;  %v4957_v41 = vadd.f32 %v4956_v28, %v15031_v18 }
 0x313   : > { %v15141_v10 = vpop.f32.mrf.mxu1  ;;  %v4958_v35 = vpop.f32.mrf.mxu0 }
 0x314   : > { %v15146_v59 = vadd.f32 %v4957_v41, %v14956_v53  ;;  %v4959_v46 = vadd.f32 %v4958_v35, %v15038_v30  ;;  %v11892_v35 = vld [vmem:[#allocation9 + $0x24] ss:$8 sps:$4 sm:$0xff]  }
 0x315   : > { %v15149_v20 = vpop.f32.mrf.mxu1  ;;  %v4960_v62 = vpop.f32.mrf.mxu0  ;;  %7939 = vmatprep.subr.bf16.mxu0 %v11892_v35  ;;  %v16462_v35 = vld [vmem:[#allocation44_spill] sm:$0xff] }
 0x316   : > { %v15152_v54 = vadd.f32 %v4959_v46, %v14962_v33  ;;  %v4961_v18 = vadd.f32 %v4960_v62, %v15041_v5  ;;  %v11890_v46 = vld [vmem:[#allocation9 + $0x20] ss:$8 sps:$4 sm:$0xff]  }
 0x317   : > { %v15155_v24 = vpop.f32.mrf.mxu1  ;;  %v4962_v37 = vpop.f32.mrf.mxu0  ;;  %7940 = vmatpush1.bf16.msra.mxu0 %v11890_v46  ;;  %v11895_v46 = vld [vmem:[#allocation9 + $0x14] ss:$8 sps:$4 sm:$0xff]  }
 0x318   : > { %v15159_v60 = vadd.f32 %v4961_v18, %v14970_v17  ;;  %v4963_v53 = vadd.f32 %v4962_v37, %v15047_v36  ;;  %7941 = vmatprep.subr.bf16.mxu0 %v11895_v46 }
 0x319   : > { %v15162_v50 = vpop.f32.mrf.mxu1  ;;  %v5563_v30 = vpop.f32.mrf.mxu0 }
 0x31a   : > { %v15164_v16 = vadd.f32 %v4963_v53, %v4403_v55  ;;  %v5564_v33 = vadd.f32 %v5563_v30, %v15053_v57 }
 0x31b   : > { %v15167_v31 = vpop.f32.mrf.mxu1  ;;  %v5565_v5 = vpop.f32.mrf.mxu0 }
 0x31c   : > { %v15170_v12 = vadd.f32 %v5564_v33, %v14978_v23  ;;  %v5566_v28 = vadd.f32 %v5565_v5, %v15060_v51 }
 0x31d   : > { %v15173_v41 = vpop.f32.mrf.mxu1  ;;  %v5567_v17 = vpop.f32.mrf.mxu0 }
 0x31e   : > { %v15176_v36 = vadd.f32 %v5566_v28, %v14984_v32  ;;  %v5568_v47 = vadd.f32 %v5567_v17, %v15063_v52  ;;  %v4903_v32 = vadd.f32 %v15011_v61, %v14911_v9 }
 0x31f   : > { %v15179_v62 = vpop.f32.mrf.mxu0  ;;  %v15181_v57 = vpop.f32.mrf.mxu1 }
 0x320   : > { %v15184_v23 = vadd.f32 %v5568_v47, %v14992_v42 }
 0x321   : > { %v5573_v51 = vpop.f32.mrf.mxu0  ;;  %v15187_v22 = vpop.f32.mrf.mxu1 }
 0x322   : > { %v5574_v18 = vadd.f32 %v5573_v51, %v15077_v26  ;;  %v4972_v26 = vadd.f32 %v4903_v32, %v14824_v43  ;;  %v16463_v51 = vld [vmem:[#allocation53_spill] sm:$0xff] }
 0x323   : > { %v5575_v37 = vpop.f32.mrf.mxu0  ;;  %v15199_v5 = vpop.f32.mrf.mxu1 }
 0x324   : > { %v15192_v52 = vadd.f32 %v5574_v18, %v15000_v40  ;;  %v5576_v55 = vadd.f32 %v5575_v37, %v15084_v0  ;;  %v11893_v37 = vld [vmem:[#allocation9 + $0x10] ss:$8 sps:$4 sm:$0xff]  }
 0x325   : > { %v5577_v53 = vpop.f32.mrf.mxu0  ;;  %7942 = vmatpush1.bf16.msra.mxu0 %v11893_v37  ;;  %v16469_v37 = vld [vmem:[#allocation58_spill] sm:$0xff] }
 0x326   : > { %v15196_v30 = vadd.f32 %v5576_v55, %v15006_v21  ;;  %v5578_v42 = vadd.f32 %v5577_v53, %v15089_v38  ;;  %v15209_v21 = vpop.f32.mrf.mxu1  ;;  %v4913_v38 = vadd.f32 %v15033_v34, %v14935_v15  ;;  %v16464_v55 = vld [vmem:[#allocation35_spill] sm:$0xff] }
 0x327   : > { %v5579_v33 = vpop.f32.mrf.mxu0 }
 0x328   : > { %v15203_v28 = vadd.f32 %v5578_v42, %v15014_v56  ;;  %v5580_v61 = vadd.f32 %v5579_v33, %v15097_v63  ;;  %v5510_v32 = vpop.f32.mrf.mxu1  ;;  %v4976_v53 = vadd.f32 %v4913_v38, %v16464_v55  ;;  %v16465_v42 = vld [vmem:[#allocation50_spill] sm:$0xff] }
 0x329   : > { %v5583_v9 = vpop.f32.mrf.mxu0 }
 0x32a   : > { %v15206_v40 = vadd.f32 %v5580_v61, %v4972_v26  ;;  %v5584_v0 = vadd.f32 %v5583_v9, %v15103_v13  ;;  %v5512_v9 = vpop.f32.mrf.mxu1 }
 0x32b   : > { %v5585_v17 = vpop.f32.mrf.mxu0 }
 0x32c   : > { %v15214_v47 = vadd.f32 %v5584_v0, %v16462_v35  ;;  %v5586_v43 = vadd.f32 %v5585_v17, %v15110_v3 }
 0x32d   : > { %v5587_v56 = vpop.f32.mrf.mxu0 }
 0x32e   : > { %v15218_v63 = vadd.f32 %v5586_v43, %v16463_v51  ;;  %v5588_v18 = vadd.f32 %v5587_v56, %v15115_v44  ;;  %v16466_v44 = vld [vmem:[#allocation29_spill] sm:$0xff]  ;;  %v16467_v43 = vld [vmem:[#allocation36_spill] sm:$0xff]  ;;  %v5514_v51 = vpop.f32.mrf.mxu1 }
 0x32f   : > { %v5589_v13 = vpop.f32.mrf.mxu0  ;;  %v4923_v0 = vadd.f32 %v15055_v2, %v16466_v44 }
 0x330   : > { %v15223_v15 = vadd.f32 %v5588_v18, %v16465_v42  ;;  %v5590_v34 = vadd.f32 %v5589_v13, %v15123_v39  ;;  %v16468_v18 = vld [vmem:[#allocation45_spill] sm:$0xff]  ;;  %v5516_v42 = vpop.f32.mrf.mxu1 }
 0x331   : > { %v5593_v3 = vpop.f32.mrf.mxu0 }
 0x332   : > { %v15226_v33 = vadd.f32 %v5590_v34, %v4976_v53  ;;  %v5594_v26 = vadd.f32 %v5593_v3, %v15129_v7  ;;  %v4980_v7 = vadd.f32 %v4923_v0, %v16468_v18  ;;  %v11898_v3 = vld [vmem:[#allocation9 + $0x4] ss:$8 sps:$4 sm:$0xff]  }
 0x333   : > { %v5595_v61 = vpop.f32.mrf.mxu0  ;;  %7943 = vmatprep.subr.bf16.mxu0 %v11898_v3 }
 0x334   : > { %v15232_v17 = vadd.f32 %v5594_v26, %v15044_v29  ;;  %v5596_v38 = vadd.f32 %v5595_v61, %v15136_v27  ;;  %v11896_v61 = vld [vmem:[#allocation9] ss:$8 sps:$4 sm:$0xff]  }
 0x335   : > { %v5597_v35 = vpop.f32.mrf.mxu0  ;;  %7944 = vmatpush1.bf16.msra.mxu0 %v11896_v61 }
 0x336   : > { %v15236_v56 = vadd.f32 %v5596_v38, %v16467_v43  ;;  %v5598_v39 = vadd.f32 %v5597_v35, %v15141_v10  ;;  %v5520_v38 = vpop.f32.mrf.mxu1 }
 0x337   : > { %v5599_v46 = vpop.f32.mrf.mxu0 }
 0x338   : > { %v15241_v13 = vadd.f32 %v5598_v39, %v16469_v37  ;;  %v5600_v2 = vadd.f32 %v5599_v46, %v15149_v20 }
 0x339   : > { %v5603_v55 = vpop.f32.mrf.mxu0 }
 0x33a   : > { %v15244_v29 = vadd.f32 %v5600_v2, %v4980_v7  ;;  %v5604_v27 = vadd.f32 %v5603_v55, %v15155_v24  ;;  %v11901_v2 = vld [vmem:[#allocation9 + $0xf4] ss:$8 sps:$4 sm:$0xff]   ;;  %v11899_v55 = vld [vmem:[#allocation9 + $0xf0] ss:$8 sps:$4 sm:$0xff]  }
 0x33b   : > { %v5605_v53 = vpop.f32.mrf.mxu0  ;;  %7945 = vmatprep.subr.bf16.mxu0 %v11901_v2 }
 0x33c   : > { %v15248_v34 = vadd.f32 %v5604_v27, %v15068_v25  ;;  %v5606_v10 = vadd.f32 %v5605_v53, %v15162_v50  ;;  %7946 = vmatpush2.bf16.msra.mxu0 %v11899_v55 }
 0x33d   : > { %v5607_v26 = vpop.f32.mrf.mxu0 }
 0x33e   : > { %v15252_v44 = vadd.f32 %v5606_v10, %v15074_v14  ;;  %v5608_v20 = vadd.f32 %v5607_v26, %v15167_v31  ;;  %v5522_v14 = vpop.f32.mrf.mxu1 }
 0x33f   : > { %v5609_v0 = vpop.f32.mrf.mxu0 }
 0x340   : > { %v15256_v24 = vadd.f32 %v5608_v20, %v15081_v1  ;;  %v5610_v25 = vadd.f32 %v5609_v0, %v15173_v41  ;;  %v5524_v37 = vpop.f32.mrf.mxu1 }
 0x341   : > { %v5613_v35 = vpop.f32.mrf.mxu0 }
 0x342   : > { %v15260_v50 = vadd.f32 %v5610_v25, %v15086_v8  ;;  %v5614_v43 = vadd.f32 %v5613_v35, %v15181_v57  ;;  %v5526_v53 = vpop.f32.mrf.mxu1 }
 0x343   : > { %v5615_v39 = vpop.f32.mrf.mxu0 }
 0x344   : > { %v15264_v46 = vadd.f32 %v5614_v43, %v15094_v6  ;;  %v5616_v31 = vadd.f32 %v5615_v39, %v15187_v22  ;;  %v6005_v61 = vpop.f32.mrf.mxu1 }
 0x345   : > { %v5617_v18 = vpop.f32.mrf.mxu0 }
 0x346   : > { %v15268_v7 = vadd.f32 %v5616_v31, %v15100_v19  ;;  %v5618_v1 = vadd.f32 %v5617_v18, %v15199_v5  ;;  %v6839_v31 = vlaneseq }
 0x347   : > { %v5619_v41 = vpop.f32.mrf.mxu0 }
 0x348   : > { %v15272_v8 = vadd.f32 %v5618_v1, %v15107_v49  ;;  %v5620_v57 = vadd.f32 %v5619_v41, %v15209_v21  ;;  %v11904_v41 = vld [vmem:[#allocation9 + $0xe4] ss:$8 sps:$4 sm:$0xff]  }
 0x349   : > { %v5623_v27 = vpop.f32.mrf.mxu0  ;;  %7947 = vmatprep.subr.bf16.mxu0 %v11904_v41 }
 0x34a   : > { %v15276_v6 = vadd.f32 %v5620_v57, %v15112_v4  ;;  %v5624_v22 = vadd.f32 %v5623_v27, %v5510_v32  ;;  %v11907_v32 = vld [vmem:[#allocation9 + $0x174] ss:$8 sps:$4 sm:$0xff]   ;;  %v15299_v57 = vshrl.u32 %v6839_v31, 7  ;;  %v16471_v27 = vld [vmem:[#allocation41_spill] sm:$0xff] }
 0x34b   : > { %v5625_v19 = vpop.f32.mrf.mxu0  ;;  %7696 = vmatprep.subr.bf16.mxu1 %v11907_v32  ;;  %v11911_v32 = vld [vmem:[#allocation9 + $0x160] ss:$8 sps:$4 sm:$0xff]  }
 0x34c   : > { %v15279_v5 = vadd.f32 %v5624_v22, %v15120_v48  ;;  %v5626_v10 = vadd.f32 %v5625_v19, %v5512_v9  ;;  %v11905_v48 = vld [vmem:[#allocation9 + $0x170] ss:$8 sps:$4 sm:$0xff]   ;;  %v6007_v9 = vpop.f32.mrf.mxu1  ;;  %16470 = vst [vmem:[#allocation31_spill] sm:$0xff] %v15299_v57 }
 0x34d   : > { %v5627_v3 = vpop.f32.mrf.mxu0  ;;  %7697 = vmatpush1.bf16.msra.mxu1 %v11905_v48 }
 0x34e   : > { %v15282_v49 = vadd.f32 %v5626_v10, %v15126_v58  ;;  %v5628_v26 = vadd.f32 %v5627_v3, %v5514_v51  ;;  %v6009_v1 = vpop.f32.mrf.mxu1  ;;  %v16097_v3 = vsub.s32 0, %v15299_v57 }
 0x34f   : > { %v5629_v21 = vpop.f32.mrf.mxu0 }
 0x350   : > { %v15285_v20 = vadd.f32 %v5628_v26, %v15133_v11  ;;  %v5630_v4 = vadd.f32 %v5629_v21, %v5516_v42  ;;  %v16096_v26 = vsub.s32 1, %v15299_v57 }
 0x351   : > { %v5633_v0 = vpop.f32.mrf.mxu0 }
 0x352   : > { %v15288_v25 = vadd.f32 %v5630_v4, %v15138_v45  ;;  %v5634_v35 = vadd.f32 %v5633_v0, %v5520_v38  ;;  %v11913_v4 = vld [vmem:[#allocation9 + $0x164] ss:$8 sps:$4 sm:$0xff]  }
 0x353   : > { %v5635_v43 = vpop.f32.mrf.mxu0  ;;  %7698 = vmatprep.subr.bf16.mxu1 %v11913_v4 }
 0x354   : > { %v15291_v58 = vadd.f32 %v5634_v35, %v15146_v59  ;;  %v5636_v51 = vadd.f32 %v5635_v43, %v5522_v14  ;;  %v11902_v59 = vld [vmem:[#allocation9 + $0xe0] ss:$8 sps:$4 sm:$0xff]   ;;  %7699 = vmatpush1.bf16.msra.mxu1 %v11911_v32 }
 0x355   : > { %v5637_v39 = vpop.f32.mrf.mxu0  ;;  %7948 = vmatpush2.bf16.msra.mxu0 %v11902_v59  ;;  %v16474_v35 = vld [vmem:[#allocation42_spill] sm:$0xff] }
 0x356   : > { %v15294_v11 = vadd.f32 %v5636_v51, %v15152_v54  ;;  %v5638_v42 = vadd.f32 %v5637_v39, %v5524_v37  ;;  %v16472_v54 = vld [vmem:[#allocation51_spill] sm:$0xff]  ;;  %v6011_v37 = vpop.f32.mrf.mxu1 }
 0x357   : > { %v5639_v18 = vpop.f32.mrf.mxu0  ;;  %v4893_v22 = vadd.f32 %v16472_v54, %v16471_v27 }
 0x358   : > { %v15297_v45 = vadd.f32 %v5638_v42, %v15159_v60  ;;  %v5640_v38 = vadd.f32 %v5639_v18, %v5526_v53  ;;  %v16473_v60 = vld [vmem:[#allocation52_spill] sm:$0xff]  ;;  %v6015_v43 = vpop.f32.mrf.mxu1 }
 0x359   : > { %v6118_v2 = vpop.f32.mrf.mxu0  ;;  %v5570_v53 = vadd.f32 %v15179_v62, %v16473_v60  ;;  %v4968_v48 = vadd.f32 %v4893_v22, %v16474_v35 }
 0x35a   : > { %v15302_v14 = vadd.f32 %v5640_v38, %v15164_v16  ;;  %v6119_v55 = vadd.f32 %v6118_v2, %v6005_v61  ;;  %v517_v61 = vld [vmem:[#allocation7] sm:$0x3] }
 0x35b   : > { %v6120_v19 = vpop.f32.mrf.mxu0  ;;  %v5645_v18 = vadd.f32 %v5570_v53, %v4968_v48  ;;  %v11908_v48 = vld [vmem:[#allocation9 + $0xd0] ss:$8 sps:$4 sm:$0xff]  }
 0x35c   : > { %v6121_v10 = vadd.f32 %v6120_v19, %v6007_v9  ;;  %v6197_v16 = vadd.f32 %v6119_v55, %v15170_v12  ;;  %v15315_v12 = vrot.slane %v517_v61, %v16097_v3 }
 0x35d   : > { %v6122_v21 = vpop.f32.mrf.mxu0 }
 0x35e   : > { %v6198_v0 = vadd.f32 %v6121_v10, %v15176_v36  ;;  %v6123_v9 = vadd.f32 %v6122_v21, %v6009_v1  ;;  %v15319_v36 = vrot.slane %v517_v61, %v16096_v26  ;;  %v6017_v10 = vpop.f32.mrf.mxu1 }
 0x35f   : > { %v6124_v51 = vpop.f32.mrf.mxu0 }
 0x360   : > { %v6261_v62 = vcombine.low %v6197_v16, %v6198_v0  ;;  %v6262_v39 = vcombine.high %v6197_v16, %v6198_v0  ;;  %v10839_v31 = vcombine.low %v6198_v0, %v6198_v0  ;;  %v10840_v42 = vcombine.high %v6198_v0, %v6198_v0  ;;  %v11910_v16 = vld [vmem:[#allocation9 + $0xd4] ss:$8 sps:$4 sm:$0xff]  }
 0x361   : > { %v6125_v38 = vadd.f32 %v6124_v51, %v6011_v37  ;;  %v6128_v41 = vpop.f32.mrf.mxu0  ;;  %v6199_v53 = vadd.f32 %v6123_v9, %v15184_v23  ;;  %7949 = vmatprep.subr.bf16.mxu0 %v11910_v16 }
 0x362   : > { %v6390_v1 = vsel %vm6389_vm15, %v6261_v62, -inf  ;;  %v6397_v2 = vsel %vm6389_vm15, %v10839_v31, -inf  ;;  %v6404_v59 = vsel %vm6389_vm15, %v6262_v39, -inf  ;;  %v6411_v55 = vsel %vm6389_vm15, %v10840_v42, -inf  ;;  %7950 = vmatpush2.bf16.msra.mxu0 %v11908_v48 }
 0x363   : > { %v6391_v27 = vrot.slane %v6390_v1, 4  ;;  %v6398_v54 = vrot.slane %v6397_v2, 4  ;;  %v6405_v22 = vrot.slane %v6404_v59, 4  ;;  %v6412_v19 = vrot.slane %v6411_v55, 4  ;;  %v6130_v60 = vpop.f32.mrf.mxu0 }
 0x364   : > { %v6200_v21 = vadd.f32 %v6125_v38, %v5645_v18  ;;  %v15326_v4 = vadd.f32 %v6128_v41, %v6015_v43  ;;  %v15328_v37 = vadd.f32 %v6130_v60, %v6017_v10 }
 0x365   : > { %v6392_v61 = vmax.f32 %v6390_v1, %v6391_v27  ;;  %v6399_v0 = vmax.f32 %v6397_v2, %v6398_v54  ;;  %v6406_v32 = vmax.f32 %v6404_v59, %v6405_v22  ;;  %v6413_v35 = vmax.f32 %v6411_v55, %v6412_v19 }
 0x366   : > { %v6263_v51 = vcombine.low %v6199_v53, %v6200_v21  ;;  %v6264_v62 = vcombine.high %v6199_v53, %v6200_v21  ;;  %v10841_v39 = vcombine.low %v6200_v21, %v6200_v21  ;;  %v10842_v31 = vcombine.high %v6200_v21, %v6200_v21 }
 0x367   : > { %v6393_v42 = vrot.slane %v6392_v61, 2  ;;  %v6400_v26 = vrot.slane %v6399_v0, 2  ;;  %v6407_v3 = vrot.slane %v6406_v32, 2  ;;  %v6414_v23 = vrot.slane %v6413_v35, 2 }
 0x368   : > { %v6418_v43 = vsel %vm6389_vm15, %v6263_v51, -inf  ;;  %v6425_v9 = vsel %vm6389_vm15, %v10841_v39, -inf  ;;  %v6432_v18 = vsel %vm6389_vm15, %v6264_v62, -inf  ;;  %v6439_v38 = vsel %vm6389_vm15, %v10842_v31, -inf }
 0x369   : > { %v6394_v41 = vmax.f32 %v6392_v61, %v6393_v42  ;;  %v6401_v1 = vmax.f32 %v6399_v0, %v6400_v26  ;;  %v6408_v2 = vmax.f32 %v6406_v32, %v6407_v3  ;;  %v6415_v59 = vmax.f32 %v6413_v35, %v6414_v23  ;;  %v11919_v61 = vld [vmem:[#allocation9 + $0x154] ss:$8 sps:$4 sm:$0xff]   ;;  %v11917_v35 = vld [vmem:[#allocation9 + $0x150] ss:$8 sps:$4 sm:$0xff]  }
 0x36a   : > { %v6419_v55 = vrot.slane %v6418_v43, 4  ;;  %v6426_v27 = vrot.slane %v6425_v9, 4  ;;  %v6433_v54 = vrot.slane %v6432_v18, 4  ;;  %v6440_v22 = vrot.slane %v6439_v38, 4  ;;  %7700 = vmatprep.subr.bf16.mxu1 %v11919_v61 }
 0x36b   : > { %v6395_v19 = vrot.slane %v6394_v41, 1  ;;  %v6402_v10 = vrot.slane %v6401_v1, 1  ;;  %v6409_v60 = vrot.slane %v6408_v2, 1  ;;  %v6416_v53 = vrot.slane %v6415_v59, 1  ;;  %7701 = vmatpush1.bf16.msra.mxu1 %v11917_v35 }
 0x36c   : > { %v6420_v21 = vmax.f32 %v6418_v43, %v6419_v55  ;;  %v6427_v16 = vmax.f32 %v6425_v9, %v6426_v27  ;;  %v6434_v48 = vmax.f32 %v6432_v18, %v6433_v54  ;;  %v6441_v51 = vmax.f32 %v6439_v38, %v6440_v22 }
 0x36d   : > { %v6396_v39 = vmax.f32 %v6394_v41, %v6395_v19  ;;  %v6403_v62 = vmax.f32 %v6401_v1, %v6402_v10  ;;  %v6410_v57 = vmax.f32 %v6408_v2, %v6409_v60  ;;  %v6417_v31 = vmax.f32 %v6415_v59, %v6416_v53 }
 0x36e   : > { %v6421_v3 = vrot.slane %v6420_v21, 2  ;;  %v6428_v26 = vrot.slane %v6427_v16, 2  ;;  %v6435_v0 = vrot.slane %v6434_v48, 2  ;;  %v6442_v32 = vrot.slane %v6441_v51, 2 }
 0x36f   : > { %v6849_v42 = vadd.f32 %v15315_v12, %v6396_v39  ;;  %v6850_v23 = vadd.f32 %v15319_v36, %v6403_v62  ;;  %v6851_v43 = vadd.f32 %v15315_v12, %v6410_v57  ;;  %v6852_v9 = vadd.f32 %v15319_v36, %v6417_v31  ;;  %v6132_v62 = vpop.f32.mrf.mxu0  ;;  %v11916_v31 = vld [vmem:[#allocation9 + $0xc4] ss:$8 sps:$4 sm:$0xff]  }
 0x370   : > { %v6422_v18 = vmax.f32 %v6420_v21, %v6421_v3  ;;  %v6429_v38 = vmax.f32 %v6427_v16, %v6428_v26  ;;  %v6436_v41 = vmax.f32 %v6434_v48, %v6435_v0  ;;  %v6443_v1 = vmax.f32 %v6441_v51, %v6442_v32  ;;  %v11914_v32 = vld [vmem:[#allocation9 + $0xc0] ss:$8 sps:$4 sm:$0xff]   ;;  %7951 = vmatprep.subr.bf16.mxu0 %v11916_v31 }
 0x371   : > { %v6913_v2 = vmax.f32 %v6849_v42, 0.0  ;;  %v6914_v59 = vmax.f32 %v6850_v23, 0.0  ;;  %v6915_v55 = vmax.f32 %v6851_v43, 0.0  ;;  %v6916_v27 = vmax.f32 %v6852_v9, 0.0  ;;  %7952 = vmatpush2.bf16.msra.mxu0 %v11914_v32 }
 0x372   : > { %v6423_v54 = vrot.slane %v6422_v18, 1  ;;  %v6430_v22 = vrot.slane %v6429_v38, 1  ;;  %v6437_v19 = vrot.slane %v6436_v41, 1  ;;  %v6444_v10 = vrot.slane %v6443_v1, 1 }
 0x373   : > { %v11230_v60 = vpack.c.bf16 %v6914_v59, %v6913_v2  ;;  %v11231_v53 = vpack.c.bf16 %v6916_v27, %v6915_v55  ;;  %v6201_v57 = vadd.f32 %v15326_v4, %v15192_v52  ;;  %v6202_v21 = vadd.f32 %v15328_v37, %v15196_v30  ;;  %v6019_v4 = vpop.f32.mrf.mxu1  ;;  %v6134_v2 = vpop.f32.mrf.mxu0 }
 0x374   : > { %v6424_v16 = vmax.f32 %v6422_v18, %v6423_v54  ;;  %v6431_v48 = vmax.f32 %v6429_v38, %v6430_v22  ;;  %v6438_v51 = vmax.f32 %v6436_v41, %v6437_v19  ;;  %v6445_v39 = vmax.f32 %v6443_v1, %v6444_v10 }
 0x375   : > { %v7201_v61 = vunpack.c.l.b16 %v11230_v60  ;;  %v7202_v3 = vunpack.c.h.b16 %v11230_v60  ;;  %v7203_v26 = vunpack.c.l.b16 %v11231_v53  ;;  %v7204_v0 = vunpack.c.h.b16 %v11231_v53  ;;  %v6021_v10 = vpop.f32.mrf.mxu1 }
 0x376   : > { %v6853_v35 = vadd.f32 %v15315_v12, %v6424_v16  ;;  %v6854_v42 = vadd.f32 %v15319_v36, %v6431_v48  ;;  %v6855_v52 = vadd.f32 %v15315_v12, %v6438_v51  ;;  %v6856_v30 = vadd.f32 %v15319_v36, %v6445_v39  ;;  %v11925_v16 = vld [vmem:[#allocation9 + $0x144] ss:$8 sps:$4 sm:$0xff]  }
 0x377   : > { %v7265_v37 = vrot.slane %v7201_v61, 4  ;;  %v7266_v23 = vrot.slane %v7203_v26, 3  ;;  %v7275_v43 = vrot.slane %v7202_v3, 4  ;;  %v7276_v9 = vrot.slane %v7204_v0, 3  ;;  %v11923_v61 = vld [vmem:[#allocation9 + $0x140] ss:$8 sps:$4 sm:$0xff]   ;;  %7702 = vmatprep.subr.bf16.mxu1 %v11925_v16 }
 0x378   : > { %v6917_v18 = vmax.f32 %v6853_v35, 0.0  ;;  %v6918_v38 = vmax.f32 %v6854_v42, 0.0  ;;  %v6919_v41 = vmax.f32 %v6855_v52, 0.0  ;;  %v6920_v1 = vmax.f32 %v6856_v30, 0.0  ;;  %7703 = vmatpush1.bf16.msra.mxu1 %v11923_v61 }
 0x379   : > { %v7268_v59 = vsel %vm7267_vm0, %v7266_v23, %v7265_v37  ;;  %v7277_v55 = vsel %vm7267_vm0, %v7276_v9, %v7275_v43  ;;  %v6265_v27 = vcombine.low %v6201_v57, %v6202_v21  ;;  %v6266_v54 = vcombine.high %v6201_v57, %v6202_v21 }
 0x37a   : > { %v11232_v22 = vpack.c.bf16 %v6918_v38, %v6917_v18  ;;  %v11233_v19 = vpack.c.bf16 %v6920_v1, %v6919_v41  ;;  %v10843_v60 = vcombine.low %v6202_v21, %v6202_v21  ;;  %v10844_v53 = vcombine.high %v6202_v21, %v6202_v21 }
 0x37b   : > { %v6446_v48 = vsel %vm6389_vm15, %v6265_v27, -inf  ;;  %v6460_v51 = vsel %vm6389_vm15, %v6266_v54, -inf  ;;  %v6133_v39 = vadd.f32 %v6132_v62, %v6019_v4  ;;  %v6135_v31 = vadd.f32 %v6134_v2, %v6021_v10 }
 0x37c   : > { %v7205_v3 = vunpack.c.l.b16 %v11232_v22  ;;  %v7206_v26 = vunpack.c.h.b16 %v11232_v22  ;;  %v7207_v0 = vunpack.c.l.b16 %v11233_v19  ;;  %v7208_v32 = vunpack.c.h.b16 %v11233_v19  ;;  %v11922_v19 = vld [vmem:[#allocation9 + $0xb4] ss:$8 sps:$4 sm:$0xff]  }
 0x37d   : > { %v6447_v35 = vrot.slane %v6446_v48, 4  ;;  %v6453_v57 = vsel %vm6389_vm15, %v10843_v60, -inf  ;;  %v6461_v42 = vrot.slane %v6460_v51, 4  ;;  %v6467_v52 = vsel %vm6389_vm15, %v10844_v53, -inf  ;;  %7953 = vmatprep.subr.bf16.mxu0 %v11922_v19 }
 0x37e   : > { %v7269_v21 = vrot.slane %v7205_v3, 2  ;;  %v7272_v30 = vrot.slane %v7207_v0, 1  ;;  %v7278_v37 = vrot.slane %v7206_v26, 2  ;;  %v7280_v23 = vrot.slane %v7208_v32, 1 }
 0x37f   : > { %v6448_v43 = vmax.f32 %v6446_v48, %v6447_v35  ;;  %v6454_v62 = vrot.slane %v6453_v57, 4  ;;  %v6462_v4 = vmax.f32 %v6460_v51, %v6461_v42  ;;  %v6468_v9 = vrot.slane %v6467_v52, 4  ;;  %v11920_v48 = vld [vmem:[#allocation9 + $0xb0] ss:$8 sps:$4 sm:$0xff]  }
 0x380   : > { %v7271_v18 = vsel %vm7270_vm1, %v7269_v21, %v7268_v59  ;;  %v7279_v38 = vsel %vm7270_vm1, %v7278_v37, %v7277_v55  ;;  %v6203_v41 = vadd.f32 %v6133_v39, %v15203_v28  ;;  %v6204_v1 = vadd.f32 %v6135_v31, %v15206_v40  ;;  %7954 = vmatpush2.bf16.msra.mxu0 %v11920_v48 }
 0x381   : > { %v7274_v2 = vsel %vm7273_vm3, %v7272_v30, %v7271_v18  ;;  %v7281_v27 = vsel %vm7273_vm3, %v7280_v23, %v7279_v38  ;;  %v6449_v54 = vrot.slane %v6448_v43, 2  ;;  %v6455_v22 = vmax.f32 %v6453_v57, %v6454_v62 }
 0x382   : > { %v7382_v10 = vpack.c.b16 %v7281_v27, %v7274_v2  ;;  %v6463_v60 = vrot.slane %v6462_v4, 2  ;;  %v6469_v53 = vmax.f32 %v6467_v52, %v6468_v9  ;;  %v6267_v16 = vcombine.low %v6203_v41, %v6204_v1 }
 0x383   : > { %v6450_v51 = vmax.f32 %v6448_v43, %v6449_v54  ;;  %v6456_v59 = vrot.slane %v6455_v22, 2  ;;  %v6268_v61 = vcombine.high %v6203_v41, %v6204_v1  ;;  %v10845_v55 = vcombine.low %v6204_v1, %v6204_v1  ;;  %v6138_v43 = vpop.f32.mrf.mxu0 }
 0x384   : > { %7392 = vst [vmem:[#allocation3 + $0x20] sm:$0xcc] %v7382_v10  ;;  %v6464_v28 = vmax.f32 %v6462_v4, %v6463_v60  ;;  %v6470_v40 = vrot.slane %v6469_v53, 2  ;;  %v10846_v39 = vcombine.high %v6204_v1, %v6204_v1  ;;  %v6474_v31 = vsel %vm6389_vm15, %v6267_v16, -inf  ;;  %v6025_v1 = vpop.f32.mrf.mxu1 }
 0x385   : > { %v6451_v3 = vrot.slane %v6450_v51, 1  ;;  %v6457_v26 = vmax.f32 %v6455_v22, %v6456_v59  ;;  %v6475_v0 = vrot.slane %v6474_v31, 4  ;;  %v6481_v32 = vsel %vm6389_vm15, %v10845_v55, -inf }
 0x386   : > { %v6465_v35 = vrot.slane %v6464_v28, 1  ;;  %v6471_v57 = vmax.f32 %v6469_v53, %v6470_v40  ;;  %v6482_v42 = vrot.slane %v6481_v32, 4  ;;  %v6488_v52 = vsel %vm6389_vm15, %v6268_v61, -inf  ;;  %v11931_v40 = vld [vmem:[#allocation9 + $0x134] ss:$8 sps:$4 sm:$0xff]  }
 0x387   : > { %v6452_v21 = vmax.f32 %v6450_v51, %v6451_v3  ;;  %v6458_v30 = vrot.slane %v6457_v26, 1  ;;  %v6476_v37 = vmax.f32 %v6474_v31, %v6475_v0  ;;  %v6489_v23 = vrot.slane %v6488_v52, 4  ;;  %v6140_v51 = vpop.f32.mrf.mxu0  ;;  %v6027_v31 = vpop.f32.mrf.mxu1  ;;  %7704 = vmatprep.subr.bf16.mxu1 %v11931_v40 }
 0x388   : > { %v6466_v62 = vmax.f32 %v6464_v28, %v6465_v35  ;;  %v6472_v4 = vrot.slane %v6471_v57, 1  ;;  %v6483_v9 = vmax.f32 %v6481_v32, %v6482_v42  ;;  %v6495_v18 = vsel %vm6389_vm15, %v10846_v39, -inf  ;;  %v11929_v32 = vld [vmem:[#allocation9 + $0x130] ss:$8 sps:$4 sm:$0xff]  }
 0x389   : > { %v6459_v38 = vmax.f32 %v6457_v26, %v6458_v30  ;;  %v6857_v41 = vadd.f32 %v15315_v12, %v6452_v21  ;;  %v6477_v2 = vrot.slane %v6476_v37, 2  ;;  %v6490_v27 = vmax.f32 %v6488_v52, %v6489_v23  ;;  %7705 = vmatpush1.bf16.msra.mxu1 %v11929_v32 }
 0x38a   : > { %v6473_v54 = vmax.f32 %v6471_v57, %v6472_v4  ;;  %v6859_v22 = vadd.f32 %v15315_v12, %v6466_v62  ;;  %v6484_v19 = vrot.slane %v6483_v9, 2  ;;  %v6496_v10 = vrot.slane %v6495_v18, 4 }
 0x38b   : > { %v6858_v60 = vadd.f32 %v15319_v36, %v6459_v38  ;;  %v6921_v53 = vmax.f32 %v6857_v41, 0.0  ;;  %v6478_v16 = vmax.f32 %v6476_v37, %v6477_v2  ;;  %v6491_v48 = vrot.slane %v6490_v27, 2 }
 0x38c   : > { %v6860_v59 = vadd.f32 %v15319_v36, %v6473_v54  ;;  %v6923_v61 = vmax.f32 %v6859_v22, 0.0  ;;  %v6485_v55 = vmax.f32 %v6483_v9, %v6484_v19  ;;  %v6497_v28 = vmax.f32 %v6495_v18, %v6496_v10 }
 0x38d   : > { %v6922_v39 = vmax.f32 %v6858_v60, 0.0  ;;  %v6479_v3 = vrot.slane %v6478_v16, 1  ;;  %v6492_v26 = vmax.f32 %v6490_v27, %v6491_v48  ;;  %v6139_v0 = vadd.f32 %v6138_v43, %v6025_v1 }
 0x38e   : > { %v6924_v35 = vmax.f32 %v6860_v59, 0.0  ;;  %v6486_v57 = vrot.slane %v6485_v55, 1  ;;  %v6498_v42 = vrot.slane %v6497_v28, 2  ;;  %v6141_v52 = vadd.f32 %v6140_v51, %v6027_v31 }
 0x38f   : > { %v11234_v21 = vpack.c.bf16 %v6922_v39, %v6921_v53  ;;  %v6480_v30 = vmax.f32 %v6478_v16, %v6479_v3  ;;  %v6493_v37 = vrot.slane %v6492_v26, 1  ;;  %v6205_v23 = vadd.f32 %v6139_v0, %v15214_v47  ;;  %v6142_v53 = vpop.f32.mrf.mxu0  ;;  %v11928_v16 = vld [vmem:[#allocation9 + $0xa4] ss:$8 sps:$4 sm:$0xff]  }
 0x390   : > { %v11235_v62 = vpack.c.bf16 %v6924_v35, %v6923_v61  ;;  %v6487_v4 = vmax.f32 %v6485_v55, %v6486_v57  ;;  %v6499_v9 = vmax.f32 %v6497_v28, %v6498_v42  ;;  %v6206_v18 = vadd.f32 %v6141_v52, %v15218_v63  ;;  %v11926_v61 = vld [vmem:[#allocation9 + $0xa0] ss:$8 sps:$4 sm:$0xff]   ;;  %v6029_v28 = vpop.f32.mrf.mxu1  ;;  %7955 = vmatprep.subr.bf16.mxu0 %v11928_v16 }
 0x391   : > { %v7209_v38 = vunpack.c.l.b16 %v11234_v21  ;;  %v7210_v41 = vunpack.c.h.b16 %v11234_v21  ;;  %v6494_v43 = vmax.f32 %v6492_v26, %v6493_v37  ;;  %v6861_v1 = vadd.f32 %v15315_v12, %v6480_v30  ;;  %7956 = vmatpush2.bf16.msra.mxu0 %v11926_v61  ;;  %v6144_v21 = vpop.f32.mrf.mxu0  ;;  %v11937_v30 = vld [vmem:[#allocation9 + $0x124] ss:$8 sps:$4 sm:$0xff]  }
 0x392   : > { %v7211_v2 = vunpack.c.l.b16 %v11235_v62  ;;  %v7212_v27 = vunpack.c.h.b16 %v11235_v62  ;;  %v6500_v54 = vrot.slane %v6499_v9, 1  ;;  %v6862_v22 = vadd.f32 %v15319_v36, %v6487_v4  ;;  %7706 = vmatprep.subr.bf16.mxu1 %v11937_v30  ;;  %v11932_v30 = vld [vmem:[#allocation9 + $0x90] ss:$8 sps:$4 sm:$0xff]  }
 0x393   : > { %v6863_v19 = vadd.f32 %v15315_v12, %v6494_v43  ;;  %v6925_v47 = vmax.f32 %v6861_v1, 0.0  ;;  %v6269_v10 = vcombine.low %v6205_v23, %v6206_v18  ;;  %v6270_v60 = vcombine.high %v6205_v23, %v6206_v18  ;;  %v6148_v16 = vpop.f32.mrf.mxu0 }
 0x394   : > { %v7282_v48 = vrot.slane %v7211_v2, 7  ;;  %v7300_v63 = vrot.slane %v7212_v27, 7  ;;  %v6501_v51 = vmax.f32 %v6499_v9, %v6500_v54  ;;  %v6926_v59 = vmax.f32 %v6862_v22, 0.0  ;;  %v11935_v9 = vld [vmem:[#allocation9 + $0x120] ss:$8 sps:$4 sm:$0xff]  }
 0x395   : > { %v6927_v55 = vmax.f32 %v6863_v19, 0.0  ;;  %v10847_v40 = vcombine.low %v6206_v18, %v6206_v18  ;;  %v10848_v39 = vcombine.high %v6206_v18, %v6206_v18  ;;  %v6502_v31 = vsel %vm6389_vm15, %v6269_v10, -inf  ;;  %v6031_v18 = vpop.f32.mrf.mxu1  ;;  %7707 = vmatpush1.bf16.msra.mxu1 %v11935_v9 }
 0x396   : > { %v7284_v3 = vsel %vm7283_vm4, %v7282_v48, %v7209_v38  ;;  %v7301_v26 = vsel %vm7283_vm4, %v7300_v63, %v7210_v41  ;;  %v6864_v0 = vadd.f32 %v15319_v36, %v6501_v51  ;;  %v11236_v32 = vpack.c.bf16 %v6926_v59, %v6925_v47 }
 0x397   : > { %v6503_v35 = vrot.slane %v6502_v31, 4  ;;  %v6509_v57 = vsel %vm6389_vm15, %v10847_v40, -inf  ;;  %v6516_v42 = vsel %vm6389_vm15, %v6270_v60, -inf  ;;  %v6523_v52 = vsel %vm6389_vm15, %v10848_v39, -inf  ;;  %v6035_v40 = vpop.f32.mrf.mxu1 }
 0x398   : > { %v6928_v37 = vmax.f32 %v6864_v0, 0.0  ;;  %v7213_v23 = vunpack.c.l.b16 %v11236_v32  ;;  %v7214_v62 = vunpack.c.h.b16 %v11236_v32  ;;  %v6510_v4 = vrot.slane %v6509_v57, 4 }
 0x399   : > { %v6504_v38 = vmax.f32 %v6502_v31, %v6503_v35  ;;  %v6517_v41 = vrot.slane %v6516_v42, 4  ;;  %v6524_v43 = vrot.slane %v6523_v52, 4  ;;  %v6143_v1 = vadd.f32 %v6142_v53, %v6029_v28  ;;  %v11934_v35 = vld [vmem:[#allocation9 + $0x94] ss:$8 sps:$4 sm:$0xff]  }
 0x39a   : > { %v11237_v2 = vpack.c.bf16 %v6928_v37, %v6927_v55  ;;  %v7285_v27 = vrot.slane %v7213_v23, 6  ;;  %v7302_v54 = vrot.slane %v7214_v62, 6  ;;  %v6511_v22 = vmax.f32 %v6509_v57, %v6510_v4  ;;  %7957 = vmatprep.subr.bf16.mxu0 %v11934_v35 }
 0x39b   : > { %v6505_v19 = vrot.slane %v6504_v38, 2  ;;  %v6518_v47 = vmax.f32 %v6516_v42, %v6517_v41  ;;  %v6525_v10 = vmax.f32 %v6523_v52, %v6524_v43  ;;  %v6207_v60 = vadd.f32 %v6143_v1, %v15223_v15  ;;  %7958 = vmatpush2.bf16.msra.mxu0 %v11932_v30  ;;  %v6150_v1 = vpop.f32.mrf.mxu0 }
 0x39c   : > { %v7215_v48 = vunpack.c.l.b16 %v11237_v2  ;;  %v7216_v63 = vunpack.c.h.b16 %v11237_v2  ;;  %v7287_v51 = vsel %vm7286_vm5, %v7285_v27, %v7284_v3  ;;  %v7303_v59 = vsel %vm7286_vm5, %v7302_v54, %v7301_v26 }
 0x39d   : > { %v6506_v61 = vmax.f32 %v6504_v38, %v6505_v19  ;;  %v6512_v53 = vrot.slane %v6511_v22, 2  ;;  %v6519_v28 = vrot.slane %v6518_v47, 2  ;;  %v6526_v55 = vrot.slane %v6525_v10, 2 }
 0x39e   : > { %v7288_v39 = vrot.slane %v7215_v48, 5  ;;  %v7304_v31 = vrot.slane %v7216_v63, 5  ;;  %v6145_v0 = vadd.f32 %v6144_v21, %v6031_v18  ;;  %v6149_v32 = vadd.f32 %v6148_v16, %v6035_v40 }
 0x39f   : > { %v6507_v57 = vrot.slane %v6506_v61, 1  ;;  %v6513_v42 = vmax.f32 %v6511_v22, %v6512_v53  ;;  %v6520_v15 = vmax.f32 %v6518_v47, %v6519_v28  ;;  %v6527_v52 = vmax.f32 %v6525_v10, %v6526_v55  ;;  %v6152_v28 = vpop.f32.mrf.mxu0 }
 0x3a0   : > { %v15382_v37 = vsel %vm7289_vm6, %v7288_v39, %v7287_v51  ;;  %v15385_v3 = vsel %vm7289_vm6, %v7304_v31, %v7303_v59  ;;  %v6208_v26 = vadd.f32 %v6145_v0, %v15226_v33  ;;  %v15389_v23 = vadd.f32 %v6149_v32, %v15232_v17  ;;  %v6037_v33 = vpop.f32.mrf.mxu1  ;;  %v11943_v0 = vld [vmem:[#allocation9 + $0x114] ss:$8 sps:$4 sm:$0xff]  }
 0x3a1   : > { %v6508_v21 = vmax.f32 %v6506_v61, %v6507_v57  ;;  %v6514_v62 = vrot.slane %v6513_v42, 1  ;;  %v6521_v4 = vrot.slane %v6520_v15, 1  ;;  %v6528_v9 = vrot.slane %v6527_v52, 1  ;;  %7708 = vmatprep.subr.bf16.mxu1 %v11943_v0  ;;  %v11951_v0 = vld [vmem:[#allocation9 + $0x104] ss:$8 sps:$4 sm:$0xff]  }
 0x3a2   : > { %v6271_v18 = vcombine.low %v6207_v60, %v6208_v26  ;;  %v6272_v38 = vcombine.high %v6207_v60, %v6208_v26  ;;  %v10849_v41 = vcombine.low %v6208_v26, %v6208_v26  ;;  %v10850_v43 = vcombine.high %v6208_v26, %v6208_v26 }
 0x3a3   : > { %v6515_v2 = vmax.f32 %v6513_v42, %v6514_v62  ;;  %v6522_v27 = vmax.f32 %v6520_v15, %v6521_v4  ;;  %v6529_v54 = vmax.f32 %v6527_v52, %v6528_v9  ;;  %v6865_v22 = vadd.f32 %v15315_v12, %v6508_v21  ;;  %v6039_v15 = vpop.f32.mrf.mxu1  ;;  %v11941_v52 = vld [vmem:[#allocation9 + $0x110] ss:$8 sps:$4 sm:$0xff]  }
 0x3a4   : > { %v6530_v17 = vsel %vm6389_vm15, %v6271_v18, -inf  ;;  %v6537_v19 = vsel %vm6389_vm15, %v10849_v41, -inf  ;;  %v6544_v47 = vsel %vm6389_vm15, %v6272_v38, -inf  ;;  %v6551_v10 = vsel %vm6389_vm15, %v10850_v43, -inf  ;;  %7709 = vmatpush1.bf16.msra.mxu1 %v11941_v52 }
 0x3a5   : > { %v6866_v60 = vadd.f32 %v15319_v36, %v6515_v2  ;;  %v6867_v16 = vadd.f32 %v15315_v12, %v6522_v27  ;;  %v6868_v48 = vadd.f32 %v15319_v36, %v6529_v54  ;;  %v6929_v63 = vmax.f32 %v6865_v22, 0.0  ;;  %7710 = vmatprep.subr.bf16.mxu1 %v11951_v0 }
 0x3a6   : > { %v6531_v51 = vrot.slane %v6530_v17, 4  ;;  %v6538_v59 = vrot.slane %v6537_v19, 4  ;;  %v6545_v61 = vrot.slane %v6544_v47, 4  ;;  %v6552_v53 = vrot.slane %v6551_v10, 4 }
 0x3a7   : > { %v6930_v55 = vmax.f32 %v6866_v60, 0.0  ;;  %v6931_v40 = vmax.f32 %v6867_v16, 0.0  ;;  %v6932_v39 = vmax.f32 %v6868_v48, 0.0  ;;  %v6151_v31 = vadd.f32 %v6150_v1, %v6037_v33 }
 0x3a8   : > { %v6532_v32 = vmax.f32 %v6530_v17, %v6531_v51  ;;  %v6539_v35 = vmax.f32 %v6537_v19, %v6538_v59  ;;  %v6546_v57 = vmax.f32 %v6544_v47, %v6545_v61  ;;  %v6553_v42 = vmax.f32 %v6551_v10, %v6552_v53 }
 0x3a9   : > { %v11238_v30 = vpack.c.bf16 %v6930_v55, %v6929_v63  ;;  %v11239_v26 = vpack.c.bf16 %v6932_v39, %v6931_v40  ;;  %v6210_v21 = vadd.f32 %v6151_v31, %v15236_v56  ;;  %v15400_v62 = vadd.f32 %v6152_v28, %v6039_v15  ;;  %v11940_v63 = vld [vmem:[#allocation9 + $0x84] ss:$8 sps:$4 sm:$0xff]   ;;  %v11938_v28 = vld [vmem:[#allocation9 + $0x80] ss:$8 sps:$4 sm:$0xff]  }
 0x3aa   : > { %v6533_v4 = vrot.slane %v6532_v32, 2  ;;  %v6540_v9 = vrot.slane %v6539_v35, 2  ;;  %v6547_v18 = vrot.slane %v6546_v57, 2  ;;  %v6554_v38 = vrot.slane %v6553_v42, 2  ;;  %7959 = vmatprep.subr.bf16.mxu0 %v11940_v63 }
 0x3ab   : > { %v7217_v41 = vunpack.c.l.b16 %v11238_v30  ;;  %v7218_v43 = vunpack.c.h.b16 %v11238_v30  ;;  %v7219_v1 = vunpack.c.l.b16 %v11239_v26  ;;  %v7220_v2 = vunpack.c.h.b16 %v11239_v26  ;;  %7960 = vmatpush2.bf16.msra.mxu0 %v11938_v28 }
 0x3ac   : > { %v6534_v27 = vmax.f32 %v6532_v32, %v6533_v4  ;;  %v6541_v54 = vmax.f32 %v6539_v35, %v6540_v9  ;;  %v6548_v22 = vmax.f32 %v6546_v57, %v6547_v18  ;;  %v6555_v33 = vmax.f32 %v6553_v42, %v6554_v38 }
 0x3ad   : > { %v7291_v17 = vrot.slane %v7217_v41, 4  ;;  %v7294_v19 = vrot.slane %v7219_v1, 3  ;;  %v7306_v47 = vrot.slane %v7218_v43, 4  ;;  %v7308_v56 = vrot.slane %v7220_v2, 3  ;;  %v6154_v43 = vpop.f32.mrf.mxu0 }
 0x3ae   : > { %v6535_v10 = vrot.slane %v6534_v27, 1  ;;  %v6542_v60 = vrot.slane %v6541_v54, 1  ;;  %v6549_v16 = vrot.slane %v6548_v22, 1  ;;  %v6556_v48 = vrot.slane %v6555_v33, 1 }
 0x3af   : > { %v7293_v51 = vsel %vm7292_vm7, %v7291_v17, %v15382_v37  ;;  %v7307_v59 = vsel %vm7292_vm7, %v7306_v47, %v15385_v3  ;;  %v6273_v61 = vcombine.low %v15389_v23, %v6210_v21  ;;  %v6274_v53 = vcombine.high %v15389_v23, %v6210_v21  ;;  %v11949_v3 = vld [vmem:[#allocation9 + $0x100] ss:$8 sps:$4 sm:$0xff]   ;;  %v6041_v17 = vpop.f32.mrf.mxu1 }
 0x3b0   : > { %v15409_v55 = vsel %vm7267_vm0, %v7294_v19, %v7293_v51  ;;  %v15412_v40 = vsel %vm7267_vm0, %v7308_v56, %v7307_v59  ;;  %v6536_v39 = vmax.f32 %v6534_v27, %v6535_v10  ;;  %v6543_v31 = vmax.f32 %v6541_v54, %v6542_v60  ;;  %7711 = vmatpush1.bf16.msra.mxu1 %v11949_v3  ;;  %v11955_v10 = vld [vmem:[#allocation9 + $0x1f0] ss:$8 sps:$4 sm:$0xff]   ;;  %v11948_v51 = vld [vmem:[#allocation9 + $0x374] ss:$8 sps:$4 sm:$0xff]  }
 0x3b1   : > { %v6550_v32 = vmax.f32 %v6548_v22, %v6549_v16  ;;  %v6557_v37 = vmax.f32 %v6555_v33, %v6556_v48  ;;  %v10851_v35 = vcombine.low %v6210_v21, %v6210_v21  ;;  %v10852_v57 = vcombine.high %v6210_v21, %v6210_v21  ;;  %v11957_v22 = vld [vmem:[#allocation9 + $0x1f4] ss:$8 sps:$4 sm:$0xff]   ;;  %8501 = vmatprep.subr.bf16.mxu0 %v11948_v51 }
 0x3b2   : > { %v6869_v42 = vadd.f32 %v15315_v12, %v6536_v39  ;;  %v6870_v23 = vadd.f32 %v15319_v36, %v6543_v31  ;;  %v6558_v15 = vsel %vm6389_vm15, %v6273_v61, -inf  ;;  %v6572_v52 = vsel %vm6389_vm15, %v6274_v53, -inf  ;;  %7712 = vmatprep.subr.bf16.mxu1 %v11957_v22  ;;  %v6158_v39 = vpop.f32.mrf.mxu0 }
 0x3b3   : > { %v6871_v30 = vadd.f32 %v15315_v12, %v6550_v32  ;;  %v6872_v26 = vadd.f32 %v15319_v36, %v6557_v37  ;;  %v6559_v4 = vrot.slane %v6558_v15, 4  ;;  %v6565_v9 = vsel %vm6389_vm15, %v10851_v35, -inf  ;;  %v11963_v35 = vld [vmem:[#allocation9 + $0x1e4] ss:$8 sps:$4 sm:$0xff]  }
 0x3b4   : > { %v6933_v21 = vmax.f32 %v6869_v42, 0.0  ;;  %v6934_v18 = vmax.f32 %v6870_v23, 0.0  ;;  %v6566_v38 = vrot.slane %v6565_v9, 4  ;;  %v6573_v41 = vrot.slane %v6572_v52, 4  ;;  %7713 = vmatpush2.bf16.msra.mxu1 %v11955_v10  ;;  %v11961_v23 = vld [vmem:[#allocation9 + $0x1e0] ss:$8 sps:$4 sm:$0xff]  }
 0x3b5   : > { %v6935_v1 = vmax.f32 %v6871_v30, 0.0  ;;  %v6936_v2 = vmax.f32 %v6872_v26, 0.0  ;;  %v6560_v27 = vmax.f32 %v6558_v15, %v6559_v4  ;;  %v6579_v54 = vsel %vm6389_vm15, %v10852_v57, -inf  ;;  %7714 = vmatprep.subr.bf16.mxu1 %v11963_v35 }
 0x3b6   : > { %v11240_v33 = vpack.c.bf16 %v6934_v18, %v6933_v21  ;;  %v6567_v19 = vmax.f32 %v6565_v9, %v6566_v38  ;;  %v6574_v47 = vmax.f32 %v6572_v52, %v6573_v41  ;;  %v6580_v56 = vrot.slane %v6579_v54, 4  ;;  %v6160_v38 = vpop.f32.mrf.mxu0 }
 0x3b7   : > { %v11241_v60 = vpack.c.bf16 %v6936_v2, %v6935_v1  ;;  %v6561_v16 = vrot.slane %v6560_v27, 2  ;;  %v15424_v48 = vadd.f32 %v15400_v62, %v15241_v13  ;;  %v6155_v63 = vadd.f32 %v6154_v43, %v6041_v17  ;;  %v6045_v62 = vpop.f32.mrf.mxu1 }
 0x3b8   : > { %v7221_v59 = vunpack.c.l.b16 %v11240_v33  ;;  %v7222_v61 = vunpack.c.h.b16 %v11240_v33  ;;  %v6568_v53 = vrot.slane %v6567_v19, 2  ;;  %v6575_v28 = vrot.slane %v6574_v47, 2  ;;  %7715 = vmatpush2.bf16.msra.mxu1 %v11961_v23 }
 0x3b9   : > { %v7223_v31 = vunpack.c.l.b16 %v11241_v60  ;;  %v7224_v0 = vunpack.c.h.b16 %v11241_v60  ;;  %v6562_v32 = vmax.f32 %v6560_v27, %v6561_v16  ;;  %v6581_v37 = vmax.f32 %v6579_v54, %v6580_v56  ;;  %v11969_v27 = vld [vmem:[#allocation9 + $0x1d4] ss:$8 sps:$4 sm:$0xff]   ;;  %v6047_v17 = vpop.f32.mrf.mxu1 }
 0x3ba   : > { %v7296_v57 = vrot.slane %v7221_v59, 2  ;;  %v7310_v3 = vrot.slane %v7222_v61, 2  ;;  %v6569_v42 = vmax.f32 %v6567_v19, %v6568_v53  ;;  %v6576_v13 = vmax.f32 %v6574_v47, %v6575_v28  ;;  %v11967_v19 = vld [vmem:[#allocation9 + $0x1d0] ss:$8 sps:$4 sm:$0xff]   ;;  %7716 = vmatprep.subr.bf16.mxu1 %v11969_v27  ;;  %v11975_v28 = vld [vmem:[#allocation9 + $0x1c4] ss:$8 sps:$4 sm:$0xff]  }
 0x3bb   : > { %v7298_v15 = vrot.slane %v7223_v31, 1  ;;  %v7312_v52 = vrot.slane %v7224_v0, 1  ;;  %v6563_v30 = vrot.slane %v6562_v32, 1  ;;  %v6582_v26 = vrot.slane %v6581_v37, 2 }
 0x3bc   : > { %v7297_v4 = vsel %vm7270_vm1, %v7296_v57, %v15409_v55  ;;  %v7311_v9 = vsel %vm7270_vm1, %v7310_v3, %v15412_v40  ;;  %v6570_v21 = vrot.slane %v6569_v42, 1  ;;  %v6577_v18 = vrot.slane %v6576_v13, 1  ;;  %7717 = vmatpush2.bf16.msra.mxu1 %v11967_v19 }
 0x3bd   : > { %v7299_v41 = vsel %vm7273_vm3, %v7298_v15, %v7297_v4  ;;  %v7313_v43 = vsel %vm7273_vm3, %v7312_v52, %v7311_v9  ;;  %v6564_v1 = vmax.f32 %v6562_v32, %v6563_v30  ;;  %v6583_v2 = vmax.f32 %v6581_v37, %v6582_v26  ;;  %v11973_v37 = vld [vmem:[#allocation9 + $0x1c0] ss:$8 sps:$4 sm:$0xff]   ;;  %7718 = vmatprep.subr.bf16.mxu1 %v11975_v28  ;;  %v11981_v4 = vld [vmem:[#allocation9 + $0x1b4] ss:$8 sps:$4 sm:$0xff]  }
 0x3be   : > { %v7383_v54 = vpack.c.b16 %v7313_v43, %v7299_v41  ;;  %v6571_v22 = vmax.f32 %v6569_v42, %v6570_v21  ;;  %v6578_v33 = vmax.f32 %v6576_v13, %v6577_v18  ;;  %v6212_v55 = vadd.f32 %v6155_v63, %v15244_v29  ;;  %v11979_v41 = vld [vmem:[#allocation9 + $0x1b0] ss:$8 sps:$4 sm:$0xff]  }
 0x3bf   : > { %v6584_v47 = vrot.slane %v6583_v2, 1  ;;  %v6873_v40 = vadd.f32 %v15315_v12, %v6564_v1  ;;  %v6159_v56 = vadd.f32 %v6158_v39, %v6045_v62  ;;  %v6161_v10 = vadd.f32 %v6160_v38, %v6047_v17 }
 0x3c0   : > { %7393 = vst [vmem:[#allocation3 + $0x18] sm:$0xff] %v7383_v54  ;;  %v6874_v60 = vadd.f32 %v15319_v36, %v6571_v22  ;;  %v6875_v16 = vadd.f32 %v15315_v12, %v6578_v33  ;;  %v6275_v51 = vcombine.low %v15424_v48, %v6212_v55  ;;  %v6276_v59 = vcombine.high %v15424_v48, %v6212_v55 }
 0x3c1   : > { %v6585_v61 = vmax.f32 %v6583_v2, %v6584_v47  ;;  %v6937_v53 = vmax.f32 %v6873_v40, 0.0  ;;  %v10853_v29 = vcombine.low %v6212_v55, %v6212_v55  ;;  %v10854_v63 = vcombine.high %v6212_v55, %v6212_v55  ;;  %7719 = vmatpush2.bf16.msra.mxu1 %v11973_v37  ;;  %v11987_v40 = vld [vmem:[#allocation9 + $0x1a4] ss:$8 sps:$4 sm:$0xff]  }
 0x3c2   : > { %v6938_v31 = vmax.f32 %v6874_v60, 0.0  ;;  %v6939_v0 = vmax.f32 %v6875_v16, 0.0  ;;  %v6586_v39 = vsel %vm6389_vm15, %v6275_v51, -inf  ;;  %v6600_v32 = vsel %vm6389_vm15, %v6276_v59, -inf  ;;  %7720 = vmatprep.subr.bf16.mxu1 %v11981_v4 }
 0x3c3   : > { %v6876_v35 = vadd.f32 %v15319_v36, %v6585_v61  ;;  %v6587_v57 = vrot.slane %v6586_v39, 4  ;;  %v6593_v3 = vsel %vm6389_vm15, %v10853_v29, -inf  ;;  %v6601_v42 = vrot.slane %v6600_v32, 4 }
 0x3c4   : > { %v11242_v48 = vpack.c.bf16 %v6938_v31, %v6937_v53  ;;  %v6594_v13 = vrot.slane %v6593_v3, 4  ;;  %v6607_v62 = vsel %vm6389_vm15, %v10854_v63, -inf  ;;  %v6213_v23 = vadd.f32 %v6159_v56, %v15248_v34 }
 0x3c5   : > { %v6940_v15 = vmax.f32 %v6876_v35, 0.0  ;;  %v6588_v52 = vmax.f32 %v6586_v39, %v6587_v57  ;;  %v6602_v30 = vmax.f32 %v6600_v32, %v6601_v42  ;;  %v6608_v26 = vrot.slane %v6607_v62, 4  ;;  %7721 = vmatpush2.bf16.msra.mxu1 %v11979_v41  ;;  %v11993_v57 = vld [vmem:[#allocation9 + $0x194] ss:$8 sps:$4 sm:$0xff]  }
 0x3c6   : > { %v7225_v9 = vunpack.c.l.b16 %v11242_v48  ;;  %v7226_v21 = vunpack.c.h.b16 %v11242_v48  ;;  %v6595_v18 = vmax.f32 %v6593_v3, %v6594_v13  ;;  %v6214_v38 = vadd.f32 %v6161_v10, %v15252_v44  ;;  %v11985_v10 = vld [vmem:[#allocation9 + $0x1a0] ss:$8 sps:$4 sm:$0xff]   ;;  %7722 = vmatprep.subr.bf16.mxu1 %v11987_v40  ;;  %v6049_v48 = vpop.f32.mrf.mxu1 }
 0x3c7   : > { %v11243_v43 = vpack.c.bf16 %v6940_v15, %v6939_v0  ;;  %v6589_v1 = vrot.slane %v6588_v52, 2  ;;  %v6603_v2 = vrot.slane %v6602_v30, 2  ;;  %v6609_v27 = vmax.f32 %v6607_v62, %v6608_v26  ;;  %v6162_v0 = vpop.f32.mrf.mxu0 }
 0x3c8   : > { %v6596_v54 = vrot.slane %v6595_v18, 2  ;;  %v6277_v22 = vcombine.low %v6213_v23, %v6214_v38  ;;  %v6278_v34 = vcombine.high %v6213_v23, %v6214_v38  ;;  %v10855_v33 = vcombine.low %v6214_v38, %v6214_v38  ;;  %v11991_v23 = vld [vmem:[#allocation9 + $0x190] ss:$8 sps:$4 sm:$0xff]  }
 0x3c9   : > { %v7227_v17 = vunpack.c.l.b16 %v11243_v43  ;;  %v7228_v55 = vunpack.c.h.b16 %v11243_v43  ;;  %v6590_v19 = vmax.f32 %v6588_v52, %v6589_v1  ;;  %v6604_v47 = vmax.f32 %v6602_v30, %v6603_v2  ;;  %7723 = vmatpush2.bf16.msra.mxu1 %v11985_v10 }
 0x3ca   : > { %v6597_v56 = vmax.f32 %v6595_v18, %v6596_v54  ;;  %v6610_v60 = vrot.slane %v6609_v27, 2  ;;  %v10856_v16 = vcombine.high %v6214_v38, %v6214_v38  ;;  %v6614_v44 = vsel %vm6389_vm15, %v6277_v22, -inf  ;;  %7724 = vmatprep.subr.bf16.mxu1 %v11993_v57  ;;  %v6164_v38 = vpop.f32.mrf.mxu0  ;;  %v6051_v22 = vpop.f32.mrf.mxu1 }
 0x3cb   : > { %v7314_v51 = vrot.slane %v7227_v17, 7  ;;  %v7328_v59 = vrot.slane %v7228_v55, 7  ;;  %v6591_v61 = vrot.slane %v6590_v19, 1  ;;  %v6605_v53 = vrot.slane %v6604_v47, 1  ;;  %v11997_v17 = vld [vmem:[#allocation9 + $0x180] ss:$8 sps:$4 sm:$0xff]  }
 0x3cc   : > { %v6598_v29 = vrot.slane %v6597_v56, 1  ;;  %v6611_v63 = vmax.f32 %v6609_v27, %v6610_v60  ;;  %v6615_v28 = vrot.slane %v6614_v44, 4  ;;  %v6621_v31 = vsel %vm6389_vm15, %v10855_v33, -inf  ;;  %v11999_v55 = vld [vmem:[#allocation9 + $0x184] ss:$8 sps:$4 sm:$0xff]  }
 0x3cd   : > { %v15448_v39 = vsel %vm7283_vm4, %v7314_v51, %v7225_v9  ;;  %v15451_v32 = vsel %vm7283_vm4, %v7328_v59, %v7226_v21  ;;  %v6592_v37 = vmax.f32 %v6590_v19, %v6591_v61  ;;  %v6606_v35 = vmax.f32 %v6604_v47, %v6605_v53  ;;  %7725 = vmatpush2.bf16.msra.mxu1 %v11991_v23 }
 0x3ce   : > { %v6599_v3 = vmax.f32 %v6597_v56, %v6598_v29  ;;  %v6612_v42 = vrot.slane %v6611_v63, 1  ;;  %v6616_v13 = vmax.f32 %v6614_v44, %v6615_v28  ;;  %v6622_v62 = vrot.slane %v6621_v31, 4  ;;  %7726 = vmatprep.subr.bf16.mxu1 %v11999_v55 }
 0x3cf   : > { %v6877_v15 = vadd.f32 %v15315_v12, %v6592_v37  ;;  %v6879_v52 = vadd.f32 %v15315_v12, %v6606_v35  ;;  %v6628_v30 = vsel %vm6389_vm15, %v6278_v34, -inf  ;;  %v6635_v26 = vsel %vm6389_vm15, %v10856_v16, -inf }
 0x3d0   : > { %v6613_v4 = vmax.f32 %v6611_v63, %v6612_v42  ;;  %v6878_v9 = vadd.f32 %v15319_v36, %v6599_v3  ;;  %v6617_v21 = vrot.slane %v6616_v13, 2  ;;  %v6623_v18 = vmax.f32 %v6621_v31, %v6622_v62  ;;  %v12005_v62 = vld [vmem:[#allocation9 + $0x274] ss:$8 sps:$4 sm:$0xff]  }
 0x3d1   : > { %v6941_v41 = vmax.f32 %v6877_v15, 0.0  ;;  %v6943_v43 = vmax.f32 %v6879_v52, 0.0  ;;  %v6629_v1 = vrot.slane %v6628_v30, 4  ;;  %v6636_v2 = vrot.slane %v6635_v26, 4  ;;  %7727 = vmatpush2.bf16.msra.mxu1 %v11997_v17 }
 0x3d2   : > { %v6880_v27 = vadd.f32 %v15319_v36, %v6613_v4  ;;  %v6942_v54 = vmax.f32 %v6878_v9, 0.0  ;;  %v6618_v33 = vmax.f32 %v6616_v13, %v6617_v21  ;;  %v6624_v34 = vrot.slane %v6623_v18, 2  ;;  %8195 = vmatprep.subr.bf16.mxu1 %v12005_v62 }
 0x3d3   : > { %v6630_v19 = vmax.f32 %v6628_v30, %v6629_v1  ;;  %v6637_v47 = vmax.f32 %v6635_v26, %v6636_v2  ;;  %v6163_v40 = vadd.f32 %v6162_v0, %v6049_v48  ;;  %v6165_v56 = vadd.f32 %v6164_v38, %v6051_v22 }
 0x3d4   : > { %v6944_v60 = vmax.f32 %v6880_v27, 0.0  ;;  %v11244_v16 = vpack.c.bf16 %v6942_v54, %v6941_v41  ;;  %v6619_v44 = vrot.slane %v6618_v33, 1  ;;  %v6625_v10 = vmax.f32 %v6623_v18, %v6624_v34  ;;  %v6168_v41 = vpop.f32.mrf.mxu0 }
 0x3d5   : > { %v6631_v51 = vrot.slane %v6630_v19, 2  ;;  %v6638_v59 = vrot.slane %v6637_v47, 2  ;;  %v6215_v61 = vadd.f32 %v6163_v40, %v15256_v24  ;;  %v6216_v53 = vadd.f32 %v6165_v56, %v15260_v50 }
 0x3d6   : > { %v11245_v29 = vpack.c.bf16 %v6944_v60, %v6943_v43  ;;  %v7229_v63 = vunpack.c.l.b16 %v11244_v16  ;;  %v7230_v28 = vunpack.c.h.b16 %v11244_v16  ;;  %v6620_v31 = vmax.f32 %v6618_v33, %v6619_v44  ;;  %v6170_v16 = vpop.f32.mrf.mxu0 }
 0x3d7   : > { %v6626_v37 = vrot.slane %v6625_v10, 1  ;;  %v6632_v35 = vmax.f32 %v6630_v19, %v6631_v51  ;;  %v6639_v0 = vmax.f32 %v6637_v47, %v6638_v59  ;;  %v6279_v57 = vcombine.low %v6215_v61, %v6216_v53 }
 0x3d8   : > { %v7231_v3 = vunpack.c.l.b16 %v11245_v29  ;;  %v7232_v42 = vunpack.c.h.b16 %v11245_v29  ;;  %v7316_v48 = vrot.slane %v7229_v63, 6  ;;  %v7330_v13 = vrot.slane %v7230_v28, 6 }
 0x3d9   : > { %v6627_v23 = vmax.f32 %v6625_v10, %v6626_v37  ;;  %v6633_v15 = vrot.slane %v6632_v35, 1  ;;  %v6640_v52 = vrot.slane %v6639_v0, 1  ;;  %v6881_v24 = vadd.f32 %v15315_v12, %v6620_v31 }
 0x3da   : > { %v7317_v50 = vsel %vm7286_vm5, %v7316_v48, %v15448_v39  ;;  %v7318_v30 = vrot.slane %v7231_v3, 5  ;;  %v7331_v26 = vsel %vm7286_vm5, %v7330_v13, %v15451_v32  ;;  %v7332_v4 = vrot.slane %v7232_v42, 5  ;;  %v6055_v32 = vpop.f32.mrf.mxu1 }
 0x3db   : > { %v6634_v9 = vmax.f32 %v6632_v35, %v6633_v15  ;;  %v6641_v21 = vmax.f32 %v6639_v0, %v6640_v52  ;;  %v6882_v18 = vadd.f32 %v15319_v36, %v6627_v23  ;;  %v6945_v38 = vmax.f32 %v6881_v24, 0.0  ;;  %v6172_v52 = vpop.f32.mrf.mxu0 }
 0x3dc   : > { %v7319_v43 = vsel %vm7289_vm6, %v7318_v30, %v7317_v50  ;;  %v7333_v1 = vsel %vm7289_vm6, %v7332_v4, %v7331_v26  ;;  %v6280_v2 = vcombine.high %v6215_v61, %v6216_v53  ;;  %v10857_v27 = vcombine.low %v6216_v53, %v6216_v53  ;;  %v6057_v63 = vpop.f32.mrf.mxu1 }
 0x3dd   : > { %v6883_v39 = vadd.f32 %v15315_v12, %v6634_v9  ;;  %v6884_v54 = vadd.f32 %v15319_v36, %v6641_v21  ;;  %v6946_v22 = vmax.f32 %v6882_v18, 0.0  ;;  %v10858_v33 = vcombine.high %v6216_v53, %v6216_v53 }
 0x3de   : > { %v6642_v34 = vsel %vm6389_vm15, %v6279_v57, -inf  ;;  %v6649_v17 = vsel %vm6389_vm15, %v10857_v27, -inf  ;;  %v6656_v55 = vsel %vm6389_vm15, %v6280_v2, -inf  ;;  %v6169_v19 = vadd.f32 %v6168_v41, %v6055_v32  ;;  %v6059_v18 = vpop.f32.mrf.mxu1 }
 0x3df   : > { %v6947_v47 = vmax.f32 %v6883_v39, 0.0  ;;  %v6948_v40 = vmax.f32 %v6884_v54, 0.0  ;;  %v11246_v56 = vpack.c.bf16 %v6946_v22, %v6945_v38  ;;  %v6643_v60 = vrot.slane %v6642_v34, 4 }
 0x3e0   : > { %v6650_v44 = vrot.slane %v6649_v17, 4  ;;  %v6657_v10 = vrot.slane %v6656_v55, 4  ;;  %v6663_v51 = vsel %vm6389_vm15, %v10858_v33, -inf  ;;  %v6217_v59 = vadd.f32 %v6169_v19, %v15264_v46 }
 0x3e1   : > { %v11247_v61 = vpack.c.bf16 %v6948_v40, %v6947_v47  ;;  %v7233_v53 = vunpack.c.l.b16 %v11246_v56  ;;  %v7234_v29 = vunpack.c.h.b16 %v11246_v56  ;;  %v6644_v28 = vmax.f32 %v6642_v34, %v6643_v60 }
 0x3e2   : > { %v6651_v31 = vmax.f32 %v6649_v17, %v6650_v44  ;;  %v6658_v37 = vmax.f32 %v6656_v55, %v6657_v10  ;;  %v6664_v35 = vrot.slane %v6663_v51, 4  ;;  %v6171_v0 = vadd.f32 %v6170_v16, %v6057_v63  ;;  %v6174_v63 = vpop.f32.mrf.mxu0 }
 0x3e3   : > { %v7235_v57 = vunpack.c.l.b16 %v11247_v61  ;;  %v7236_v3 = vunpack.c.h.b16 %v11247_v61  ;;  %v7320_v42 = vrot.slane %v7233_v53, 4  ;;  %v7334_v48 = vrot.slane %v7234_v29, 4 }
 0x3e4   : > { %v6645_v13 = vrot.slane %v6644_v28, 2  ;;  %v6652_v62 = vrot.slane %v6651_v31, 2  ;;  %v6659_v23 = vrot.slane %v6658_v37, 2  ;;  %v6665_v15 = vmax.f32 %v6663_v51, %v6664_v35 }
 0x3e5   : > { %v7321_v46 = vsel %vm7292_vm7, %v7320_v42, %v7319_v43  ;;  %v7322_v24 = vrot.slane %v7235_v57, 3  ;;  %v7335_v50 = vsel %vm7292_vm7, %v7334_v48, %v7333_v1  ;;  %v7336_v30 = vrot.slane %v7236_v3, 3 }
 0x3e6   : > { %v6646_v26 = vmax.f32 %v6644_v28, %v6645_v13  ;;  %v6653_v4 = vmax.f32 %v6651_v31, %v6652_v62  ;;  %v6660_v9 = vmax.f32 %v6658_v37, %v6659_v23  ;;  %v6666_v21 = vrot.slane %v6665_v15, 2 }
 0x3e7   : > { %v15479_v38 = vsel %vm7267_vm0, %v7322_v24, %v7321_v46  ;;  %v15482_v41 = vsel %vm7267_vm0, %v7336_v30, %v7335_v50  ;;  %v6218_v2 = vadd.f32 %v6171_v0, %v15268_v7  ;;  %v6173_v27 = vadd.f32 %v6172_v52, %v6059_v18  ;;  %v6061_v0 = vpop.f32.mrf.mxu1 }
 0x3e8   : > { %v6647_v39 = vrot.slane %v6646_v26, 1  ;;  %v6654_v43 = vrot.slane %v6653_v4, 1  ;;  %v6661_v54 = vrot.slane %v6660_v9, 1  ;;  %v6667_v22 = vmax.f32 %v6665_v15, %v6666_v21 }
 0x3e9   : > { %v6281_v1 = vcombine.low %v6217_v59, %v6218_v2  ;;  %v6282_v32 = vcombine.high %v6217_v59, %v6218_v2  ;;  %v10859_v33 = vcombine.low %v6218_v2, %v6218_v2  ;;  %v10860_v34 = vcombine.high %v6218_v2, %v6218_v2 }
 0x3ea   : > { %v6648_v17 = vmax.f32 %v6646_v26, %v6647_v39  ;;  %v6655_v55 = vmax.f32 %v6653_v4, %v6654_v43  ;;  %v6662_v19 = vmax.f32 %v6660_v9, %v6661_v54  ;;  %v6668_v47 = vrot.slane %v6667_v22, 1 }
 0x3eb   : > { %v6670_v40 = vsel %vm6389_vm15, %v6281_v1, -inf  ;;  %v6677_v56 = vsel %vm6389_vm15, %v10859_v33, -inf  ;;  %v6684_v60 = vsel %vm6389_vm15, %v6282_v32, -inf  ;;  %v6691_v7 = vsel %vm6389_vm15, %v10860_v34, -inf }
 0x3ec   : > { %v6669_v16 = vmax.f32 %v6667_v22, %v6668_v47  ;;  %v6885_v44 = vadd.f32 %v15315_v12, %v6648_v17  ;;  %v6886_v10 = vadd.f32 %v15319_v36, %v6655_v55  ;;  %v6887_v51 = vadd.f32 %v15315_v12, %v6662_v19 }
 0x3ed   : > { %v6671_v59 = vrot.slane %v6670_v40, 4  ;;  %v6678_v61 = vrot.slane %v6677_v56, 4  ;;  %v6685_v53 = vrot.slane %v6684_v60, 4  ;;  %v6692_v29 = vrot.slane %v6691_v7, 4 }
 0x3ee   : > { %v6888_v28 = vadd.f32 %v15319_v36, %v6669_v16  ;;  %v6949_v31 = vmax.f32 %v6885_v44, 0.0  ;;  %v6950_v37 = vmax.f32 %v6886_v10, 0.0  ;;  %v6951_v35 = vmax.f32 %v6887_v51, 0.0 }
 0x3ef   : > { %v6672_v57 = vmax.f32 %v6670_v40, %v6671_v59  ;;  %v6679_v3 = vmax.f32 %v6677_v56, %v6678_v61  ;;  %v6686_v42 = vmax.f32 %v6684_v60, %v6685_v53  ;;  %v6693_v48 = vmax.f32 %v6691_v7, %v6692_v29  ;;  %v6178_v60 = vpop.f32.mrf.mxu0 }
 0x3f0   : > { %v6952_v13 = vmax.f32 %v6888_v28, 0.0  ;;  %v11248_v62 = vpack.c.bf16 %v6950_v37, %v6949_v31  ;;  %v6219_v23 = vadd.f32 %v6173_v27, %v15272_v8  ;;  %v6175_v15 = vadd.f32 %v6174_v63, %v6061_v0 }
 0x3f1   : > { %v6673_v52 = vrot.slane %v6672_v57, 2  ;;  %v6680_v46 = vrot.slane %v6679_v3, 2  ;;  %v6687_v24 = vrot.slane %v6686_v42, 2  ;;  %v6694_v50 = vrot.slane %v6693_v48, 2 }
 0x3f2   : > { %v11249_v30 = vpack.c.bf16 %v6952_v13, %v6951_v35  ;;  %v7237_v26 = vunpack.c.l.b16 %v11248_v62  ;;  %v7238_v4 = vunpack.c.h.b16 %v11248_v62  ;;  %v6220_v9 = vadd.f32 %v6175_v15, %v15276_v6 }
 0x3f3   : > { %v6674_v21 = vmax.f32 %v6672_v57, %v6673_v52  ;;  %v6681_v18 = vmax.f32 %v6679_v3, %v6680_v46  ;;  %v6688_v2 = vmax.f32 %v6686_v42, %v6687_v24  ;;  %v6695_v39 = vmax.f32 %v6693_v48, %v6694_v50  ;;  %v6180_v57 = vpop.f32.mrf.mxu0 }
 0x3f4   : > { %v7239_v43 = vunpack.c.l.b16 %v11249_v30  ;;  %v7240_v54 = vunpack.c.h.b16 %v11249_v30  ;;  %v7324_v22 = vrot.slane %v7237_v26, 2  ;;  %v7338_v1 = vrot.slane %v7238_v4, 2 }
 0x3f5   : > { %v6675_v32 = vrot.slane %v6674_v21, 1  ;;  %v6682_v8 = vrot.slane %v6681_v18, 1  ;;  %v6689_v27 = vrot.slane %v6688_v2, 1  ;;  %v6696_v33 = vrot.slane %v6695_v39, 1 }
 0x3f6   : > { %v7325_v34 = vsel %vm7270_vm1, %v7324_v22, %v15479_v38  ;;  %v7326_v17 = vrot.slane %v7239_v43, 1  ;;  %v7339_v55 = vsel %vm7270_vm1, %v7338_v1, %v15482_v41  ;;  %v7340_v6 = vrot.slane %v7240_v54, 1  ;;  %v6065_v41 = vpop.f32.mrf.mxu1 }
 0x3f7   : > { %v6676_v19 = vmax.f32 %v6674_v21, %v6675_v32  ;;  %v6683_v47 = vmax.f32 %v6681_v18, %v6682_v8  ;;  %v6690_v40 = vmax.f32 %v6688_v2, %v6689_v27  ;;  %v6697_v56 = vmax.f32 %v6695_v39, %v6696_v33 }
 0x3f8   : > { %v7327_v7 = vsel %vm7273_vm3, %v7326_v17, %v7325_v34  ;;  %v7341_v16 = vsel %vm7273_vm3, %v7340_v6, %v7339_v55  ;;  %v6283_v44 = vcombine.low %v6219_v23, %v6220_v9  ;;  %v6284_v10 = vcombine.high %v6219_v23, %v6220_v9  ;;  %v6067_v23 = vpop.f32.mrf.mxu1 }
 0x3f9   : > { %v7384_v51 = vpack.c.b16 %v7341_v16, %v7327_v7  ;;  %v6889_v59 = vadd.f32 %v15315_v12, %v6676_v19  ;;  %v6890_v38 = vadd.f32 %v15319_v36, %v6683_v47  ;;  %v6891_v61 = vadd.f32 %v15315_v12, %v6690_v40  ;;  %v6182_v40 = vpop.f32.mrf.mxu0 }
 0x3fa   : > { %v6892_v53 = vadd.f32 %v15319_v36, %v6697_v56  ;;  %v10861_v29 = vcombine.low %v6220_v9, %v6220_v9  ;;  %v10862_v63 = vcombine.high %v6220_v9, %v6220_v9  ;;  %v6698_v28 = vsel %vm6389_vm15, %v6283_v44, -inf }
 0x3fb   : > { %7394 = vst [vmem:[#allocation3 + $0x8] sm:$0xff] %v7384_v51  ;;  %v6953_v31 = vmax.f32 %v6889_v59, 0.0  ;;  %v6954_v37 = vmax.f32 %v6890_v38, 0.0  ;;  %v6955_v35 = vmax.f32 %v6891_v61, 0.0  ;;  %v6699_v0 = vrot.slane %v6698_v28, 4 }
 0x3fc   : > { %v6956_v3 = vmax.f32 %v6892_v53, 0.0  ;;  %v6705_v42 = vsel %vm6389_vm15, %v10861_v29, -inf  ;;  %v6712_v48 = vsel %vm6389_vm15, %v6284_v10, -inf  ;;  %v6719_v13 = vsel %vm6389_vm15, %v10862_v63, -inf }
 0x3fd   : > { %v11250_v62 = vpack.c.bf16 %v6954_v37, %v6953_v31  ;;  %v6700_v15 = vmax.f32 %v6698_v28, %v6699_v0  ;;  %v6706_v52 = vrot.slane %v6705_v42, 4  ;;  %v6713_v46 = vrot.slane %v6712_v48, 4  ;;  %v6184_v31 = vpop.f32.mrf.mxu0 }
 0x3fe   : > { %v11251_v24 = vpack.c.bf16 %v6956_v3, %v6955_v35  ;;  %v6720_v50 = vrot.slane %v6719_v13, 4  ;;  %v6179_v30 = vadd.f32 %v6178_v60, %v6065_v41  ;;  %v6181_v26 = vadd.f32 %v6180_v57, %v6067_v23 }
 0x3ff   : > { %v7241_v4 = vunpack.c.l.b16 %v11250_v62  ;;  %v7242_v9 = vunpack.c.h.b16 %v11250_v62  ;;  %v6701_v21 = vrot.slane %v6700_v15, 2  ;;  %v6707_v18 = vmax.f32 %v6705_v42, %v6706_v52 }
 0x400   : > { %v7243_v2 = vunpack.c.l.b16 %v11251_v24  ;;  %v7244_v39 = vunpack.c.h.b16 %v11251_v24  ;;  %v6714_v43 = vmax.f32 %v6712_v48, %v6713_v46  ;;  %v6721_v54 = vmax.f32 %v6719_v13, %v6720_v50 }
 0x401   : > { %v6702_v22 = vmax.f32 %v6700_v15, %v6701_v21  ;;  %v6708_v1 = vrot.slane %v6707_v18, 2  ;;  %v6221_v32 = vadd.f32 %v6179_v30, %v15279_v5  ;;  %v6222_v8 = vadd.f32 %v6181_v26, %v15282_v49  ;;  %v6069_v49 = vpop.f32.mrf.mxu1 }
 0x402   : > { %v7342_v27 = vrot.slane %v7243_v2, 7  ;;  %v7356_v33 = vrot.slane %v7244_v39, 7  ;;  %v6715_v34 = vrot.slane %v6714_v43, 2  ;;  %v6722_v17 = vrot.slane %v6721_v54, 2 }
 0x403   : > { %v6703_v55 = vrot.slane %v6702_v22, 1  ;;  %v6709_v6 = vmax.f32 %v6707_v18, %v6708_v1  ;;  %v6285_v19 = vcombine.low %v6221_v32, %v6222_v8  ;;  %v6286_v47 = vcombine.high %v6221_v32, %v6222_v8  ;;  %v6071_v48 = vpop.f32.mrf.mxu1 }
 0x404   : > { %v15512_v56 = vsel %vm7283_vm4, %v7342_v27, %v7241_v4  ;;  %v15515_v60 = vsel %vm7283_vm4, %v7356_v33, %v7242_v9  ;;  %v6716_v7 = vmax.f32 %v6714_v43, %v6715_v34  ;;  %v6723_v16 = vmax.f32 %v6721_v54, %v6722_v17  ;;  %v6188_v9 = vpop.f32.mrf.mxu0 }
 0x405   : > { %v6704_v5 = vmax.f32 %v6702_v22, %v6703_v55  ;;  %v6710_v44 = vrot.slane %v6709_v6, 1  ;;  %v10863_v10 = vcombine.low %v6222_v8, %v6222_v8  ;;  %v10864_v51 = vcombine.high %v6222_v8, %v6222_v8  ;;  %v6075_v4 = vpop.f32.mrf.mxu1 }
 0x406   : > { %v6717_v59 = vrot.slane %v6716_v7, 1  ;;  %v6724_v38 = vrot.slane %v6723_v16, 1  ;;  %v6726_v61 = vsel %vm6389_vm15, %v6285_v19, -inf  ;;  %v6740_v41 = vsel %vm6389_vm15, %v6286_v47, -inf  ;;  %v6190_v47 = vpop.f32.mrf.mxu0 }
 0x407   : > { %v6711_v53 = vmax.f32 %v6709_v6, %v6710_v44  ;;  %v6893_v29 = vadd.f32 %v15315_v12, %v6704_v5  ;;  %v6727_v63 = vrot.slane %v6726_v61, 4  ;;  %v6733_v28 = vsel %vm6389_vm15, %v10863_v10, -inf  ;;  %v6077_v19 = vpop.f32.mrf.mxu1 }
 0x408   : > { %v6718_v37 = vmax.f32 %v6716_v7, %v6717_v59  ;;  %v6725_v35 = vmax.f32 %v6723_v16, %v6724_v38  ;;  %v6734_v0 = vrot.slane %v6733_v28, 4  ;;  %v6741_v57 = vrot.slane %v6740_v41, 4 }
 0x409   : > { %v6894_v3 = vadd.f32 %v15319_v36, %v6711_v53  ;;  %v6957_v42 = vmax.f32 %v6893_v29, 0.0  ;;  %v6728_v13 = vmax.f32 %v6726_v61, %v6727_v63  ;;  %v6747_v62 = vsel %vm6389_vm15, %v10864_v51, -inf }
 0x40a   : > { %v6895_v23 = vadd.f32 %v15315_v12, %v6718_v37  ;;  %v6896_v15 = vadd.f32 %v15319_v36, %v6725_v35  ;;  %v6735_v52 = vmax.f32 %v6733_v28, %v6734_v0  ;;  %v6742_v46 = vmax.f32 %v6740_v41, %v6741_v57  ;;  %v6079_v28 = vpop.f32.mrf.mxu1 }
 0x40b   : > { %v6958_v24 = vmax.f32 %v6894_v3, 0.0  ;;  %v6729_v50 = vrot.slane %v6728_v13, 2  ;;  %v6748_v30 = vrot.slane %v6747_v62, 4  ;;  %v6183_v26 = vadd.f32 %v6182_v40, %v6069_v49 }
 0x40c   : > { %v6959_v21 = vmax.f32 %v6895_v23, 0.0  ;;  %v6960_v18 = vmax.f32 %v6896_v15, 0.0  ;;  %v6736_v2 = vrot.slane %v6735_v52, 2  ;;  %v6743_v39 = vrot.slane %v6742_v46, 2 }
 0x40d   : > { %v11252_v43 = vpack.c.bf16 %v6958_v24, %v6957_v42  ;;  %v6730_v54 = vmax.f32 %v6728_v13, %v6729_v50  ;;  %v6749_v22 = vmax.f32 %v6747_v62, %v6748_v30  ;;  %v6223_v1 = vadd.f32 %v6183_v26, %v15285_v20 }
 0x40e   : > { %v11253_v32 = vpack.c.bf16 %v6960_v18, %v6959_v21  ;;  %v6737_v8 = vmax.f32 %v6735_v52, %v6736_v2  ;;  %v6744_v27 = vmax.f32 %v6742_v46, %v6743_v39  ;;  %v6185_v33 = vadd.f32 %v6184_v31, %v6071_v48  ;;  %v6192_v31 = vpop.f32.mrf.mxu0 }
 0x40f   : > { %v7245_v34 = vunpack.c.l.b16 %v11252_v43  ;;  %v7246_v17 = vunpack.c.h.b16 %v11252_v43  ;;  %v6731_v55 = vrot.slane %v6730_v54, 1  ;;  %v6750_v6 = vrot.slane %v6749_v22, 2 }
 0x410   : > { %v7247_v40 = vunpack.c.l.b16 %v11253_v32  ;;  %v7248_v7 = vunpack.c.h.b16 %v11253_v32  ;;  %v6738_v16 = vrot.slane %v6737_v8, 1  ;;  %v6745_v5 = vrot.slane %v6744_v27, 1 }
 0x411   : > { %v7344_v44 = vrot.slane %v7245_v34, 6  ;;  %v7358_v49 = vrot.slane %v7246_v17, 6  ;;  %v6732_v10 = vmax.f32 %v6730_v54, %v6731_v55  ;;  %v6751_v51 = vmax.f32 %v6749_v22, %v6750_v6 }
 0x412   : > { %v7346_v59 = vrot.slane %v7247_v40, 5  ;;  %v7360_v20 = vrot.slane %v7248_v7, 5  ;;  %v6739_v38 = vmax.f32 %v6737_v8, %v6738_v16  ;;  %v6746_v61 = vmax.f32 %v6744_v27, %v6745_v5 }
 0x413   : > { %v7345_v41 = vsel %vm7286_vm5, %v7344_v44, %v15512_v56  ;;  %v7359_v53 = vsel %vm7286_vm5, %v7358_v49, %v15515_v60  ;;  %v6752_v29 = vrot.slane %v6751_v51, 1  ;;  %v6897_v63 = vadd.f32 %v15315_v12, %v6732_v10 }
 0x414   : > { %v7347_v37 = vsel %vm7289_vm6, %v7346_v59, %v7345_v41  ;;  %v7361_v35 = vsel %vm7289_vm6, %v7360_v20, %v7359_v53  ;;  %v6898_v0 = vadd.f32 %v15319_v36, %v6739_v38  ;;  %v6899_v57 = vadd.f32 %v15315_v12, %v6746_v61 }
 0x415   : > { %v6753_v3 = vmax.f32 %v6751_v51, %v6752_v29  ;;  %v6961_v42 = vmax.f32 %v6897_v63, 0.0  ;;  %v6224_v56 = vadd.f32 %v6185_v33, %v15288_v25  ;;  %v6189_v48 = vadd.f32 %v6188_v9, %v6075_v4 }
 0x416   : > { %v6962_v13 = vmax.f32 %v6898_v0, 0.0  ;;  %v6963_v60 = vmax.f32 %v6899_v57, 0.0  ;;  %v6191_v62 = vadd.f32 %v6190_v47, %v6077_v19  ;;  %v15536_v23 = vadd.f32 %v6192_v31, %v6079_v28 }
 0x417   : > { %v6900_v15 = vadd.f32 %v15319_v36, %v6753_v3  ;;  %v6287_v52 = vcombine.low %v6223_v1, %v6224_v56  ;;  %v6288_v46 = vcombine.high %v6223_v1, %v6224_v56  ;;  %v10865_v24 = vcombine.low %v6224_v56, %v6224_v56 }
 0x418   : > { %v11254_v50 = vpack.c.bf16 %v6962_v13, %v6961_v42  ;;  %v10866_v30 = vcombine.high %v6224_v56, %v6224_v56  ;;  %v6225_v26 = vadd.f32 %v6189_v48, %v15291_v58  ;;  %v6226_v21 = vadd.f32 %v6191_v62, %v15294_v11 }
 0x419   : > { %v6964_v18 = vmax.f32 %v6900_v15, 0.0  ;;  %v6754_v25 = vsel %vm6389_vm15, %v6287_v52, -inf  ;;  %v6761_v4 = vsel %vm6389_vm15, %v10865_v24, -inf  ;;  %v6768_v9 = vsel %vm6389_vm15, %v6288_v46, -inf }
 0x41a   : > { %v7249_v2 = vunpack.c.l.b16 %v11254_v50  ;;  %v7250_v39 = vunpack.c.h.b16 %v11254_v50  ;;  %v6755_v43 = vrot.slane %v6754_v25, 4  ;;  %v6762_v54 = vrot.slane %v6761_v4, 4 }
 0x41b   : > { %v11255_v22 = vpack.c.bf16 %v6964_v18, %v6963_v60  ;;  %v6769_v1 = vrot.slane %v6768_v9, 4  ;;  %v6775_v32 = vsel %vm6389_vm15, %v10866_v30, -inf  ;;  %v6289_v8 = vcombine.low %v6225_v26, %v6226_v21 }
 0x41c   : > { %v7348_v27 = vrot.slane %v7249_v2, 4  ;;  %v7362_v58 = vrot.slane %v7250_v39, 4  ;;  %v6756_v33 = vmax.f32 %v6754_v25, %v6755_v43  ;;  %v6763_v11 = vmax.f32 %v6761_v4, %v6762_v54  ;;  %v6081_v39 = vpop.f32.mrf.mxu1  ;;  %v6194_v43 = vpop.f32.mrf.mxu0 }
 0x41d   : > { %v7251_v34 = vunpack.c.l.b16 %v11255_v22  ;;  %v7252_v17 = vunpack.c.h.b16 %v11255_v22  ;;  %v6770_v55 = vmax.f32 %v6768_v9, %v6769_v1  ;;  %v6776_v6 = vrot.slane %v6775_v32, 4 }
 0x41e   : > { %v7349_v19 = vsel %vm7292_vm7, %v7348_v27, %v7347_v37  ;;  %v7363_v47 = vsel %vm7292_vm7, %v7362_v58, %v7361_v35  ;;  %v6757_v40 = vrot.slane %v6756_v33, 2  ;;  %v6764_v7 = vrot.slane %v6763_v11, 2 }
 0x41f   : > { %v7350_v16 = vrot.slane %v7251_v34, 3  ;;  %v7364_v5 = vrot.slane %v7252_v17, 3  ;;  %v6771_v44 = vrot.slane %v6770_v55, 2  ;;  %v6777_v49 = vmax.f32 %v6775_v32, %v6776_v6 }
 0x420   : > { %v6758_v10 = vmax.f32 %v6756_v33, %v6757_v40  ;;  %v6765_v51 = vmax.f32 %v6763_v11, %v6764_v7  ;;  %v6290_v59 = vcombine.high %v6225_v26, %v6226_v21  ;;  %v10867_v20 = vcombine.low %v6226_v21, %v6226_v21 }
 0x421   : > { %v15548_v38 = vsel %vm7267_vm0, %v7350_v16, %v7349_v19  ;;  %v15551_v61 = vsel %vm7267_vm0, %v7364_v5, %v7363_v47  ;;  %v6772_v41 = vmax.f32 %v6770_v55, %v6771_v44  ;;  %v6778_v53 = vrot.slane %v6777_v49, 2 }
 0x422   : > { %v6759_v29 = vrot.slane %v6758_v10, 1  ;;  %v6766_v63 = vrot.slane %v6765_v51, 1  ;;  %v10868_v28 = vcombine.high %v6226_v21, %v6226_v21  ;;  %v6782_v31 = vsel %vm6389_vm15, %v6289_v8, -inf }
 0x423   : > { %v6773_v37 = vrot.slane %v6772_v41, 1  ;;  %v6779_v35 = vmax.f32 %v6777_v49, %v6778_v53  ;;  %v6783_v0 = vrot.slane %v6782_v31, 4  ;;  %v6789_v57 = vsel %vm6389_vm15, %v10867_v20, -inf }
 0x424   : > { %v6760_v3 = vmax.f32 %v6758_v10, %v6759_v29  ;;  %v6767_v42 = vmax.f32 %v6765_v51, %v6766_v63  ;;  %v6790_v56 = vrot.slane %v6789_v57, 4  ;;  %v6796_v48 = vsel %vm6389_vm15, %v6290_v59, -inf }
 0x425   : > { %v6774_v13 = vmax.f32 %v6772_v41, %v6773_v37  ;;  %v6780_v60 = vrot.slane %v6779_v35, 1  ;;  %v6784_v62 = vmax.f32 %v6782_v31, %v6783_v0  ;;  %v6797_v15 = vrot.slane %v6796_v48, 4 }
 0x426   : > { %v6901_v52 = vadd.f32 %v15315_v12, %v6760_v3  ;;  %v6902_v46 = vadd.f32 %v15319_v36, %v6767_v42  ;;  %v6791_v24 = vmax.f32 %v6789_v57, %v6790_v56  ;;  %v6803_v50 = vsel %vm6389_vm15, %v10868_v28, -inf  ;;  %v15571_v56 = vld [vmem:[#allocation3 + $0x18] sm:$0xff] }
 0x427   : > { %v6781_v30 = vmax.f32 %v6779_v35, %v6780_v60  ;;  %v6903_v26 = vadd.f32 %v15315_v12, %v6774_v13  ;;  %v6785_v21 = vrot.slane %v6784_v62, 2  ;;  %v6798_v18 = vmax.f32 %v6796_v48, %v6797_v15 }
 0x428   : > { %v6965_v25 = vmax.f32 %v6901_v52, 0.0  ;;  %v6966_v4 = vmax.f32 %v6902_v46, 0.0  ;;  %v6792_v9 = vrot.slane %v6791_v24, 2  ;;  %v6804_v2 = vrot.slane %v6803_v50, 4  ;;  %v7397_v46 = vld [vmem:[#allocation3 + $0x20] sm:$0xff] }
 0x429   : > { %v6904_v54 = vadd.f32 %v15319_v36, %v6781_v30  ;;  %v6967_v22 = vmax.f32 %v6903_v26, 0.0  ;;  %v6786_v1 = vmax.f32 %v6784_v62, %v6785_v21  ;;  %v6799_v32 = vrot.slane %v6798_v18, 2 }
 0x42a   : > { %v11256_v8 = vpack.c.bf16 %v6966_v4, %v6965_v25  ;;  %v6793_v27 = vmax.f32 %v6791_v24, %v6792_v9  ;;  %v6805_v58 = vmax.f32 %v6803_v50, %v6804_v2  ;;  %v6227_v33 = vadd.f32 %v15536_v23, %v15297_v45 }
 0x42b   : > { %v6968_v11 = vmax.f32 %v6904_v54, 0.0  ;;  %v6787_v34 = vrot.slane %v6786_v1, 1  ;;  %v6800_v17 = vmax.f32 %v6798_v18, %v6799_v32  ;;  %v6195_v55 = vadd.f32 %v6194_v43, %v6081_v39  ;;  %v11946_v54 = vld [vmem:[#allocation9 + $0x370] ss:$8 sps:$4 sm:$0xff]  }
 0x42c   : > { %v7253_v6 = vunpack.c.l.b16 %v11256_v8  ;;  %v7254_v19 = vunpack.c.h.b16 %v11256_v8  ;;  %v6794_v47 = vrot.slane %v6793_v27, 1  ;;  %v6806_v40 = vrot.slane %v6805_v58, 2 }
 0x42d   : > { %v11257_v7 = vpack.c.bf16 %v6968_v11, %v6967_v22  ;;  %v6788_v16 = vmax.f32 %v6786_v1, %v6787_v34  ;;  %v6801_v5 = vrot.slane %v6800_v17, 1  ;;  %v6228_v44 = vadd.f32 %v6195_v55, %v15302_v14  ;;  %v15584_v22 = vld [vmem:[#allocation3 + $0x8] sm:$0xff] }
 0x42e   : > { %v7352_v49 = vrot.slane %v7253_v6, 2  ;;  %v7366_v10 = vrot.slane %v7254_v19, 2  ;;  %v6795_v51 = vmax.f32 %v6793_v27, %v6794_v47  ;;  %v6807_v59 = vmax.f32 %v6805_v58, %v6806_v40  ;;  %v11954_v27 = vld [vmem:[#allocation9 + $0x364] ss:$8 sps:$4 sm:$0xff]  }
 0x42f   : > { %v7255_v20 = vunpack.c.l.b16 %v11257_v7  ;;  %v7256_v41 = vunpack.c.h.b16 %v11257_v7  ;;  %v6802_v45 = vmax.f32 %v6800_v17, %v6801_v5  ;;  %v6905_v23 = vadd.f32 %v15315_v12, %v6788_v16  ;;  %v11952_v16 = vld [vmem:[#allocation9 + $0x360] ss:$8 sps:$4 sm:$0xff]  }
 0x430   : > { %v7353_v53 = vsel %vm7270_vm1, %v7352_v49, %v15548_v38  ;;  %v7367_v29 = vsel %vm7270_vm1, %v7366_v10, %v15551_v61  ;;  %v6808_v63 = vrot.slane %v6807_v59, 1  ;;  %v6906_v28 = vadd.f32 %v15319_v36, %v6795_v51 }
 0x431   : > { %v7354_v31 = vrot.slane %v7255_v20, 1  ;;  %v7368_v14 = vrot.slane %v7256_v41, 1  ;;  %v6907_v37 = vadd.f32 %v15315_v12, %v6802_v45  ;;  %v6969_v35 = vmax.f32 %v6905_v23, 0.0  ;;  %v11960_v20 = vld [vmem:[#allocation9 + $0x354] ss:$8 sps:$4 sm:$0xff]  }
 0x432   : > { %v6809_v0 = vmax.f32 %v6807_v59, %v6808_v63  ;;  %v6970_v57 = vmax.f32 %v6906_v28, 0.0  ;;  %v6291_v3 = vcombine.low %v6227_v33, %v6228_v44  ;;  %v6292_v42 = vcombine.high %v6227_v33, %v6228_v44 }
 0x433   : > { %v7355_v48 = vsel %vm7273_vm3, %v7354_v31, %v7353_v53  ;;  %v7369_v38 = vsel %vm7273_vm3, %v7368_v14, %v7367_v29  ;;  %v6971_v13 = vmax.f32 %v6907_v37, 0.0  ;;  %v10869_v61 = vcombine.low %v6228_v44, %v6228_v44 }
 0x434   : > { %v15575_v60 = vpack.c.b16 %v7369_v38, %v7355_v48  ;;  %v6908_v62 = vadd.f32 %v15319_v36, %v6809_v0  ;;  %v11258_v15 = vpack.c.bf16 %v6970_v57, %v6969_v35  ;;  %v10870_v52 = vcombine.high %v6228_v44, %v6228_v44  ;;  %v11958_v35 = vld [vmem:[#allocation9 + $0x350] ss:$8 sps:$4 sm:$0xff]   ;;  %v11966_v48 = vld [vmem:[#allocation9 + $0x344] ss:$8 sps:$4 sm:$0xff]  }
 0x435   : > { %v6810_v24 = vsel %vm6389_vm15, %v6291_v3, -inf  ;;  %v6817_v50 = vsel %vm6389_vm15, %v10869_v61, -inf  ;;  %v6824_v30 = vsel %vm6389_vm15, %v6292_v42, -inf  ;;  %v10941_v26 = vcombine.low %v7397_v46, %v15571_v56 }
 0x436   : > { %v6972_v21 = vmax.f32 %v6908_v62, 0.0  ;;  %v7257_v18 = vunpack.c.l.b16 %v11258_v15  ;;  %v7258_v25 = vunpack.c.h.b16 %v11258_v15  ;;  %v6811_v4 = vrot.slane %v6810_v24, 4 }
 0x437   : > { %v6818_v9 = vrot.slane %v6817_v50, 4  ;;  %v6825_v2 = vrot.slane %v6824_v30, 4  ;;  %v6831_v39 = vsel %vm6389_vm15, %v10870_v52, -inf  ;;  %v10942_v43 = vcombine.high %v7397_v46, %v15571_v56 }
 0x438   : > { %v11259_v1 = vpack.c.bf16 %v6972_v21, %v6971_v13  ;;  %v6812_v32 = vmax.f32 %v6810_v24, %v6811_v4  ;;  %v6832_v8 = vrot.slane %v6831_v39, 4  ;;  %v15588_v58 = vcombine.low %v15584_v22, %v15575_v60 }
 0x439   : > { %v6819_v33 = vmax.f32 %v6817_v50, %v6818_v9  ;;  %v6826_v11 = vmax.f32 %v6824_v30, %v6825_v2  ;;  %7961 = vmatprep.mubr.bf16.mxu0 %v10942_v43  ;;  %v15592_v34 = vcombine.high %v15584_v22, %v15575_v60  ;;  %v7493_v17 = vshrl.u32 %v10941_v26, 16  ;;  %v12003_v50 = vld [vmem:[#allocation9 + $0x270] ss:$8 sps:$4 sm:$0xff]   ;;  %v15619_v9 = vld [vmem:[#allocation3 + $0x20] sm:$0xee] }
 0x43a   : > { %v7259_v55 = vunpack.c.l.b16 %v11259_v1  ;;  %v7260_v6 = vunpack.c.h.b16 %v11259_v1  ;;  %v6813_v19 = vrot.slane %v6812_v32, 2  ;;  %v6833_v47 = vmax.f32 %v6831_v39, %v6832_v8  ;;  %7962 = vmatmul.mubr.bf16.vlgmr.msra.gmra.mxu0 %v10941_v26  ;;  %v12013_v2 = vld [vmem:[#allocation9 + $0x264] ss:$8 sps:$4 sm:$0xff]  }
 0x43b   : > { %v6820_v40 = vrot.slane %v6819_v33, 2  ;;  %v6827_v7 = vrot.slane %v6826_v11, 2  ;;  %8502 = vmatpush1.bf16.msra.mxu0 %v11946_v54  ;;  %7971 = vmatprep.mubr.bf16.mxu0 %v15592_v34  ;;  %v7495_v5 = vshll.u32 %v10941_v26, 16  ;;  %v7505_v44 = vshrl.u32 %v10942_v43, 16  ;;  %v11972_v54 = vld [vmem:[#allocation9 + $0x334] ss:$8 sps:$4 sm:$0xff]  }
 0x43c   : > { %v7370_v49 = vrot.slane %v7259_v55, 7  ;;  %v7376_v10 = vrot.slane %v7260_v6, 7  ;;  %v6814_v51 = vmax.f32 %v6812_v32, %v6813_v19  ;;  %v6834_v59 = vrot.slane %v6833_v47, 2  ;;  %8503 = vmatprep.subr.bf16.mxu0 %v11954_v27  ;;  %v12011_v55 = vld [vmem:[#allocation9 + $0x260] ss:$8 sps:$4 sm:$0xff]  }
 0x43d   : > { %v6821_v41 = vmax.f32 %v6819_v33, %v6820_v40  ;;  %v6828_v45 = vmax.f32 %v6826_v11, %v6827_v7  ;;  %v7497_v23 = vrot.slane %v7495_v5, 1  ;;  %v7507_v53 = vshll.u32 %v10942_v43, 16  ;;  %v11970_v19 = vld [vmem:[#allocation9 + $0x330] ss:$8 sps:$4 sm:$0xff]   ;;  %v11978_v7 = vld [vmem:[#allocation9 + $0x324] ss:$8 sps:$4 sm:$0xff]  }
 0x43e   : > { %v15596_v29 = vsel %vm7283_vm4, %v7370_v49, %v7257_v18  ;;  %v15599_v63 = vsel %vm7283_vm4, %v7376_v10, %v7258_v25  ;;  %v6815_v28 = vrot.slane %v6814_v51, 1  ;;  %v6835_v31 = vmax.f32 %v6833_v47, %v6834_v59  ;;  %v11964_v25 = vld [vmem:[#allocation9 + $0x340] ss:$8 sps:$4 sm:$0xff]   ;;  %v12020_v47 = vld [vmem:[#allocation9 + $0x254] ss:$8 sps:$4 sm:$0xff]  }
 0x43f   : > { %v6822_v14 = vrot.slane %v6821_v41, 1  ;;  %v6829_v37 = vrot.slane %v6828_v45, 1  ;;  %8504 = vmatpush1.bf16.msra.mxu0 %v11952_v16  ;;  %v7509_v0 = vrot.slane %v7507_v53, 1  ;;  %v15602_v57 = vshll.u32 %v15592_v34, 16  ;;  %v11976_v53 = vld [vmem:[#allocation9 + $0x320] ss:$8 sps:$4 sm:$0xff]  }
 0x440   : > { %v6816_v3 = vmax.f32 %v6814_v51, %v6815_v28  ;;  %v6836_v42 = vrot.slane %v6835_v31, 1  ;;  %8505 = vmatprep.subr.bf16.mxu0 %v11960_v20  ;;  %v7498_v38 = vor.u32 %v7497_v23, %v7493_v17  ;;  %v15605_v13 = vshll.u32 %v15588_v58, 16  ;;  %v12027_v28 = vld [vmem:[#allocation9 + $0x244] ss:$8 sps:$4 sm:$0xff]  }
 0x441   : > { %v6823_v61 = vmax.f32 %v6821_v41, %v6822_v14  ;;  %v6830_v62 = vmax.f32 %v6828_v45, %v6829_v37  ;;  %v7510_v15 = vor.u32 %v7509_v0, %v7505_v44  ;;  %v7514_v52 = vrot.slane %v15602_v57, 1  ;;  %v12018_v41 = vld [vmem:[#allocation9 + $0x250] ss:$8 sps:$4 sm:$0xff]   ;;  %v11984_v37 = vld [vmem:[#allocation9 + $0x314] ss:$8 sps:$4 sm:$0xff]  }
 0x442   : > { %v6837_v46 = vmax.f32 %v6835_v31, %v6836_v42  ;;  %v6909_v24 = vadd.f32 %v15315_v12, %v6816_v3  ;;  %7972 = vmatmul.mubr.bf16.gmra.mxu0 %v15588_v58  ;;  %v7502_v30 = vrot.slane %v15605_v13, 1  ;;  %v15612_v26 = vshrl.u32 %v15592_v34, 16  ;;  %v8562_v42 = vld [vmem:[#allocation3 + $0x20] sm:$0xcc] }
 0x443   : > { %v6910_v21 = vadd.f32 %v15319_v36, %v6823_v61  ;;  %v6911_v18 = vadd.f32 %v15315_v12, %v6830_v62  ;;  %8506 = vmatpush1.bf16.msra.mxu0 %v11958_v35  ;;  %v7515_v4 = vsel %vm742_vm8, %v7510_v15, %v7514_v52  ;;  %v15627_v12 = vcombine.high %v15619_v9, %v15571_v56  ;;  %v12025_v61 = vld [vmem:[#allocation9 + $0x240] ss:$8 sps:$4 sm:$0xff]  }
 0x444   : > { %v6912_v39 = vadd.f32 %v15319_v36, %v6837_v46  ;;  %v6973_v43 = vmax.f32 %v6909_v24, 0.0  ;;  %8507 = vmatprep.subr.bf16.mxu0 %v11966_v48  ;;  %7728 = vmatprep.mubr.bf16.mxu1 %v7515_v4  ;;  %v7503_v1 = vsel %vm742_vm8, %v7498_v38, %v7502_v30  ;;  %v8315_v27 = vrot.slane %v15612_v26, 1  ;;  %v11982_v24 = vld [vmem:[#allocation9 + $0x310] ss:$8 sps:$4 sm:$0xff]  }
 0x445   : > { %v6974_v32 = vmax.f32 %v6910_v21, 0.0  ;;  %v6975_v8 = vmax.f32 %v6911_v18, 0.0  ;;  %7729 = vmatmul.mubr.bf16.vlgmr.msra.gmra.mxu1 %v7503_v1  ;;  %v8316_v33 = vrot.slane %v15602_v57, 2  ;;  %v8308_v11 = vshrl.u32 %v15627_v12, 16  ;;  %v11990_v21 = vld [vmem:[#allocation9 + $0x304] ss:$8 sps:$4 sm:$0xff]  }
 0x446   : > { %v6976_v36 = vmax.f32 %v6912_v39, 0.0  ;;  %8196 = vmatpush1.bf16.msra.mxu1 %v12003_v50  ;;  %v8311_v17 = vshll.u32 %v15627_v12, 16  ;;  %v11045_v62 = vcombine.low %v8562_v42, %v15571_v56  ;;  %v11046_v15 = vcombine.high %v8562_v42, %v15571_v56 }
 0x447   : > { %v11260_v6 = vpack.c.bf16 %v6974_v32, %v6973_v43  ;;  %8508 = vmatpush1.bf16.msra.mxu0 %v11964_v25  ;;  %8197 = vmatprep.subr.bf16.mxu1 %v12013_v2  ;;  %v8310_v16 = vrot.slane %v8308_v11, 1  ;;  %v15633_v44 = vor.u32 %v8316_v33, %v8315_v27  ;;  %v8895_v50 = vrot.slane %v15612_v26, 2  ;;  %v12031_v43 = vld [vmem:[#allocation9 + $0x230] ss:$8 sps:$4 sm:$0xff]   ;;  %v11988_v27 = vld [vmem:[#allocation9 + $0x300] ss:$8 sps:$4 sm:$0xff]  }
 0x448   : > { %v11261_v40 = vpack.c.bf16 %v6976_v36, %v6975_v8  ;;  %8509 = vmatprep.subr.bf16.mxu0 %v11972_v54  ;;  %v8313_v5 = vrot.slane %v8311_v17, 2  ;;  %v8888_v18 = vshrl.u32 %v11046_v15, 16  ;;  %v8891_v25 = vshll.u32 %v11046_v15, 16  ;;  %v12039_v33 = vld [vmem:[#allocation9 + $0x224] ss:$8 sps:$4 sm:$0xff]  }
 0x449   : > { %v7261_v49 = vunpack.c.l.b16 %v11260_v6  ;;  %v7262_v10 = vunpack.c.h.b16 %v11260_v6  ;;  %v8896_v4 = vrot.slane %v15602_v57, 3  ;;  %v8604_v2 = vrot.slane %v11046_v15, 2 }
 0x44a   : > { %v7263_v51 = vunpack.c.l.b16 %v11261_v40  ;;  %v7264_v59 = vunpack.c.h.b16 %v11261_v40  ;;  %v8314_v20 = vor.u32 %v8313_v5, %v8310_v16  ;;  %8198 = vmatpush1.bf16.msra.mxu1 %v12011_v55  ;;  %v8605_v39 = vrot.slane %v15592_v34, 2  ;;  %v11996_v55 = vld [vmem:[#allocation9 + $0x3f4] ss:$8 sps:$4 sm:$0xff]   ;;  %v12037_v5 = vld [vmem:[#allocation9 + $0x220] ss:$8 sps:$4 sm:$0xff]  }
 0x44b   : > { %v7372_v45 = vrot.slane %v7261_v49, 6  ;;  %v7378_v23 = vrot.slane %v7262_v10, 6  ;;  %8510 = vmatpush1.bf16.msra.mxu0 %v11970_v19  ;;  %8199 = vmatprep.subr.bf16.mxu1 %v12020_v47  ;;  %v8890_v54 = vrot.slane %v8888_v18, 2  ;;  %v8893_v1 = vrot.slane %v8891_v25, 3 }
 0x44c   : > { %v7374_v31 = vrot.slane %v7263_v51, 5  ;;  %v7380_v14 = vrot.slane %v7264_v59, 5  ;;  %8511 = vmatprep.subr.bf16.mxu0 %v11978_v7  ;;  %v8318_v35 = vsel %vm2506_vm10, %v8314_v20, %v15633_v44  ;;  %v15651_v32 = vor.u32 %v8896_v4, %v8895_v50  ;;  %v9142_v51 = vld [vmem:[#allocation3 + $0x20] sm:$0x88]  ;;  %v12010_v50 = vld [vmem:[#allocation9 + $0x3d4] ss:$8 sps:$4 sm:$0xff]  }
 0x44d   : > { %v7373_v0 = vsel %vm7286_vm5, %v7372_v45, %v15596_v29  ;;  %v7379_v3 = vsel %vm7286_vm5, %v7378_v23, %v15599_v63  ;;  %8533 = vmatprep.mubr.bf16.mxu0 %v8318_v35  ;;  %v15646_v29 = vshrl.u32 %v15588_v58, 16  ;;  %v12033_v63 = vld [vmem:[#allocation9 + $0x234] ss:$8 sps:$4 sm:$0xff]   ;;  %v8876_v8 = vshrl.u32 %v11045_v62, 16 }
 0x44e   : > { %v7375_v48 = vsel %vm7289_vm6, %v7374_v31, %v7373_v0  ;;  %v7381_v38 = vsel %vm7289_vm6, %v7380_v14, %v7379_v3  ;;  %8200 = vmatpush1.bf16.msra.mxu1 %v12018_v41  ;;  %v15656_v36 = vsel %vm3183_vm11, %v8604_v2, %v8605_v39  ;;  %v8879_v11 = vshll.u32 %v11045_v62, 16  ;;  %v11994_v41 = vld [vmem:[#allocation9 + $0x3f0] ss:$8 sps:$4 sm:$0xff]   ;;  %v12045_v45 = vld [vmem:[#allocation9 + $0x214] ss:$8 sps:$4 sm:$0xff]  }
 0x44f   : > { %v7386_v46 = vpack.c.b16 %v7381_v38, %v7375_v48  ;;  %8512 = vmatpush1.bf16.msra.mxu0 %v11976_v53  ;;  %8201 = vmatprep.subr.bf16.mxu1 %v12027_v28  ;;  %v8883_v17 = vrot.slane %v15646_v29, 2  ;;  %v8894_v6 = vor.u32 %v8893_v1, %v8890_v54  ;;  %v8878_v19 = vrot.slane %v8876_v8, 2  ;;  %v12002_v28 = vld [vmem:[#allocation9 + $0x3e4] ss:$8 sps:$4 sm:$0xff]   ;;  %v12000_v48 = vld [vmem:[#allocation9 + $0x3e0] ss:$8 sps:$4 sm:$0xff]  }
 0x450   : > { %8513 = vmatprep.subr.bf16.mxu0 %v11984_v37  ;;  %v8884_v47 = vrot.slane %v15605_v13, 3  ;;  %v8881_v40 = vrot.slane %v8879_v11, 3  ;;  %v9475_v7 = vrot.slane %v15612_v26, 3  ;;  %v9476_v16 = vrot.slane %v15602_v57, 4  ;;  %v12043_v38 = vld [vmem:[#allocation9 + $0x210] ss:$8 sps:$4 sm:$0xff]  }
 0x451   : > { %7396 = vst [vmem:[#allocation3] sm:$0x33] %v7386_v46  ;;  %v15664_v49 = vsel %vm3776_vm12, %v8894_v6, %v15651_v32  ;;  %v8601_v59 = vrot.slane %v11045_v62, 2  ;;  %v8602_v20 = vrot.slane %v15588_v58, 2  ;;  %v15670_v23 = vcombine.high %v9142_v51, %v15571_v56  ;;  %v12049_v8 = vld [vmem:[#allocation9 + $0x200] ss:$8 sps:$4 sm:$0xff]  }
 0x452   : > { %8202 = vmatpush1.bf16.msra.mxu1 %v12025_v61  ;;  %v15666_v10 = vor.u32 %v8884_v47, %v8883_v17  ;;  %v15672_v53 = vor.u32 %v9476_v16, %v9475_v7  ;;  %v8882_v14 = vor.u32 %v8881_v40, %v8878_v19  ;;  %v11182_v35 = vcombine.high %v15571_v56, %v15584_v22  ;;  %v12008_v57 = vld [vmem:[#allocation9 + $0x3d0] ss:$8 sps:$4 sm:$0xff]   ;;  %v12016_v11 = vld [vmem:[#allocation9 + $0x3c4] ss:$8 sps:$4 sm:$0xff]   ;;  %v12014_v19 = vld [vmem:[#allocation9 + $0x3c0] ss:$8 sps:$4 sm:$0xff]  }
 0x453   : > { %8514 = vmatpush1.bf16.msra.mxu0 %v11982_v24  ;;  %8203 = vmatprep.subr.bf16.mxu1 %v12033_v63  ;;  %v15677_v37 = vsel %vm3183_vm11, %v8601_v59, %v8602_v20  ;;  %v11181_v0 = vcombine.low %v15571_v56, %v15584_v22  ;;  %v12051_v24 = vld [vmem:[#allocation9 + $0x204] ss:$8 sps:$4 sm:$0xff]   ;;  %v9468_v63 = vshrl.u32 %v15670_v23, 16  ;;  %v7518_v18 = vor.u32 %v15646_v29, %v7502_v30  ;;  %v12058_v30 = vld [vmem:[#allocation9 + $0x2f4] ss:$8 sps:$4 sm:$0xff]  }
 0x454   : > { %8515 = vmatprep.subr.bf16.mxu0 %v11990_v21  ;;  %v15689_v62 = vsel %vm3776_vm12, %v8882_v14, %v15666_v10  ;;  %v7526_v21 = vor.u32 %v15612_v26, %v7514_v52  ;;  %v8025_v25 = vrot.slane %v15592_v34, 1  ;;  %v9471_v54 = vshll.u32 %v15670_v23, 16  ;;  %v12056_v47 = vld [vmem:[#allocation9 + $0x2f0] ss:$8 sps:$4 sm:$0xff]   ;;  %v12065_v40 = vld [vmem:[#allocation9 + $0x2e4] ss:$8 sps:$4 sm:$0xff]  }
 0x455   : > { %v8024_v1 = vrot.slane %v15627_v12, 1  ;;  %v11113_v17 = vcombine.low %v9142_v51, %v15571_v56  ;;  %v12024_v59 = vld [vmem:[#allocation9 + $0x3b4] ss:$8 sps:$4 sm:$0xff]  }
 0x456   : > { %8204 = vmatpush1.bf16.msra.mxu1 %v12031_v43 }
 0x457   : > { %8516 = vmatpush1.bf16.msra.mxu0 %v11988_v27  ;;  %8205 = vmatprep.subr.bf16.mxu1 %v12039_v33  ;;  %v9470_v33 = vrot.slane %v9468_v63, 3  ;;  %v8026_v12 = vsel %vm1176_vm2, %v8024_v1, %v8025_v25  ;;  %v12073_v63 = vld [vmem:[#allocation9 + $0x2d4] ss:$8 sps:$4 sm:$0xff]  }
 0x458   : > { %8517 = vmatprep.subr.bf16.mxu0 %v11996_v55  ;;  %v7437_v31 = vld [vmem:[#allocation3] sm:$0x11]  ;;  %v9473_v55 = vrot.slane %v9471_v54, 4 }
 0x459   : > { %v15683_v3 = vcombine.high %v7437_v31, %v7437_v31  ;;  %v15685_v42 = vcombine.low %v7437_v31, %v7437_v31  ;;  %v8256_v61 = vld [vmem:[#allocation3] sm:$0x33] }
 0x45a   : > { %8206 = vmatpush1.bf16.msra.mxu1 %v12037_v5  ;;  %v15701_v43 = vcombine.high %v8256_v61, %v8256_v61  ;;  %v15707_v27 = vcombine.low %v8256_v61, %v8256_v61  ;;  %v8836_v7 = vld [vmem:[#allocation3] sm:$0x77]  ;;  %v9474_v16 = vor.u32 %v9473_v55, %v9470_v33  ;;  %v15755_v33 = vcombine.low %v15619_v9, %v15571_v56  ;;  %v12036_v55 = vld [vmem:[#allocation9 + $0x394] ss:$8 sps:$4 sm:$0xff]  }
 0x45b   : > { %8518 = vmatpush2.bf16.msra.mxu0 %v11994_v41  ;;  %v7528_v15 = vshll.u32 %v15683_v3, 16  ;;  %v7520_v46 = vshll.u32 %v15685_v42, 16  ;;  %8207 = vmatprep.subr.bf16.mxu1 %v12045_v45  ;;  %v9184_v41 = vrot.slane %v15670_v23, 3  ;;  %v9185_v45 = vrot.slane %v15592_v34, 3  ;;  %v12063_v61 = vld [vmem:[#allocation9 + $0x2e0] ss:$8 sps:$4 sm:$0xff]  }
 0x45c   : > { %8519 = vmatprep.subr.bf16.mxu0 %v12002_v28  ;;  %v8609_v6 = vrot.slane %v15701_v43, 2  ;;  %v8607_v51 = vrot.slane %v15707_v27, 2  ;;  %v9456_v28 = vshrl.u32 %v11113_v17, 16  ;;  %v15724_v31 = vsel %vm5046_vm14, %v9474_v16, %v15672_v53  ;;  %v12088_v34 = vld [vmem:[#allocation9 + $0x514] ss:$8 sps:$4 sm:$0xff]  }
 0x45d   : > { %v7530_v4 = vrot.slane %v7528_v15, 1  ;;  %v7522_v2 = vrot.slane %v7520_v46, 1  ;;  %v15734_v23 = vcombine.high %v8836_v7, %v8836_v7  ;;  %v15737_v15 = vsel %vm4453_vm13, %v9184_v41, %v9185_v45 }
 0x45e   : > { %8208 = vmatpush1.bf16.msra.mxu1 %v12043_v38  ;;  %v15717_v5 = vsel %vm3183_vm11, %v8605_v39, %v8609_v6  ;;  %v15729_v14 = vsel %vm3183_vm11, %v8602_v20, %v8607_v51  ;;  %v9459_v39 = vshll.u32 %v11113_v17, 16  ;;  %v15732_v38 = vld [vmem:[#allocation3] sm:$0xff]  ;;  %v9458_v46 = vrot.slane %v9456_v28, 3 }
 0x45f   : > { %8520 = vmatpush2.bf16.msra.mxu0 %v12000_v48  ;;  %v7531_v52 = vsel %vm742_vm8, %v7526_v21, %v7530_v4  ;;  %v7523_v26 = vsel %vm742_vm8, %v7518_v18, %v7522_v2  ;;  %8209 = vmatprep.subr.bf16.mxu1 %v12051_v24  ;;  %v9463_v48 = vrot.slane %v15646_v29, 3  ;;  %v12022_v24 = vld [vmem:[#allocation9 + $0x3b0] ss:$8 sps:$4 sm:$0xff]   ;;  %v9464_v20 = vrot.slane %v15605_v13, 4  ;;  %v12030_v21 = vld [vmem:[#allocation9 + $0x3a4] ss:$8 sps:$4 sm:$0xff]  }
 0x460   : > { %8521 = vmatprep.subr.bf16.mxu0 %v12010_v50  ;;  %7738 = vmatprep.mubr.bf16.mxu1 %v7531_v52  ;;  %v9461_v50 = vrot.slane %v9459_v39, 4  ;;  %v9181_v18 = vrot.slane %v11113_v17, 3  ;;  %v9182_v4 = vrot.slane %v15588_v58, 3  ;;  %v11184_v2 = vcombine.high %v15575_v60, %v15732_v38  ;;  %v12071_v52 = vld [vmem:[#allocation9 + $0x2d0] ss:$8 sps:$4 sm:$0xff]  }
 0x461   : > { %7739 = vmatmul.mubr.bf16.gmra.mxu1 %v7523_v26  ;;  %v11183_v54 = vcombine.low %v15575_v60, %v15732_v38  ;;  %v15745_v1 = vcombine.low %v8836_v7, %v8836_v7  ;;  %v12079_v17 = vld [vmem:[#allocation9 + $0x2c4] ss:$8 sps:$4 sm:$0xff]   ;;  %v8332_v9 = vshll.u32 %v15701_v43, 16  ;;  %v12034_v7 = vld [vmem:[#allocation9 + $0x390] ss:$8 sps:$4 sm:$0xff]   ;;  %v8296_v16 = vshrl.u32 %v15755_v33, 16 }
 0x462   : > { %8227 = vmatprep.mubr.bf16.mxu1 %v8026_v12  ;;  %8210 = vmatpush1.bf16.msra.mxu1 %v12049_v8  ;;  %v9462_v8 = vor.u32 %v9461_v50, %v9458_v46  ;;  %v15750_v26 = vsel %vm4453_vm13, %v9181_v18, %v9182_v4  ;;  %v8299_v51 = vshll.u32 %v15755_v33, 16  ;;  %v8303_v28 = vrot.slane %v15646_v29, 1  ;;  %v12040_v46 = vld [vmem:[#allocation9 + $0x380] ss:$8 sps:$4 sm:$0xff]   ;;  %v12091_v50 = vld [vmem:[#allocation9 + $0x2a4] ss:$8 sps:$4 sm:$0xff]  }
 0x463   : > { %8522 = vmatpush2.bf16.msra.mxu0 %v12008_v57  ;;  %8211 = vmatprep.subr.bf16.mxu1 %v12058_v30  ;;  %v15747_v57 = vor.u32 %v9464_v20, %v9463_v48  ;;  %v9189_v30 = vrot.slane %v15734_v23, 3  ;;  %v8304_v39 = vrot.slane %v15605_v13, 2  ;;  %v8334_v48 = vrot.slane %v8332_v9, 2  ;;  %v12048_v20 = vld [vmem:[#allocation9 + $0x574] ss:$8 sps:$4 sm:$0xff]  }
 0x464   : > { %8523 = vmatprep.subr.bf16.mxu0 %v12016_v11  ;;  %v12028_v11 = vld [vmem:[#allocation9 + $0x3a0] ss:$8 sps:$4 sm:$0xff]   ;;  %v8320_v18 = vshrl.u32 %v15707_v27, 16 }
 0x465   : > { %v15759_v12 = vsel %vm5046_vm14, %v9462_v8, %v15747_v57  ;;  %v15762_v6 = vsel %vm4453_vm13, %v9185_v45, %v9189_v30  ;;  %v12042_v45 = vld [vmem:[#allocation9 + $0x384] ss:$8 sps:$4 sm:$0xff]   ;;  %v12089_v13 = vld [vmem:[#allocation9 + $0x2a0] ss:$8 sps:$4 sm:$0xff]  }
 0x466   : > { %8212 = vmatpush2.bf16.msra.mxu1 %v12056_v47  ;;  %v8329_v47 = vshrl.u32 %v15701_v43, 16  ;;  %v12055_v30 = vld [vmem:[#allocation9 + $0x564] ss:$8 sps:$4 sm:$0xff]   ;;  %v12053_v9 = vld [vmem:[#allocation9 + $0x560] ss:$8 sps:$4 sm:$0xff]  }
 0x467   : > { %8524 = vmatpush2.bf16.msra.mxu0 %v12014_v19  ;;  %8213 = vmatprep.subr.bf16.mxu1 %v12065_v40  ;;  %v9187_v19 = vrot.slane %v15745_v1, 3  ;;  %v12077_v40 = vld [vmem:[#allocation9 + $0x2c0] ss:$8 sps:$4 sm:$0xff]  }
 0x468   : > { %8525 = vmatprep.subr.bf16.mxu0 %v12024_v59  ;;  %v12085_v59 = vld [vmem:[#allocation9 + $0x2b4] ss:$8 sps:$4 sm:$0xff]   ;;  %v8331_v43 = vrot.slane %v8329_v47, 1 }
 0x469   : > { %v15770_v41 = vsel %vm4453_vm13, %v9182_v4, %v9187_v19  ;;  %v8323_v4 = vshll.u32 %v15707_v27, 16  ;;  %v12095_v27 = vld [vmem:[#allocation9 + $0x290] ss:$8 sps:$4 sm:$0xff]  }
 0x46a   : > { %8214 = vmatpush2.bf16.msra.mxu1 %v12063_v61  ;;  %v12083_v61 = vld [vmem:[#allocation9 + $0x2b0] ss:$8 sps:$4 sm:$0xff]   ;;  %v8335_v29 = vor.u32 %v8334_v48, %v8331_v43  ;;  %v8029_v43 = vrot.slane %v15683_v3, 1  ;;  %v8021_v48 = vrot.slane %v15755_v33, 1  ;;  %v12113_v3 = vld [vmem:[#allocation9 + $0x460] ss:$8 sps:$4 sm:$0xff]  }
 0x46b   : > { %8526 = vmatpush2.bf16.msra.mxu0 %v12022_v24  ;;  %8215 = vmatprep.subr.bf16.mxu1 %v12073_v63  ;;  %v8298_v24 = vrot.slane %v8296_v16, 1  ;;  %v8301_v63 = vrot.slane %v8299_v51, 2  ;;  %v8325_v19 = vrot.slane %v8323_v4, 2  ;;  %v12101_v51 = vld [vmem:[#allocation9 + $0x280] ss:$8 sps:$4 sm:$0xff]  }
 0x46c   : > { %8527 = vmatprep.subr.bf16.mxu0 %v12030_v21  ;;  %v8305_v21 = vor.u32 %v8304_v39, %v8303_v28  ;;  %v8336_v47 = vsel %vm2506_vm10, %v15633_v44, %v8335_v29  ;;  %v8022_v28 = vrot.slane %v15588_v58, 1  ;;  %v12109_v44 = vld [vmem:[#allocation9 + $0x474] ss:$8 sps:$4 sm:$0xff]   ;;  %v8030_v58 = vsel %vm1176_vm2, %v8025_v25, %v8029_v43  ;;  %v12074_v33 = vld [vmem:[#allocation9 + $0x530] ss:$8 sps:$4 sm:$0xff]  }
 0x46d   : > { %v8302_v8 = vor.u32 %v8301_v63, %v8298_v24  ;;  %v12115_v24 = vld [vmem:[#allocation9 + $0x464] ss:$8 sps:$4 sm:$0xff]   ;;  %v12076_v63 = vld [vmem:[#allocation9 + $0x534] ss:$8 sps:$4 sm:$0xff]   ;;  %v12080_v4 = vld [vmem:[#allocation9 + $0x520] ss:$8 sps:$4 sm:$0xff]  }
 0x46e   : > { %8216 = vmatpush2.bf16.msra.mxu1 %v12071_v52  ;;  %v12046_v52 = vld [vmem:[#allocation9 + $0x570] ss:$8 sps:$4 sm:$0xff]   ;;  %v12127_v29 = vld [vmem:[#allocation9 + $0x444] ss:$8 sps:$4 sm:$0xff]  }
 0x46f   : > { %8528 = vmatpush2.bf16.msra.mxu0 %v12028_v11  ;;  %8217 = vmatprep.subr.bf16.mxu1 %v12079_v17  ;;  %v12097_v11 = vld [vmem:[#allocation9 + $0x294] ss:$8 sps:$4 sm:$0xff]   ;;  %v8306_v17 = vsel %vm2506_vm10, %v8302_v8, %v8305_v21  ;;  %v12086_v8 = vld [vmem:[#allocation9 + $0x510] ss:$8 sps:$4 sm:$0xff]   ;;  %v12165_v43 = vld [vmem:[#allocation9 + $0x4e4] ss:$8 sps:$4 sm:$0xff]  }
 0x470   : > { %8529 = vmatprep.subr.bf16.mxu0 %v12036_v55  ;;  %v8322_v55 = vrot.slane %v8320_v18, 1  ;;  %v12119_v18 = vld [vmem:[#allocation9 + $0x450] ss:$8 sps:$4 sm:$0xff]  }
 0x472   : > { %8218 = vmatpush2.bf16.msra.mxu1 %v12077_v40  ;;  %v12103_v40 = vld [vmem:[#allocation9 + $0x284] ss:$8 sps:$4 sm:$0xff]   ;;  %v8326_v16 = vor.u32 %v8325_v19, %v8322_v55  ;;  %v12100_v55 = vld [vmem:[#allocation9 + $0x5f4] ss:$8 sps:$4 sm:$0xff]   ;;  %v12137_v19 = vld [vmem:[#allocation9 + $0x420] ss:$8 sps:$4 sm:$0xff]  }
 0x473   : > { %8530 = vmatpush2.bf16.msra.mxu0 %v12034_v7  ;;  %8219 = vmatprep.subr.bf16.mxu1 %v12085_v59  ;;  %v12062_v7 = vld [vmem:[#allocation9 + $0x554] ss:$8 sps:$4 sm:$0xff]   ;;  %v12060_v59 = vld [vmem:[#allocation9 + $0x550] ss:$8 sps:$4 sm:$0xff]  }
 0x474   : > { %8531 = vmatprep.subr.bf16.mxu0 %v12042_v45  ;;  %v12070_v45 = vld [vmem:[#allocation9 + $0x544] ss:$8 sps:$4 sm:$0xff]   ;;  %v8327_v39 = vsel %vm2506_vm10, %v8305_v21, %v8326_v16  ;;  %v8027_v21 = vrot.slane %v15685_v42, 1  ;;  %v12112_v16 = vld [vmem:[#allocation9 + $0x5d4] ss:$8 sps:$4 sm:$0xff]  }
 0x475   : > { %v12094_v42 = vld [vmem:[#allocation9 + $0x504] ss:$8 sps:$4 sm:$0xff]  }
 0x476   : > { %8220 = vmatpush2.bf16.msra.mxu1 %v12083_v61  ;;  %v12107_v61 = vld [vmem:[#allocation9 + $0x470] ss:$8 sps:$4 sm:$0xff]   ;;  %v8028_v25 = vsel %vm1176_vm2, %v8022_v28, %v8027_v21  ;;  %v12177_v21 = vld [vmem:[#allocation9 + $0x4c0] ss:$8 sps:$4 sm:$0xff]  }
 0x477   : > { %8532 = vmatpush2.bf16.msra.mxu0 %v12040_v46  ;;  %8221 = vmatprep.subr.bf16.mxu1 %v12091_v50  ;;  %v12068_v46 = vld [vmem:[#allocation9 + $0x540] ss:$8 sps:$4 sm:$0xff]   ;;  %v8023_v50 = vsel %vm1176_vm2, %v8021_v48, %v8022_v28  ;;  %v12118_v28 = vld [vmem:[#allocation9 + $0x5c4] ss:$8 sps:$4 sm:$0xff]   ;;  %v12124_v48 = vld [vmem:[#allocation9 + $0x5b4] ss:$8 sps:$4 sm:$0xff]  }
 0x478   : > { %9081 = vmatprep.subr.bf16.mxu0 %v12048_v20  ;;  %v12121_v20 = vld [vmem:[#allocation9 + $0x454] ss:$8 sps:$4 sm:$0xff]  }
 0x47a   : > { %8534 = vmatmul.mubr.bf16.vlgmr.msra.gmra.mxu0 %v8306_v17  ;;  %8222 = vmatpush2.bf16.msra.mxu1 %v12089_v13  ;;  %v12125_v13 = vld [vmem:[#allocation9 + $0x440] ss:$8 sps:$4 sm:$0xff]   ;;  %v12139_v17 = vld [vmem:[#allocation9 + $0x424] ss:$8 sps:$4 sm:$0xff]  }
 0x47b   : > { %8543 = vmatprep.mubr.bf16.mxu0 %v8336_v47  ;;  %9082 = vmatpush1.bf16.msra.mxu0 %v12046_v52  ;;  %v12133_v52 = vld [vmem:[#allocation9 + $0x434] ss:$8 sps:$4 sm:$0xff]   ;;  %v12098_v47 = vld [vmem:[#allocation9 + $0x5f0] ss:$8 sps:$4 sm:$0xff]  }
 0x47c   : > { %9083 = vmatprep.subr.bf16.mxu0 %v12055_v30  ;;  %8223 = vmatprep.subr.bf16.mxu1 %v12097_v11  ;;  %v12131_v30 = vld [vmem:[#allocation9 + $0x430] ss:$8 sps:$4 sm:$0xff]   ;;  %v12092_v11 = vld [vmem:[#allocation9 + $0x500] ss:$8 sps:$4 sm:$0xff]  }
 0x47e   : > { %8224 = vmatpush2.bf16.msra.mxu1 %v12095_v27  ;;  %v12106_v27 = vld [vmem:[#allocation9 + $0x5e4] ss:$8 sps:$4 sm:$0xff]  }
 0x47f   : > { %9084 = vmatpush1.bf16.msra.mxu0 %v12053_v9  ;;  %8225 = vmatprep.subr.bf16.mxu1 %v12103_v40  ;;  %v12143_v9 = vld [vmem:[#allocation9 + $0x410] ss:$8 sps:$4 sm:$0xff]   ;;  %v12104_v40 = vld [vmem:[#allocation9 + $0x5e0] ss:$8 sps:$4 sm:$0xff]  }
 0x480   : > { %9085 = vmatprep.subr.bf16.mxu0 %v12062_v7  ;;  %v12151_v7 = vld [vmem:[#allocation9 + $0x404] ss:$8 sps:$4 sm:$0xff]  }
 0x482   : > { %8544 = vmatmul.mubr.bf16.gmra.mxu0 %v8327_v39  ;;  %8226 = vmatpush2.bf16.msra.mxu1 %v12101_v51  ;;  %v12149_v51 = vld [vmem:[#allocation9 + $0x400] ss:$8 sps:$4 sm:$0xff]  }
 0x483   : > { %9086 = vmatpush1.bf16.msra.mxu0 %v12060_v59  ;;  %9113 = vmatprep.mubr.bf16.mxu0 %v15664_v49  ;;  %v12082_v49 = vld [vmem:[#allocation9 + $0x524] ss:$8 sps:$4 sm:$0xff]   ;;  %v12110_v59 = vld [vmem:[#allocation9 + $0x5d0] ss:$8 sps:$4 sm:$0xff]   ;;  %v12116_v39 = vld [vmem:[#allocation9 + $0x5c0] ss:$8 sps:$4 sm:$0xff]  }
 0x484   : > { %9087 = vmatprep.subr.bf16.mxu0 %v12070_v45  ;;  %8775 = vmatprep.subr.bf16.mxu1 %v12109_v44  ;;  %v12158_v45 = vld [vmem:[#allocation9 + $0x4f4] ss:$8 sps:$4 sm:$0xff]   ;;  %v12156_v44 = vld [vmem:[#allocation9 + $0x4f0] ss:$8 sps:$4 sm:$0xff]  }
 0x485   : > { %8228 = vmatmul.mubr.bf16.vlgmr.msra.gmra.mxu1 %v8023_v50  ;;  %v12171_v50 = vld [vmem:[#allocation9 + $0x4d0] ss:$8 sps:$4 sm:$0xff]  }
 0x486   : > { %8237 = vmatprep.mubr.bf16.mxu1 %v8030_v58  ;;  %8776 = vmatpush1.bf16.msra.mxu1 %v12107_v61  ;;  %v12163_v61 = vld [vmem:[#allocation9 + $0x4e0] ss:$8 sps:$4 sm:$0xff]  }
 0x487   : > { %9088 = vmatpush1.bf16.msra.mxu0 %v12068_v46  ;;  %8777 = vmatprep.subr.bf16.mxu1 %v12115_v24  ;;  %v12122_v46 = vld [vmem:[#allocation9 + $0x5b0] ss:$8 sps:$4 sm:$0xff]   ;;  %v12173_v24 = vld [vmem:[#allocation9 + $0x4d4] ss:$8 sps:$4 sm:$0xff]   ;;  %v12128_v58 = vld [vmem:[#allocation9 + $0x5a0] ss:$8 sps:$4 sm:$0xff]  }
 0x488   : > { %9089 = vmatprep.subr.bf16.mxu0 %v12076_v63  ;;  %v12130_v63 = vld [vmem:[#allocation9 + $0x5a4] ss:$8 sps:$4 sm:$0xff]  }
 0x48a   : > { %8778 = vmatpush1.bf16.msra.mxu1 %v12113_v3  ;;  %v12179_v3 = vld [vmem:[#allocation9 + $0x4c4] ss:$8 sps:$4 sm:$0xff]  }
 0x48b   : > { %9090 = vmatpush1.bf16.msra.mxu0 %v12074_v33  ;;  %8779 = vmatprep.subr.bf16.mxu1 %v12121_v20  ;;  %v12136_v33 = vld [vmem:[#allocation9 + $0x594] ss:$8 sps:$4 sm:$0xff]   ;;  %v8909_v20 = vshrl.u32 %v15734_v23, 16 }
 0x48c   : > { %9091 = vmatprep.subr.bf16.mxu0 %v12082_v49  ;;  %v8912_v49 = vshll.u32 %v15734_v23, 16  ;;  %v8900_v23 = vshrl.u32 %v15745_v1, 16 }
 0x48d   : > { %8238 = vmatmul.mubr.bf16.gmra.mxu1 %v8028_v25 }
 0x48e   : > { %8780 = vmatpush1.bf16.msra.mxu1 %v12119_v18  ;;  %8807 = vmatprep.mubr.bf16.mxu1 %v15656_v36  ;;  %v12145_v36 = vld [vmem:[#allocation9 + $0x414] ss:$8 sps:$4 sm:$0xff]   ;;  %v12134_v18 = vld [vmem:[#allocation9 + $0x590] ss:$8 sps:$4 sm:$0xff]   ;;  %v8914_v25 = vrot.slane %v8912_v49, 3 }
 0x48f   : > { %9092 = vmatpush1.bf16.msra.mxu0 %v12080_v4  ;;  %8781 = vmatprep.subr.bf16.mxu1 %v12127_v29  ;;  %v12185_v4 = vld [vmem:[#allocation9 + $0x4b4] ss:$8 sps:$4 sm:$0xff]   ;;  %v12142_v29 = vld [vmem:[#allocation9 + $0x584] ss:$8 sps:$4 sm:$0xff]   ;;  %v12192_v49 = vld [vmem:[#allocation9 + $0x700] ss:$8 sps:$4 sm:$0xff]  }
 0x490   : > { %9093 = vmatprep.subr.bf16.mxu0 %v12088_v34  ;;  %v8911_v34 = vrot.slane %v8909_v20, 2  ;;  %v12231_v20 = vld [vmem:[#allocation9 + $0x630] ss:$8 sps:$4 sm:$0xff]  }
 0x492   : > { %8782 = vmatpush1.bf16.msra.mxu1 %v12125_v13  ;;  %v12183_v13 = vld [vmem:[#allocation9 + $0x4b0] ss:$8 sps:$4 sm:$0xff]  }
 0x493   : > { %9094 = vmatpush1.bf16.msra.mxu0 %v12086_v8  ;;  %8783 = vmatprep.subr.bf16.mxu1 %v12133_v52  ;;  %v12140_v8 = vld [vmem:[#allocation9 + $0x580] ss:$8 sps:$4 sm:$0xff]   ;;  %v12191_v52 = vld [vmem:[#allocation9 + $0x4a4] ss:$8 sps:$4 sm:$0xff]  }
 0x494   : > { %9095 = vmatprep.subr.bf16.mxu0 %v12094_v42  ;;  %v12148_v42 = vld [vmem:[#allocation9 + $0x774] ss:$8 sps:$4 sm:$0xff]  }
 0x496   : > { %8784 = vmatpush1.bf16.msra.mxu1 %v12131_v30  ;;  %v8903_v30 = vshll.u32 %v15745_v1, 16  ;;  %v12153_v1 = vld [vmem:[#allocation9 + $0x760] ss:$8 sps:$4 sm:$0xff]  }
 0x497   : > { %9096 = vmatpush1.bf16.msra.mxu0 %v12092_v11  ;;  %8785 = vmatprep.subr.bf16.mxu1 %v12139_v17  ;;  %v8915_v11 = vor.u32 %v8914_v25, %v8911_v34  ;;  %v12189_v17 = vld [vmem:[#allocation9 + $0x4a0] ss:$8 sps:$4 sm:$0xff]   ;;  %v12243_v34 = vld [vmem:[#allocation9 + $0x610] ss:$8 sps:$4 sm:$0xff]  }
 0x498   : > { %9097 = vmatprep.subr.bf16.mxu0 %v12100_v55  ;;  %v12146_v55 = vld [vmem:[#allocation9 + $0x770] ss:$8 sps:$4 sm:$0xff]   ;;  %v12204_v25 = vld [vmem:[#allocation9 + $0x7e0] ss:$8 sps:$4 sm:$0xff]  }
 0x49a   : > { %8786 = vmatpush1.bf16.msra.mxu1 %v12137_v19  ;;  %v12155_v19 = vld [vmem:[#allocation9 + $0x764] ss:$8 sps:$4 sm:$0xff]  }
 0x49b   : > { %9098 = vmatpush2.bf16.msra.mxu0 %v12098_v47  ;;  %8787 = vmatprep.subr.bf16.mxu1 %v12145_v36  ;;  %v12197_v47 = vld [vmem:[#allocation9 + $0x494] ss:$8 sps:$4 sm:$0xff]   ;;  %v8902_v36 = vrot.slane %v8900_v23, 2 }
 0x49c   : > { %9099 = vmatprep.subr.bf16.mxu0 %v12106_v27  ;;  %v8905_v27 = vrot.slane %v8903_v30, 3  ;;  %v12252_v23 = vld [vmem:[#allocation9 + $0x6f4] ss:$8 sps:$4 sm:$0xff]   ;;  %v12218_v30 = vld [vmem:[#allocation9 + $0x7c4] ss:$8 sps:$4 sm:$0xff]  }
 0x49e   : > { %8788 = vmatpush1.bf16.msra.mxu1 %v12143_v9  ;;  %v8916_v9 = vsel %vm3776_vm12, %v15651_v32, %v8915_v11  ;;  %v12250_v11 = vld [vmem:[#allocation9 + $0x6f0] ss:$8 sps:$4 sm:$0xff]  }
 0x49f   : > { %9100 = vmatpush2.bf16.msra.mxu0 %v12104_v40  ;;  %8789 = vmatprep.subr.bf16.mxu1 %v12151_v7  ;;  %v12195_v40 = vld [vmem:[#allocation9 + $0x490] ss:$8 sps:$4 sm:$0xff]   ;;  %v12203_v7 = vld [vmem:[#allocation9 + $0x484] ss:$8 sps:$4 sm:$0xff]  }
 0x4a0   : > { %9101 = vmatprep.subr.bf16.mxu0 %v12112_v16  ;;  %v12162_v16 = vld [vmem:[#allocation9 + $0x754] ss:$8 sps:$4 sm:$0xff]  }
 0x4a2   : > { %8790 = vmatpush1.bf16.msra.mxu1 %v12149_v51  ;;  %v8906_v51 = vor.u32 %v8905_v27, %v8902_v36  ;;  %v12222_v36 = vld [vmem:[#allocation9 + $0x7b0] ss:$8 sps:$4 sm:$0xff]   ;;  %v12259_v27 = vld [vmem:[#allocation9 + $0x6d4] ss:$8 sps:$4 sm:$0xff]  }
 0x4a3   : > { %9102 = vmatpush2.bf16.msra.mxu0 %v12110_v59  ;;  %8791 = vmatprep.subr.bf16.mxu1 %v12158_v45  ;;  %v12201_v59 = vld [vmem:[#allocation9 + $0x480] ss:$8 sps:$4 sm:$0xff]   ;;  %v12160_v45 = vld [vmem:[#allocation9 + $0x750] ss:$8 sps:$4 sm:$0xff]  }
 0x4a4   : > { %9103 = vmatprep.subr.bf16.mxu0 %v12118_v28  ;;  %v12209_v28 = vld [vmem:[#allocation9 + $0x674] ss:$8 sps:$4 sm:$0xff]   ;;  %v8907_v32 = vsel %vm3776_vm12, %v15666_v10, %v8906_v51 }
 0x4a5   : > { %v12221_v10 = vld [vmem:[#allocation9 + $0x654] ss:$8 sps:$4 sm:$0xff]  }
 0x4a6   : > { %8792 = vmatpush2.bf16.msra.mxu1 %v12156_v44  ;;  %v12207_v44 = vld [vmem:[#allocation9 + $0x670] ss:$8 sps:$4 sm:$0xff]   ;;  %v12236_v51 = vld [vmem:[#allocation9 + $0x794] ss:$8 sps:$4 sm:$0xff]  }
 0x4a7   : > { %9104 = vmatpush2.bf16.msra.mxu0 %v12116_v39  ;;  %8793 = vmatprep.subr.bf16.mxu1 %v12165_v43  ;;  %v12168_v39 = vld [vmem:[#allocation9 + $0x740] ss:$8 sps:$4 sm:$0xff]   ;;  %v12215_v43 = vld [vmem:[#allocation9 + $0x664] ss:$8 sps:$4 sm:$0xff]  }
 0x4a8   : > { %9105 = vmatprep.subr.bf16.mxu0 %v12124_v48  ;;  %v12176_v48 = vld [vmem:[#allocation9 + $0x734] ss:$8 sps:$4 sm:$0xff]  }
 0x4aa   : > { %8794 = vmatpush2.bf16.msra.mxu1 %v12163_v61  ;;  %v12213_v61 = vld [vmem:[#allocation9 + $0x660] ss:$8 sps:$4 sm:$0xff]  }
 0x4ab   : > { %9106 = vmatpush2.bf16.msra.mxu0 %v12122_v46  ;;  %8795 = vmatprep.subr.bf16.mxu1 %v12173_v24  ;;  %v12174_v46 = vld [vmem:[#allocation9 + $0x730] ss:$8 sps:$4 sm:$0xff]   ;;  %v12182_v24 = vld [vmem:[#allocation9 + $0x724] ss:$8 sps:$4 sm:$0xff]  }
 0x4ac   : > { %9107 = vmatprep.subr.bf16.mxu0 %v12130_v63  ;;  %v12219_v63 = vld [vmem:[#allocation9 + $0x650] ss:$8 sps:$4 sm:$0xff]  }
 0x4ae   : > { %8796 = vmatpush2.bf16.msra.mxu1 %v12171_v50  ;;  %v12227_v50 = vld [vmem:[#allocation9 + $0x644] ss:$8 sps:$4 sm:$0xff]  }
 0x4af   : > { %9108 = vmatpush2.bf16.msra.mxu0 %v12128_v58  ;;  %8797 = vmatprep.subr.bf16.mxu1 %v12179_v3  ;;  %v12188_v58 = vld [vmem:[#allocation9 + $0x714] ss:$8 sps:$4 sm:$0xff]  }
 0x4b0   : > { %9109 = vmatprep.subr.bf16.mxu0 %v12136_v33  ;;  %v12233_v3 = vld [vmem:[#allocation9 + $0x634] ss:$8 sps:$4 sm:$0xff]   ;;  %v12194_v33 = vld [vmem:[#allocation9 + $0x704] ss:$8 sps:$4 sm:$0xff]  }
 0x4b2   : > { %8798 = vmatpush2.bf16.msra.mxu1 %v12177_v21  ;;  %v12239_v21 = vld [vmem:[#allocation9 + $0x624] ss:$8 sps:$4 sm:$0xff]  }
 0x4b3   : > { %9110 = vmatpush2.bf16.msra.mxu0 %v12134_v18  ;;  %8799 = vmatprep.subr.bf16.mxu1 %v12185_v4  ;;  %v12200_v18 = vld [vmem:[#allocation9 + $0x7f4] ss:$8 sps:$4 sm:$0xff]   ;;  %v12198_v4 = vld [vmem:[#allocation9 + $0x7f0] ss:$8 sps:$4 sm:$0xff]  }
 0x4b4   : > { %9111 = vmatprep.subr.bf16.mxu0 %v12142_v29  ;;  %v12206_v29 = vld [vmem:[#allocation9 + $0x7e4] ss:$8 sps:$4 sm:$0xff]  }
 0x4b6   : > { %8800 = vmatpush2.bf16.msra.mxu1 %v12183_v13  ;;  %v12248_v13 = vld [vmem:[#allocation9 + $0x604] ss:$8 sps:$4 sm:$0xff]  }
 0x4b7   : > { %9112 = vmatpush2.bf16.msra.mxu0 %v12140_v8  ;;  %8801 = vmatprep.subr.bf16.mxu1 %v12191_v52  ;;  %v12212_v8 = vld [vmem:[#allocation9 + $0x7d4] ss:$8 sps:$4 sm:$0xff]   ;;  %v12246_v52 = vld [vmem:[#allocation9 + $0x600] ss:$8 sps:$4 sm:$0xff]  }
 0x4b8   : > { %9661 = vmatprep.subr.bf16.mxu0 %v12148_v42  ;;  %v12210_v42 = vld [vmem:[#allocation9 + $0x7d0] ss:$8 sps:$4 sm:$0xff]  }
 0x4ba   : > { %9114 = vmatmul.mubr.bf16.vlgmr.msra.gmra.mxu0 %v15689_v62  ;;  %8802 = vmatpush2.bf16.msra.mxu1 %v12189_v17  ;;  %v12170_v62 = vld [vmem:[#allocation9 + $0x744] ss:$8 sps:$4 sm:$0xff]   ;;  %v12216_v17 = vld [vmem:[#allocation9 + $0x7c0] ss:$8 sps:$4 sm:$0xff]  }
 0x4bb   : > { %9123 = vmatprep.mubr.bf16.mxu0 %v8916_v9  ;;  %9662 = vmatpush1.bf16.msra.mxu0 %v12146_v55  ;;  %v12256_v55 = vld [vmem:[#allocation9 + $0x6e4] ss:$8 sps:$4 sm:$0xff]  }
 0x4bc   : > { %9663 = vmatprep.subr.bf16.mxu0 %v12155_v19  ;;  %8803 = vmatprep.subr.bf16.mxu1 %v12197_v47  ;;  %v12224_v19 = vld [vmem:[#allocation9 + $0x7b4] ss:$8 sps:$4 sm:$0xff]   ;;  %v12254_v47 = vld [vmem:[#allocation9 + $0x6e0] ss:$8 sps:$4 sm:$0xff]   ;;  %v12230_v9 = vld [vmem:[#allocation9 + $0x7a4] ss:$8 sps:$4 sm:$0xff]  }
 0x4be   : > { %8804 = vmatpush2.bf16.msra.mxu1 %v12195_v40  ;;  %v11148_v40 = vcombine.high %v15732_v38, %v15732_v38 }
 0x4bf   : > { %9664 = vmatpush1.bf16.msra.mxu0 %v12153_v1  ;;  %8805 = vmatprep.subr.bf16.mxu1 %v12203_v7  ;;  %v12257_v1 = vld [vmem:[#allocation9 + $0x6d0] ss:$8 sps:$4 sm:$0xff]   ;;  %v12228_v7 = vld [vmem:[#allocation9 + $0x7a0] ss:$8 sps:$4 sm:$0xff]  }
 0x4c0   : > { %9665 = vmatprep.subr.bf16.mxu0 %v12162_v16  ;;  %v12262_v16 = vld [vmem:[#allocation9 + $0x6c4] ss:$8 sps:$4 sm:$0xff]  }
 0x4c2   : > { %9124 = vmatmul.mubr.bf16.gmra.mxu0 %v8907_v32  ;;  %8806 = vmatpush2.bf16.msra.mxu1 %v12201_v59  ;;  %v9489_v59 = vshrl.u32 %v11148_v40, 16  ;;  %v12265_v32 = vld [vmem:[#allocation9 + $0x6b4] ss:$8 sps:$4 sm:$0xff]  }
 0x4c3   : > { %9666 = vmatpush1.bf16.msra.mxu0 %v12160_v45  ;;  %9693 = vmatprep.mubr.bf16.mxu0 %v15724_v31  ;;  %v12180_v31 = vld [vmem:[#allocation9 + $0x720] ss:$8 sps:$4 sm:$0xff]   ;;  %v9492_v45 = vshll.u32 %v11148_v40, 16 }
 0x4c4   : > { %9667 = vmatprep.subr.bf16.mxu0 %v12170_v62  ;;  %9355 = vmatprep.subr.bf16.mxu1 %v12209_v28  ;;  %v12260_v62 = vld [vmem:[#allocation9 + $0x6c0] ss:$8 sps:$4 sm:$0xff]   ;;  %v12234_v28 = vld [vmem:[#allocation9 + $0x790] ss:$8 sps:$4 sm:$0xff]  }
 0x4c5   : > { %8808 = vmatmul.mubr.bf16.vlgmr.msra.gmra.mxu1 %v15677_v37  ;;  %v12225_v37 = vld [vmem:[#allocation9 + $0x640] ss:$8 sps:$4 sm:$0xff]  }
 0x4c6   : > { %8817 = vmatprep.mubr.bf16.mxu1 %v15717_v5  ;;  %9356 = vmatpush1.bf16.msra.mxu1 %v12207_v44  ;;  %v12186_v5 = vld [vmem:[#allocation9 + $0x710] ss:$8 sps:$4 sm:$0xff]   ;;  %v12242_v44 = vld [vmem:[#allocation9 + $0x784] ss:$8 sps:$4 sm:$0xff]   ;;  %v12315_v40 = vld [vmem:[#allocation9 + $0x8a0] ss:$8 sps:$4 sm:$0xff]  }
 0x4c7   : > { %9668 = vmatpush1.bf16.msra.mxu0 %v12168_v39  ;;  %9357 = vmatprep.subr.bf16.mxu1 %v12215_v43  ;;  %v11147_v39 = vcombine.low %v15732_v38, %v15732_v38  ;;  %v9491_v43 = vrot.slane %v9489_v59, 3 }
 0x4c8   : > { %9669 = vmatprep.subr.bf16.mxu0 %v12176_v48  ;;  %v9494_v48 = vrot.slane %v9492_v45, 4 }
 0x4ca   : > { %9358 = vmatpush1.bf16.msra.mxu1 %v12213_v61  ;;  %v12263_v61 = vld [vmem:[#allocation9 + $0x6b0] ss:$8 sps:$4 sm:$0xff]  }
 0x4cb   : > { %9670 = vmatpush1.bf16.msra.mxu0 %v12174_v46  ;;  %9359 = vmatprep.subr.bf16.mxu1 %v12221_v10  ;;  %v12240_v46 = vld [vmem:[#allocation9 + $0x780] ss:$8 sps:$4 sm:$0xff]   ;;  %v12268_v10 = vld [vmem:[#allocation9 + $0x6a4] ss:$8 sps:$4 sm:$0xff]  }
 0x4cc   : > { %9671 = vmatprep.subr.bf16.mxu0 %v12182_v24  ;;  %v9480_v24 = vshrl.u32 %v11147_v39, 16 }
 0x4cd   : > { %8818 = vmatmul.mubr.bf16.gmra.mxu1 %v15729_v14  ;;  %v12237_v14 = vld [vmem:[#allocation9 + $0x620] ss:$8 sps:$4 sm:$0xff]  }
 0x4ce   : > { %9360 = vmatpush1.bf16.msra.mxu1 %v12219_v63  ;;  %9387 = vmatprep.mubr.bf16.mxu1 %v15737_v15  ;;  %v12245_v15 = vld [vmem:[#allocation9 + $0x614] ss:$8 sps:$4 sm:$0xff]   ;;  %v9483_v63 = vshll.u32 %v11147_v39, 16 }
 0x4cf   : > { %9672 = vmatpush1.bf16.msra.mxu0 %v12180_v31  ;;  %9361 = vmatprep.subr.bf16.mxu1 %v12227_v50  ;;  %v9495_v31 = vor.u32 %v9494_v48, %v9491_v43  ;;  %v12266_v50 = vld [vmem:[#allocation9 + $0x6a0] ss:$8 sps:$4 sm:$0xff]  }
 0x4d0   : > { %9673 = vmatprep.subr.bf16.mxu0 %v12188_v58  ;;  %v12271_v58 = vld [vmem:[#allocation9 + $0x694] ss:$8 sps:$4 sm:$0xff]  }
 0x4d2   : > { %9362 = vmatpush1.bf16.msra.mxu1 %v12225_v37  ;;  %v9482_v37 = vrot.slane %v9480_v24, 3 }
 0x4d3   : > { %9674 = vmatpush1.bf16.msra.mxu0 %v12186_v5  ;;  %9363 = vmatprep.subr.bf16.mxu1 %v12233_v3  ;;  %v9485_v5 = vrot.slane %v9483_v63, 4  ;;  %v9496_v3 = vsel %vm5046_vm14, %v15672_v53, %v9495_v31  ;;  %v12278_v53 = vld [vmem:[#allocation9 + $0x860] ss:$8 sps:$4 sm:$0xff]  }
 0x4d4   : > { %9675 = vmatprep.subr.bf16.mxu0 %v12194_v33  ;;  %v12269_v33 = vld [vmem:[#allocation9 + $0x690] ss:$8 sps:$4 sm:$0xff]  }
 0x4d6   : > { %9364 = vmatpush1.bf16.msra.mxu1 %v12231_v20  ;;  %v12274_v20 = vld [vmem:[#allocation9 + $0x684] ss:$8 sps:$4 sm:$0xff]  }
 0x4d7   : > { %9676 = vmatpush1.bf16.msra.mxu0 %v12192_v49  ;;  %9365 = vmatprep.subr.bf16.mxu1 %v12239_v21  ;;  %v9486_v49 = vor.u32 %v9485_v5, %v9482_v37  ;;  %v12272_v21 = vld [vmem:[#allocation9 + $0x680] ss:$8 sps:$4 sm:$0xff]  }
 0x4d8   : > { %9677 = vmatprep.subr.bf16.mxu0 %v12200_v18  ;;  %v12277_v18 = vld [vmem:[#allocation9 + $0x874] ss:$8 sps:$4 sm:$0xff]  }
 0x4da   : > { %9366 = vmatpush1.bf16.msra.mxu1 %v12237_v14  ;;  %v9487_v14 = vsel %vm5046_vm14, %v15747_v57, %v9486_v49  ;;  %v12285_v57 = vld [vmem:[#allocation9 + $0x840] ss:$8 sps:$4 sm:$0xff]  }
 0x4db   : > { %9678 = vmatpush2.bf16.msra.mxu0 %v12198_v4  ;;  %9367 = vmatprep.subr.bf16.mxu1 %v12245_v15  ;;  %v12275_v4 = vld [vmem:[#allocation9 + $0x870] ss:$8 sps:$4 sm:$0xff]   ;;  %v12283_v15 = vld [vmem:[#allocation9 + $0x854] ss:$8 sps:$4 sm:$0xff]  }
 0x4dc   : > { %9679 = vmatprep.subr.bf16.mxu0 %v12206_v29  ;;  %v12281_v29 = vld [vmem:[#allocation9 + $0x850] ss:$8 sps:$4 sm:$0xff]  }
 0x4de   : > { %9368 = vmatpush1.bf16.msra.mxu1 %v12243_v34  ;;  %v12287_v34 = vld [vmem:[#allocation9 + $0x844] ss:$8 sps:$4 sm:$0xff]  }
 0x4df   : > { %9680 = vmatpush2.bf16.msra.mxu0 %v12204_v25  ;;  %9369 = vmatprep.subr.bf16.mxu1 %v12248_v13  ;;  %v12293_v25 = vld [vmem:[#allocation9 + $0x824] ss:$8 sps:$4 sm:$0xff]   ;;  %v12291_v13 = vld [vmem:[#allocation9 + $0x820] ss:$8 sps:$4 sm:$0xff]  }
 0x4e0   : > { %9681 = vmatprep.subr.bf16.mxu0 %v12212_v8  ;;  %v12296_v8 = vld [vmem:[#allocation9 + $0x814] ss:$8 sps:$4 sm:$0xff]  }
 0x4e2   : > { %9370 = vmatpush1.bf16.msra.mxu1 %v12246_v52  ;;  %v12294_v52 = vld [vmem:[#allocation9 + $0x810] ss:$8 sps:$4 sm:$0xff]  }
 0x4e3   : > { %9682 = vmatpush2.bf16.msra.mxu0 %v12210_v42  ;;  %9371 = vmatprep.subr.bf16.mxu1 %v12252_v23  ;;  %v12297_v42 = vld [vmem:[#allocation9 + $0x800] ss:$8 sps:$4 sm:$0xff]   ;;  %v12302_v23 = vld [vmem:[#allocation9 + $0x8f4] ss:$8 sps:$4 sm:$0xff]  }
 0x4e4   : > { %9683 = vmatprep.subr.bf16.mxu0 %v12218_v30  ;;  %v12305_v30 = vld [vmem:[#allocation9 + $0x8e4] ss:$8 sps:$4 sm:$0xff]  }
 0x4e6   : > { %9372 = vmatpush2.bf16.msra.mxu1 %v12250_v11  ;;  %v12303_v11 = vld [vmem:[#allocation9 + $0x8e0] ss:$8 sps:$4 sm:$0xff]  }
 0x4e7   : > { %9684 = vmatpush2.bf16.msra.mxu0 %v12216_v17  ;;  %9373 = vmatprep.subr.bf16.mxu1 %v12256_v55  ;;  %v12308_v17 = vld [vmem:[#allocation9 + $0x8d4] ss:$8 sps:$4 sm:$0xff]   ;;  %v12306_v55 = vld [vmem:[#allocation9 + $0x8d0] ss:$8 sps:$4 sm:$0xff]  }
 0x4e8   : > { %9685 = vmatprep.subr.bf16.mxu0 %v12224_v19  ;;  %v12311_v19 = vld [vmem:[#allocation9 + $0x8c4] ss:$8 sps:$4 sm:$0xff]  }
 0x4ea   : > { %9374 = vmatpush2.bf16.msra.mxu1 %v12254_v47  ;;  %v12309_v47 = vld [vmem:[#allocation9 + $0x8c0] ss:$8 sps:$4 sm:$0xff]  }
 0x4eb   : > { %9686 = vmatpush2.bf16.msra.mxu0 %v12222_v36  ;;  %9375 = vmatprep.subr.bf16.mxu1 %v12259_v27  ;;  %v12314_v36 = vld [vmem:[#allocation9 + $0x8b4] ss:$8 sps:$4 sm:$0xff]   ;;  %v12312_v27 = vld [vmem:[#allocation9 + $0x8b0] ss:$8 sps:$4 sm:$0xff]  }
 0x4ec   : > { %9687 = vmatprep.subr.bf16.mxu0 %v12230_v9  ;;  %v12317_v9 = vld [vmem:[#allocation9 + $0x8a4] ss:$8 sps:$4 sm:$0xff]  }
 0x4ee   : > { %9376 = vmatpush2.bf16.msra.mxu1 %v12257_v1  ;;  %v12320_v1 = vld [vmem:[#allocation9 + $0x894] ss:$8 sps:$4 sm:$0xff]  }
 0x4ef   : > { %9688 = vmatpush2.bf16.msra.mxu0 %v12228_v7  ;;  %9377 = vmatprep.subr.bf16.mxu1 %v12262_v16  ;;  %v12318_v7 = vld [vmem:[#allocation9 + $0x890] ss:$8 sps:$4 sm:$0xff]   ;;  %v12323_v16 = vld [vmem:[#allocation9 + $0x884] ss:$8 sps:$4 sm:$0xff]  }
 0x4f0   : > { %9689 = vmatprep.subr.bf16.mxu0 %v12236_v51  ;;  %v12321_v51 = vld [vmem:[#allocation9 + $0x880] ss:$8 sps:$4 sm:$0xff]  }
 0x4f2   : > { %9378 = vmatpush2.bf16.msra.mxu1 %v12260_v62 }
 0x4f3   : > { %9690 = vmatpush2.bf16.msra.mxu0 %v12234_v28  ;;  %9379 = vmatprep.subr.bf16.mxu1 %v12265_v32 }
 0x4f4   : > { %9691 = vmatprep.subr.bf16.mxu0 %v12242_v44 }
 0x4f6   : > { %9380 = vmatpush2.bf16.msra.mxu1 %v12263_v61 }
 0x4f7   : > { %9692 = vmatpush2.bf16.msra.mxu0 %v12240_v46  ;;  %9381 = vmatprep.subr.bf16.mxu1 %v12268_v10 }
 0x4fa   : > { %9694 = vmatmul.mubr.bf16.vlgmr.msra.gmra.mxu0 %v15759_v12  ;;  %9382 = vmatpush2.bf16.msra.mxu1 %v12266_v50  ;;  %v12280_v12 = vld [vmem:[#allocation9 + $0x864] ss:$8 sps:$4 sm:$0xff]   ;;  %v7963_v39 = vpop.f32.mrf.mxu0 }
 0x4fb   : > { %9703 = vmatprep.mubr.bf16.mxu0 %v9496_v3  ;;  %9383 = vmatprep.subr.bf16.mxu1 %v12271_v58 }
 0x4fc   : > { %v7965_v48 = vpop.f32.mrf.mxu0 }
 0x4fe   : > { %9384 = vmatpush2.bf16.msra.mxu1 %v12269_v33  ;;  %v7967_v22 = vpop.f32.mrf.mxu0 }
 0x4ff   : > { %9385 = vmatprep.subr.bf16.mxu1 %v12274_v20 }
 0x500   : > { %v7969_v46 = vpop.f32.mrf.mxu0 }
 0x502   : > { %9704 = vmatmul.mubr.bf16.gmra.mxu0 %v9487_v14  ;;  %9386 = vmatpush2.bf16.msra.mxu1 %v12272_v21  ;;  %v7973_v10 = vpop.f32.mrf.mxu0 }
 0x503   : > { %9923 = vmatprep.subr.bf16.mxu1 %v12277_v18 }
 0x504   : > { %v7975_v24 = vpop.f32.mrf.mxu0 }
 0x505   : > { %9388 = vmatmul.mubr.bf16.vlgmr.msra.gmra.mxu1 %v15750_v26  ;;  %v12290_v26 = vld [vmem:[#allocation9 + $0x834] ss:$8 sps:$4 sm:$0xff]   ;;  %v7730_v59 = vpop.f32.mrf.mxu1 }
 0x506   : > { %9397 = vmatprep.mubr.bf16.mxu1 %v15762_v6  ;;  %9924 = vmatpush1.bf16.msra.mxu1 %v12275_v4  ;;  %v12288_v6 = vld [vmem:[#allocation9 + $0x830] ss:$8 sps:$4 sm:$0xff]   ;;  %v7977_v60 = vpop.f32.mrf.mxu0 }
 0x507   : > { %9925 = vmatprep.subr.bf16.mxu1 %v12280_v12  ;;  %v7732_v45 = vpop.f32.mrf.mxu1 }
 0x509   : > { %v7734_v62 = vpop.f32.mrf.mxu1 }
 0x50a   : > { %9926 = vmatpush1.bf16.msra.mxu1 %v12278_v53 }
 0x50b   : > { %9927 = vmatprep.subr.bf16.mxu1 %v12283_v15  ;;  %v7736_v28 = vpop.f32.mrf.mxu1 }
 0x50d   : > { %9398 = vmatmul.mubr.bf16.gmra.mxu1 %v15770_v41  ;;  %v12299_v41 = vld [vmem:[#allocation9 + $0x804] ss:$8 sps:$4 sm:$0xff]  }
 0x50e   : > { %9928 = vmatpush1.bf16.msra.mxu1 %v12281_v29  ;;  %9955 = vmatprep.mubr.bf16.mxu1 %v11182_v35  ;;  %v12300_v35 = vld [vmem:[#allocation9 + $0x8f0] ss:$8 sps:$4 sm:$0xff]  }
 0x50f   : > { %9929 = vmatprep.subr.bf16.mxu1 %v12287_v34 }
 0x512   : > { %9930 = vmatpush1.bf16.msra.mxu1 %v12285_v57 }
 0x513   : > { %9931 = vmatprep.subr.bf16.mxu1 %v12290_v26 }
 0x516   : > { %9932 = vmatpush1.bf16.msra.mxu1 %v12288_v6 }
 0x517   : > { %9933 = vmatprep.subr.bf16.mxu1 %v12293_v25 }
 0x51a   : > { %9934 = vmatpush1.bf16.msra.mxu1 %v12291_v13 }
 0x51b   : > { %9935 = vmatprep.subr.bf16.mxu1 %v12296_v8 }
 0x51e   : > { %9936 = vmatpush1.bf16.msra.mxu1 %v12294_v52 }
 0x51f   : > { %9937 = vmatprep.subr.bf16.mxu1 %v12299_v41 }
 0x521   : > { %v7740_v32 = vpop.f32.mrf.mxu1 }
 0x522   : > { %9938 = vmatpush1.bf16.msra.mxu1 %v12297_v42 }
 0x523   : > { %9939 = vmatprep.subr.bf16.mxu1 %v12302_v23  ;;  %v7742_v44 = vpop.f32.mrf.mxu1 }
 0x525   : > { %v7744_v43 = vpop.f32.mrf.mxu1 }
 0x526   : > { %9940 = vmatpush2.bf16.msra.mxu1 %v12300_v35 }
 0x527   : > { %9941 = vmatprep.subr.bf16.mxu1 %v12305_v30  ;;  %v7746_v61 = vpop.f32.mrf.mxu1  ;;  %v7964_v30 = vadd.f32 %v7963_v39, %v7730_v59  ;;  %v7976_v59 = vadd.f32 %v7975_v24, %v7742_v44 }
 0x52a   : > { %9942 = vmatpush2.bf16.msra.mxu1 %v12303_v11  ;;  %v7966_v11 = vadd.f32 %v7965_v48, %v7732_v45 }
 0x52b   : > { %9943 = vmatprep.subr.bf16.mxu1 %v12308_v17 }
 0x52e   : > { %9944 = vmatpush2.bf16.msra.mxu1 %v12306_v55 }
 0x52f   : > { %9945 = vmatprep.subr.bf16.mxu1 %v12311_v19 }
 0x532   : > { %9946 = vmatpush2.bf16.msra.mxu1 %v12309_v47 }
 0x533   : > { %9947 = vmatprep.subr.bf16.mxu1 %v12314_v36  ;;  %v7968_v36 = vadd.f32 %v7967_v22, %v7734_v62 }
 0x536   : > { %9948 = vmatpush2.bf16.msra.mxu1 %v12312_v27  ;;  %v7970_v27 = vadd.f32 %v7969_v46, %v7736_v28 }
 0x537   : > { %9949 = vmatprep.subr.bf16.mxu1 %v12317_v9 }
 0x53a   : > { %9950 = vmatpush2.bf16.msra.mxu1 %v12315_v40 }
 0x53b   : > { %9951 = vmatprep.subr.bf16.mxu1 %v12320_v1  ;;  %v7974_v1 = vadd.f32 %v7973_v10, %v7740_v32 }
 0x53e   : > { %9952 = vmatpush2.bf16.msra.mxu1 %v12318_v7 }
 0x53f   : > { %9953 = vmatprep.subr.bf16.mxu1 %v12323_v16 }
 0x542   : > { %9954 = vmatpush2.bf16.msra.mxu1 %v12321_v51 }
 0x545   : > { %9956 = vmatmul.mubr.bf16.vlgmr.msra.gmra.mxu1 %v11181_v0  ;;  %v8229_v56 = vpop.f32.mrf.mxu1 }
 0x546   : > { %9965 = vmatprep.mubr.bf16.mxu1 %v11184_v2  ;;  %v8248_v17 = vadd.f32 %v8229_v56, %v7964_v30  ;;  %v7978_v30 = vadd.f32 %v7977_v60, %v7744_v43 }
 0x547   : > { %v8231_v0 = vpop.f32.mrf.mxu1 }
 0x548   : > { %v8249_v55 = vadd.f32 %v8231_v0, %v7966_v11 }
 0x549   : > { %v8233_v2 = vpop.f32.mrf.mxu1 }
 0x54a   : > { %v8250_v7 = vadd.f32 %v8233_v2, %v7968_v36 }
 0x54b   : > { %v8235_v63 = vpop.f32.mrf.mxu1 }
 0x54c   : > { %v8251_v16 = vadd.f32 %v8235_v63, %v7970_v27 }
 0x54d   : > { %9966 = vmatmul.mubr.bf16.gmra.mxu1 %v11183_v54  ;;  %v8239_v38 = vpop.f32.mrf.mxu1  ;;  %v7979_v54 = vpop.f32.mrf.mxu0 }
 0x54e   : > { %v7980_v56 = vadd.f32 %v7979_v54, %v7746_v61  ;;  %v8252_v0 = vadd.f32 %v8239_v38, %v7974_v1 }
 0x54f   : > { %v8241_v31 = vpop.f32.mrf.mxu1  ;;  %v8535_v50 = vpop.f32.mrf.mxu0 }
 0x550   : > { %v8554_v9 = vadd.f32 %v8535_v50, %v8248_v17  ;;  %v8253_v22 = vadd.f32 %v8241_v31, %v7976_v59 }
 0x551   : > { %v8243_v58 = vpop.f32.mrf.mxu1  ;;  %v8537_v37 = vpop.f32.mrf.mxu0 }
 0x552   : > { %v8555_v40 = vadd.f32 %v8537_v37, %v8249_v55  ;;  %v8254_v62 = vadd.f32 %v8243_v58, %v7978_v30 }
 0x553   : > { %v8245_v5 = vpop.f32.mrf.mxu1  ;;  %v8539_v3 = vpop.f32.mrf.mxu0 }
 0x554   : > { %v8255_v28 = vadd.f32 %v8245_v5, %v7980_v56  ;;  %v8556_v46 = vadd.f32 %v8539_v3, %v8250_v7 }
 0x555   : > { %v8541_v20 = vpop.f32.mrf.mxu0 }
 0x556   : > { %v8557_v17 = vadd.f32 %v8541_v20, %v8251_v16 }
 0x557   : > { %v8545_v21 = vpop.f32.mrf.mxu0 }
 0x558   : > { %v8558_v2 = vadd.f32 %v8545_v21, %v8252_v0 }
 0x559   : > { %v8547_v14 = vpop.f32.mrf.mxu0 }
 0x55a   : > { %v8559_v36 = vadd.f32 %v8547_v14, %v8253_v22 }
 0x55b   : > { %v8549_v12 = vpop.f32.mrf.mxu0 }
 0x55c   : > { %v8560_v43 = vadd.f32 %v8549_v12, %v8254_v62 }
 0x55d   : > { %v8551_v15 = vpop.f32.mrf.mxu0 }
 0x55e   : > { %v8561_v61 = vadd.f32 %v8551_v15, %v8255_v28 }
 0x57a   : > { %v9115_v34 = vpop.f32.mrf.mxu0 }
 0x57c   : > { %v9117_v26 = vpop.f32.mrf.mxu0 }
 0x57e   : > { %v9119_v25 = vpop.f32.mrf.mxu0 }
 0x580   : > { %v9121_v8 = vpop.f32.mrf.mxu0 }
 0x582   : > { %v9125_v41 = vpop.f32.mrf.mxu0 }
 0x584   : > { %v9127_v23 = vpop.f32.mrf.mxu0 }
 0x585   : > { %v8809_v33 = vpop.f32.mrf.mxu1 }
 0x586   : > { %v9129_v19 = vpop.f32.mrf.mxu0  ;;  %v8828_v45 = vadd.f32 %v8809_v33, %v8554_v9 }
 0x587   : > { %v8811_v49 = vpop.f32.mrf.mxu1 }
 0x588   : > { %v9131_v51 = vpop.f32.mrf.mxu0  ;;  %v8829_v48 = vadd.f32 %v8811_v49, %v8555_v40  ;;  %v9134_v37 = vadd.f32 %v9115_v34, %v8828_v45 }
 0x589   : > { %v8813_v18 = vpop.f32.mrf.mxu1 }
 0x58a   : > { %v9135_v55 = vadd.f32 %v9117_v26, %v8829_v48  ;;  %v8830_v32 = vadd.f32 %v8813_v18, %v8556_v46  ;;  %v518_v18 = vld [vmem:[#allocation10] sm:$0x3] }
 0x58b   : > { %v8815_v4 = vpop.f32.mrf.mxu1 }
 0x58c   : > { %v8831_v10 = vadd.f32 %v8815_v4, %v8557_v17  ;;  %v9136_v5 = vadd.f32 %v9119_v25, %v8830_v32 }
 0x58d   : > { %v8819_v53 = vpop.f32.mrf.mxu1 }
 0x58e   : > { %v8832_v33 = vadd.f32 %v8819_v53, %v8558_v2  ;;  %v9137_v3 = vadd.f32 %v9121_v8, %v8831_v10 }
 0x58f   : > { %v8821_v29 = vpop.f32.mrf.mxu1 }
 0x590   : > { %v8833_v38 = vadd.f32 %v8821_v29, %v8559_v36  ;;  %v9138_v14 = vadd.f32 %v9125_v41, %v8832_v33 }
 0x591   : > { %v8823_v57 = vpop.f32.mrf.mxu1 }
 0x592   : > { %v8834_v54 = vadd.f32 %v8823_v57, %v8560_v43  ;;  %v16475_v57 = vld [vmem:[#allocation31_spill] sm:$0xff] }
 0x593   : > { %v8825_v6 = vpop.f32.mrf.mxu1  ;;  %v16477_v41 = vsub.s32 1, %v16475_v57 }
 0x594   : > { %v8835_v31 = vadd.f32 %v8825_v6, %v8561_v61  ;;  %v9140_v27 = vadd.f32 %v9129_v19, %v8834_v54  ;;  %v16476_v6 = vsub.s32 0, %v16475_v57 }
 0x596   : > { %v15831_v29 = vadd.f32 %v9131_v51, %v8835_v31  ;;  %v15835_v25 = vrot.slane %v518_v18, %v16476_v6 }
 0x5ba   : > { %v9695_v11 = vpop.f32.mrf.mxu0 }
 0x5bc   : > { %v9697_v63 = vpop.f32.mrf.mxu0 }
 0x5be   : > { %v9699_v58 = vpop.f32.mrf.mxu0 }
 0x5c0   : > { %v9701_v15 = vpop.f32.mrf.mxu0 }
 0x5c2   : > { %v9705_v48 = vpop.f32.mrf.mxu0 }
 0x5c5   : > { %v9389_v13 = vpop.f32.mrf.mxu1 }
 0x5c6   : > { %v9408_v44 = vadd.f32 %v9389_v13, %v9134_v37  ;;  %v9139_v13 = vadd.f32 %v9127_v23, %v8833_v38  ;;  %v15839_v23 = vrot.slane %v518_v18, %v16477_v41 }
 0x5c7   : > { %v9391_v52 = vpop.f32.mrf.mxu1 }
 0x5c8   : > { %v9409_v24 = vadd.f32 %v9391_v52, %v9135_v55  ;;  %v9714_v49 = vadd.f32 %v9695_v11, %v9408_v44 }
 0x5c9   : > { %v9393_v42 = vpop.f32.mrf.mxu1 }
 0x5ca   : > { %v9715_v4 = vadd.f32 %v9697_v63, %v9409_v24  ;;  %v9410_v21 = vadd.f32 %v9393_v42, %v9136_v5 }
 0x5cb   : > { %v9395_v35 = vpop.f32.mrf.mxu1 }
 0x5cc   : > { %v9411_v34 = vadd.f32 %v9395_v35, %v9137_v3  ;;  %v9716_v7 = vadd.f32 %v9699_v58, %v9410_v21  ;;  %v9707_v3 = vpop.f32.mrf.mxu0 }
 0x5cd   : > { %v9399_v47 = vpop.f32.mrf.mxu1 }
 0x5ce   : > { %v9412_v52 = vadd.f32 %v9399_v47, %v9138_v14  ;;  %v9717_v16 = vadd.f32 %v9701_v15, %v9411_v34 }
 0x5cf   : > { %v9401_v39 = vpop.f32.mrf.mxu1 }
 0x5d0   : > { %v9413_v35 = vadd.f32 %v9401_v39, %v9139_v13  ;;  %v15845_v28 = vadd.f32 %v9705_v48, %v9412_v52 }
 0x5d1   : > { %v9403_v50 = vpop.f32.mrf.mxu1 }
 0x5d2   : > { %v9414_v11 = vadd.f32 %v9403_v50, %v9140_v27 }
 0x5d3   : > { %v15829_v60 = vpop.f32.mrf.mxu1 }
 0x605   : > { %v9957_v20 = vpop.f32.mrf.mxu1 }
 0x606   : > { %v9976_v53 = vadd.f32 %v9957_v20, %v9714_v49 }
 0x607   : > { %v9959_v26 = vpop.f32.mrf.mxu1 }
 0x608   : > { %v9977_v12 = vadd.f32 %v9959_v26, %v9715_v4 }
 0x609   : > { %v9961_v8 = vpop.f32.mrf.mxu1 }
 0x60a   : > { %v9992_v9 = vcombine.low %v9976_v53, %v9977_v12  ;;  %v9993_v40 = vcombine.high %v9976_v53, %v9977_v12  ;;  %v11217_v1 = vcombine.low %v9977_v12, %v9977_v12  ;;  %v11218_v42 = vcombine.high %v9977_v12, %v9977_v12 }
 0x60b   : > { %v9963_v47 = vpop.f32.mrf.mxu1  ;;  %v9978_v22 = vadd.f32 %v9961_v8, %v9716_v7  ;;  %v9719_v8 = vadd.f32 %v9707_v3, %v9413_v35  ;;  %v9415_v7 = vadd.f32 %v15829_v60, %v15831_v29 }
 0x60c   : > { %v10024_v19 = vsel %vm6389_vm15, %v9992_v9, -inf  ;;  %v10031_v51 = vsel %vm6389_vm15, %v11217_v1, -inf  ;;  %v10038_v59 = vsel %vm6389_vm15, %v9993_v40, -inf  ;;  %v10045_v45 = vsel %vm6389_vm15, %v11218_v42, -inf  ;;  %v9709_v9 = vpop.f32.mrf.mxu0 }
 0x60d   : > { %v10025_v30 = vrot.slane %v10024_v19, 4  ;;  %v10032_v56 = vrot.slane %v10031_v51, 4  ;;  %v10039_v0 = vrot.slane %v10038_v59, 4  ;;  %v10046_v39 = vrot.slane %v10045_v45, 4  ;;  %v9967_v52 = vpop.f32.mrf.mxu1 }
 0x60e   : > { %v9979_v62 = vadd.f32 %v9963_v47, %v9717_v16 }
 0x60f   : > { %v10026_v46 = vmax.f32 %v10024_v19, %v10025_v30  ;;  %v10033_v17 = vmax.f32 %v10031_v51, %v10032_v56  ;;  %v10040_v37 = vmax.f32 %v10038_v59, %v10039_v0  ;;  %v10047_v55 = vmax.f32 %v10045_v45, %v10046_v39  ;;  %v9969_v30 = vpop.f32.mrf.mxu1 }
 0x610   : > { %v9994_v32 = vcombine.low %v9978_v22, %v9979_v62  ;;  %v9995_v10 = vcombine.high %v9978_v22, %v9979_v62  ;;  %v11219_v2 = vcombine.low %v9979_v62, %v9979_v62  ;;  %v11220_v63 = vcombine.high %v9979_v62, %v9979_v62  ;;  %v9711_v22 = vpop.f32.mrf.mxu0 }
 0x611   : > { %v10027_v36 = vrot.slane %v10026_v46, 2  ;;  %v10034_v44 = vrot.slane %v10033_v17, 2  ;;  %v10041_v24 = vrot.slane %v10040_v37, 2  ;;  %v10048_v33 = vrot.slane %v10047_v55, 2 }
 0x612   : > { %v10052_v43 = vsel %vm6389_vm15, %v9994_v32, -inf  ;;  %v10059_v50 = vsel %vm6389_vm15, %v11219_v2, -inf  ;;  %v10066_v61 = vsel %vm6389_vm15, %v9995_v10, -inf  ;;  %v10073_v38 = vsel %vm6389_vm15, %v11220_v63, -inf }
 0x613   : > { %v10028_v54 = vmax.f32 %v10026_v46, %v10027_v36  ;;  %v10035_v31 = vmax.f32 %v10033_v17, %v10034_v44  ;;  %v10042_v58 = vmax.f32 %v10040_v37, %v10041_v24  ;;  %v10049_v5 = vmax.f32 %v10047_v55, %v10048_v33 }
 0x614   : > { %v10053_v20 = vrot.slane %v10052_v43, 4  ;;  %v10060_v49 = vrot.slane %v10059_v50, 4  ;;  %v10067_v18 = vrot.slane %v10066_v61, 4  ;;  %v10074_v4 = vrot.slane %v10073_v38, 4 }
 0x615   : > { %v10029_v21 = vrot.slane %v10028_v54, 1  ;;  %v10036_v34 = vrot.slane %v10035_v31, 1  ;;  %v10043_v14 = vrot.slane %v10042_v58, 1  ;;  %v10050_v26 = vrot.slane %v10049_v5, 1 }
 0x616   : > { %v10054_v13 = vmax.f32 %v10052_v43, %v10053_v20  ;;  %v10061_v53 = vmax.f32 %v10059_v50, %v10060_v49  ;;  %v10068_v12 = vmax.f32 %v10066_v61, %v10067_v18  ;;  %v10075_v15 = vmax.f32 %v10073_v38, %v10074_v4 }
 0x617   : > { %v10030_v27 = vmax.f32 %v10028_v54, %v10029_v21  ;;  %v10044_v57 = vmax.f32 %v10042_v58, %v10043_v14  ;;  %v10051_v6 = vmax.f32 %v10049_v5, %v10050_v26  ;;  %v10037_v16 = vmax.f32 %v10035_v31, %v10036_v34 }
 0x618   : > { %v10055_v40 = vrot.slane %v10054_v13, 2  ;;  %v10062_v1 = vrot.slane %v10061_v53, 2  ;;  %v10069_v42 = vrot.slane %v10068_v12, 2  ;;  %v10076_v41 = vrot.slane %v10075_v15, 2 }
 0x619   : > { %v10149_v47 = vadd.f32 %v15835_v25, %v10044_v57  ;;  %v10150_v19 = vadd.f32 %v15839_v23, %v10051_v6  ;;  %v10147_v35 = vadd.f32 %v15835_v25, %v10030_v27  ;;  %v9720_v39 = vadd.f32 %v9709_v9, %v9414_v11  ;;  %v9971_v11 = vpop.f32.mrf.mxu1 }
 0x61a   : > { %v10056_v51 = vmax.f32 %v10054_v13, %v10055_v40  ;;  %v10063_v59 = vmax.f32 %v10061_v53, %v10062_v1  ;;  %v10070_v45 = vmax.f32 %v10068_v12, %v10069_v42  ;;  %v10077_v48 = vmax.f32 %v10075_v15, %v10076_v41 }
 0x61b   : > { %v10165_v56 = vmax.f32 %v10149_v47, 0.0  ;;  %v10166_v0 = vmax.f32 %v10150_v19, 0.0  ;;  %v10148_v29 = vadd.f32 %v15839_v23, %v10037_v16  ;;  %v9980_v37 = vadd.f32 %v9967_v52, %v15845_v28  ;;  %v9973_v26 = vpop.f32.mrf.mxu1 }
 0x61c   : > { %v10057_v62 = vrot.slane %v10056_v51, 1  ;;  %v10064_v46 = vrot.slane %v10063_v59, 1  ;;  %v10071_v17 = vrot.slane %v10070_v45, 1  ;;  %v10078_v60 = vrot.slane %v10077_v48, 1 }
 0x61d   : > { %v9981_v55 = vadd.f32 %v9969_v30, %v9719_v8  ;;  %v9721_v32 = vadd.f32 %v9711_v22, %v9415_v7  ;;  %v10163_v44 = vmax.f32 %v10147_v35, 0.0  ;;  %v10195_v24 = vrot.slane %v10165_v56, 7 }
 0x61e   : > { %v10058_v10 = vmax.f32 %v10056_v51, %v10057_v62  ;;  %v10065_v2 = vmax.f32 %v10063_v59, %v10064_v46  ;;  %v10072_v63 = vmax.f32 %v10070_v45, %v10071_v17  ;;  %v10079_v36 = vmax.f32 %v10077_v48, %v10078_v60 }
 0x61f   : > { %v9996_v33 = vcombine.low %v9980_v37, %v9981_v55  ;;  %v9997_v43 = vcombine.high %v9980_v37, %v9981_v55  ;;  %v10209_v50 = vrot.slane %v10166_v0, 7  ;;  %v11221_v31 = vcombine.low %v9981_v55, %v9981_v55 }
 0x620   : > { %v10151_v61 = vadd.f32 %v15835_v25, %v10058_v10  ;;  %v10152_v38 = vadd.f32 %v15839_v23, %v10065_v2  ;;  %v10153_v54 = vadd.f32 %v15835_v25, %v10072_v63  ;;  %v11222_v28 = vcombine.high %v9981_v55, %v9981_v55 }
 0x621   : > { %v10080_v58 = vsel %vm6389_vm15, %v9996_v33, -inf  ;;  %v10094_v5 = vsel %vm6389_vm15, %v9997_v43, -inf  ;;  %v10164_v3 = vmax.f32 %v10148_v29, 0.0  ;;  %v15864_v20 = vadd.f32 %v15839_v23, %v10079_v36 }
 0x622   : > { %v10167_v49 = vmax.f32 %v10151_v61, 0.0  ;;  %v10169_v18 = vmax.f32 %v10153_v54, 0.0  ;;  %v10081_v4 = vrot.slane %v10080_v58, 4  ;;  %v10087_v21 = vsel %vm6389_vm15, %v11221_v31, -inf }
 0x623   : > { %v10095_v34 = vrot.slane %v10094_v5, 4  ;;  %v10101_v14 = vsel %vm6389_vm15, %v11222_v28, -inf  ;;  %v15869_v13 = vsel %vm7283_vm4, %v10195_v24, %v10163_v44  ;;  %v15872_v53 = vsel %vm7283_vm4, %v10209_v50, %v10164_v3 }
 0x624   : > { %v10168_v12 = vmax.f32 %v10152_v38, 0.0  ;;  %v9982_v15 = vadd.f32 %v9971_v11, %v9720_v39  ;;  %v10082_v52 = vmax.f32 %v10080_v58, %v10081_v4  ;;  %v10088_v27 = vrot.slane %v10087_v21, 4 }
 0x625   : > { %v10096_v57 = vmax.f32 %v10094_v5, %v10095_v34  ;;  %v10102_v6 = vrot.slane %v10101_v14, 4  ;;  %v10170_v8 = vmax.f32 %v15864_v20, 0.0  ;;  %v10197_v9 = vrot.slane %v10167_v49, 6 }
 0x626   : > { %v15875_v40 = vrot.slane %v10169_v18, 5  ;;  %v9983_v1 = vadd.f32 %v9973_v26, %v9721_v32  ;;  %v10083_v42 = vrot.slane %v10082_v52, 2  ;;  %v10089_v41 = vmax.f32 %v10087_v21, %v10088_v27 }
 0x627   : > { %v10097_v7 = vrot.slane %v10096_v57, 2  ;;  %v10103_v16 = vmax.f32 %v10101_v14, %v10102_v6  ;;  %v10211_v11 = vrot.slane %v10168_v12, 6  ;;  %v10213_v14 = vrot.slane %v10170_v8, 5 }
 0x628   : > { %v9998_v47 = vcombine.low %v9982_v15, %v9983_v1  ;;  %v9999_v19 = vcombine.high %v9982_v15, %v9983_v1  ;;  %v11223_v51 = vcombine.low %v9983_v1, %v9983_v1  ;;  %v11224_v59 = vcombine.high %v9983_v1, %v9983_v1 }
 0x629   : > { %v10084_v45 = vmax.f32 %v10082_v52, %v10083_v42  ;;  %v10090_v48 = vrot.slane %v10089_v41, 2  ;;  %v10098_v30 = vmax.f32 %v10096_v57, %v10097_v7  ;;  %v10104_v35 = vrot.slane %v10103_v16, 2 }
 0x62a   : > { %v10108_v56 = vsel %vm6389_vm15, %v9998_v47, -inf  ;;  %v10115_v0 = vsel %vm6389_vm15, %v11223_v51, -inf  ;;  %v10122_v39 = vsel %vm6389_vm15, %v9999_v19, -inf  ;;  %v10129_v22 = vsel %vm6389_vm15, %v11224_v59, -inf }
 0x62b   : > { %v10085_v62 = vrot.slane %v10084_v45, 1  ;;  %v10091_v46 = vmax.f32 %v10089_v41, %v10090_v48  ;;  %v10099_v17 = vrot.slane %v10098_v30, 1  ;;  %v10105_v60 = vmax.f32 %v10103_v16, %v10104_v35 }
 0x62c   : > { %v10109_v29 = vrot.slane %v10108_v56, 4  ;;  %v10116_v37 = vrot.slane %v10115_v0, 4  ;;  %v10123_v55 = vrot.slane %v10122_v39, 4  ;;  %v10130_v32 = vrot.slane %v10129_v22, 4 }
 0x62d   : > { %v10086_v10 = vmax.f32 %v10084_v45, %v10085_v62  ;;  %v10092_v2 = vrot.slane %v10091_v46, 1  ;;  %v10100_v63 = vmax.f32 %v10098_v30, %v10099_v17  ;;  %v10106_v36 = vrot.slane %v10105_v60, 1 }
 0x62e   : > { %v10110_v44 = vmax.f32 %v10108_v56, %v10109_v29  ;;  %v10117_v24 = vmax.f32 %v10115_v0, %v10116_v37  ;;  %v10124_v33 = vmax.f32 %v10122_v39, %v10123_v55  ;;  %v10131_v43 = vmax.f32 %v10129_v22, %v10130_v32 }
 0x62f   : > { %v10093_v50 = vmax.f32 %v10091_v46, %v10092_v2  ;;  %v10107_v61 = vmax.f32 %v10105_v60, %v10106_v36  ;;  %v10155_v38 = vadd.f32 %v15835_v25, %v10086_v10  ;;  %v10157_v3 = vadd.f32 %v15835_v25, %v10100_v63 }
 0x630   : > { %v10111_v54 = vrot.slane %v10110_v44, 2  ;;  %v10118_v31 = vrot.slane %v10117_v24, 2  ;;  %v10125_v28 = vrot.slane %v10124_v33, 2  ;;  %v10132_v58 = vrot.slane %v10131_v43, 2 }
 0x631   : > { %v10156_v5 = vadd.f32 %v15839_v23, %v10093_v50  ;;  %v10158_v20 = vadd.f32 %v15839_v23, %v10107_v61  ;;  %v10171_v49 = vmax.f32 %v10155_v38, 0.0  ;;  %v10198_v12 = vsel %vm7286_vm5, %v10197_v9, %v15869_v13 }
 0x632   : > { %v10112_v18 = vmax.f32 %v10110_v44, %v10111_v54  ;;  %v10119_v4 = vmax.f32 %v10117_v24, %v10118_v31  ;;  %v10126_v21 = vmax.f32 %v10124_v33, %v10125_v28  ;;  %v10133_v34 = vmax.f32 %v10131_v43, %v10132_v58 }
 0x633   : > { %v10172_v26 = vmax.f32 %v10156_v5, 0.0  ;;  %v10212_v15 = vsel %vm7286_vm5, %v10211_v11, %v15872_v53  ;;  %v10173_v1 = vmax.f32 %v10157_v3, 0.0  ;;  %v10174_v42 = vmax.f32 %v10158_v20, 0.0 }
 0x634   : > { %v10113_v52 = vrot.slane %v10112_v18, 1  ;;  %v10120_v27 = vrot.slane %v10119_v4, 1  ;;  %v10127_v57 = vrot.slane %v10126_v21, 1  ;;  %v10134_v6 = vrot.slane %v10133_v34, 1 }
 0x635   : > { %v10201_v41 = vrot.slane %v10171_v49, 4  ;;  %v10215_v7 = vrot.slane %v10172_v26, 4  ;;  %v10200_v13 = vsel %vm7289_vm6, %v15875_v40, %v10198_v12  ;;  %v10214_v53 = vsel %vm7289_vm6, %v10213_v14, %v10212_v15 }
 0x636   : > { %v10114_v16 = vmax.f32 %v10112_v18, %v10113_v52  ;;  %v10121_v47 = vmax.f32 %v10119_v4, %v10120_v27  ;;  %v10128_v8 = vmax.f32 %v10126_v21, %v10127_v57  ;;  %v10135_v19 = vmax.f32 %v10133_v34, %v10134_v6 }
 0x637   : > { %v10203_v48 = vrot.slane %v10173_v1, 3  ;;  %v10217_v30 = vrot.slane %v10174_v42, 3  ;;  %v10202_v35 = vsel %vm7292_vm7, %v10201_v41, %v10200_v13  ;;  %v10216_v56 = vsel %vm7292_vm7, %v10215_v7, %v10214_v53 }
 0x638   : > { %v10159_v9 = vadd.f32 %v15835_v25, %v10114_v16  ;;  %v10160_v51 = vadd.f32 %v15839_v23, %v10121_v47  ;;  %v10161_v59 = vadd.f32 %v15835_v25, %v10128_v8  ;;  %v10162_v45 = vadd.f32 %v15839_v23, %v10135_v19 }
 0x639   : > { %v10204_v23 = vsel %vm7267_vm0, %v10203_v48, %v10202_v35  ;;  %v10218_v60 = vsel %vm7267_vm0, %v10217_v30, %v10216_v56 }
 0x63a   : > { %v10175_v0 = vmax.f32 %v10159_v9, 0.0  ;;  %v10176_v39 = vmax.f32 %v10160_v51, 0.0  ;;  %v10177_v22 = vmax.f32 %v10161_v59, 0.0  ;;  %v10178_v40 = vmax.f32 %v10162_v45, 0.0 }
 0x63c   : > { %v10205_v62 = vrot.slane %v10175_v0, 2  ;;  %v10207_v46 = vrot.slane %v10177_v22, 1  ;;  %v10219_v25 = vrot.slane %v10176_v39, 2  ;;  %v10221_v17 = vrot.slane %v10178_v40, 1 }
 0x63e   : > { %v10206_v29 = vsel %vm7270_vm1, %v10205_v62, %v10204_v23  ;;  %v10220_v37 = vsel %vm7270_vm1, %v10219_v25, %v10218_v60 }
 0x63f   : > { %v10208_v55 = vsel %vm7273_vm3, %v10207_v46, %v10206_v29  ;;  %v10222_v32 = vsel %vm7273_vm3, %v10221_v17, %v10220_v37 }
 0x640   : > { %10225 = vst [vmem:[%s272_s6] sm:$0xff] %v10208_v55  ;;  %10226 = vst [vmem:[%s272_s6 + $0x8] sm:$0xff] %v10222_v32 }
 0x641   : > { %12479 = shalt.err (!%p12476_p4)
}
 0x642   : > { %s12480_s10 = scalar_lea.hbm %s15909_s22, 256  ;;  %s12484_s17 = scalar_lea.hbm %s15959_s5, 512 }
 0x643   : > { %p12481_p13 = scmp.ne.s32.totalorder %s15909_s22, %s12480_s10  ;;  %p12485_p6 = scmp.lt.s32.totalorder %s15909_s22, %s15959_s5 }
 0x644   : > { %p12486_p12 = scmp.lt.s32.totalorder %s12484_s17, %s12480_s10 }
 0x645   : > { %p12482_p7 = pnand %p12481_p13, %p16478_p11 }
 0x646   : > { %p12487_p10 = por %p12486_p12, %p12485_p6 }
 0x647   : > { %p12483_p5 = pneg %p12482_p7 }
 0x649   : > { %p12488_p8 = pnand %p12487_p10, %p12483_p5 }
 0x64b   : > { %12491 = shalt.err (!%p12488_p8)
}
 0x64c   : > { %11280 = dma.vmem_to_hbm [thread:$0]  (%p16478_p11), %s15911_s7, 256, %s15909_s22, %s10228_s11  }
 0x64d PF: > { %p11307_p0 = scmp.ge.s32.totalorder %s12538_s21, 2  ;;  %s10254_s26 = sand.u32 1, %s12526_s18  }
 0x64e   : > { %p16479_p1 = scmp.ne.s32.totalorder %s16101_s29, 0  ;;  %s10255_s6 = scalar_lea.sflag [#allocation6], %s10254_s26 }
 0x650   : > { %p11296_p2 = pnand %p11307_p0, %p16479_p1 }
 0x652   : > { %p11297_p9 = pneg %p11296_p2 }
 0x654   : > { %12521 = dma.done.wait (%p11297_p9), %s10255_s6, 256  }
 0x655   : > { %12523 = vsyncadd (%p11297_p9), %s10255_s6, 4294967040  ;;  %p18_p3 = scmp.ge.s32.totalorder %s12604_s24, 4   ;;  %s16480_s18 = smov %s12530_s19 }
 0x656   : > { %s16481_s19 = smov %s12534_s20  ;;  %s16482_s20 = smov %s12615_s27 }
 0x657   : > { %s16483_s21 = smov %s12604_s24  ;;  %20 = sbr.rel (!%p18_p3) target bundleno = 6 (0x6), region = 108 }
 0x65c   :  { %10260 = vsyncpa [#allocation5], 1 }
 0x65d   :  { %10262 = vsyncpa [#allocation5 + $0x1], 1 }
 0x65e   :  { %10263 = vsyncpa [#allocation8], 1 }
 0x65f   :  { %10264 = vsyncpa [#allocation11], 1 }
 0x660   :  { %10265 = vsyncpa [#allocation6], 1 }
 0x661   :  { %10267 = vsyncpa [#allocation6 + $0x1], 1 }

</bundles_post_ra>
